<compile_context>
chip_gen: v5e
topology: v5e:2x2
jax: 0.10.0
libtpu: 0.0.40
codegen_flags: <defaults>
</compile_context>

<pallas_src>
import jax
import jax.numpy as jnp
from jax.experimental import pallas as pl
from jax.experimental.pallas import tpu as pltpu

LANES = 128


# ----------------------------------------------------------------------------
# Pallas kernels
# ----------------------------------------------------------------------------
def _conv_relu_pool_kernel(p_ref, w_ref, b_ref, o_ref):
    """Fused conv(as matmul) + bias + ReLU + 2x2 max-pool for one image.

    p_ref: (1, 4, M, K)  im2col patches, one row-set per 2x2 pooling "corner"
    w_ref: (K, 128)      zero-padded conv weights (K, Cout_pad)
    b_ref: (1, 128)      zero-padded bias
    o_ref: (1, M, 128)   pooled output, M = pooled_h * pooled_w
    """
    w = w_ref[...]
    b = b_ref[...]

    def corner(r):
        acc = jnp.dot(p_ref[0, r], w, preferred_element_type=jnp.float32)
        return jnp.maximum(acc + b, 0.0)

    m = jnp.maximum(jnp.maximum(corner(0), corner(1)),
                    jnp.maximum(corner(2), corner(3)))
    o_ref[0] = m.astype(o_ref.dtype)


def _fc_stack_kernel(x_ref, w1_ref, b1_ref, w2_ref, b2_ref, w3_ref, b3_ref,
                     o_ref):
    """fc1+ReLU -> fc2+ReLU -> fc3; intermediates stay resident in VMEM/vregs."""
    h = jnp.dot(x_ref[...], w1_ref[...], preferred_element_type=jnp.float32)
    h = jnp.maximum(h + b1_ref[...], 0.0)
    h = jnp.dot(h, w2_ref[...], preferred_element_type=jnp.float32)
    h = jnp.maximum(h + b2_ref[...], 0.0)
    out = jnp.dot(h, w3_ref[...], preferred_element_type=jnp.float32)
    o_ref[...] = (out + b3_ref[...]).astype(o_ref.dtype)


# ----------------------------------------------------------------------------
# pallas_call wrappers
# ----------------------------------------------------------------------------
def conv_relu_pool(patches, w, b):
    """patches: (N, 4, M, K); w: (K, 128); b: (1, 128) -> (N, M, 128)."""
    n, _, m, k = patches.shape
    cout = w.shape[1]
    flops = 2 * n * 4 * m * k * cout
    bytes_accessed = 4 * (patches.size + w.size + b.size + n * m * cout)
    return pl.pallas_call(
        _conv_relu_pool_kernel,
        out_shape=jax.ShapeDtypeStruct((n, m, cout), jnp.float32),
        grid=(n,),
        in_specs=[
            pl.BlockSpec((1, 4, m, k), lambda i: (i, 0, 0, 0)),
            pl.BlockSpec((k, cout), lambda i: (0, 0)),
            pl.BlockSpec((1, cout), lambda i: (0, 0)),
        ],
        out_specs=pl.BlockSpec((1, m, cout), lambda i: (i, 0, 0)),
        compiler_params=pltpu.CompilerParams(
            dimension_semantics=("parallel",)),
        cost_estimate=pl.CostEstimate(flops=flops, transcendentals=0,
                                      bytes_accessed=bytes_accessed),
    )(patches, w, b)


def fc_stack(x, w1, b1, w2, b2, w3, b3):
    """x: (N, 3200) -> (N, 128) padded logits (first 10 columns valid)."""
    m, k = x.shape
    flops = 2 * m * (k * LANES + LANES * LANES + LANES * LANES)
    bytes_accessed = 4 * (x.size + w1.size + w2.size + w3.size +
                          b1.size + b2.size + b3.size + m * LANES)
    return pl.pallas_call(
        _fc_stack_kernel,
        out_shape=jax.ShapeDtypeStruct((m, LANES), jnp.float32),
        grid=(1,),
        in_specs=[
            pl.BlockSpec((m, k), lambda i: (0, 0)),
            pl.BlockSpec(w1.shape, lambda i: (0, 0)),
            pl.BlockSpec((1, LANES), lambda i: (0, 0)),
            pl.BlockSpec(w2.shape, lambda i: (0, 0)),
            pl.BlockSpec((1, LANES), lambda i: (0, 0)),
            pl.BlockSpec(w3.shape, lambda i: (0, 0)),
            pl.BlockSpec((1, LANES), lambda i: (0, 0)),
        ],
        out_specs=pl.BlockSpec((m, LANES), lambda i: (0, 0)),
        compiler_params=pltpu.CompilerParams(
            dimension_semantics=("arbitrary",)),
        cost_estimate=pl.CostEstimate(flops=flops, transcendentals=0,
                                      bytes_accessed=bytes_accessed),
    )(x, w1, b1, w2, b2, w3, b3)


# ----------------------------------------------------------------------------
# JAX glue: corner-grouped im2col, parameter init / one-time prep, forward pass
# ----------------------------------------------------------------------------
def im2col_pool_corners(x, kh, kw):
    """NHWC x -> (N, 4, PH*PW, KH*KW*C) patches, one row-set per pooling corner.

    Row-set (r*2+s) holds the im2col patches of conv output positions
    (2*ph + r, 2*pw + s); the kernel max-reduces over the 4 row-sets => 2x2/2 pool.
    """
    n, h, w, c = x.shape
    ph, pw = (h - kh + 1) // 2, (w - kw + 1) // 2
    k = kh * kw * c
    corners = []
    for r in (0, 1):
        for s in (0, 1):
            taps = [x[:, r + i: r + i + 2 * ph: 2, s + j: s + j + 2 * pw: 2, :]
                    for i in range(kh) for j in range(kw)]
            corners.append(jnp.stack(taps, axis=3).reshape(n, ph, pw, k))
    p = jnp.stack(corners, axis=1)                       # (N, 4, PH, PW, K)
    return p.reshape(n, 4, ph * pw, k)


def init_params(key):
    """PyTorch-layout params, PyTorch default init U(-1/sqrt(fan_in), +)."""
    def uniform(k, shape, fan_in):
        bound = 1.0 / jnp.sqrt(jnp.float32(fan_in))
        return jax.random.uniform(k, shape, jnp.float32, -bound, bound)

    ks = jax.random.split(key, 10)
    return {
        "conv1_w": uniform(ks[0], (6, 3, 5, 5), 3 * 5 * 5),
        "conv1_b": uniform(ks[1], (6,), 3 * 5 * 5),
        "conv2_w": uniform(ks[2], (16, 6, 5, 5), 6 * 5 * 5),
        "conv2_b": uniform(ks[3], (16,), 6 * 5 * 5),
        "fc1_w": uniform(ks[4], (120, 400), 400),
        "fc1_b": uniform(ks[5], (120,), 400),
        "fc2_w": uniform(ks[6], (84, 120), 120),
        "fc2_b": uniform(ks[7], (84,), 120),
        "fc3_w": uniform(ks[8], (10, 84), 84),
        "fc3_b": uniform(ks[9], (10,), 84),
    }


def prepare_params(p):
    """One-time conversion of PyTorch-layout params into padded, pre-transposed
    kernel operands (K and output-channel dims padded to 128, NHWC ordering)."""
    def pad2(a, rows, cols):
        r, c = a.shape
        return jnp.pad(a, ((0, rows - r), (0, cols - c)))

    def pad_bias(b):
        return jnp.pad(b, (0, LANES - b.shape[0])).reshape(1, LANES)

    prep = {}
    # conv1: (6,3,5,5) -> (kh,kw,cin,cout) -> (75,6) -> (128,128)
    w = jnp.transpose(p["conv1_w"], (2, 3, 1, 0)).reshape(5 * 5 * 3, 6)
    prep["conv1_w"] = pad2(w, LANES, LANES)
    prep["conv1_b"] = pad_bias(p["conv1_b"])
    # conv2: (16,6,5,5) -> (5,5,6,16) -> pad cin 6->128 -> (3200,16) -> (3200,128)
    w = jnp.transpose(p["conv2_w"], (2, 3, 1, 0))
    w = jnp.pad(w, ((0, 0), (0, 0), (0, LANES - 6), (0, 0)))
    prep["conv2_w"] = pad2(w.reshape(5 * 5 * LANES, 16), 5 * 5 * LANES, LANES)
    prep["conv2_b"] = pad_bias(p["conv2_b"])
    # fc1: (120,400) (NCHW flatten) -> reorder to (h,w,c_pad) flatten -> (3200,128)
    w = p["fc1_w"].reshape(120, 16, 5, 5).transpose(0, 2, 3, 1)     # (o,h,w,c)
    w = jnp.pad(w, ((0, 0), (0, 0), (0, 0), (0, LANES - 16)))
    prep["fc1_w"] = pad2(w.reshape(120, 5 * 5 * LANES).T, 5 * 5 * LANES, LANES)
    prep["fc1_b"] = pad_bias(p["fc1_b"])
    # fc2 / fc3: pre-transposed to (in, out), padded to (128,128)
    prep["fc2_w"] = pad2(p["fc2_w"].T, LANES, LANES)
    prep["fc2_b"] = pad_bias(p["fc2_b"])
    prep["fc3_w"] = pad2(p["fc3_w"].T, LANES, LANES)
    prep["fc3_b"] = pad_bias(p["fc3_b"])
    return prep


@jax.jit
def net_forward(prep, x):
    """x: (N, 3, 32, 32) NCHW float32 -> logits (N, 10)."""
    n = x.shape[0]
    x = jnp.transpose(x, (0, 2, 3, 1))                   # NCHW -> NHWC (boundary only)

    # conv1 + ReLU + pool : (N,32,32,3) -> (N,14*14,128)  (channels 0..5 valid)
    p1 = im2col_pool_corners(x, 5, 5)                    # (N,4,196,75)
    p1 = jnp.pad(p1, ((0, 0), (0, 0), (0, 0), (0, LANES - 75)))
    y1 = conv_relu_pool(p1, prep["conv1_w"], prep["conv1_b"])

    # conv2 + ReLU + pool : (N,14,14,128) -> (N,5*5,128)  (channels 0..15 valid)
    p2 = im2col_pool_corners(y1.reshape(n, 14, 14, LANES), 5, 5)   # (N,4,25,3200)
    y2 = conv_relu_pool(p2, prep["conv2_w"], prep["conv2_b"])

    # fc1+ReLU -> fc2+ReLU -> fc3, fused into one kernel
    feat = y2.reshape(n, 5 * 5 * LANES)                  # (N,3200), (h,w,c) order
    logits = fc_stack(feat, prep["fc1_w"], prep["fc1_b"],
                      prep["fc2_w"], prep["fc2_b"],
                      prep["fc3_w"], prep["fc3_b"])      # (N,128)
    return logits[:, :10]


def reference_forward(params, x):
    """Pure-XLA reference with PyTorch semantics (correctness check only)."""
    def conv(x, w, b):
        y = jax.lax.conv_general_dilated(
            x, w, window_strides=(1, 1), padding="VALID",
            dimension_numbers=("NCHW", "OIHW", "NCHW"))
        return y + b.reshape(1, -1, 1, 1)

    def pool(x):
        return jax.lax.reduce_window(x, -jnp.inf, jax.lax.max,
                                     (1, 1, 2, 2), (1, 1, 2, 2), "VALID")

    x = pool(jax.nn.relu(conv(x, params["conv1_w"], params["conv1_b"])))
    x = pool(jax.nn.relu(conv(x, params["conv2_w"], params["conv2_b"])))
    x = x.reshape(x.shape[0], -1)
    x = jax.nn.relu(x @ params["fc1_w"].T + params["fc1_b"])
    x = jax.nn.relu(x @ params["fc2_w"].T + params["fc2_b"])
    return x @ params["fc3_w"].T + params["fc3_b"]


if __name__ == "__main__":
    key = jax.random.PRNGKey(0)
    k_param, k_x = jax.random.split(key)
    params = init_params(k_param)
    prep = prepare_params(params)            # one-time padding / transposition
    # CIFAR-10 input implied by fc1 = 16*5*5: 32x32 spatial, 3 channels; batch=2.
    x = jax.random.normal(k_x, (2, 3, 32, 32), dtype=jnp.float32)

    out = jax.block_until_ready(net_forward(prep, x))
    assert out.shape == (2, 10)
    assert bool(jnp.all(jnp.isfinite(out)))

    ref = jax.block_until_ready(reference_forward(params, x))
    max_err = float(jnp.max(jnp.abs(out - ref)))
    assert max_err < 5e-2, f"mismatch vs XLA reference (max abs err {max_err:.3e})"
    print("KERNEL_OK")
</pallas_src>

<mosaic_0001>
module attributes {stable_mosaic.version = 11 : i64} {
  func.func @_conv_relu_pool_kernel(%arg0: i32, %arg1: memref<1x4x196x128xf32, #tpu.memory_space<vmem>>, %arg2: memref<128x128xf32, #tpu.memory_space<vmem>>, %arg3: memref<1x128xf32, #tpu.memory_space<vmem>>, %arg4: memref<1x196x128xf32, #tpu.memory_space<vmem>>) attributes {dimension_semantics = [#tpu.dimension_semantics<parallel>], iteration_bounds = array<i64: 2>, scalar_prefetch = 0 : i64, scratch_operands = 0 : i64, tpu.core_type = #tpu.core_type<tc>, window_params = [{transform_indices = @transform_0, window_bounds = array<i64: 1, 4, 196, 128>}, {pipeline_mode = #tpu.pipeline_mode<synchronous>, transform_indices = @transform_1, window_bounds = array<i64: 128, 128>}, {pipeline_mode = #tpu.pipeline_mode<synchronous>, transform_indices = @transform_2, window_bounds = array<i64: 1, 128>}, {transform_indices = @transform_3, window_bounds = array<i64: 1, 196, 128>}]} {
    %c0 = arith.constant 0 : index
    %c0_0 = arith.constant 0 : index
    %0 = vector.load %arg2[%c0, %c0_0] : memref<128x128xf32, #tpu.memory_space<vmem>>, vector<128x128xf32>
    %c0_1 = arith.constant 0 : index
    %c0_2 = arith.constant 0 : index
    %1 = vector.load %arg3[%c0_1, %c0_2] : memref<1x128xf32, #tpu.memory_space<vmem>>, vector<1x128xf32>
    %c0_3 = arith.constant 0 : index
    %c0_4 = arith.constant 0 : index
    %c0_5 = arith.constant 0 : index
    %c0_6 = arith.constant 0 : index
    %2 = vector.load %arg1[%c0_3, %c0_4, %c0_5, %c0_6] : memref<1x4x196x128xf32, #tpu.memory_space<vmem>>, vector<1x1x196x128xf32>
    %3 = vector.shape_cast %2 : vector<1x1x196x128xf32> to vector<196x128xf32>
    %cst = arith.constant dense<0.000000e+00> : vector<196x128xf32>
    %4 = tpu.matmul %3, %0, %cst {dimension_numbers = #tpu.dot_dimension_numbers<[1], [0], [0], [1], [0, 0, 1, 1], [], []>} : vector<196x128xf32>, vector<128x128xf32>, vector<196x128xf32> -> vector<196x128xf32>
    %5 = vector.broadcast %1 : vector<1x128xf32> to vector<196x128xf32>
    %6 = arith.addf %4, %5 : vector<196x128xf32>
    %cst_7 = arith.constant 0.000000e+00 : f32
    %7 = vector.broadcast %cst_7 : f32 to vector<196x128xf32>
    %8 = arith.maximumf %6, %7 : vector<196x128xf32>
    %c0_8 = arith.constant 0 : index
    %c1 = arith.constant 1 : index
    %c0_9 = arith.constant 0 : index
    %c0_10 = arith.constant 0 : index
    %9 = vector.load %arg1[%c0_8, %c1, %c0_9, %c0_10] : memref<1x4x196x128xf32, #tpu.memory_space<vmem>>, vector<1x1x196x128xf32>
    %10 = vector.shape_cast %9 : vector<1x1x196x128xf32> to vector<196x128xf32>
    %cst_11 = arith.constant dense<0.000000e+00> : vector<196x128xf32>
    %11 = tpu.matmul %10, %0, %cst_11 {dimension_numbers = #tpu.dot_dimension_numbers<[1], [0], [0], [1], [0, 0, 1, 1], [], []>} : vector<196x128xf32>, vector<128x128xf32>, vector<196x128xf32> -> vector<196x128xf32>
    %12 = vector.broadcast %1 : vector<1x128xf32> to vector<196x128xf32>
    %13 = arith.addf %11, %12 : vector<196x128xf32>
    %cst_12 = arith.constant 0.000000e+00 : f32
    %14 = vector.broadcast %cst_12 : f32 to vector<196x128xf32>
    %15 = arith.maximumf %13, %14 : vector<196x128xf32>
    %16 = arith.maximumf %8, %15 : vector<196x128xf32>
    %c0_13 = arith.constant 0 : index
    %c2 = arith.constant 2 : index
    %c0_14 = arith.constant 0 : index
    %c0_15 = arith.constant 0 : index
    %17 = vector.load %arg1[%c0_13, %c2, %c0_14, %c0_15] : memref<1x4x196x128xf32, #tpu.memory_space<vmem>>, vector<1x1x196x128xf32>
    %18 = vector.shape_cast %17 : vector<1x1x196x128xf32> to vector<196x128xf32>
    %cst_16 = arith.constant dense<0.000000e+00> : vector<196x128xf32>
    %19 = tpu.matmul %18, %0, %cst_16 {dimension_numbers = #tpu.dot_dimension_numbers<[1], [0], [0], [1], [0, 0, 1, 1], [], []>} : vector<196x128xf32>, vector<128x128xf32>, vector<196x128xf32> -> vector<196x128xf32>
    %20 = vector.broadcast %1 : vector<1x128xf32> to vector<196x128xf32>
    %21 = arith.addf %19, %20 : vector<196x128xf32>
    %cst_17 = arith.constant 0.000000e+00 : f32
    %22 = vector.broadcast %cst_17 : f32 to vector<196x128xf32>
    %23 = arith.maximumf %21, %22 : vector<196x128xf32>
    %c0_18 = arith.constant 0 : index
    %c3 = arith.constant 3 : index
    %c0_19 = arith.constant 0 : index
    %c0_20 = arith.constant 0 : index
    %24 = vector.load %arg1[%c0_18, %c3, %c0_19, %c0_20] : memref<1x4x196x128xf32, #tpu.memory_space<vmem>>, vector<1x1x196x128xf32>
    %25 = vector.shape_cast %24 : vector<1x1x196x128xf32> to vector<196x128xf32>
    %cst_21 = arith.constant dense<0.000000e+00> : vector<196x128xf32>
    %26 = tpu.matmul %25, %0, %cst_21 {dimension_numbers = #tpu.dot_dimension_numbers<[1], [0], [0], [1], [0, 0, 1, 1], [], []>} : vector<196x128xf32>, vector<128x128xf32>, vector<196x128xf32> -> vector<196x128xf32>
    %27 = vector.broadcast %1 : vector<1x128xf32> to vector<196x128xf32>
    %28 = arith.addf %26, %27 : vector<196x128xf32>
    %cst_22 = arith.constant 0.000000e+00 : f32
    %29 = vector.broadcast %cst_22 : f32 to vector<196x128xf32>
    %30 = arith.maximumf %28, %29 : vector<196x128xf32>
    %31 = arith.maximumf %23, %30 : vector<196x128xf32>
    %32 = arith.maximumf %16, %31 : vector<196x128xf32>
    %c0_23 = arith.constant 0 : index
    %c0_24 = arith.constant 0 : index
    %c0_25 = arith.constant 0 : index
    %33 = vector.load %arg4[%c0_23, %c0_24, %c0_25] : memref<1x196x128xf32, #tpu.memory_space<vmem>>, vector<1x196x128xf32>
    %34 = vector.shape_cast %33 : vector<1x196x128xf32> to vector<196x128xf32>
    %35 = vector.shape_cast %32 : vector<196x128xf32> to vector<1x196x128xf32>
    tpu.vector_store %arg4[%c0_23, %c0_24, %c0_25], %35 {strides = array<i32>} : memref<1x196x128xf32, #tpu.memory_space<vmem>>, vector<1x196x128xf32>,
    return
  }
  func.func @transform_0(%arg0: i32) -> (i32, i32, i32, i32) {
    %c0_i32 = arith.constant 0 : i32
    %c0_i32_0 = arith.constant 0 : i32
    %c0_i32_1 = arith.constant 0 : i32
    %c0_i32_2 = arith.constant 0 : i32
    return %arg0, %c0_i32, %c0_i32_0, %c0_i32_1 : i32, i32, i32, i32
  }
  func.func @transform_1(%arg0: i32) -> (i32, i32) {
    %c0_i32 = arith.constant 0 : i32
    %c0_i32_0 = arith.constant 0 : i32
    %c0_i32_1 = arith.constant 0 : i32
    return %c0_i32, %c0_i32_0 : i32, i32
  }
  func.func @transform_2(%arg0: i32) -> (i32, i32) {
    %c0_i32 = arith.constant 0 : i32
    %c0_i32_0 = arith.constant 0 : i32
    %c0_i32_1 = arith.constant 0 : i32
    return %c0_i32, %c0_i32_0 : i32, i32
  }
  func.func @transform_3(%arg0: i32) -> (i32, i32, i32) {
    %c0_i32 = arith.constant 0 : i32
    %c0_i32_0 = arith.constant 0 : i32
    %c0_i32_1 = arith.constant 0 : i32
    return %arg0, %c0_i32, %c0_i32_0 : i32, i32, i32
  }
}

module attributes {stable_mosaic.version = 11 : i64} {
  func.func @_conv_relu_pool_kernel(%arg0: i32, %arg1: memref<1x4x25x3200xf32, #tpu.memory_space<vmem>>, %arg2: memref<3200x128xf32, #tpu.memory_space<vmem>>, %arg3: memref<1x128xf32, #tpu.memory_space<vmem>>, %arg4: memref<1x25x128xf32, #tpu.memory_space<vmem>>) attributes {dimension_semantics = [#tpu.dimension_semantics<parallel>], iteration_bounds = array<i64: 2>, scalar_prefetch = 0 : i64, scratch_operands = 0 : i64, tpu.core_type = #tpu.core_type<tc>, window_params = [{transform_indices = @transform_0, window_bounds = array<i64: 1, 4, 25, 3200>}, {pipeline_mode = #tpu.pipeline_mode<synchronous>, transform_indices = @transform_1, window_bounds = array<i64: 3200, 128>}, {pipeline_mode = #tpu.pipeline_mode<synchronous>, transform_indices = @transform_2, window_bounds = array<i64: 1, 128>}, {transform_indices = @transform_3, window_bounds = array<i64: 1, 25, 128>}]} {
    %c0 = arith.constant 0 : index
    %c0_0 = arith.constant 0 : index
    %0 = vector.load %arg2[%c0, %c0_0] : memref<3200x128xf32, #tpu.memory_space<vmem>>, vector<3200x128xf32>
    %c0_1 = arith.constant 0 : index
    %c0_2 = arith.constant 0 : index
    %1 = vector.load %arg3[%c0_1, %c0_2] : memref<1x128xf32, #tpu.memory_space<vmem>>, vector<1x128xf32>
    %c0_3 = arith.constant 0 : index
    %c0_4 = arith.constant 0 : index
    %c0_5 = arith.constant 0 : index
    %c0_6 = arith.constant 0 : index
    %2 = vector.load %arg1[%c0_3, %c0_4, %c0_5, %c0_6] : memref<1x4x25x3200xf32, #tpu.memory_space<vmem>>, vector<1x1x25x3200xf32>
    %3 = vector.shape_cast %2 : vector<1x1x25x3200xf32> to vector<25x3200xf32>
    %cst = arith.constant dense<0.000000e+00> : vector<25x128xf32>
    %4 = tpu.matmul %3, %0, %cst {dimension_numbers = #tpu.dot_dimension_numbers<[1], [0], [0], [1], [0, 0, 1, 1], [], []>} : vector<25x3200xf32>, vector<3200x128xf32>, vector<25x128xf32> -> vector<25x128xf32>
    %5 = vector.broadcast %1 : vector<1x128xf32> to vector<25x128xf32>
    %6 = arith.addf %4, %5 : vector<25x128xf32>
    %cst_7 = arith.constant 0.000000e+00 : f32
    %7 = vector.broadcast %cst_7 : f32 to vector<25x128xf32>
    %8 = arith.maximumf %6, %7 : vector<25x128xf32>
    %c0_8 = arith.constant 0 : index
    %c1 = arith.constant 1 : index
    %c0_9 = arith.constant 0 : index
    %c0_10 = arith.constant 0 : index
    %9 = vector.load %arg1[%c0_8, %c1, %c0_9, %c0_10] : memref<1x4x25x3200xf32, #tpu.memory_space<vmem>>, vector<1x1x25x3200xf32>
    %10 = vector.shape_cast %9 : vector<1x1x25x3200xf32> to vector<25x3200xf32>
    %cst_11 = arith.constant dense<0.000000e+00> : vector<25x128xf32>
    %11 = tpu.matmul %10, %0, %cst_11 {dimension_numbers = #tpu.dot_dimension_numbers<[1], [0], [0], [1], [0, 0, 1, 1], [], []>} : vector<25x3200xf32>, vector<3200x128xf32>, vector<25x128xf32> -> vector<25x128xf32>
    %12 = vector.broadcast %1 : vector<1x128xf32> to vector<25x128xf32>
    %13 = arith.addf %11, %12 : vector<25x128xf32>
    %cst_12 = arith.constant 0.000000e+00 : f32
    %14 = vector.broadcast %cst_12 : f32 to vector<25x128xf32>
    %15 = arith.maximumf %13, %14 : vector<25x128xf32>
    %16 = arith.maximumf %8, %15 : vector<25x128xf32>
    %c0_13 = arith.constant 0 : index
    %c2 = arith.constant 2 : index
    %c0_14 = arith.constant 0 : index
    %c0_15 = arith.constant 0 : index
    %17 = vector.load %arg1[%c0_13, %c2, %c0_14, %c0_15] : memref<1x4x25x3200xf32, #tpu.memory_space<vmem>>, vector<1x1x25x3200xf32>
    %18 = vector.shape_cast %17 : vector<1x1x25x3200xf32> to vector<25x3200xf32>
    %cst_16 = arith.constant dense<0.000000e+00> : vector<25x128xf32>
    %19 = tpu.matmul %18, %0, %cst_16 {dimension_numbers = #tpu.dot_dimension_numbers<[1], [0], [0], [1], [0, 0, 1, 1], [], []>} : vector<25x3200xf32>, vector<3200x128xf32>, vector<25x128xf32> -> vector<25x128xf32>
    %20 = vector.broadcast %1 : vector<1x128xf32> to vector<25x128xf32>
    %21 = arith.addf %19, %20 : vector<25x128xf32>
    %cst_17 = arith.constant 0.000000e+00 : f32
    %22 = vector.broadcast %cst_17 : f32 to vector<25x128xf32>
    %23 = arith.maximumf %21, %22 : vector<25x128xf32>
    %c0_18 = arith.constant 0 : index
    %c3 = arith.constant 3 : index
    %c0_19 = arith.constant 0 : index
    %c0_20 = arith.constant 0 : index
    %24 = vector.load %arg1[%c0_18, %c3, %c0_19, %c0_20] : memref<1x4x25x3200xf32, #tpu.memory_space<vmem>>, vector<1x1x25x3200xf32>
    %25 = vector.shape_cast %24 : vector<1x1x25x3200xf32> to vector<25x3200xf32>
    %cst_21 = arith.constant dense<0.000000e+00> : vector<25x128xf32>
    %26 = tpu.matmul %25, %0, %cst_21 {dimension_numbers = #tpu.dot_dimension_numbers<[1], [0], [0], [1], [0, 0, 1, 1], [], []>} : vector<25x3200xf32>, vector<3200x128xf32>, vector<25x128xf32> -> vector<25x128xf32>
    %27 = vector.broadcast %1 : vector<1x128xf32> to vector<25x128xf32>
    %28 = arith.addf %26, %27 : vector<25x128xf32>
    %cst_22 = arith.constant 0.000000e+00 : f32
    %29 = vector.broadcast %cst_22 : f32 to vector<25x128xf32>
    %30 = arith.maximumf %28, %29 : vector<25x128xf32>
    %31 = arith.maximumf %23, %30 : vector<25x128xf32>
    %32 = arith.maximumf %16, %31 : vector<25x128xf32>
    %c0_23 = arith.constant 0 : index
    %c0_24 = arith.constant 0 : index
    %c0_25 = arith.constant 0 : index
    %33 = vector.load %arg4[%c0_23, %c0_24, %c0_25] : memref<1x25x128xf32, #tpu.memory_space<vmem>>, vector<1x25x128xf32>
    %34 = vector.shape_cast %33 : vector<1x25x128xf32> to vector<25x128xf32>
    %35 = vector.shape_cast %32 : vector<25x128xf32> to vector<1x25x128xf32>
    tpu.vector_store %arg4[%c0_23, %c0_24, %c0_25], %35 {strides = array<i32>} : memref<1x25x128xf32, #tpu.memory_space<vmem>>, vector<1x25x128xf32>,
    return
  }
  func.func @transform_0(%arg0: i32) -> (i32, i32, i32, i32) {
    %c0_i32 = arith.constant 0 : i32
    %c0_i32_0 = arith.constant 0 : i32
    %c0_i32_1 = arith.constant 0 : i32
    %c0_i32_2 = arith.constant 0 : i32
    return %arg0, %c0_i32, %c0_i32_0, %c0_i32_1 : i32, i32, i32, i32
  }
  func.func @transform_1(%arg0: i32) -> (i32, i32) {
    %c0_i32 = arith.constant 0 : i32
    %c0_i32_0 = arith.constant 0 : i32
    %c0_i32_1 = arith.constant 0 : i32
    return %c0_i32, %c0_i32_0 : i32, i32
  }
  func.func @transform_2(%arg0: i32) -> (i32, i32) {
    %c0_i32 = arith.constant 0 : i32
    %c0_i32_0 = arith.constant 0 : i32
    %c0_i32_1 = arith.constant 0 : i32
    return %c0_i32, %c0_i32_0 : i32, i32
  }
  func.func @transform_3(%arg0: i32) -> (i32, i32, i32) {
    %c0_i32 = arith.constant 0 : i32
    %c0_i32_0 = arith.constant 0 : i32
    %c0_i32_1 = arith.constant 0 : i32
    return %arg0, %c0_i32, %c0_i32_0 : i32, i32, i32
  }
}

module attributes {stable_mosaic.version = 11 : i64} {
  func.func @_fc_stack_kernel(%arg0: i32, %arg1: memref<2x3200xf32, #tpu.memory_space<vmem>>, %arg2: memref<3200x128xf32, #tpu.memory_space<vmem>>, %arg3: memref<1x128xf32, #tpu.memory_space<vmem>>, %arg4: memref<128x128xf32, #tpu.memory_space<vmem>>, %arg5: memref<1x128xf32, #tpu.memory_space<vmem>>, %arg6: memref<128x128xf32, #tpu.memory_space<vmem>>, %arg7: memref<1x128xf32, #tpu.memory_space<vmem>>, %arg8: memref<2x128xf32, #tpu.memory_space<vmem>>) attributes {dimension_semantics = [#tpu.dimension_semantics<arbitrary>], iteration_bounds = array<i64: 1>, scalar_prefetch = 0 : i64, scratch_operands = 0 : i64, tpu.core_type = #tpu.core_type<tc>, window_params = [{pipeline_mode = #tpu.pipeline_mode<synchronous>, transform_indices = @transform_0, window_bounds = array<i64: 2, 3200>}, {pipeline_mode = #tpu.pipeline_mode<synchronous>, transform_indices = @transform_1, window_bounds = array<i64: 3200, 128>}, {pipeline_mode = #tpu.pipeline_mode<synchronous>, transform_indices = @transform_2, window_bounds = array<i64: 1, 128>}, {pipeline_mode = #tpu.pipeline_mode<synchronous>, transform_indices = @transform_3, window_bounds = array<i64: 128, 128>}, {pipeline_mode = #tpu.pipeline_mode<synchronous>, transform_indices = @transform_4, window_bounds = array<i64: 1, 128>}, {pipeline_mode = #tpu.pipeline_mode<synchronous>, transform_indices = @transform_5, window_bounds = array<i64: 128, 128>}, {pipeline_mode = #tpu.pipeline_mode<synchronous>, transform_indices = @transform_6, window_bounds = array<i64: 1, 128>}, {pipeline_mode = #tpu.pipeline_mode<synchronous>, transform_indices = @transform_7, window_bounds = array<i64: 2, 128>}]} {
    %c0 = arith.constant 0 : index
    %c0_0 = arith.constant 0 : index
    %0 = vector.load %arg1[%c0, %c0_0] : memref<2x3200xf32, #tpu.memory_space<vmem>>, vector<2x3200xf32>
    %c0_1 = arith.constant 0 : index
    %c0_2 = arith.constant 0 : index
    %1 = vector.load %arg2[%c0_1, %c0_2] : memref<3200x128xf32, #tpu.memory_space<vmem>>, vector<3200x128xf32>
    %cst = arith.constant dense<0.000000e+00> : vector<2x128xf32>
    %2 = tpu.matmul %0, %1, %cst {dimension_numbers = #tpu.dot_dimension_numbers<[1], [0], [0], [1], [0, 0, 1, 1], [], []>} : vector<2x3200xf32>, vector<3200x128xf32>, vector<2x128xf32> -> vector<2x128xf32>
    %c0_3 = arith.constant 0 : index
    %c0_4 = arith.constant 0 : index
    %3 = vector.load %arg3[%c0_3, %c0_4] : memref<1x128xf32, #tpu.memory_space<vmem>>, vector<1x128xf32>
    %4 = vector.broadcast %3 : vector<1x128xf32> to vector<2x128xf32>
    %5 = arith.addf %2, %4 : vector<2x128xf32>
    %cst_5 = arith.constant 0.000000e+00 : f32
    %6 = vector.broadcast %cst_5 : f32 to vector<2x128xf32>
    %7 = arith.maximumf %5, %6 : vector<2x128xf32>
    %c0_6 = arith.constant 0 : index
    %c0_7 = arith.constant 0 : index
    %8 = vector.load %arg4[%c0_6, %c0_7] : memref<128x128xf32, #tpu.memory_space<vmem>>, vector<128x128xf32>
    %cst_8 = arith.constant dense<0.000000e+00> : vector<2x128xf32>
    %9 = tpu.matmul %7, %8, %cst_8 {dimension_numbers = #tpu.dot_dimension_numbers<[1], [0], [0], [1], [0, 0, 1, 1], [], []>} : vector<2x128xf32>, vector<128x128xf32>, vector<2x128xf32> -> vector<2x128xf32>
    %c0_9 = arith.constant 0 : index
    %c0_10 = arith.constant 0 : index
    %10 = vector.load %arg5[%c0_9, %c0_10] : memref<1x128xf32, #tpu.memory_space<vmem>>, vector<1x128xf32>
    %11 = vector.broadcast %10 : vector<1x128xf32> to vector<2x128xf32>
    %12 = arith.addf %9, %11 : vector<2x128xf32>
    %cst_11 = arith.constant 0.000000e+00 : f32
    %13 = vector.broadcast %cst_11 : f32 to vector<2x128xf32>
    %14 = arith.maximumf %12, %13 : vector<2x128xf32>
    %c0_12 = arith.constant 0 : index
    %c0_13 = arith.constant 0 : index
    %15 = vector.load %arg6[%c0_12, %c0_13] : memref<128x128xf32, #tpu.memory_space<vmem>>, vector<128x128xf32>
    %cst_14 = arith.constant dense<0.000000e+00> : vector<2x128xf32>
    %16 = tpu.matmul %14, %15, %cst_14 {dimension_numbers = #tpu.dot_dimension_numbers<[1], [0], [0], [1], [0, 0, 1, 1], [], []>} : vector<2x128xf32>, vector<128x128xf32>, vector<2x128xf32> -> vector<2x128xf32>
    %c0_15 = arith.constant 0 : index
    %c0_16 = arith.constant 0 : index
    %17 = vector.load %arg7[%c0_15, %c0_16] : memref<1x128xf32, #tpu.memory_space<vmem>>, vector<1x128xf32>
    %18 = vector.broadcast %17 : vector<1x128xf32> to vector<2x128xf32>
    %19 = arith.addf %16, %18 : vector<2x128xf32>
    %c0_17 = arith.constant 0 : index
    %c0_18 = arith.constant 0 : index
    %20 = vector.load %arg8[%c0_17, %c0_18] : memref<2x128xf32, #tpu.memory_space<vmem>>, vector<2x128xf32>
    tpu.vector_store %arg8[%c0_17, %c0_18], %19 {strides = array<i32>} : memref<2x128xf32, #tpu.memory_space<vmem>>, vector<2x128xf32>,
    return
  }
  func.func @transform_0(%arg0: i32) -> (i32, i32) {
    %c0_i32 = arith.constant 0 : i32
    %c0_i32_0 = arith.constant 0 : i32
    %c0_i32_1 = arith.constant 0 : i32
    return %c0_i32, %c0_i32_0 : i32, i32
  }
  func.func @transform_1(%arg0: i32) -> (i32, i32) {
    %c0_i32 = arith.constant 0 : i32
    %c0_i32_0 = arith.constant 0 : i32
    %c0_i32_1 = arith.constant 0 : i32
    return %c0_i32, %c0_i32_0 : i32, i32
  }
  func.func @transform_2(%arg0: i32) -> (i32, i32) {
    %c0_i32 = arith.constant 0 : i32
    %c0_i32_0 = arith.constant 0 : i32
    %c0_i32_1 = arith.constant 0 : i32
    return %c0_i32, %c0_i32_0 : i32, i32
  }
  func.func @transform_3(%arg0: i32) -> (i32, i32) {
    %c0_i32 = arith.constant 0 : i32
    %c0_i32_0 = arith.constant 0 : i32
    %c0_i32_1 = arith.constant 0 : i32
    return %c0_i32, %c0_i32_0 : i32, i32
  }
  func.func @transform_4(%arg0: i32) -> (i32, i32) {
    %c0_i32 = arith.constant 0 : i32
    %c0_i32_0 = arith.constant 0 : i32
    %c0_i32_1 = arith.constant 0 : i32
    return %c0_i32, %c0_i32_0 : i32, i32
  }
  func.func @transform_5(%arg0: i32) -> (i32, i32) {
    %c0_i32 = arith.constant 0 : i32
    %c0_i32_0 = arith.constant 0 : i32
    %c0_i32_1 = arith.constant 0 : i32
    return %c0_i32, %c0_i32_0 : i32, i32
  }
  func.func @transform_6(%arg0: i32) -> (i32, i32) {
    %c0_i32 = arith.constant 0 : i32
    %c0_i32_0 = arith.constant 0 : i32
    %c0_i32_1 = arith.constant 0 : i32
    return %c0_i32, %c0_i32_0 : i32, i32
  }
  func.func @transform_7(%arg0: i32) -> (i32, i32) {
    %c0_i32 = arith.constant 0 : i32
    %c0_i32_0 = arith.constant 0 : i32
    %c0_i32_1 = arith.constant 0 : i32
    return %c0_i32, %c0_i32_0 : i32, i32
  }
}

</mosaic_0001>

<bundles_post_ra>
// kernel: net_forward.3
= control target key start
LH: loop header
LB: loop body
LE: loop exit
PB: predicated region body
PF: predicated region fallthrough
CT: control target
= control target key end

     0   :  { %s1040_s12 = smov 0   ;;  %s1347_s0 = inlined_call_operand.vmem [shape: f32[2,4,196,128], index: 0, kind: input, shape index: {}]   ;;  %s1348_s1 = inlined_call_operand.vmem [shape: f32[128,128], index: 1, kind: input, shape index: {}]   ;;  %s1349_s2 = inlined_call_operand.vmem [shape: f32[1,128], index: 2, kind: input, shape index: {}]   ;;  %s1350_s3 = inlined_call_operand.vmem [shape: f32[2,196,128], index: 3, kind: output, shape index: {}]  }
   0x1 LB: > { %s917_s13 = sadd.s32 4294967295, %s1018_s12   ;;  %p921_p0 = scmp.ge.s32.totalorder %s1018_s12, 1  ;;  %s1018_s12 = sphi %s1040_s12, %s13_s12  }
   0x2   : > { %p137_p1 = scmp.lt.s32.totalorder %s1018_s12, 3 }
   0x4   : > { %p138_p2 = pnand %p921_p0, %p137_p1 }
   0x5   : > { %p161_p3 = scmp.lt.s32.totalorder (!%p138_p2), %s917_s13, 1 }
   0x6   : > { %141 = sbr.rel (%p138_p2) target bundleno = 376 (0x178), region = 32 }
   0xb   : > { %v186_v0 = vld [vmem:[%s1348_s1 + $0x78] sm:$0xff]  ;;  %v185_v1 = vld [vmem:[%s1348_s1 + $0x70] sm:$0xff]  ;;  %v184_v2 = vld [vmem:[%s1348_s1 + $0x68] sm:$0xff]  ;;  %s1352_s13 = smov (!%p161_p3, %s917_s13), 1 }
   0xc   : > { %527 = vmatpush.msra.mxu2 %v186_v0  ;;  %670 = vmatpush.msra.mxu3 %v186_v0  ;;  %v183_v3 = vld [vmem:[%s1348_s1 + $0x60] sm:$0xff]  ;;  %v182_v4 = vld [vmem:[%s1348_s1 + $0x58] sm:$0xff]  ;;  %v181_v5 = vld [vmem:[%s1348_s1 + $0x50] sm:$0xff]  ;;  %s1001_s15 = smul.u32 800, %s1352_s13 }
   0xd   : > { %216 = vmatpush.msra.mxu0 %v186_v0  ;;  %359 = vmatpush.msra.mxu1 %v186_v0  ;;  %v180_v6 = vld [vmem:[%s1348_s1 + $0x48] sm:$0xff]  ;;  %v179_v7 = vld [vmem:[%s1348_s1 + $0x40] sm:$0xff]  ;;  %v178_v8 = vld [vmem:[%s1348_s1 + $0x38] sm:$0xff]  ;;  %s1002_s27 = smul.u32 200, %s1352_s13 }
   0xe   : > { %528 = vmatpush.msra.mxu2 %v185_v1  ;;  %671 = vmatpush.msra.mxu3 %v185_v1  ;;  %v177_v9 = vld [vmem:[%s1348_s1 + $0x30] sm:$0xff]  ;;  %v176_v10 = vld [vmem:[%s1348_s1 + $0x28] sm:$0xff]  ;;  %v175_v11 = vld [vmem:[%s1348_s1 + $0x20] sm:$0xff]  ;;  %s1103_s22 = scalar_lea.vmem %s1347_s0, %s1001_s15 }
   0xf   : > { %217 = vmatpush.msra.mxu0 %v185_v1  ;;  %360 = vmatpush.msra.mxu1 %v185_v1  ;;  %v174_v12 = vld [vmem:[%s1348_s1 + $0x18] sm:$0xff]  ;;  %v173_v13 = vld [vmem:[%s1348_s1 + $0x10] sm:$0xff]  ;;  %v172_v14 = vld [vmem:[%s1348_s1 + $0x8] sm:$0xff]  ;;  %s1195_s29 = scalar_lea.vmem %s1350_s3, %s1002_s27 }
  0x10   : > { %529 = vmatpush.msra.mxu2 %v184_v2  ;;  %672 = vmatpush.msra.mxu3 %v184_v2  ;;  %v171_v15 = vld [vmem:[%s1348_s1] sm:$0xff]  ;;  %v949_v16 = vld [vmem:[%s1103_s22 + $0x190] sm:$0xff]  ;;  %v974_v17 = vld [vmem:[%s1103_s22 + $0x258] sm:$0xff] }
  0x11   : > { %218 = vmatpush.msra.mxu0 %v184_v2  ;;  %361 = vmatpush.msra.mxu1 %v184_v2  ;;  %v188_v18 = vld [vmem:[%s1103_s22] sm:$0xff]  ;;  %v924_v19 = vld [vmem:[%s1103_s22 + $0xc8] sm:$0xff]  ;;  %v950_v20 = vld [vmem:[%s1103_s22 + $0x198] sm:$0xff] }
  0x12   : > { %530 = vmatpush.msra.mxu2 %v183_v3  ;;  %673 = vmatpush.msra.mxu3 %v183_v3  ;;  %v975_v21 = vld [vmem:[%s1103_s22 + $0x260] sm:$0xff]  ;;  %v189_v22 = vld [vmem:[%s1103_s22 + $0x8] sm:$0xff]  ;;  %v925_v23 = vld [vmem:[%s1103_s22 + $0xd0] sm:$0xff] }
  0x13   : > { %219 = vmatpush.msra.mxu0 %v183_v3  ;;  %362 = vmatpush.msra.mxu1 %v183_v3  ;;  %v951_v24 = vld [vmem:[%s1103_s22 + $0x1a0] sm:$0xff]  ;;  %v976_v25 = vld [vmem:[%s1103_s22 + $0x268] sm:$0xff]  ;;  %v190_v26 = vld [vmem:[%s1103_s22 + $0x10] sm:$0xff] }
  0x14   : > { %531 = vmatpush.msra.mxu2 %v182_v4  ;;  %674 = vmatpush.msra.mxu3 %v182_v4  ;;  %v926_v27 = vld [vmem:[%s1103_s22 + $0xd8] sm:$0xff]  ;;  %v952_v28 = vld [vmem:[%s1103_s22 + $0x1a8] sm:$0xff]  ;;  %v977_v29 = vld [vmem:[%s1103_s22 + $0x270] sm:$0xff] }
  0x15   : > { %220 = vmatpush.msra.mxu0 %v182_v4  ;;  %363 = vmatpush.msra.mxu1 %v182_v4  ;;  %v191_v30 = vld [vmem:[%s1103_s22 + $0x18] sm:$0xff]  ;;  %v927_v31 = vld [vmem:[%s1103_s22 + $0xe0] sm:$0xff]  ;;  %v953_v32 = vld [vmem:[%s1103_s22 + $0x1b0] sm:$0xff] }
  0x16   : > { %532 = vmatpush.msra.mxu2 %v181_v5  ;;  %675 = vmatpush.msra.mxu3 %v181_v5  ;;  %v978_v33 = vld [vmem:[%s1103_s22 + $0x278] sm:$0xff]  ;;  %v192_v34 = vld [vmem:[%s1103_s22 + $0x20] sm:$0xff]  ;;  %v928_v35 = vld [vmem:[%s1103_s22 + $0xe8] sm:$0xff] }
  0x17   : > { %221 = vmatpush.msra.mxu0 %v181_v5  ;;  %364 = vmatpush.msra.mxu1 %v181_v5  ;;  %v954_v36 = vld [vmem:[%s1103_s22 + $0x1b8] sm:$0xff]  ;;  %v979_v37 = vld [vmem:[%s1103_s22 + $0x280] sm:$0xff]  ;;  %v193_v38 = vld [vmem:[%s1103_s22 + $0x28] sm:$0xff] }
  0x18   : > { %533 = vmatpush.msra.mxu2 %v180_v6  ;;  %676 = vmatpush.msra.mxu3 %v180_v6  ;;  %v929_v39 = vld [vmem:[%s1103_s22 + $0xf0] sm:$0xff]  ;;  %v955_v40 = vld [vmem:[%s1103_s22 + $0x1c0] sm:$0xff]  ;;  %v980_v41 = vld [vmem:[%s1103_s22 + $0x288] sm:$0xff] }
  0x19   : > { %222 = vmatpush.msra.mxu0 %v180_v6  ;;  %365 = vmatpush.msra.mxu1 %v180_v6  ;;  %v194_v42 = vld [vmem:[%s1103_s22 + $0x30] sm:$0xff]  ;;  %v930_v43 = vld [vmem:[%s1103_s22 + $0xf8] sm:$0xff]  ;;  %v956_v44 = vld [vmem:[%s1103_s22 + $0x1c8] sm:$0xff] }
  0x1a   : > { %534 = vmatpush.msra.mxu2 %v179_v7  ;;  %677 = vmatpush.msra.mxu3 %v179_v7  ;;  %v981_v45 = vld [vmem:[%s1103_s22 + $0x290] sm:$0xff]  ;;  %v195_v46 = vld [vmem:[%s1103_s22 + $0x38] sm:$0xff]  ;;  %v931_v47 = vld [vmem:[%s1103_s22 + $0x100] sm:$0xff] }
  0x1b   : > { %223 = vmatpush.msra.mxu0 %v179_v7  ;;  %366 = vmatpush.msra.mxu1 %v179_v7  ;;  %v957_v48 = vld [vmem:[%s1103_s22 + $0x1d0] sm:$0xff]  ;;  %v982_v49 = vld [vmem:[%s1103_s22 + $0x298] sm:$0xff]  ;;  %v196_v50 = vld [vmem:[%s1103_s22 + $0x40] sm:$0xff] }
  0x1c   : > { %535 = vmatpush.msra.mxu2 %v178_v8  ;;  %678 = vmatpush.msra.mxu3 %v178_v8  ;;  %v932_v51 = vld [vmem:[%s1103_s22 + $0x108] sm:$0xff]  ;;  %v958_v52 = vld [vmem:[%s1103_s22 + $0x1d8] sm:$0xff]  ;;  %v983_v53 = vld [vmem:[%s1103_s22 + $0x2a0] sm:$0xff] }
  0x1d   : > { %224 = vmatpush.msra.mxu0 %v178_v8  ;;  %367 = vmatpush.msra.mxu1 %v178_v8  ;;  %v197_v54 = vld [vmem:[%s1103_s22 + $0x48] sm:$0xff]  ;;  %v933_v55 = vld [vmem:[%s1103_s22 + $0x110] sm:$0xff]  ;;  %v959_v56 = vld [vmem:[%s1103_s22 + $0x1e0] sm:$0xff] }
  0x1e   : > { %536 = vmatpush.msra.mxu2 %v177_v9  ;;  %679 = vmatpush.msra.mxu3 %v177_v9  ;;  %v984_v57 = vld [vmem:[%s1103_s22 + $0x2a8] sm:$0xff]  ;;  %v198_v58 = vld [vmem:[%s1103_s22 + $0x50] sm:$0xff]  ;;  %v934_v59 = vld [vmem:[%s1103_s22 + $0x118] sm:$0xff] }
  0x1f   : > { %225 = vmatpush.msra.mxu0 %v177_v9  ;;  %368 = vmatpush.msra.mxu1 %v177_v9  ;;  %v960_v60 = vld [vmem:[%s1103_s22 + $0x1e8] sm:$0xff]  ;;  %v985_v61 = vld [vmem:[%s1103_s22 + $0x2b0] sm:$0xff]  ;;  %v199_v62 = vld [vmem:[%s1103_s22 + $0x58] sm:$0xff] }
  0x20   : > { %537 = vmatpush.msra.mxu2 %v176_v10  ;;  %680 = vmatpush.msra.mxu3 %v176_v10  ;;  %v935_v63 = vld [vmem:[%s1103_s22 + $0x120] sm:$0xff]  ;;  %v961_v0 = vld [vmem:[%s1103_s22 + $0x1f0] sm:$0xff]  ;;  %v986_v1 = vld [vmem:[%s1103_s22 + $0x2b8] sm:$0xff] }
  0x21   : > { %226 = vmatpush.msra.mxu0 %v176_v10  ;;  %369 = vmatpush.msra.mxu1 %v176_v10  ;;  %v200_v2 = vld [vmem:[%s1103_s22 + $0x60] sm:$0xff]  ;;  %v936_v3 = vld [vmem:[%s1103_s22 + $0x128] sm:$0xff]  ;;  %v962_v4 = vld [vmem:[%s1103_s22 + $0x1f8] sm:$0xff] }
  0x22   : > { %538 = vmatpush.msra.mxu2 %v175_v11  ;;  %681 = vmatpush.msra.mxu3 %v175_v11  ;;  %v987_v5 = vld [vmem:[%s1103_s22 + $0x2c0] sm:$0xff]  ;;  %v201_v6 = vld [vmem:[%s1103_s22 + $0x68] sm:$0xff]  ;;  %v937_v7 = vld [vmem:[%s1103_s22 + $0x130] sm:$0xff] }
  0x23   : > { %227 = vmatpush.msra.mxu0 %v175_v11  ;;  %370 = vmatpush.msra.mxu1 %v175_v11  ;;  %v963_v8 = vld [vmem:[%s1103_s22 + $0x200] sm:$0xff]  ;;  %v988_v9 = vld [vmem:[%s1103_s22 + $0x2c8] sm:$0xff]  ;;  %v202_v10 = vld [vmem:[%s1103_s22 + $0x70] sm:$0xff] }
  0x24   : > { %539 = vmatpush.msra.mxu2 %v174_v12  ;;  %682 = vmatpush.msra.mxu3 %v174_v12  ;;  %v938_v11 = vld [vmem:[%s1103_s22 + $0x138] sm:$0xff] }
  0x25   : > { %228 = vmatpush.msra.mxu0 %v174_v12  ;;  %371 = vmatpush.msra.mxu1 %v174_v12  ;;  %v964_v12 = vld [vmem:[%s1103_s22 + $0x208] sm:$0xff] }
  0x26   : > { %540 = vmatpush.msra.mxu2 %v173_v13  ;;  %683 = vmatpush.msra.mxu3 %v173_v13 }
  0x27   : > { %229 = vmatpush.msra.mxu0 %v173_v13  ;;  %372 = vmatpush.msra.mxu1 %v173_v13  ;;  %v989_v13 = vld [vmem:[%s1103_s22 + $0x2d0] sm:$0xff] }
  0x28   : > { %541 = vmatpush.msra.mxu2 %v172_v14  ;;  %684 = vmatpush.msra.mxu3 %v172_v14 }
  0x29   : > { %230 = vmatpush.msra.mxu0 %v172_v14  ;;  %373 = vmatpush.msra.mxu1 %v172_v14  ;;  %v203_v14 = vld [vmem:[%s1103_s22 + $0x78] sm:$0xff] }
  0x2a   : > { %542 = vmatpush.msra.mxu2 %v171_v15  ;;  %685 = vmatpush.msra.mxu3 %v171_v15 }
  0x2b   : > { %543 = vmatmul.f32.vlgmr.msra.gmra.mxu2 %v949_v16  ;;  %686 = vmatmul.f32.vlgmr.msra.gmra.mxu3 %v974_v17  ;;  %v1175_v16 = vld [vmem:[%s1349_s2] ss:$0 sm:$0xff]  ;;  %v965_v17 = vld [vmem:[%s1103_s22 + $0x210] sm:$0xff] }
  0x2c   : > { %231 = vmatpush.msra.mxu0 %v171_v15  ;;  %374 = vmatpush.msra.mxu1 %v171_v15  ;;  %v939_v15 = vld [vmem:[%s1103_s22 + $0x140] sm:$0xff] }
  0x2d   : > { %232 = vmatmul.f32.vlgmr.msra.gmra.mxu0 %v188_v18  ;;  %375 = vmatmul.f32.vlgmr.msra.gmra.mxu1 %v924_v19  ;;  %v990_v18 = vld [vmem:[%s1103_s22 + $0x2d8] sm:$0xff] }
  0x33   : > { %546 = vmatmul.f32.gmra.mxu2 %v950_v20  ;;  %689 = vmatmul.f32.gmra.mxu3 %v975_v21  ;;  %v204_v21 = vld [vmem:[%s1103_s22 + $0x80] sm:$0xff] }
  0x35   : > { %235 = vmatmul.f32.gmra.mxu0 %v189_v22  ;;  %378 = vmatmul.f32.gmra.mxu1 %v925_v23  ;;  %v940_v22 = vld [vmem:[%s1103_s22 + $0x148] sm:$0xff] }
  0x3b   : > { %549 = vmatmul.f32.gmra.mxu2 %v951_v24  ;;  %692 = vmatmul.f32.gmra.mxu3 %v976_v25 }
  0x3d   : > { %238 = vmatmul.f32.gmra.mxu0 %v190_v26  ;;  %381 = vmatmul.f32.gmra.mxu1 %v926_v27 }
  0x43   : > { %552 = vmatmul.f32.gmra.mxu2 %v952_v28  ;;  %695 = vmatmul.f32.gmra.mxu3 %v977_v29 }
  0x45   : > { %241 = vmatmul.f32.gmra.mxu0 %v191_v30  ;;  %384 = vmatmul.f32.gmra.mxu1 %v927_v31  ;;  %v966_v31 = vld [vmem:[%s1103_s22 + $0x218] sm:$0xff] }
  0x4b   : > { %555 = vmatmul.f32.gmra.mxu2 %v953_v32  ;;  %698 = vmatmul.f32.gmra.mxu3 %v978_v33  ;;  %v991_v32 = vld [vmem:[%s1103_s22 + $0x2e0] sm:$0xff] }
  0x4d   : > { %244 = vmatmul.f32.gmra.mxu0 %v192_v34  ;;  %387 = vmatmul.f32.gmra.mxu1 %v928_v35 }
  0x53   : > { %558 = vmatmul.f32.gmra.mxu2 %v954_v36  ;;  %701 = vmatmul.f32.gmra.mxu3 %v979_v37 }
  0x55   : > { %247 = vmatmul.f32.gmra.mxu0 %v193_v38  ;;  %390 = vmatmul.f32.gmra.mxu1 %v929_v39  ;;  %v205_v38 = vld [vmem:[%s1103_s22 + $0x88] sm:$0xff]  ;;  %v941_v39 = vld [vmem:[%s1103_s22 + $0x150] sm:$0xff] }
  0x5b   : > { %561 = vmatmul.f32.gmra.mxu2 %v955_v40  ;;  %704 = vmatmul.f32.gmra.mxu3 %v980_v41 }
  0x5d   : > { %250 = vmatmul.f32.gmra.mxu0 %v194_v42  ;;  %393 = vmatmul.f32.gmra.mxu1 %v930_v43 }
  0x63   : > { %564 = vmatmul.f32.gmra.mxu2 %v956_v44  ;;  %707 = vmatmul.f32.gmra.mxu3 %v981_v45 }
  0x65   : > { %253 = vmatmul.f32.gmra.mxu0 %v195_v46  ;;  %396 = vmatmul.f32.gmra.mxu1 %v931_v47 }
  0x6b   : > { %567 = vmatmul.f32.gmra.mxu2 %v957_v48  ;;  %710 = vmatmul.f32.gmra.mxu3 %v982_v49 }
  0x6d   : > { %256 = vmatmul.f32.gmra.mxu0 %v196_v50  ;;  %399 = vmatmul.f32.gmra.mxu1 %v932_v51  ;;  %v967_v50 = vld [vmem:[%s1103_s22 + $0x220] sm:$0xff]  ;;  %v992_v51 = vld [vmem:[%s1103_s22 + $0x2e8] sm:$0xff] }
  0x73   : > { %570 = vmatmul.f32.gmra.mxu2 %v958_v52  ;;  %713 = vmatmul.f32.gmra.mxu3 %v983_v53 }
  0x75   : > { %259 = vmatmul.f32.gmra.mxu0 %v197_v54  ;;  %402 = vmatmul.f32.gmra.mxu1 %v933_v55 }
  0x7b   : > { %573 = vmatmul.f32.gmra.mxu2 %v959_v56  ;;  %716 = vmatmul.f32.gmra.mxu3 %v984_v57  ;;  %v206_v57 = vld [vmem:[%s1103_s22 + $0x90] sm:$0xff] }
  0x7d   : > { %262 = vmatmul.f32.gmra.mxu0 %v198_v58  ;;  %405 = vmatmul.f32.gmra.mxu1 %v934_v59  ;;  %v942_v58 = vld [vmem:[%s1103_s22 + $0x158] sm:$0xff] }
  0x83   : > { %576 = vmatmul.f32.gmra.mxu2 %v960_v60  ;;  %719 = vmatmul.f32.gmra.mxu3 %v985_v61 }
  0x85   : > { %265 = vmatmul.f32.gmra.mxu0 %v199_v62  ;;  %408 = vmatmul.f32.gmra.mxu1 %v935_v63 }
  0x8b   : > { %579 = vmatmul.f32.gmra.mxu2 %v961_v0  ;;  %722 = vmatmul.f32.gmra.mxu3 %v986_v1 }
  0x8d   : > { %268 = vmatmul.f32.gmra.mxu0 %v200_v2  ;;  %411 = vmatmul.f32.gmra.mxu1 %v936_v3 }
  0x93   : > { %582 = vmatmul.f32.gmra.mxu2 %v962_v4  ;;  %725 = vmatmul.f32.gmra.mxu3 %v987_v5  ;;  %v968_v5 = vld [vmem:[%s1103_s22 + $0x228] sm:$0xff] }
  0x95   : > { %271 = vmatmul.f32.gmra.mxu0 %v201_v6  ;;  %414 = vmatmul.f32.gmra.mxu1 %v937_v7  ;;  %v993_v6 = vld [vmem:[%s1103_s22 + $0x2f0] sm:$0xff] }
  0x9b   : > { %585 = vmatmul.f32.gmra.mxu2 %v963_v8  ;;  %728 = vmatmul.f32.gmra.mxu3 %v988_v9 }
  0x9d   : > { %274 = vmatmul.f32.gmra.mxu0 %v202_v10  ;;  %417 = vmatmul.f32.gmra.mxu1 %v938_v11 }
  0xa3   : > { %588 = vmatmul.f32.gmra.mxu2 %v964_v12  ;;  %731 = vmatmul.f32.gmra.mxu3 %v989_v13  ;;  %v207_v12 = vld [vmem:[%s1103_s22 + $0x98] sm:$0xff]  ;;  %v943_v13 = vld [vmem:[%s1103_s22 + $0x160] sm:$0xff] }
  0xa5   : > { %277 = vmatmul.f32.gmra.mxu0 %v203_v14  ;;  %420 = vmatmul.f32.gmra.mxu1 %v939_v15 }
  0xaa   : > { %v233_v19 = vpop.f32.mrf.mxu0  ;;  %v376_v20 = vpop.f32.mrf.mxu1 }
  0xab   : > { %591 = vmatmul.f32.gmra.mxu2 %v965_v17  ;;  %734 = vmatmul.f32.gmra.mxu3 %v990_v18  ;;  %v234_v23 = vadd.f32 %v1175_v16, %v233_v19  ;;  %v377_v24 = vadd.f32 %v1175_v16, %v376_v20 }
  0xad   : > { %v308_v25 = vmax.f32 %v234_v23, 0.0  ;;  %v451_v26 = vmax.f32 %v377_v24, 0.0  ;;  %280 = vmatmul.f32.gmra.mxu0 %v204_v21  ;;  %423 = vmatmul.f32.gmra.mxu1 %v940_v22 }
  0xae   : > { %v544_v27 = vpop.f32.mrf.mxu2  ;;  %v687_v28 = vpop.f32.mrf.mxu3 }
  0xaf   : > { %v545_v29 = vadd.f32 %v1175_v16, %v544_v27  ;;  %v688_v30 = vadd.f32 %v1175_v16, %v687_v28  ;;  %v476_v33 = vmax.f32 %v308_v25, %v451_v26  ;;  %v969_v25 = vld [vmem:[%s1103_s22 + $0x230] sm:$0xff]  ;;  %v994_v26 = vld [vmem:[%s1103_s22 + $0x2f8] sm:$0xff] }
  0xb1   : > { %v619_v34 = vmax.f32 %v545_v29, 0.0  ;;  %v762_v35 = vmax.f32 %v688_v30, 0.0 }
  0xb2   : > { %v236_v36 = vpop.f32.mrf.mxu0  ;;  %v379_v37 = vpop.f32.mrf.mxu1 }
  0xb3   : > { %v787_v40 = vmax.f32 %v619_v34, %v762_v35  ;;  %594 = vmatmul.f32.gmra.mxu2 %v966_v31  ;;  %737 = vmatmul.f32.gmra.mxu3 %v991_v32  ;;  %v237_v41 = vadd.f32 %v1175_v16, %v236_v36  ;;  %v380_v42 = vadd.f32 %v1175_v16, %v379_v37  ;;  %v208_v32 = vld [vmem:[%s1103_s22 + $0xa0] sm:$0xff] }
  0xb5   : > { %v812_v43 = vmax.f32 %v476_v33, %v787_v40  ;;  %v309_v44 = vmax.f32 %v237_v41, 0.0  ;;  %v452_v45 = vmax.f32 %v380_v42, 0.0  ;;  %283 = vmatmul.f32.gmra.mxu0 %v205_v38  ;;  %426 = vmatmul.f32.gmra.mxu1 %v941_v39  ;;  %v944_v33 = vld [vmem:[%s1103_s22 + $0x168] sm:$0xff] }
  0xb6   : > { %v547_v46 = vpop.f32.mrf.mxu2  ;;  %v690_v47 = vpop.f32.mrf.mxu3 }
  0xb7   : > { %837 = vst [vmem:[%s1195_s29] sm:$0xff] %v812_v43  ;;  %v548_v48 = vadd.f32 %v1175_v16, %v547_v46  ;;  %v691_v49 = vadd.f32 %v1175_v16, %v690_v47  ;;  %v477_v52 = vmax.f32 %v309_v44, %v452_v45  ;;  %v970_v44 = vld [vmem:[%s1103_s22 + $0x238] sm:$0xff]  ;;  %v995_v45 = vld [vmem:[%s1103_s22 + $0x300] sm:$0xff] }
  0xb9   : > { %v620_v53 = vmax.f32 %v548_v48, 0.0  ;;  %v763_v54 = vmax.f32 %v691_v49, 0.0 }
  0xba   : > { %v239_v55 = vpop.f32.mrf.mxu0  ;;  %v382_v56 = vpop.f32.mrf.mxu1 }
  0xbb   : > { %v788_v59 = vmax.f32 %v620_v53, %v763_v54  ;;  %597 = vmatmul.f32.gmra.mxu2 %v967_v50  ;;  %740 = vmatmul.f32.gmra.mxu3 %v992_v51  ;;  %v240_v60 = vadd.f32 %v1175_v16, %v239_v55  ;;  %v383_v61 = vadd.f32 %v1175_v16, %v382_v56  ;;  %v209_v51 = vld [vmem:[%s1103_s22 + $0xa8] sm:$0xff] }
  0xbd   : > { %v813_v62 = vmax.f32 %v477_v52, %v788_v59  ;;  %v310_v63 = vmax.f32 %v240_v60, 0.0  ;;  %v453_v0 = vmax.f32 %v383_v61, 0.0  ;;  %286 = vmatmul.f32.gmra.mxu0 %v206_v57  ;;  %429 = vmatmul.f32.gmra.mxu1 %v942_v58  ;;  %v945_v52 = vld [vmem:[%s1103_s22 + $0x170] sm:$0xff] }
  0xbe   : > { %v550_v1 = vpop.f32.mrf.mxu2  ;;  %v693_v2 = vpop.f32.mrf.mxu3 }
  0xbf   : > { %838 = vst [vmem:[%s1195_s29 + $0x8] sm:$0xff] %v813_v62  ;;  %v551_v3 = vadd.f32 %v1175_v16, %v550_v1  ;;  %v694_v4 = vadd.f32 %v1175_v16, %v693_v2  ;;  %v478_v7 = vmax.f32 %v310_v63, %v453_v0  ;;  %v971_v63 = vld [vmem:[%s1103_s22 + $0x240] sm:$0xff]  ;;  %v996_v0 = vld [vmem:[%s1103_s22 + $0x308] sm:$0xff] }
  0xc1   : > { %v621_v8 = vmax.f32 %v551_v3, 0.0  ;;  %v764_v9 = vmax.f32 %v694_v4, 0.0 }
  0xc2   : > { %v242_v10 = vpop.f32.mrf.mxu0  ;;  %v385_v11 = vpop.f32.mrf.mxu1 }
  0xc3   : > { %v789_v14 = vmax.f32 %v621_v8, %v764_v9  ;;  %600 = vmatmul.f32.gmra.mxu2 %v968_v5  ;;  %743 = vmatmul.f32.gmra.mxu3 %v993_v6  ;;  %v243_v15 = vadd.f32 %v1175_v16, %v242_v10  ;;  %v386_v17 = vadd.f32 %v1175_v16, %v385_v11  ;;  %v210_v6 = vld [vmem:[%s1103_s22 + $0xb0] sm:$0xff] }
  0xc5   : > { %v814_v18 = vmax.f32 %v478_v7, %v789_v14  ;;  %v311_v19 = vmax.f32 %v243_v15, 0.0  ;;  %v454_v20 = vmax.f32 %v386_v17, 0.0  ;;  %289 = vmatmul.f32.gmra.mxu0 %v207_v12  ;;  %432 = vmatmul.f32.gmra.mxu1 %v943_v13  ;;  %v946_v7 = vld [vmem:[%s1103_s22 + $0x178] sm:$0xff] }
  0xc6   : > { %v553_v21 = vpop.f32.mrf.mxu2  ;;  %v696_v22 = vpop.f32.mrf.mxu3 }
  0xc7   : > { %839 = vst [vmem:[%s1195_s29 + $0x10] sm:$0xff] %v814_v18  ;;  %v554_v23 = vadd.f32 %v1175_v16, %v553_v21  ;;  %v697_v24 = vadd.f32 %v1175_v16, %v696_v22  ;;  %v479_v27 = vmax.f32 %v311_v19, %v454_v20  ;;  %v972_v19 = vld [vmem:[%s1103_s22 + $0x248] sm:$0xff]  ;;  %v997_v20 = vld [vmem:[%s1103_s22 + $0x310] sm:$0xff] }
  0xc9   : > { %v622_v28 = vmax.f32 %v554_v23, 0.0  ;;  %v765_v29 = vmax.f32 %v697_v24, 0.0 }
  0xca   : > { %v245_v30 = vpop.f32.mrf.mxu0  ;;  %v388_v31 = vpop.f32.mrf.mxu1 }
  0xcb   : > { %v790_v34 = vmax.f32 %v622_v28, %v765_v29  ;;  %603 = vmatmul.f32.gmra.mxu2 %v969_v25  ;;  %746 = vmatmul.f32.gmra.mxu3 %v994_v26  ;;  %v246_v35 = vadd.f32 %v1175_v16, %v245_v30  ;;  %v389_v36 = vadd.f32 %v1175_v16, %v388_v31  ;;  %v211_v26 = vld [vmem:[%s1103_s22 + $0xb8] sm:$0xff] }
  0xcd   : > { %v815_v37 = vmax.f32 %v479_v27, %v790_v34  ;;  %v312_v38 = vmax.f32 %v246_v35, 0.0  ;;  %v455_v39 = vmax.f32 %v389_v36, 0.0  ;;  %292 = vmatmul.f32.gmra.mxu0 %v208_v32  ;;  %435 = vmatmul.f32.gmra.mxu1 %v944_v33  ;;  %v947_v27 = vld [vmem:[%s1103_s22 + $0x180] sm:$0xff] }
  0xce   : > { %v556_v40 = vpop.f32.mrf.mxu2  ;;  %v699_v41 = vpop.f32.mrf.mxu3 }
  0xcf   : > { %840 = vst [vmem:[%s1195_s29 + $0x18] sm:$0xff] %v815_v37  ;;  %v557_v42 = vadd.f32 %v1175_v16, %v556_v40  ;;  %v700_v43 = vadd.f32 %v1175_v16, %v699_v41  ;;  %v480_v46 = vmax.f32 %v312_v38, %v455_v39  ;;  %v973_v38 = vld [vmem:[%s1103_s22 + $0x250] sm:$0xf]  ;;  %v998_v39 = vld [vmem:[%s1103_s22 + $0x318] sm:$0xf] }
  0xd1   : > { %v623_v47 = vmax.f32 %v557_v42, 0.0  ;;  %v766_v48 = vmax.f32 %v700_v43, 0.0 }
  0xd2   : > { %v248_v49 = vpop.f32.mrf.mxu0  ;;  %v391_v50 = vpop.f32.mrf.mxu1 }
  0xd3   : > { %v791_v53 = vmax.f32 %v623_v47, %v766_v48  ;;  %606 = vmatmul.f32.gmra.mxu2 %v970_v44  ;;  %749 = vmatmul.f32.gmra.mxu3 %v995_v45  ;;  %v249_v54 = vadd.f32 %v1175_v16, %v248_v49  ;;  %v392_v55 = vadd.f32 %v1175_v16, %v391_v50  ;;  %v212_v45 = vld [vmem:[%s1103_s22 + $0xc0] sm:$0xf] }
  0xd5   : > { %v816_v56 = vmax.f32 %v480_v46, %v791_v53  ;;  %v313_v57 = vmax.f32 %v249_v54, 0.0  ;;  %v456_v58 = vmax.f32 %v392_v55, 0.0  ;;  %295 = vmatmul.f32.gmra.mxu0 %v209_v51  ;;  %438 = vmatmul.f32.gmra.mxu1 %v945_v52  ;;  %v948_v46 = vld [vmem:[%s1103_s22 + $0x188] sm:$0xf] }
  0xd6   : > { %v559_v59 = vpop.f32.mrf.mxu2  ;;  %v702_v60 = vpop.f32.mrf.mxu3 }
  0xd7   : > { %841 = vst [vmem:[%s1195_s29 + $0x20] sm:$0xff] %v816_v56  ;;  %v560_v61 = vadd.f32 %v1175_v16, %v559_v59  ;;  %v703_v62 = vadd.f32 %v1175_v16, %v702_v60  ;;  %v481_v1 = vmax.f32 %v313_v57, %v456_v58 }
  0xd9   : > { %v624_v2 = vmax.f32 %v560_v61, 0.0  ;;  %v767_v3 = vmax.f32 %v703_v62, 0.0 }
  0xda   : > { %v251_v4 = vpop.f32.mrf.mxu0  ;;  %v394_v5 = vpop.f32.mrf.mxu1 }
  0xdb   : > { %v792_v8 = vmax.f32 %v624_v2, %v767_v3  ;;  %609 = vmatmul.f32.gmra.mxu2 %v971_v63  ;;  %752 = vmatmul.f32.gmra.mxu3 %v996_v0  ;;  %v252_v9 = vadd.f32 %v1175_v16, %v251_v4  ;;  %v395_v10 = vadd.f32 %v1175_v16, %v394_v5 }
  0xdd   : > { %v817_v11 = vmax.f32 %v481_v1, %v792_v8  ;;  %v314_v12 = vmax.f32 %v252_v9, 0.0  ;;  %v457_v13 = vmax.f32 %v395_v10, 0.0  ;;  %298 = vmatmul.f32.gmra.mxu0 %v210_v6  ;;  %441 = vmatmul.f32.gmra.mxu1 %v946_v7 }
  0xde   : > { %v562_v14 = vpop.f32.mrf.mxu2  ;;  %v705_v15 = vpop.f32.mrf.mxu3 }
  0xdf   : > { %842 = vst [vmem:[%s1195_s29 + $0x28] sm:$0xff] %v817_v11  ;;  %v563_v17 = vadd.f32 %v1175_v16, %v562_v14  ;;  %v706_v18 = vadd.f32 %v1175_v16, %v705_v15  ;;  %v482_v21 = vmax.f32 %v314_v12, %v457_v13 }
  0xe1   : > { %v625_v22 = vmax.f32 %v563_v17, 0.0  ;;  %v768_v23 = vmax.f32 %v706_v18, 0.0 }
  0xe2   : > { %v254_v24 = vpop.f32.mrf.mxu0  ;;  %v397_v25 = vpop.f32.mrf.mxu1 }
  0xe3   : > { %v793_v28 = vmax.f32 %v625_v22, %v768_v23  ;;  %612 = vmatmul.f32.gmra.mxu2 %v972_v19  ;;  %755 = vmatmul.f32.gmra.mxu3 %v997_v20  ;;  %v255_v29 = vadd.f32 %v1175_v16, %v254_v24  ;;  %v398_v30 = vadd.f32 %v1175_v16, %v397_v25 }
  0xe5   : > { %v818_v31 = vmax.f32 %v482_v21, %v793_v28  ;;  %v315_v32 = vmax.f32 %v255_v29, 0.0  ;;  %v458_v33 = vmax.f32 %v398_v30, 0.0  ;;  %301 = vmatmul.f32.gmra.mxu0 %v211_v26  ;;  %444 = vmatmul.f32.gmra.mxu1 %v947_v27 }
  0xe6   : > { %v565_v34 = vpop.f32.mrf.mxu2  ;;  %v708_v35 = vpop.f32.mrf.mxu3 }
  0xe7   : > { %843 = vst [vmem:[%s1195_s29 + $0x30] sm:$0xff] %v818_v31  ;;  %v566_v36 = vadd.f32 %v1175_v16, %v565_v34  ;;  %v709_v37 = vadd.f32 %v1175_v16, %v708_v35  ;;  %v483_v40 = vmax.f32 %v315_v32, %v458_v33 }
  0xe9   : > { %v626_v41 = vmax.f32 %v566_v36, 0.0  ;;  %v769_v42 = vmax.f32 %v709_v37, 0.0 }
  0xea   : > { %v257_v43 = vpop.f32.mrf.mxu0  ;;  %v400_v44 = vpop.f32.mrf.mxu1 }
  0xeb   : > { %v794_v47 = vmax.f32 %v626_v41, %v769_v42  ;;  %615 = vmatmul.f32.gmra.mxu2 %v973_v38  ;;  %758 = vmatmul.f32.gmra.mxu3 %v998_v39  ;;  %v258_v48 = vadd.f32 %v1175_v16, %v257_v43  ;;  %v401_v49 = vadd.f32 %v1175_v16, %v400_v44 }
  0xed   : > { %v819_v50 = vmax.f32 %v483_v40, %v794_v47  ;;  %v316_v51 = vmax.f32 %v258_v48, 0.0  ;;  %v459_v52 = vmax.f32 %v401_v49, 0.0  ;;  %304 = vmatmul.f32.gmra.mxu0 %v212_v45  ;;  %447 = vmatmul.f32.gmra.mxu1 %v948_v46 }
  0xee   : > { %v568_v53 = vpop.f32.mrf.mxu2  ;;  %v711_v54 = vpop.f32.mrf.mxu3 }
  0xef   : > { %844 = vst [vmem:[%s1195_s29 + $0x38] sm:$0xff] %v819_v50  ;;  %v569_v55 = vadd.f32 %v1175_v16, %v568_v53  ;;  %v712_v56 = vadd.f32 %v1175_v16, %v711_v54  ;;  %v484_v57 = vmax.f32 %v316_v51, %v459_v52 }
  0xf1   : > { %v627_v58 = vmax.f32 %v569_v55, 0.0  ;;  %v770_v59 = vmax.f32 %v712_v56, 0.0 }
  0xf2   : > { %v260_v60 = vpop.f32.mrf.mxu0  ;;  %v403_v61 = vpop.f32.mrf.mxu1 }
  0xf3   : > { %v795_v62 = vmax.f32 %v627_v58, %v770_v59  ;;  %v261_v63 = vadd.f32 %v1175_v16, %v260_v60  ;;  %v404_v0 = vadd.f32 %v1175_v16, %v403_v61 }
  0xf5   : > { %v820_v1 = vmax.f32 %v484_v57, %v795_v62  ;;  %v317_v2 = vmax.f32 %v261_v63, 0.0  ;;  %v460_v3 = vmax.f32 %v404_v0, 0.0 }
  0xf6   : > { %v571_v4 = vpop.f32.mrf.mxu2  ;;  %v714_v5 = vpop.f32.mrf.mxu3 }
  0xf7   : > { %845 = vst [vmem:[%s1195_s29 + $0x40] sm:$0xff] %v820_v1  ;;  %v572_v6 = vadd.f32 %v1175_v16, %v571_v4  ;;  %v715_v7 = vadd.f32 %v1175_v16, %v714_v5  ;;  %v485_v8 = vmax.f32 %v317_v2, %v460_v3 }
  0xf9   : > { %v628_v9 = vmax.f32 %v572_v6, 0.0  ;;  %v771_v10 = vmax.f32 %v715_v7, 0.0 }
  0xfa   : > { %v263_v11 = vpop.f32.mrf.mxu0  ;;  %v406_v12 = vpop.f32.mrf.mxu1 }
  0xfb   : > { %v796_v13 = vmax.f32 %v628_v9, %v771_v10  ;;  %v264_v14 = vadd.f32 %v1175_v16, %v263_v11  ;;  %v407_v15 = vadd.f32 %v1175_v16, %v406_v12 }
  0xfd   : > { %v821_v17 = vmax.f32 %v485_v8, %v796_v13  ;;  %v318_v18 = vmax.f32 %v264_v14, 0.0  ;;  %v461_v19 = vmax.f32 %v407_v15, 0.0 }
  0xfe   : > { %v574_v20 = vpop.f32.mrf.mxu2  ;;  %v717_v21 = vpop.f32.mrf.mxu3 }
  0xff   : > { %846 = vst [vmem:[%s1195_s29 + $0x48] sm:$0xff] %v821_v17  ;;  %v575_v22 = vadd.f32 %v1175_v16, %v574_v20  ;;  %v718_v23 = vadd.f32 %v1175_v16, %v717_v21  ;;  %v486_v24 = vmax.f32 %v318_v18, %v461_v19 }
 0x101   : > { %v629_v25 = vmax.f32 %v575_v22, 0.0  ;;  %v772_v26 = vmax.f32 %v718_v23, 0.0 }
 0x102   : > { %v266_v27 = vpop.f32.mrf.mxu0  ;;  %v409_v28 = vpop.f32.mrf.mxu1 }
 0x103   : > { %v797_v29 = vmax.f32 %v629_v25, %v772_v26  ;;  %v267_v30 = vadd.f32 %v1175_v16, %v266_v27  ;;  %v410_v31 = vadd.f32 %v1175_v16, %v409_v28 }
 0x105   : > { %v822_v32 = vmax.f32 %v486_v24, %v797_v29  ;;  %v319_v33 = vmax.f32 %v267_v30, 0.0  ;;  %v462_v34 = vmax.f32 %v410_v31, 0.0 }
 0x106   : > { %v577_v35 = vpop.f32.mrf.mxu2  ;;  %v720_v36 = vpop.f32.mrf.mxu3 }
 0x107   : > { %847 = vst [vmem:[%s1195_s29 + $0x50] sm:$0xff] %v822_v32  ;;  %v578_v37 = vadd.f32 %v1175_v16, %v577_v35  ;;  %v721_v38 = vadd.f32 %v1175_v16, %v720_v36  ;;  %v487_v39 = vmax.f32 %v319_v33, %v462_v34 }
 0x109   : > { %v630_v40 = vmax.f32 %v578_v37, 0.0  ;;  %v773_v41 = vmax.f32 %v721_v38, 0.0 }
 0x10a   : > { %v269_v42 = vpop.f32.mrf.mxu0  ;;  %v412_v43 = vpop.f32.mrf.mxu1 }
 0x10b   : > { %v798_v44 = vmax.f32 %v630_v40, %v773_v41  ;;  %v270_v45 = vadd.f32 %v1175_v16, %v269_v42  ;;  %v413_v46 = vadd.f32 %v1175_v16, %v412_v43 }
 0x10d   : > { %v823_v47 = vmax.f32 %v487_v39, %v798_v44  ;;  %v320_v48 = vmax.f32 %v270_v45, 0.0  ;;  %v463_v49 = vmax.f32 %v413_v46, 0.0 }
 0x10e   : > { %v580_v50 = vpop.f32.mrf.mxu2  ;;  %v723_v51 = vpop.f32.mrf.mxu3 }
 0x10f   : > { %848 = vst [vmem:[%s1195_s29 + $0x58] sm:$0xff] %v823_v47  ;;  %v581_v52 = vadd.f32 %v1175_v16, %v580_v50  ;;  %v724_v53 = vadd.f32 %v1175_v16, %v723_v51  ;;  %v488_v54 = vmax.f32 %v320_v48, %v463_v49 }
 0x111   : > { %v631_v55 = vmax.f32 %v581_v52, 0.0  ;;  %v774_v56 = vmax.f32 %v724_v53, 0.0 }
 0x112   : > { %v272_v57 = vpop.f32.mrf.mxu0  ;;  %v415_v58 = vpop.f32.mrf.mxu1 }
 0x113   : > { %v799_v59 = vmax.f32 %v631_v55, %v774_v56  ;;  %v273_v60 = vadd.f32 %v1175_v16, %v272_v57  ;;  %v416_v61 = vadd.f32 %v1175_v16, %v415_v58 }
 0x115   : > { %v824_v62 = vmax.f32 %v488_v54, %v799_v59  ;;  %v321_v63 = vmax.f32 %v273_v60, 0.0  ;;  %v464_v0 = vmax.f32 %v416_v61, 0.0 }
 0x116   : > { %v583_v1 = vpop.f32.mrf.mxu2  ;;  %v726_v2 = vpop.f32.mrf.mxu3 }
 0x117   : > { %849 = vst [vmem:[%s1195_s29 + $0x60] sm:$0xff] %v824_v62  ;;  %v584_v3 = vadd.f32 %v1175_v16, %v583_v1  ;;  %v727_v4 = vadd.f32 %v1175_v16, %v726_v2  ;;  %v489_v5 = vmax.f32 %v321_v63, %v464_v0 }
 0x119   : > { %v632_v6 = vmax.f32 %v584_v3, 0.0  ;;  %v775_v7 = vmax.f32 %v727_v4, 0.0 }
 0x11a   : > { %v275_v8 = vpop.f32.mrf.mxu0  ;;  %v418_v9 = vpop.f32.mrf.mxu1 }
 0x11b   : > { %v800_v10 = vmax.f32 %v632_v6, %v775_v7  ;;  %v276_v11 = vadd.f32 %v1175_v16, %v275_v8  ;;  %v419_v12 = vadd.f32 %v1175_v16, %v418_v9 }
 0x11d   : > { %v825_v13 = vmax.f32 %v489_v5, %v800_v10  ;;  %v322_v14 = vmax.f32 %v276_v11, 0.0  ;;  %v465_v15 = vmax.f32 %v419_v12, 0.0 }
 0x11e   : > { %v586_v17 = vpop.f32.mrf.mxu2  ;;  %v729_v18 = vpop.f32.mrf.mxu3 }
 0x11f   : > { %850 = vst [vmem:[%s1195_s29 + $0x68] sm:$0xff] %v825_v13  ;;  %v587_v19 = vadd.f32 %v1175_v16, %v586_v17  ;;  %v730_v20 = vadd.f32 %v1175_v16, %v729_v18  ;;  %v490_v21 = vmax.f32 %v322_v14, %v465_v15 }
 0x121   : > { %v633_v22 = vmax.f32 %v587_v19, 0.0  ;;  %v776_v23 = vmax.f32 %v730_v20, 0.0 }
 0x122   : > { %v278_v24 = vpop.f32.mrf.mxu0  ;;  %v421_v25 = vpop.f32.mrf.mxu1 }
 0x123   : > { %v801_v26 = vmax.f32 %v633_v22, %v776_v23  ;;  %v279_v27 = vadd.f32 %v1175_v16, %v278_v24  ;;  %v422_v28 = vadd.f32 %v1175_v16, %v421_v25 }
 0x125   : > { %v826_v29 = vmax.f32 %v490_v21, %v801_v26  ;;  %v323_v30 = vmax.f32 %v279_v27, 0.0  ;;  %v466_v31 = vmax.f32 %v422_v28, 0.0 }
 0x126   : > { %v589_v32 = vpop.f32.mrf.mxu2  ;;  %v732_v33 = vpop.f32.mrf.mxu3 }
 0x127   : > { %851 = vst [vmem:[%s1195_s29 + $0x70] sm:$0xff] %v826_v29  ;;  %v590_v34 = vadd.f32 %v1175_v16, %v589_v32  ;;  %v733_v35 = vadd.f32 %v1175_v16, %v732_v33  ;;  %v491_v36 = vmax.f32 %v323_v30, %v466_v31 }
 0x129   : > { %v634_v37 = vmax.f32 %v590_v34, 0.0  ;;  %v777_v38 = vmax.f32 %v733_v35, 0.0 }
 0x12a   : > { %v281_v39 = vpop.f32.mrf.mxu0  ;;  %v424_v40 = vpop.f32.mrf.mxu1 }
 0x12b   : > { %v802_v41 = vmax.f32 %v634_v37, %v777_v38  ;;  %v282_v42 = vadd.f32 %v1175_v16, %v281_v39  ;;  %v425_v43 = vadd.f32 %v1175_v16, %v424_v40 }
 0x12d   : > { %v827_v44 = vmax.f32 %v491_v36, %v802_v41  ;;  %v324_v45 = vmax.f32 %v282_v42, 0.0  ;;  %v467_v46 = vmax.f32 %v425_v43, 0.0 }
 0x12e   : > { %v592_v47 = vpop.f32.mrf.mxu2  ;;  %v735_v48 = vpop.f32.mrf.mxu3 }
 0x12f   : > { %852 = vst [vmem:[%s1195_s29 + $0x78] sm:$0xff] %v827_v44  ;;  %v593_v49 = vadd.f32 %v1175_v16, %v592_v47  ;;  %v736_v50 = vadd.f32 %v1175_v16, %v735_v48  ;;  %v492_v51 = vmax.f32 %v324_v45, %v467_v46 }
 0x131   : > { %v635_v52 = vmax.f32 %v593_v49, 0.0  ;;  %v778_v53 = vmax.f32 %v736_v50, 0.0 }
 0x132   : > { %v284_v54 = vpop.f32.mrf.mxu0  ;;  %v427_v55 = vpop.f32.mrf.mxu1 }
 0x133   : > { %v803_v56 = vmax.f32 %v635_v52, %v778_v53  ;;  %v285_v57 = vadd.f32 %v1175_v16, %v284_v54  ;;  %v428_v58 = vadd.f32 %v1175_v16, %v427_v55 }
 0x135   : > { %v828_v59 = vmax.f32 %v492_v51, %v803_v56  ;;  %v325_v60 = vmax.f32 %v285_v57, 0.0  ;;  %v468_v61 = vmax.f32 %v428_v58, 0.0 }
 0x136   : > { %v595_v62 = vpop.f32.mrf.mxu2  ;;  %v738_v63 = vpop.f32.mrf.mxu3 }
 0x137   : > { %853 = vst [vmem:[%s1195_s29 + $0x80] sm:$0xff] %v828_v59  ;;  %v596_v0 = vadd.f32 %v1175_v16, %v595_v62  ;;  %v739_v1 = vadd.f32 %v1175_v16, %v738_v63  ;;  %v493_v2 = vmax.f32 %v325_v60, %v468_v61 }
 0x139   : > { %v636_v3 = vmax.f32 %v596_v0, 0.0  ;;  %v779_v4 = vmax.f32 %v739_v1, 0.0 }
 0x13a   : > { %v287_v5 = vpop.f32.mrf.mxu0  ;;  %v430_v6 = vpop.f32.mrf.mxu1 }
 0x13b   : > { %v804_v7 = vmax.f32 %v636_v3, %v779_v4  ;;  %v288_v8 = vadd.f32 %v1175_v16, %v287_v5  ;;  %v431_v9 = vadd.f32 %v1175_v16, %v430_v6 }
 0x13d   : > { %v829_v10 = vmax.f32 %v493_v2, %v804_v7  ;;  %v326_v11 = vmax.f32 %v288_v8, 0.0  ;;  %v469_v12 = vmax.f32 %v431_v9, 0.0 }
 0x13e   : > { %v598_v13 = vpop.f32.mrf.mxu2  ;;  %v741_v14 = vpop.f32.mrf.mxu3 }
 0x13f   : > { %854 = vst [vmem:[%s1195_s29 + $0x88] sm:$0xff] %v829_v10  ;;  %v599_v15 = vadd.f32 %v1175_v16, %v598_v13  ;;  %v742_v17 = vadd.f32 %v1175_v16, %v741_v14  ;;  %v494_v18 = vmax.f32 %v326_v11, %v469_v12 }
 0x141   : > { %v637_v19 = vmax.f32 %v599_v15, 0.0  ;;  %v780_v20 = vmax.f32 %v742_v17, 0.0 }
 0x142   : > { %v290_v21 = vpop.f32.mrf.mxu0  ;;  %v433_v22 = vpop.f32.mrf.mxu1 }
 0x143   : > { %v805_v23 = vmax.f32 %v637_v19, %v780_v20  ;;  %v291_v24 = vadd.f32 %v1175_v16, %v290_v21  ;;  %v434_v25 = vadd.f32 %v1175_v16, %v433_v22 }
 0x145   : > { %v830_v26 = vmax.f32 %v494_v18, %v805_v23  ;;  %v327_v27 = vmax.f32 %v291_v24, 0.0  ;;  %v470_v28 = vmax.f32 %v434_v25, 0.0 }
 0x146   : > { %v601_v29 = vpop.f32.mrf.mxu2  ;;  %v744_v30 = vpop.f32.mrf.mxu3 }
 0x147   : > { %855 = vst [vmem:[%s1195_s29 + $0x90] sm:$0xff] %v830_v26  ;;  %v602_v31 = vadd.f32 %v1175_v16, %v601_v29  ;;  %v745_v32 = vadd.f32 %v1175_v16, %v744_v30  ;;  %v495_v33 = vmax.f32 %v327_v27, %v470_v28 }
 0x149   : > { %v638_v34 = vmax.f32 %v602_v31, 0.0  ;;  %v781_v35 = vmax.f32 %v745_v32, 0.0 }
 0x14a   : > { %v293_v36 = vpop.f32.mrf.mxu0  ;;  %v436_v37 = vpop.f32.mrf.mxu1 }
 0x14b   : > { %v806_v38 = vmax.f32 %v638_v34, %v781_v35  ;;  %v294_v39 = vadd.f32 %v1175_v16, %v293_v36  ;;  %v437_v40 = vadd.f32 %v1175_v16, %v436_v37 }
 0x14d   : > { %v831_v41 = vmax.f32 %v495_v33, %v806_v38  ;;  %v328_v42 = vmax.f32 %v294_v39, 0.0  ;;  %v471_v43 = vmax.f32 %v437_v40, 0.0 }
 0x14e   : > { %v604_v44 = vpop.f32.mrf.mxu2  ;;  %v747_v45 = vpop.f32.mrf.mxu3 }
 0x14f   : > { %856 = vst [vmem:[%s1195_s29 + $0x98] sm:$0xff] %v831_v41  ;;  %v605_v46 = vadd.f32 %v1175_v16, %v604_v44  ;;  %v748_v47 = vadd.f32 %v1175_v16, %v747_v45  ;;  %v496_v48 = vmax.f32 %v328_v42, %v471_v43 }
 0x151   : > { %v639_v49 = vmax.f32 %v605_v46, 0.0  ;;  %v782_v50 = vmax.f32 %v748_v47, 0.0 }
 0x152   : > { %v296_v51 = vpop.f32.mrf.mxu0  ;;  %v439_v52 = vpop.f32.mrf.mxu1 }
 0x153   : > { %v807_v53 = vmax.f32 %v639_v49, %v782_v50  ;;  %v297_v54 = vadd.f32 %v1175_v16, %v296_v51  ;;  %v440_v55 = vadd.f32 %v1175_v16, %v439_v52 }
 0x155   : > { %v832_v56 = vmax.f32 %v496_v48, %v807_v53  ;;  %v329_v57 = vmax.f32 %v297_v54, 0.0  ;;  %v472_v58 = vmax.f32 %v440_v55, 0.0 }
 0x156   : > { %v607_v59 = vpop.f32.mrf.mxu2  ;;  %v750_v60 = vpop.f32.mrf.mxu3 }
 0x157   : > { %857 = vst [vmem:[%s1195_s29 + $0xa0] sm:$0xff] %v832_v56  ;;  %v608_v61 = vadd.f32 %v1175_v16, %v607_v59  ;;  %v751_v62 = vadd.f32 %v1175_v16, %v750_v60  ;;  %v497_v63 = vmax.f32 %v329_v57, %v472_v58 }
 0x159   : > { %v640_v0 = vmax.f32 %v608_v61, 0.0  ;;  %v783_v1 = vmax.f32 %v751_v62, 0.0 }
 0x15a   : > { %v299_v2 = vpop.f32.mrf.mxu0  ;;  %v442_v3 = vpop.f32.mrf.mxu1 }
 0x15b   : > { %v808_v4 = vmax.f32 %v640_v0, %v783_v1  ;;  %v300_v5 = vadd.f32 %v1175_v16, %v299_v2  ;;  %v443_v6 = vadd.f32 %v1175_v16, %v442_v3 }
 0x15d   : > { %v833_v7 = vmax.f32 %v497_v63, %v808_v4  ;;  %v330_v8 = vmax.f32 %v300_v5, 0.0  ;;  %v473_v9 = vmax.f32 %v443_v6, 0.0 }
 0x15e   : > { %v610_v10 = vpop.f32.mrf.mxu2  ;;  %v753_v11 = vpop.f32.mrf.mxu3 }
 0x15f   : > { %858 = vst [vmem:[%s1195_s29 + $0xa8] sm:$0xff] %v833_v7  ;;  %v611_v12 = vadd.f32 %v1175_v16, %v610_v10  ;;  %v754_v13 = vadd.f32 %v1175_v16, %v753_v11  ;;  %v498_v14 = vmax.f32 %v330_v8, %v473_v9 }
 0x161   : > { %v641_v15 = vmax.f32 %v611_v12, 0.0  ;;  %v784_v17 = vmax.f32 %v754_v13, 0.0 }
 0x162   : > { %v302_v18 = vpop.f32.mrf.mxu0  ;;  %v445_v19 = vpop.f32.mrf.mxu1 }
 0x163   : > { %v809_v20 = vmax.f32 %v641_v15, %v784_v17  ;;  %v303_v21 = vadd.f32 %v1175_v16, %v302_v18  ;;  %v446_v22 = vadd.f32 %v1175_v16, %v445_v19 }
 0x165   : > { %v834_v23 = vmax.f32 %v498_v14, %v809_v20  ;;  %v331_v24 = vmax.f32 %v303_v21, 0.0  ;;  %v474_v25 = vmax.f32 %v446_v22, 0.0 }
 0x166   : > { %v613_v26 = vpop.f32.mrf.mxu2  ;;  %v756_v27 = vpop.f32.mrf.mxu3 }
 0x167   : > { %859 = vst [vmem:[%s1195_s29 + $0xb0] sm:$0xff] %v834_v23  ;;  %v614_v28 = vadd.f32 %v1175_v16, %v613_v26  ;;  %v757_v29 = vadd.f32 %v1175_v16, %v756_v27  ;;  %v499_v30 = vmax.f32 %v331_v24, %v474_v25 }
 0x169   : > { %v642_v31 = vmax.f32 %v614_v28, 0.0  ;;  %v785_v32 = vmax.f32 %v757_v29, 0.0 }
 0x16a   : > { %v305_v33 = vpop.f32.mrf.mxu0  ;;  %v448_v34 = vpop.f32.mrf.mxu1 }
 0x16b   : > { %v810_v35 = vmax.f32 %v642_v31, %v785_v32  ;;  %v306_v36 = vadd.f32 %v1175_v16, %v305_v33  ;;  %v449_v37 = vadd.f32 %v1175_v16, %v448_v34 }
 0x16d   : > { %v835_v38 = vmax.f32 %v499_v30, %v810_v35  ;;  %v332_v39 = vmax.f32 %v306_v36, 0.0  ;;  %v475_v40 = vmax.f32 %v449_v37, 0.0 }
 0x16e   : > { %v616_v41 = vpop.f32.mrf.mxu2  ;;  %v759_v42 = vpop.f32.mrf.mxu3 }
 0x16f   : > { %860 = vst [vmem:[%s1195_s29 + $0xb8] sm:$0xff] %v835_v38  ;;  %v617_v43 = vadd.f32 %v1175_v16, %v616_v41  ;;  %v760_v44 = vadd.f32 %v1175_v16, %v759_v42  ;;  %v500_v45 = vmax.f32 %v332_v39, %v475_v40 }
 0x171   : > { %v643_v46 = vmax.f32 %v617_v43, 0.0  ;;  %v786_v47 = vmax.f32 %v760_v44, 0.0 }
 0x173   : > { %v811_v48 = vmax.f32 %v643_v46, %v786_v47 }
 0x175   : > { %v836_v49 = vmax.f32 %v500_v45, %v811_v48 }
 0x177   : > { %861 = vst [vmem:[%s1195_s29 + $0xc0] sm:$0xf] %v836_v49 }
 0x178 PF: > { %s13_s12 = sadd.s32 1, %s1018_s12  }
 0x179   : > { %p10_p4 = scmp.ge.s32.totalorder %s13_s12, 4  }
 0x17b   :  { %12 = sbr.rel (!%p10_p4) target bundleno = 1 (0x1), region = 65 }

// kernel: net_forward.5
= control target key start
LH: loop header
LB: loop body
LE: loop exit
PB: predicated region body
PF: predicated region fallthrough
CT: control target
= control target key end

     0   :  { %s2547_s0 = inlined_call_operand.vmem [shape: f32[2,3200], index: 0, kind: input, shape index: {}]   ;;  %s2548_s1 = inlined_call_operand.vmem [shape: f32[3200,128], index: 1, kind: input, shape index: {}]   ;;  %s2549_s2 = inlined_call_operand.vmem [shape: f32[1,128], index: 2, kind: input, shape index: {}]   ;;  %s2550_s3 = inlined_call_operand.vmem [shape: f32[128,128], index: 3, kind: input, shape index: {}]   ;;  %s2551_s4 = inlined_call_operand.vmem [shape: f32[1,128], index: 4, kind: input, shape index: {}]   ;;  %s2552_s5 = inlined_call_operand.vmem [shape: f32[128,128], index: 5, kind: input, shape index: {}]   ;;  %s2553_s6 = inlined_call_operand.vmem [shape: f32[1,128], index: 6, kind: input, shape index: {}]   ;;  %s2554_s7 = inlined_call_operand.hbm [shape: f32[2,128], index: 7, kind: output, shape index: {}]  }
   0x1   :  { %v49_v0 = vld [vmem:[%s2548_s1 + $0x78] sm:$0xff]  ;;  %v48_v2 = vld [vmem:[%s2548_s1 + $0x70] sm:$0xff]  ;;  %v47_v6 = vld [vmem:[%s2548_s1 + $0x68] sm:$0xff] }
   0x2   :  { %v81_v1 = vld [vmem:[%s2548_s1 + $0x178] sm:$0xff]  ;;  %503 = vmatpush.msra.mxu0 %v49_v0  ;;  %v80_v4 = vld [vmem:[%s2548_s1 + $0x170] sm:$0xff]  ;;  %v79_v8 = vld [vmem:[%s2548_s1 + $0x168] sm:$0xff] }
   0x3   :  { %543 = vmatpush.msra.mxu2 %v81_v1  ;;  %v65_v3 = vld [vmem:[%s2548_s1 + $0xf8] sm:$0xff]  ;;  %v64_v7 = vld [vmem:[%s2548_s1 + $0xf0] sm:$0xff]  ;;  %v63_v10 = vld [vmem:[%s2548_s1 + $0xe8] sm:$0xff] }
   0x4   :  { %v97_v5 = vld [vmem:[%s2548_s1 + $0x1f8] sm:$0xff]  ;;  %523 = vmatpush.msra.mxu1 %v65_v3  ;;  %504 = vmatpush.msra.mxu0 %v48_v2  ;;  %v96_v9 = vld [vmem:[%s2548_s1 + $0x1f0] sm:$0xff]  ;;  %v46_v11 = vld [vmem:[%s2548_s1 + $0x60] sm:$0xff] }
   0x5   :  { %563 = vmatpush.msra.mxu3 %v97_v5  ;;  %544 = vmatpush.msra.mxu2 %v80_v4  ;;  %v78_v12 = vld [vmem:[%s2548_s1 + $0x160] sm:$0xff]  ;;  %v95_v13 = vld [vmem:[%s2548_s1 + $0x1e8] sm:$0xff]  ;;  %v45_v16 = vld [vmem:[%s2548_s1 + $0x58] sm:$0xff] }
   0x6   :  { %524 = vmatpush.msra.mxu1 %v64_v7  ;;  %505 = vmatpush.msra.mxu0 %v47_v6  ;;  %v62_v14 = vld [vmem:[%s2548_s1 + $0xe0] sm:$0xff]  ;;  %v77_v17 = vld [vmem:[%s2548_s1 + $0x158] sm:$0xff]  ;;  %v44_v20 = vld [vmem:[%s2548_s1 + $0x50] sm:$0xff] }
   0x7   :  { %564 = vmatpush.msra.mxu3 %v96_v9  ;;  %545 = vmatpush.msra.mxu2 %v79_v8  ;;  %v94_v15 = vld [vmem:[%s2548_s1 + $0x1e0] sm:$0xff]  ;;  %v61_v18 = vld [vmem:[%s2548_s1 + $0xd8] sm:$0xff]  ;;  %v76_v21 = vld [vmem:[%s2548_s1 + $0x150] sm:$0xff] }
   0x8   :  { %525 = vmatpush.msra.mxu1 %v63_v10  ;;  %506 = vmatpush.msra.mxu0 %v46_v11  ;;  %v93_v19 = vld [vmem:[%s2548_s1 + $0x1d8] sm:$0xff]  ;;  %v60_v22 = vld [vmem:[%s2548_s1 + $0xd0] sm:$0xff]  ;;  %v43_v24 = vld [vmem:[%s2548_s1 + $0x48] sm:$0xff] }
   0x9   :  { %565 = vmatpush.msra.mxu3 %v95_v13  ;;  %546 = vmatpush.msra.mxu2 %v78_v12  ;;  %v92_v23 = vld [vmem:[%s2548_s1 + $0x1d0] sm:$0xff]  ;;  %v75_v25 = vld [vmem:[%s2548_s1 + $0x148] sm:$0xff]  ;;  %v42_v28 = vld [vmem:[%s2548_s1 + $0x40] sm:$0xff] }
   0xa   :  { %526 = vmatpush.msra.mxu1 %v62_v14  ;;  %507 = vmatpush.msra.mxu0 %v45_v16  ;;  %v59_v26 = vld [vmem:[%s2548_s1 + $0xc8] sm:$0xff]  ;;  %v74_v29 = vld [vmem:[%s2548_s1 + $0x140] sm:$0xff]  ;;  %v41_v32 = vld [vmem:[%s2548_s1 + $0x38] sm:$0xff] }
   0xb   :  { %566 = vmatpush.msra.mxu3 %v94_v15  ;;  %547 = vmatpush.msra.mxu2 %v77_v17  ;;  %v91_v27 = vld [vmem:[%s2548_s1 + $0x1c8] sm:$0xff]  ;;  %v58_v30 = vld [vmem:[%s2548_s1 + $0xc0] sm:$0xff]  ;;  %v73_v33 = vld [vmem:[%s2548_s1 + $0x138] sm:$0xff] }
   0xc   :  { %527 = vmatpush.msra.mxu1 %v61_v18  ;;  %508 = vmatpush.msra.mxu0 %v44_v20  ;;  %v90_v31 = vld [vmem:[%s2548_s1 + $0x1c0] sm:$0xff]  ;;  %v57_v34 = vld [vmem:[%s2548_s1 + $0xb8] sm:$0xff]  ;;  %v40_v36 = vld [vmem:[%s2548_s1 + $0x30] sm:$0xff] }
   0xd   :  { %567 = vmatpush.msra.mxu3 %v93_v19  ;;  %548 = vmatpush.msra.mxu2 %v76_v21  ;;  %v89_v35 = vld [vmem:[%s2548_s1 + $0x1b8] sm:$0xff]  ;;  %v72_v37 = vld [vmem:[%s2548_s1 + $0x130] sm:$0xff]  ;;  %v39_v40 = vld [vmem:[%s2548_s1 + $0x28] sm:$0xff] }
   0xe   :  { %528 = vmatpush.msra.mxu1 %v60_v22  ;;  %509 = vmatpush.msra.mxu0 %v43_v24  ;;  %v56_v38 = vld [vmem:[%s2548_s1 + $0xb0] sm:$0xff]  ;;  %v71_v41 = vld [vmem:[%s2548_s1 + $0x128] sm:$0xff]  ;;  %v38_v44 = vld [vmem:[%s2548_s1 + $0x20] sm:$0xff] }
   0xf   :  { %568 = vmatpush.msra.mxu3 %v92_v23  ;;  %549 = vmatpush.msra.mxu2 %v75_v25  ;;  %v88_v39 = vld [vmem:[%s2548_s1 + $0x1b0] sm:$0xff]  ;;  %v55_v42 = vld [vmem:[%s2548_s1 + $0xa8] sm:$0xff]  ;;  %v70_v45 = vld [vmem:[%s2548_s1 + $0x120] sm:$0xff] }
  0x10   :  { %529 = vmatpush.msra.mxu1 %v59_v26  ;;  %510 = vmatpush.msra.mxu0 %v42_v28  ;;  %v87_v43 = vld [vmem:[%s2548_s1 + $0x1a8] sm:$0xff]  ;;  %v54_v46 = vld [vmem:[%s2548_s1 + $0xa0] sm:$0xff]  ;;  %v37_v48 = vld [vmem:[%s2548_s1 + $0x18] sm:$0xff] }
  0x11   :  { %569 = vmatpush.msra.mxu3 %v91_v27  ;;  %550 = vmatpush.msra.mxu2 %v74_v29  ;;  %v86_v47 = vld [vmem:[%s2548_s1 + $0x1a0] sm:$0xff]  ;;  %v69_v49 = vld [vmem:[%s2548_s1 + $0x118] sm:$0xff]  ;;  %v36_v52 = vld [vmem:[%s2548_s1 + $0x10] sm:$0xff] }
  0x12   :  { %530 = vmatpush.msra.mxu1 %v58_v30  ;;  %511 = vmatpush.msra.mxu0 %v41_v32  ;;  %v53_v50 = vld [vmem:[%s2548_s1 + $0x98] sm:$0xff]  ;;  %v68_v53 = vld [vmem:[%s2548_s1 + $0x110] sm:$0xff]  ;;  %v35_v56 = vld [vmem:[%s2548_s1 + $0x8] sm:$0xff] }
  0x13   :  { %570 = vmatpush.msra.mxu3 %v90_v31  ;;  %551 = vmatpush.msra.mxu2 %v73_v33  ;;  %v85_v51 = vld [vmem:[%s2548_s1 + $0x198] sm:$0xff]  ;;  %v52_v54 = vld [vmem:[%s2548_s1 + $0x90] sm:$0xff]  ;;  %v67_v57 = vld [vmem:[%s2548_s1 + $0x108] sm:$0xff] }
  0x14   :  { %531 = vmatpush.msra.mxu1 %v57_v34  ;;  %512 = vmatpush.msra.mxu0 %v40_v36  ;;  %v84_v55 = vld [vmem:[%s2548_s1 + $0x190] sm:$0xff]  ;;  %v51_v58 = vld [vmem:[%s2548_s1 + $0x88] sm:$0xff]  ;;  %v34_v60 = vld [vmem:[%s2548_s1] sm:$0xff] }
  0x15   :  { %571 = vmatpush.msra.mxu3 %v89_v35  ;;  %552 = vmatpush.msra.mxu2 %v72_v37  ;;  %v83_v59 = vld [vmem:[%s2548_s1 + $0x188] sm:$0xff]  ;;  %v66_v61 = vld [vmem:[%s2548_s1 + $0x100] sm:$0xff]  ;;  %v113_v62 = vld [vmem:[%s2548_s1 + $0x278] sm:$0xff] }
  0x16   :  { %532 = vmatpush.msra.mxu1 %v56_v38  ;;  %513 = vmatpush.msra.mxu0 %v39_v40  ;;  %v145_v63 = vld [vmem:[%s2548_s1 + $0x378] sm:$0xff]  ;;  %v50_v0 = vld [vmem:[%s2548_s1 + $0x80] sm:$0xff]  ;;  %v112_v2 = vld [vmem:[%s2548_s1 + $0x270] sm:$0xff] }
  0x17   :  { %572 = vmatpush.msra.mxu3 %v88_v39  ;;  %553 = vmatpush.msra.mxu2 %v71_v41  ;;  %v82_v1 = vld [vmem:[%s2548_s1 + $0x180] sm:$0xff]  ;;  %v129_v3 = vld [vmem:[%s2548_s1 + $0x2f8] sm:$0xff]  ;;  %v144_v4 = vld [vmem:[%s2548_s1 + $0x370] sm:$0xff] }
  0x18   :  { %533 = vmatpush.msra.mxu1 %v55_v42  ;;  %514 = vmatpush.msra.mxu0 %v38_v44  ;;  %v161_v5 = vld [vmem:[%s2548_s1 + $0x3f8] sm:$0xff]  ;;  %v111_v6 = vld [vmem:[%s2548_s1 + $0x268] sm:$0xff]  ;;  %v128_v7 = vld [vmem:[%s2548_s1 + $0x2f0] sm:$0xff] }
  0x19   :  { %573 = vmatpush.msra.mxu3 %v87_v43  ;;  %554 = vmatpush.msra.mxu2 %v70_v45  ;;  %v143_v8 = vld [vmem:[%s2548_s1 + $0x368] sm:$0xff]  ;;  %v160_v9 = vld [vmem:[%s2548_s1 + $0x3f0] sm:$0xff]  ;;  %v110_v10 = vld [vmem:[%s2548_s1 + $0x260] sm:$0xff] }
  0x1a   :  { %534 = vmatpush.msra.mxu1 %v54_v46  ;;  %515 = vmatpush.msra.mxu0 %v37_v48  ;;  %v127_v11 = vld [vmem:[%s2548_s1 + $0x2e8] sm:$0xff]  ;;  %v142_v12 = vld [vmem:[%s2548_s1 + $0x360] sm:$0xff]  ;;  %v109_v14 = vld [vmem:[%s2548_s1 + $0x258] sm:$0xff] }
  0x1b   :  { %574 = vmatpush.msra.mxu3 %v86_v47  ;;  %555 = vmatpush.msra.mxu2 %v69_v49  ;;  %v159_v13 = vld [vmem:[%s2548_s1 + $0x3e8] sm:$0xff]  ;;  %v126_v15 = vld [vmem:[%s2548_s1 + $0x2e0] sm:$0xff]  ;;  %v141_v16 = vld [vmem:[%s2548_s1 + $0x358] sm:$0xff] }
  0x1c   :  { %535 = vmatpush.msra.mxu1 %v53_v50  ;;  %516 = vmatpush.msra.mxu0 %v36_v52  ;;  %v158_v17 = vld [vmem:[%s2548_s1 + $0x3e0] sm:$0xff]  ;;  %v108_v18 = vld [vmem:[%s2548_s1 + $0x250] sm:$0xff]  ;;  %v125_v19 = vld [vmem:[%s2548_s1 + $0x2d8] sm:$0xff] }
  0x1d   :  { %575 = vmatpush.msra.mxu3 %v85_v51  ;;  %556 = vmatpush.msra.mxu2 %v68_v53  ;;  %v140_v20 = vld [vmem:[%s2548_s1 + $0x350] sm:$0xff]  ;;  %v157_v21 = vld [vmem:[%s2548_s1 + $0x3d8] sm:$0xff]  ;;  %v27_v22 = vld [vmem:[%s2547_s0] sm:$0xff] }
  0x1e   :  { %536 = vmatpush.msra.mxu1 %v52_v54  ;;  %517 = vmatpush.msra.mxu0 %v35_v56  ;;  %v107_v23 = vld [vmem:[%s2548_s1 + $0x248] sm:$0xff]  ;;  %v124_v24 = vld [vmem:[%s2548_s1 + $0x2d0] sm:$0xff]  ;;  %445 = vst [vmem:[#allocation1] ss:$4 sm:$0xff] %v27_v22  ;;  %v106_v27 = vld [vmem:[%s2548_s1 + $0x240] sm:$0xff] }
  0x1f   :  { %576 = vmatpush.msra.mxu3 %v84_v55  ;;  %557 = vmatpush.msra.mxu2 %v67_v57  ;;  %v139_v25 = vld [vmem:[%s2548_s1 + $0x348] sm:$0xff]  ;;  %v156_v26 = vld [vmem:[%s2548_s1 + $0x3d0] sm:$0xff]  ;;  %v138_v29 = vld [vmem:[%s2548_s1 + $0x340] sm:$0xff] }
  0x20   :  { %537 = vmatpush.msra.mxu1 %v51_v58  ;;  %518 = vmatpush.msra.mxu0 %v34_v60  ;;  %v123_v28 = vld [vmem:[%s2548_s1 + $0x2c8] sm:$0xff]  ;;  %v105_v31 = vld [vmem:[%s2548_s1 + $0x238] sm:$0xff]  ;;  %v122_v32 = vld [vmem:[%s2548_s1 + $0x2c0] sm:$0xff] }
  0x21   :  { %577 = vmatpush.msra.mxu3 %v83_v59  ;;  %558 = vmatpush.msra.mxu2 %v66_v61  ;;  %v155_v30 = vld [vmem:[%s2548_s1 + $0x3c8] sm:$0xff]  ;;  %v137_v33 = vld [vmem:[%s2548_s1 + $0x338] sm:$0xff]  ;;  %v154_v34 = vld [vmem:[%s2548_s1 + $0x3c0] sm:$0xff] }
  0x22   :  { %583 = vmatpush.msrb.mxu0 %v113_v62  ;;  %538 = vmatpush.msra.mxu1 %v50_v0  ;;  %v104_v35 = vld [vmem:[%s2548_s1 + $0x230] sm:$0xff]  ;;  %v121_v36 = vld [vmem:[%s2548_s1 + $0x2b8] sm:$0xff]  ;;  %v28_v39 = vld [vmem:[%s2547_s0 + $0x8] sm:$0xff] }
  0x23   :  { %623 = vmatpush.msrb.mxu2 %v145_v63  ;;  %578 = vmatpush.msra.mxu3 %v82_v1  ;;  %v136_v37 = vld [vmem:[%s2548_s1 + $0x330] sm:$0xff]  ;;  %v153_v38 = vld [vmem:[%s2548_s1 + $0x3b8] sm:$0xff]  ;;  %v103_v40 = vld [vmem:[%s2548_s1 + $0x228] sm:$0xff]  ;;  %447 = vst [vmem:[#allocation1 + $0x20] ss:$4 sm:$0xff] %v28_v39 }
  0x24   :  { %584 = vmatpush.msrb.mxu0 %v112_v2  ;;  %603 = vmatpush.msrb.mxu1 %v129_v3  ;;  %v120_v41 = vld [vmem:[%s2548_s1 + $0x2b0] sm:$0xff]  ;;  %v135_v43 = vld [vmem:[%s2548_s1 + $0x328] sm:$0xff]  ;;  %v102_v49 = vld [vmem:[%s2548_s1 + $0x220] sm:$0xff] }
  0x25   :  { %624 = vmatpush.msrb.mxu2 %v144_v4  ;;  %643 = vmatpush.msrb.mxu3 %v161_v5  ;;  %v29_v42 = vld [vmem:[%s2547_s0 + $0x10] sm:$0xff]  ;;  %v1497_v45 = vld.sshfl [vmem:[#allocation1] sm:$0xff pattern:$0x73625140]  ;;  %v119_v50 = vld [vmem:[%s2548_s1 + $0x2a8] sm:$0xff] }
  0x26   :  { %585 = vmatpush.msrb.mxu0 %v111_v6  ;;  %604 = vmatpush.msrb.mxu1 %v128_v7  ;;  %v450_v44 = vld.sshfl [vmem:[#allocation1 + $0x10] sm:$0xff pattern:$0x73625140]  ;;  %v1499_v46 = vld.sshfl [vmem:[#allocation1 + $0x18] sm:$0xff pattern:$0x73625140] }
  0x27   :  { %625 = vmatpush.msrb.mxu2 %v143_v8  ;;  %644 = vmatpush.msrb.mxu3 %v160_v9  ;;  %v1501_v47 = vld.sshfl [vmem:[#allocation1 + $0x8] sm:$0xff pattern:$0x73625140]  ;;  %v152_v48 = vld [vmem:[%s2548_s1 + $0x3b0] sm:$0xff]  ;;  %v134_v51 = vld [vmem:[%s2548_s1 + $0x320] sm:$0xff] }
  0x28   :  { %586 = vmatpush.msrb.mxu0 %v110_v10  ;;  %605 = vmatpush.msrb.mxu1 %v127_v11  ;;  %456 = vst [vmem:[#allocation1] ss:$4 sm:$0xff] %v29_v42  ;;  %v151_v52 = vld [vmem:[%s2548_s1 + $0x3a8] sm:$0xff]  ;;  %v101_v53 = vld [vmem:[%s2548_s1 + $0x218] sm:$0xff]  ;;  %v118_v54 = vld [vmem:[%s2548_s1 + $0x2a0] sm:$0xff] }
  0x29   :  { %626 = vmatpush.msrb.mxu2 %v142_v12  ;;  %645 = vmatpush.msrb.mxu3 %v159_v13  ;;  %v133_v55 = vld [vmem:[%s2548_s1 + $0x318] sm:$0xff]  ;;  %v150_v56 = vld [vmem:[%s2548_s1 + $0x3a0] sm:$0xff]  ;;  %v100_v57 = vld [vmem:[%s2548_s1 + $0x210] sm:$0xff] }
  0x2a   :  { %587 = vmatpush.msrb.mxu0 %v109_v14  ;;  %606 = vmatpush.msrb.mxu1 %v126_v15  ;;  %v117_v58 = vld [vmem:[%s2548_s1 + $0x298] sm:$0xff]  ;;  %v1539_v60 = vld.sshfl [vmem:[#allocation1 + $0x30] sm:$0xff pattern:$0x73625140]  ;;  %v99_v2 = vld [vmem:[%s2548_s1 + $0x208] sm:$0xff] }
  0x2b   :  { %627 = vmatpush.msrb.mxu2 %v141_v16  ;;  %646 = vmatpush.msrb.mxu3 %v158_v17  ;;  %v30_v59 = vld [vmem:[%s2547_s0 + $0x18] sm:$0xff]  ;;  %v1541_v61 = vld.sshfl [vmem:[#allocation1 + $0x20] sm:$0xff pattern:$0x73625140]  ;;  %v132_v0 = vld [vmem:[%s2548_s1 + $0x310] sm:$0xff] }
  0x2c   :  { %588 = vmatpush.msrb.mxu0 %v108_v18  ;;  %607 = vmatpush.msrb.mxu1 %v125_v19  ;;  %v1543_v62 = vld.sshfl [vmem:[#allocation1 + $0x38] sm:$0xff pattern:$0x73625140]  ;;  %v1545_v63 = vld.sshfl [vmem:[#allocation1 + $0x28] sm:$0xff pattern:$0x73625140] }
  0x2d   :  { %628 = vmatpush.msrb.mxu2 %v140_v20  ;;  %647 = vmatpush.msrb.mxu3 %v157_v21  ;;  %v149_v1 = vld [vmem:[%s2548_s1 + $0x398] sm:$0xff]  ;;  %457 = vst [vmem:[#allocation1 + $0x20] ss:$4 sm:$0xff] %v30_v59  ;;  %v116_v3 = vld [vmem:[%s2548_s1 + $0x290] sm:$0xff]  ;;  %v131_v4 = vld [vmem:[%s2548_s1 + $0x308] sm:$0xff] }
  0x2e   :  { %589 = vmatpush.msrb.mxu0 %v107_v23  ;;  %608 = vmatpush.msrb.mxu1 %v124_v24  ;;  %v148_v5 = vld [vmem:[%s2548_s1 + $0x390] sm:$0xff]  ;;  %v98_v6 = vld [vmem:[%s2548_s1 + $0x200] sm:$0xff]  ;;  %v115_v7 = vld [vmem:[%s2548_s1 + $0x288] sm:$0xff] }
  0x2f   :  { %629 = vmatpush.msrb.mxu2 %v139_v25  ;;  %648 = vmatpush.msrb.mxu3 %v156_v26  ;;  %v130_v8 = vld [vmem:[%s2548_s1 + $0x300] sm:$0xff]  ;;  %v147_v9 = vld [vmem:[%s2548_s1 + $0x388] sm:$0xff]  ;;  %v177_v10 = vld [vmem:[%s2548_s1 + $0x478] sm:$0xff] }
  0x30   :  { %590 = vmatpush.msrb.mxu0 %v106_v27  ;;  %609 = vmatpush.msrb.mxu1 %v123_v28  ;;  %v209_v11 = vld [vmem:[%s2548_s1 + $0x578] sm:$0xff]  ;;  %v114_v12 = vld [vmem:[%s2548_s1 + $0x280] sm:$0xff]  ;;  %v176_v14 = vld [vmem:[%s2548_s1 + $0x470] sm:$0xff] }
  0x31   :  { %630 = vmatpush.msrb.mxu2 %v138_v29  ;;  %649 = vmatpush.msrb.mxu3 %v155_v30  ;;  %v146_v13 = vld [vmem:[%s2548_s1 + $0x380] sm:$0xff]  ;;  %v193_v15 = vld [vmem:[%s2548_s1 + $0x4f8] sm:$0xff]  ;;  %v208_v16 = vld [vmem:[%s2548_s1 + $0x570] sm:$0xff] }
  0x32   :  { %591 = vmatpush.msrb.mxu0 %v105_v31  ;;  %610 = vmatpush.msrb.mxu1 %v122_v32  ;;  %v225_v17 = vld [vmem:[%s2548_s1 + $0x5f8] sm:$0xff]  ;;  %v175_v18 = vld [vmem:[%s2548_s1 + $0x468] sm:$0xff]  ;;  %v192_v19 = vld [vmem:[%s2548_s1 + $0x4f0] sm:$0xff] }
  0x33   :  { %631 = vmatpush.msrb.mxu2 %v137_v33  ;;  %650 = vmatpush.msrb.mxu3 %v154_v34  ;;  %v207_v20 = vld [vmem:[%s2548_s1 + $0x568] sm:$0xff]  ;;  %v224_v21 = vld [vmem:[%s2548_s1 + $0x5f0] sm:$0xff]  ;;  %v174_v22 = vld [vmem:[%s2548_s1 + $0x460] sm:$0xff] }
  0x34   :  { %592 = vmatpush.msrb.mxu0 %v104_v35  ;;  %611 = vmatpush.msrb.mxu1 %v121_v36  ;;  %v191_v23 = vld [vmem:[%s2548_s1 + $0x4e8] sm:$0xff]  ;;  %v206_v24 = vld [vmem:[%s2548_s1 + $0x560] sm:$0xff]  ;;  %v1627_v26 = vld.sshfl [vmem:[#allocation1 + $0x10] sm:$0xff pattern:$0x73625140] }
  0x35   :  { %632 = vmatpush.msrb.mxu2 %v136_v37  ;;  %651 = vmatpush.msrb.mxu3 %v153_v38  ;;  %v1625_v25 = vld.sshfl [vmem:[#allocation1] sm:$0xff pattern:$0x73625140]  ;;  %v1629_v27 = vld.sshfl [vmem:[#allocation1 + $0x8] sm:$0xff pattern:$0x73625140] }
  0x36   :  { %593 = vmatpush.msrb.mxu0 %v103_v40  ;;  %612 = vmatpush.msrb.mxu1 %v120_v41  ;;  %v223_v28 = vld [vmem:[%s2548_s1 + $0x5e8] sm:$0xff]  ;;  %v31_v29 = vld [vmem:[%s2547_s0 + $0x20] sm:$0xff]  ;;  %v1637_v30 = vld.sshfl [vmem:[#allocation1 + $0x18] sm:$0xff pattern:$0x73625140] }
  0x37   :  { %633 = vmatpush.msrb.mxu2 %v135_v43  ;;  %652 = vmatpush.msrb.mxu3 %v152_v48  ;;  %v173_v31 = vld [vmem:[%s2548_s1 + $0x458] sm:$0xff]  ;;  %v190_v32 = vld [vmem:[%s2548_s1 + $0x4e0] sm:$0xff]  ;;  %466 = vst [vmem:[#allocation1] ss:$4 sm:$0xff] %v31_v29  ;;  %v172_v35 = vld [vmem:[%s2548_s1 + $0x450] sm:$0xff] }
  0x38   :  { %594 = vmatpush.msrb.mxu0 %v102_v49  ;;  %613 = vmatpush.msrb.mxu1 %v119_v50  ;;  %v205_v33 = vld [vmem:[%s2548_s1 + $0x558] sm:$0xff]  ;;  %v222_v34 = vld [vmem:[%s2548_s1 + $0x5e0] sm:$0xff] }
  0x39   :  { %634 = vmatpush.msrb.mxu2 %v134_v51  ;;  %653 = vmatpush.msrb.mxu3 %v151_v52  ;;  %v189_v36 = vld [vmem:[%s2548_s1 + $0x4d8] sm:$0xff] }
  0x3a   :  { %595 = vmatpush.msrb.mxu0 %v101_v53  ;;  %614 = vmatpush.msrb.mxu1 %v118_v54 }
  0x3b   :  { %635 = vmatpush.msrb.mxu2 %v133_v55  ;;  %654 = vmatpush.msrb.mxu3 %v150_v56 }
  0x3c   :  { %596 = vmatpush.msrb.mxu0 %v100_v57  ;;  %615 = vmatpush.msrb.mxu1 %v117_v58 }
  0x3d   :  { %636 = vmatpush.msrb.mxu2 %v132_v0  ;;  %655 = vmatpush.msrb.mxu3 %v149_v1 }
  0x3e   :  { %597 = vmatpush.msrb.mxu0 %v99_v2  ;;  %616 = vmatpush.msrb.mxu1 %v116_v3 }
  0x3f   :  { %637 = vmatpush.msrb.mxu2 %v131_v4  ;;  %656 = vmatpush.msrb.mxu3 %v148_v5 }
  0x40   :  { %559 = vmatmul.f32.vlgmr.msra.gmra.mxu2 %v450_v44  ;;  %598 = vmatpush.msrb.mxu0 %v98_v6 }
  0x41   :  { %617 = vmatpush.msrb.mxu1 %v115_v7  ;;  %638 = vmatpush.msrb.mxu2 %v130_v8 }
  0x42   :  { %657 = vmatpush.msrb.mxu3 %v147_v9  ;;  %519 = vmatmul.f32.vlgmr.msra.gmra.mxu0 %v1497_v45 }
  0x43   :  { %579 = vmatmul.f32.vlgmr.msra.gmra.mxu3 %v1499_v46  ;;  %663 = vmatpush.msra.mxu0 %v177_v10 }
  0x44   :  { %703 = vmatpush.msra.mxu2 %v209_v11  ;;  %618 = vmatpush.msrb.mxu1 %v114_v12 }
  0x45   :  { %658 = vmatpush.msrb.mxu3 %v146_v13  ;;  %539 = vmatmul.f32.vlgmr.msra.gmra.mxu1 %v1501_v47 }
  0x46   :  { %664 = vmatpush.msra.mxu0 %v176_v14  ;;  %683 = vmatpush.msra.mxu1 %v193_v15 }
  0x47   :  { %704 = vmatpush.msra.mxu2 %v208_v16  ;;  %723 = vmatpush.msra.mxu3 %v225_v17 }
  0x48   :  { %665 = vmatpush.msra.mxu0 %v175_v18  ;;  %684 = vmatpush.msra.mxu1 %v192_v19 }
  0x49   :  { %705 = vmatpush.msra.mxu2 %v207_v20  ;;  %724 = vmatpush.msra.mxu3 %v224_v21 }
  0x4a   :  { %639 = vmatmul.f32.vlgmr.msrb.gmra.mxu2 %v1539_v60  ;;  %666 = vmatpush.msra.mxu0 %v174_v22 }
  0x4b   :  { %685 = vmatpush.msra.mxu1 %v191_v23  ;;  %706 = vmatpush.msra.mxu2 %v206_v24 }
  0x4c   :  { %725 = vmatpush.msra.mxu3 %v223_v28  ;;  %599 = vmatmul.f32.vlgmr.msrb.gmra.mxu0 %v1541_v61 }
  0x4d   :  { %659 = vmatmul.f32.vlgmr.msrb.gmra.mxu3 %v1543_v62  ;;  %667 = vmatpush.msra.mxu0 %v173_v31 }
  0x4e   :  { %12 = vsyncpa [#allocation3], 0  ;;  %686 = vmatpush.msra.mxu1 %v190_v32  ;;  %707 = vmatpush.msra.mxu2 %v205_v33  ;;  %v204_v37 = vld [vmem:[%s2548_s1 + $0x550] sm:$0xff]  ;;  %v221_v38 = vld [vmem:[%s2548_s1 + $0x5d8] sm:$0xff]  ;;  %s1132_s21 = smov [#allocation2]   ;;  %s1093_s25 = sshll.u32 %s2554_s7, 4  ;;  %s1094_s25 = int_to_ptr.hbm [resolvable:$true] %s1093_s25 }
  0x4f   :  { %726 = vmatpush.msra.mxu3 %v222_v34  ;;  %619 = vmatmul.f32.vlgmr.msrb.gmra.mxu1 %v1545_v63  ;;  %v171_v39 = vld [vmem:[%s2548_s1 + $0x448] sm:$0xff]  ;;  %v188_v40 = vld [vmem:[%s2548_s1 + $0x4d0] sm:$0xff]  ;;  %v170_v43 = vld [vmem:[%s2548_s1 + $0x440] sm:$0xff]  ;;  %s1091_s22 = sshll.u32 %s1132_s21, 4  ;;  %s1092_s22 = int_to_ptr.vmem [resolvable:$true] %s1091_s22 }
  0x50   :  { %668 = vmatpush.msra.mxu0 %v172_v35  ;;  %687 = vmatpush.msra.mxu1 %v189_v36  ;;  %v203_v41 = vld [vmem:[%s2548_s1 + $0x548] sm:$0xff]  ;;  %v220_v42 = vld [vmem:[%s2548_s1 + $0x5d0] sm:$0xff]  ;;  %v202_v45 = vld [vmem:[%s2548_s1 + $0x540] sm:$0xff] }
  0x51   :  { %708 = vmatpush.msra.mxu2 %v204_v37  ;;  %727 = vmatpush.msra.mxu3 %v221_v38  ;;  %v187_v44 = vld [vmem:[%s2548_s1 + $0x4c8] sm:$0xff]  ;;  %v169_v47 = vld [vmem:[%s2548_s1 + $0x438] sm:$0xff]  ;;  %v186_v48 = vld [vmem:[%s2548_s1 + $0x4c0] sm:$0xff] }
  0x52   :  { %669 = vmatpush.msra.mxu0 %v171_v39  ;;  %688 = vmatpush.msra.mxu1 %v188_v40  ;;  %v219_v46 = vld [vmem:[%s2548_s1 + $0x5c8] sm:$0xff]  ;;  %v201_v49 = vld [vmem:[%s2548_s1 + $0x538] sm:$0xff]  ;;  %v218_v50 = vld [vmem:[%s2548_s1 + $0x5c0] sm:$0xff] }
  0x53   :  { %709 = vmatpush.msra.mxu2 %v203_v41  ;;  %728 = vmatpush.msra.mxu3 %v220_v42  ;;  %v168_v51 = vld [vmem:[%s2548_s1 + $0x430] sm:$0xff]  ;;  %v185_v52 = vld [vmem:[%s2548_s1 + $0x4b8] sm:$0xff]  ;;  %v167_v55 = vld [vmem:[%s2548_s1 + $0x428] sm:$0xff] }
  0x54   :  { %670 = vmatpush.msra.mxu0 %v170_v43  ;;  %689 = vmatpush.msra.mxu1 %v187_v44  ;;  %v200_v53 = vld [vmem:[%s2548_s1 + $0x530] sm:$0xff]  ;;  %v217_v54 = vld [vmem:[%s2548_s1 + $0x5b8] sm:$0xff]  ;;  %v199_v57 = vld [vmem:[%s2548_s1 + $0x528] sm:$0xff] }
  0x55   :  { %710 = vmatpush.msra.mxu2 %v202_v45  ;;  %729 = vmatpush.msra.mxu3 %v219_v46  ;;  %v184_v56 = vld [vmem:[%s2548_s1 + $0x4b0] sm:$0xff]  ;;  %v166_v59 = vld [vmem:[%s2548_s1 + $0x420] sm:$0xff]  ;;  %v183_v60 = vld [vmem:[%s2548_s1 + $0x4a8] sm:$0xff] }
  0x56   :  { %671 = vmatpush.msra.mxu0 %v169_v47  ;;  %690 = vmatpush.msra.mxu1 %v186_v48  ;;  %v216_v58 = vld [vmem:[%s2548_s1 + $0x5b0] sm:$0xff]  ;;  %v198_v61 = vld [vmem:[%s2548_s1 + $0x520] sm:$0xff]  ;;  %v215_v62 = vld [vmem:[%s2548_s1 + $0x5a8] sm:$0xff] }
  0x57   :  { %711 = vmatpush.msra.mxu2 %v201_v49  ;;  %730 = vmatpush.msra.mxu3 %v218_v50  ;;  %v165_v63 = vld [vmem:[%s2548_s1 + $0x418] sm:$0xff]  ;;  %v182_v0 = vld [vmem:[%s2548_s1 + $0x4a0] sm:$0xff]  ;;  %v164_v3 = vld [vmem:[%s2548_s1 + $0x410] sm:$0xff] }
  0x58   :  { %672 = vmatpush.msra.mxu0 %v168_v51  ;;  %691 = vmatpush.msra.mxu1 %v185_v52  ;;  %v197_v1 = vld [vmem:[%s2548_s1 + $0x518] sm:$0xff]  ;;  %v214_v2 = vld [vmem:[%s2548_s1 + $0x5a0] sm:$0xff]  ;;  %v196_v5 = vld [vmem:[%s2548_s1 + $0x510] sm:$0xff] }
  0x59   :  { %712 = vmatpush.msra.mxu2 %v200_v53  ;;  %731 = vmatpush.msra.mxu3 %v217_v54  ;;  %v181_v4 = vld [vmem:[%s2548_s1 + $0x498] sm:$0xff]  ;;  %v163_v7 = vld [vmem:[%s2548_s1 + $0x408] sm:$0xff]  ;;  %v180_v8 = vld [vmem:[%s2548_s1 + $0x490] sm:$0xff] }
  0x5a   :  { %673 = vmatpush.msra.mxu0 %v167_v55  ;;  %692 = vmatpush.msra.mxu1 %v184_v56  ;;  %v213_v6 = vld [vmem:[%s2548_s1 + $0x598] sm:$0xff]  ;;  %v195_v9 = vld [vmem:[%s2548_s1 + $0x508] sm:$0xff]  ;;  %v212_v10 = vld [vmem:[%s2548_s1 + $0x590] sm:$0xff] }
  0x5b   :  { %713 = vmatpush.msra.mxu2 %v199_v57  ;;  %732 = vmatpush.msra.mxu3 %v216_v58  ;;  %v162_v11 = vld [vmem:[%s2548_s1 + $0x400] sm:$0xff]  ;;  %v179_v12 = vld [vmem:[%s2548_s1 + $0x488] sm:$0xff]  ;;  %v241_v15 = vld [vmem:[%s2548_s1 + $0x678] sm:$0xff] }
  0x5c   :  { %674 = vmatpush.msra.mxu0 %v166_v59  ;;  %693 = vmatpush.msra.mxu1 %v183_v60  ;;  %v194_v13 = vld [vmem:[%s2548_s1 + $0x500] sm:$0xff]  ;;  %v211_v14 = vld [vmem:[%s2548_s1 + $0x588] sm:$0xff]  ;;  %v273_v16 = vld [vmem:[%s2548_s1 + $0x778] sm:$0xff] }
  0x5d   :  { %714 = vmatpush.msra.mxu2 %v198_v61  ;;  %733 = vmatpush.msra.mxu3 %v215_v62  ;;  %v178_v17 = vld [vmem:[%s2548_s1 + $0x480] sm:$0xff]  ;;  %v240_v19 = vld [vmem:[%s2548_s1 + $0x670] sm:$0xff]  ;;  %v257_v20 = vld [vmem:[%s2548_s1 + $0x6f8] sm:$0xff] }
  0x5e   :  { %675 = vmatpush.msra.mxu0 %v165_v63  ;;  %694 = vmatpush.msra.mxu1 %v182_v0  ;;  %v210_v18 = vld [vmem:[%s2548_s1 + $0x580] sm:$0xff]  ;;  %v272_v21 = vld [vmem:[%s2548_s1 + $0x770] sm:$0xff]  ;;  %v289_v22 = vld [vmem:[%s2548_s1 + $0x7f8] sm:$0xff] }
  0x5f   :  { %715 = vmatpush.msra.mxu2 %v197_v1  ;;  %734 = vmatpush.msra.mxu3 %v214_v2  ;;  %v239_v23 = vld [vmem:[%s2548_s1 + $0x668] sm:$0xff]  ;;  %v256_v24 = vld [vmem:[%s2548_s1 + $0x6f0] sm:$0xff]  ;;  %v238_v28 = vld [vmem:[%s2548_s1 + $0x660] sm:$0xff] }
  0x60   :  { %676 = vmatpush.msra.mxu0 %v164_v3  ;;  %695 = vmatpush.msra.mxu1 %v181_v4  ;;  %v1830_v29 = vld.sshfl [vmem:[#allocation1 + $0x20] sm:$0xff pattern:$0x73625140]  ;;  %v1832_v31 = vld.sshfl [vmem:[#allocation1 + $0x30] sm:$0xff pattern:$0x73625140] }
  0x61   :  { %716 = vmatpush.msra.mxu2 %v196_v5  ;;  %735 = vmatpush.msra.mxu3 %v213_v6  ;;  %v1834_v32 = vld.sshfl [vmem:[#allocation1 + $0x28] sm:$0xff pattern:$0x73625140]  ;;  %v1842_v33 = vld.sshfl [vmem:[#allocation1 + $0x38] sm:$0xff pattern:$0x73625140] }
  0x62   :  { %677 = vmatpush.msra.mxu0 %v163_v7  ;;  %696 = vmatpush.msra.mxu1 %v180_v8  ;;  %v270_v34 = vld [vmem:[%s2548_s1 + $0x760] sm:$0xff]  ;;  %v287_v35 = vld [vmem:[%s2548_s1 + $0x7e8] sm:$0xff]  ;;  %v237_v36 = vld [vmem:[%s2548_s1 + $0x658] sm:$0xff] }
  0x63   :  { %717 = vmatpush.msra.mxu2 %v195_v9  ;;  %736 = vmatpush.msra.mxu3 %v212_v10  ;;  %v254_v37 = vld [vmem:[%s2548_s1 + $0x6e0] sm:$0xff]  ;;  %v269_v38 = vld [vmem:[%s2548_s1 + $0x758] sm:$0xff]  ;;  %v236_v40 = vld [vmem:[%s2548_s1 + $0x650] sm:$0xff] }
  0x64   :  { %678 = vmatpush.msra.mxu0 %v162_v11  ;;  %697 = vmatpush.msra.mxu1 %v179_v12  ;;  %v286_v39 = vld [vmem:[%s2548_s1 + $0x7e0] sm:$0xff]  ;;  %v253_v41 = vld [vmem:[%s2548_s1 + $0x6d8] sm:$0xff]  ;;  %v268_v42 = vld [vmem:[%s2548_s1 + $0x750] sm:$0xff] }
  0x65   :  { %718 = vmatpush.msra.mxu2 %v194_v13  ;;  %737 = vmatpush.msra.mxu3 %v211_v14  ;;  %v285_v43 = vld [vmem:[%s2548_s1 + $0x7d8] sm:$0xff]  ;;  %v235_v44 = vld [vmem:[%s2548_s1 + $0x648] sm:$0xff]  ;;  %v252_v45 = vld [vmem:[%s2548_s1 + $0x6d0] sm:$0xff] }
  0x66   :  { %679 = vmatmul.f32.vlgmr.msra.gmra.mxu0 %v1625_v25  ;;  %719 = vmatmul.f32.vlgmr.msra.gmra.mxu2 %v1627_v26  ;;  %v271_v25 = vld [vmem:[%s2548_s1 + $0x768] sm:$0xff]  ;;  %v288_v26 = vld [vmem:[%s2548_s1 + $0x7f0] sm:$0xff]  ;;  %v234_v48 = vld [vmem:[%s2548_s1 + $0x640] sm:$0xff] }
  0x67   :  { %743 = vmatpush.msrb.mxu0 %v241_v15  ;;  %783 = vmatpush.msrb.mxu2 %v273_v16  ;;  %v267_v46 = vld [vmem:[%s2548_s1 + $0x748] sm:$0xff]  ;;  %v284_v47 = vld [vmem:[%s2548_s1 + $0x7d0] sm:$0xff]  ;;  %v266_v50 = vld [vmem:[%s2548_s1 + $0x740] sm:$0xff] }
  0x68   :  { %698 = vmatpush.msra.mxu1 %v178_v17  ;;  %738 = vmatpush.msra.mxu3 %v210_v18  ;;  %v251_v49 = vld [vmem:[%s2548_s1 + $0x6c8] sm:$0xff]  ;;  %v233_v52 = vld [vmem:[%s2548_s1 + $0x638] sm:$0xff]  ;;  %v250_v53 = vld [vmem:[%s2548_s1 + $0x6c0] sm:$0xff] }
  0x69   :  { %699 = vmatmul.f32.vlgmr.msra.gmra.mxu1 %v1629_v27  ;;  %739 = vmatmul.f32.vlgmr.msra.gmra.mxu3 %v1637_v30  ;;  %v255_v27 = vld [vmem:[%s2548_s1 + $0x6e8] sm:$0xff]  ;;  %v265_v54 = vld [vmem:[%s2548_s1 + $0x738] sm:$0xff]  ;;  %v282_v55 = vld [vmem:[%s2548_s1 + $0x7c0] sm:$0xff] }
  0x6a   :  { %744 = vmatpush.msrb.mxu0 %v240_v19  ;;  %763 = vmatpush.msrb.mxu1 %v257_v20  ;;  %v32_v30 = vld [vmem:[%s2547_s0 + $0x28] sm:$0xff]  ;;  %v232_v56 = vld [vmem:[%s2548_s1 + $0x630] sm:$0xff]  ;;  %v249_v57 = vld [vmem:[%s2548_s1 + $0x6b8] sm:$0xff] }
  0x6b   :  { %784 = vmatpush.msrb.mxu2 %v272_v21  ;;  %803 = vmatpush.msrb.mxu3 %v289_v22  ;;  %467 = vst [vmem:[#allocation1 + $0x20] ss:$4 sm:$0xff] %v32_v30  ;;  %v283_v51 = vld [vmem:[%s2548_s1 + $0x7c8] sm:$0xff]  ;;  %v264_v58 = vld [vmem:[%s2548_s1 + $0x730] sm:$0xff]  ;;  %v281_v59 = vld [vmem:[%s2548_s1 + $0x7b8] sm:$0xff] }
  0x6c   :  { %745 = vmatpush.msrb.mxu0 %v239_v23  ;;  %764 = vmatpush.msrb.mxu1 %v256_v24  ;;  %v231_v60 = vld [vmem:[%s2548_s1 + $0x628] sm:$0xff]  ;;  %v248_v61 = vld [vmem:[%s2548_s1 + $0x6b0] sm:$0xff]  ;;  %v230_v0 = vld [vmem:[%s2548_s1 + $0x620] sm:$0xff] }
  0x6d   :  { %785 = vmatpush.msrb.mxu2 %v271_v25  ;;  %804 = vmatpush.msrb.mxu3 %v288_v26  ;;  %v263_v62 = vld [vmem:[%s2548_s1 + $0x728] sm:$0xff]  ;;  %v280_v63 = vld [vmem:[%s2548_s1 + $0x7b0] sm:$0xff]  ;;  %v262_v2 = vld [vmem:[%s2548_s1 + $0x720] sm:$0xff] }
  0x6e   :  { %746 = vmatpush.msrb.mxu0 %v238_v28  ;;  %765 = vmatpush.msrb.mxu1 %v255_v27  ;;  %v247_v1 = vld [vmem:[%s2548_s1 + $0x6a8] sm:$0xff]  ;;  %v229_v4 = vld [vmem:[%s2548_s1 + $0x618] sm:$0xff]  ;;  %v246_v5 = vld [vmem:[%s2548_s1 + $0x6a0] sm:$0xff] }
  0x6f   :  { %786 = vmatpush.msrb.mxu2 %v270_v34  ;;  %805 = vmatpush.msrb.mxu3 %v287_v35  ;;  %v279_v3 = vld [vmem:[%s2548_s1 + $0x7a8] sm:$0xff]  ;;  %v261_v6 = vld [vmem:[%s2548_s1 + $0x718] sm:$0xff]  ;;  %v278_v7 = vld [vmem:[%s2548_s1 + $0x7a0] sm:$0xff] }
  0x70   :  { %747 = vmatpush.msrb.mxu0 %v237_v36  ;;  %766 = vmatpush.msrb.mxu1 %v254_v37  ;;  %v228_v8 = vld [vmem:[%s2548_s1 + $0x610] sm:$0xff]  ;;  %v245_v9 = vld [vmem:[%s2548_s1 + $0x698] sm:$0xff]  ;;  %v227_v12 = vld [vmem:[%s2548_s1 + $0x608] sm:$0xff] }
  0x71   :  { %787 = vmatpush.msrb.mxu2 %v269_v38  ;;  %806 = vmatpush.msrb.mxu3 %v286_v39  ;;  %v260_v10 = vld [vmem:[%s2548_s1 + $0x710] sm:$0xff]  ;;  %v277_v11 = vld [vmem:[%s2548_s1 + $0x798] sm:$0xff]  ;;  %v259_v14 = vld [vmem:[%s2548_s1 + $0x708] sm:$0xff] }
  0x72   :  { %748 = vmatpush.msrb.mxu0 %v236_v40  ;;  %767 = vmatpush.msrb.mxu1 %v253_v41  ;;  %v244_v13 = vld [vmem:[%s2548_s1 + $0x690] sm:$0xff]  ;;  %v226_v16 = vld [vmem:[%s2548_s1 + $0x600] sm:$0xff]  ;;  %v243_v17 = vld [vmem:[%s2548_s1 + $0x688] sm:$0xff] }
  0x73   :  { %788 = vmatpush.msrb.mxu2 %v268_v42  ;;  %807 = vmatpush.msrb.mxu3 %v285_v43  ;;  %v276_v15 = vld [vmem:[%s2548_s1 + $0x790] sm:$0xff]  ;;  %v258_v18 = vld [vmem:[%s2548_s1 + $0x700] sm:$0xff]  ;;  %v275_v19 = vld [vmem:[%s2548_s1 + $0x788] sm:$0xff] }
  0x74   :  { %749 = vmatpush.msrb.mxu0 %v235_v44  ;;  %768 = vmatpush.msrb.mxu1 %v252_v45  ;;  %v305_v20 = vld [vmem:[%s2548_s1 + $0x878] sm:$0xff]  ;;  %v242_v22 = vld [vmem:[%s2548_s1 + $0x680] sm:$0xff]  ;;  %v304_v24 = vld [vmem:[%s2548_s1 + $0x870] sm:$0xff] }
  0x75   :  { %789 = vmatpush.msrb.mxu2 %v267_v46  ;;  %808 = vmatpush.msrb.mxu3 %v284_v47  ;;  %v337_v21 = vld [vmem:[%s2548_s1 + $0x978] sm:$0xff]  ;;  %v274_v23 = vld [vmem:[%s2548_s1 + $0x780] sm:$0xff]  ;;  %v336_v26 = vld [vmem:[%s2548_s1 + $0x970] sm:$0xff] }
  0x76   :  { %750 = vmatpush.msrb.mxu0 %v234_v48  ;;  %769 = vmatpush.msrb.mxu1 %v251_v49  ;;  %v321_v25 = vld [vmem:[%s2548_s1 + $0x8f8] sm:$0xff]  ;;  %v335_v27 = vld [vmem:[%s2548_s1 + $0x968] sm:$0xff]  ;;  %v302_v30 = vld [vmem:[%s2548_s1 + $0x860] sm:$0xff] }
  0x77   :  { %790 = vmatpush.msrb.mxu2 %v266_v50  ;;  %809 = vmatpush.msrb.mxu3 %v283_v51  ;;  %v353_v28 = vld [vmem:[%s2548_s1 + $0x9f8] sm:$0xff]  ;;  %v334_v34 = vld [vmem:[%s2548_s1 + $0x960] sm:$0xff]  ;;  %v351_v35 = vld [vmem:[%s2548_s1 + $0x9e8] sm:$0xff] }
  0x78   :  { %751 = vmatpush.msrb.mxu0 %v233_v52  ;;  %770 = vmatpush.msrb.mxu1 %v250_v53  ;;  %v301_v36 = vld [vmem:[%s2548_s1 + $0x858] sm:$0xff]  ;;  %v318_v37 = vld [vmem:[%s2548_s1 + $0x8e0] sm:$0xff]  ;;  %v300_v40 = vld [vmem:[%s2548_s1 + $0x850] sm:$0xff] }
  0x79   :  { %791 = vmatpush.msrb.mxu2 %v265_v54  ;;  %810 = vmatpush.msrb.mxu3 %v282_v55  ;;  %v333_v38 = vld [vmem:[%s2548_s1 + $0x958] sm:$0xff]  ;;  %v350_v39 = vld [vmem:[%s2548_s1 + $0x9e0] sm:$0xff]  ;;  %v332_v42 = vld [vmem:[%s2548_s1 + $0x950] sm:$0xff] }
  0x7a   :  { %752 = vmatpush.msrb.mxu0 %v232_v56  ;;  %771 = vmatpush.msrb.mxu1 %v249_v57  ;;  %v317_v41 = vld [vmem:[%s2548_s1 + $0x8d8] sm:$0xff]  ;;  %v299_v44 = vld [vmem:[%s2548_s1 + $0x848] sm:$0xff]  ;;  %v316_v45 = vld [vmem:[%s2548_s1 + $0x8d0] sm:$0xff] }
  0x7b   :  { %792 = vmatpush.msrb.mxu2 %v264_v58  ;;  %811 = vmatpush.msrb.mxu3 %v281_v59  ;;  %v349_v43 = vld [vmem:[%s2548_s1 + $0x9d8] sm:$0xff]  ;;  %v331_v46 = vld [vmem:[%s2548_s1 + $0x948] sm:$0xff]  ;;  %v348_v47 = vld [vmem:[%s2548_s1 + $0x9d0] sm:$0xff] }
  0x7c   :  { %753 = vmatpush.msrb.mxu0 %v231_v60  ;;  %772 = vmatpush.msrb.mxu1 %v248_v61  ;;  %v298_v48 = vld [vmem:[%s2548_s1 + $0x840] sm:$0xff]  ;;  %v315_v49 = vld [vmem:[%s2548_s1 + $0x8c8] sm:$0xff]  ;;  %v297_v52 = vld [vmem:[%s2548_s1 + $0x838] sm:$0xff] }
  0x7d   :  { %793 = vmatpush.msrb.mxu2 %v263_v62  ;;  %812 = vmatpush.msrb.mxu3 %v280_v63  ;;  %v330_v50 = vld [vmem:[%s2548_s1 + $0x940] sm:$0xff]  ;;  %v347_v51 = vld [vmem:[%s2548_s1 + $0x9c8] sm:$0xff]  ;;  %v329_v54 = vld [vmem:[%s2548_s1 + $0x938] sm:$0xff] }
  0x7e   :  { %754 = vmatpush.msrb.mxu0 %v230_v0  ;;  %773 = vmatpush.msrb.mxu1 %v247_v1  ;;  %v314_v53 = vld [vmem:[%s2548_s1 + $0x8c0] sm:$0xff]  ;;  %v296_v56 = vld [vmem:[%s2548_s1 + $0x830] sm:$0xff]  ;;  %v313_v57 = vld [vmem:[%s2548_s1 + $0x8b8] sm:$0xff] }
  0x7f   :  { %794 = vmatpush.msrb.mxu2 %v262_v2  ;;  %813 = vmatpush.msrb.mxu3 %v279_v3  ;;  %v346_v55 = vld [vmem:[%s2548_s1 + $0x9c0] sm:$0xff]  ;;  %v328_v58 = vld [vmem:[%s2548_s1 + $0x930] sm:$0xff]  ;;  %v345_v59 = vld [vmem:[%s2548_s1 + $0x9b8] sm:$0xff] }
  0x80   :  { %755 = vmatpush.msrb.mxu0 %v229_v4  ;;  %774 = vmatpush.msrb.mxu1 %v246_v5  ;;  %v295_v60 = vld [vmem:[%s2548_s1 + $0x828] sm:$0xff]  ;;  %v312_v61 = vld [vmem:[%s2548_s1 + $0x8b0] sm:$0xff]  ;;  %v294_v0 = vld [vmem:[%s2548_s1 + $0x820] sm:$0xff] }
  0x81   :  { %795 = vmatpush.msrb.mxu2 %v261_v6  ;;  %814 = vmatpush.msrb.mxu3 %v278_v7  ;;  %v327_v62 = vld [vmem:[%s2548_s1 + $0x928] sm:$0xff]  ;;  %v344_v63 = vld [vmem:[%s2548_s1 + $0x9b0] sm:$0xff]  ;;  %v326_v2 = vld [vmem:[%s2548_s1 + $0x920] sm:$0xff] }
  0x82   :  { %756 = vmatpush.msrb.mxu0 %v228_v8  ;;  %775 = vmatpush.msrb.mxu1 %v245_v9  ;;  %v311_v1 = vld [vmem:[%s2548_s1 + $0x8a8] sm:$0xff]  ;;  %v293_v4 = vld [vmem:[%s2548_s1 + $0x818] sm:$0xff]  ;;  %v310_v5 = vld [vmem:[%s2548_s1 + $0x8a0] sm:$0xff] }
  0x83   :  { %796 = vmatpush.msrb.mxu2 %v260_v10  ;;  %815 = vmatpush.msrb.mxu3 %v277_v11  ;;  %v343_v3 = vld [vmem:[%s2548_s1 + $0x9a8] sm:$0xff]  ;;  %v325_v6 = vld [vmem:[%s2548_s1 + $0x918] sm:$0xff]  ;;  %v342_v7 = vld [vmem:[%s2548_s1 + $0x9a0] sm:$0xff] }
  0x84   :  { %757 = vmatpush.msrb.mxu0 %v227_v12  ;;  %776 = vmatpush.msrb.mxu1 %v244_v13  ;;  %v292_v8 = vld [vmem:[%s2548_s1 + $0x810] sm:$0xff]  ;;  %v309_v9 = vld [vmem:[%s2548_s1 + $0x898] sm:$0xff]  ;;  %v291_v12 = vld [vmem:[%s2548_s1 + $0x808] sm:$0xff] }
  0x85   :  { %797 = vmatpush.msrb.mxu2 %v259_v14  ;;  %816 = vmatpush.msrb.mxu3 %v276_v15  ;;  %v324_v10 = vld [vmem:[%s2548_s1 + $0x910] sm:$0xff]  ;;  %v341_v11 = vld [vmem:[%s2548_s1 + $0x998] sm:$0xff]  ;;  %v323_v14 = vld [vmem:[%s2548_s1 + $0x908] sm:$0xff] }
  0x86   :  { %758 = vmatpush.msrb.mxu0 %v226_v16  ;;  %777 = vmatpush.msrb.mxu1 %v243_v17  ;;  %v308_v13 = vld [vmem:[%s2548_s1 + $0x890] sm:$0xff]  ;;  %v290_v16 = vld [vmem:[%s2548_s1 + $0x800] sm:$0xff]  ;;  %v307_v17 = vld [vmem:[%s2548_s1 + $0x888] sm:$0xff] }
  0x87   :  { %798 = vmatpush.msrb.mxu2 %v258_v18  ;;  %817 = vmatpush.msrb.mxu3 %v275_v19  ;;  %v340_v15 = vld [vmem:[%s2548_s1 + $0x990] sm:$0xff]  ;;  %v322_v18 = vld [vmem:[%s2548_s1 + $0x900] sm:$0xff]  ;;  %v339_v19 = vld [vmem:[%s2548_s1 + $0x988] sm:$0xff] }
  0x88   :  { %759 = vmatmul.f32.vlgmr.msrb.gmra.mxu0 %v1830_v29  ;;  %799 = vmatmul.f32.vlgmr.msrb.gmra.mxu2 %v1832_v31  ;;  %v303_v29 = vld [vmem:[%s2548_s1 + $0x868] sm:$0xff]  ;;  %v320_v31 = vld [vmem:[%s2548_s1 + $0x8f0] sm:$0xff] }
  0x89   :  { %823 = vmatpush.msra.mxu0 %v305_v20  ;;  %863 = vmatpush.msra.mxu2 %v337_v21  ;;  %v468_v20 = vld.sshfl [vmem:[#allocation1] sm:$0xff pattern:$0x73625140]  ;;  %v470_v21 = vld.sshfl [vmem:[#allocation1 + $0x10] sm:$0xff pattern:$0x73625140] }
  0x8a   :  { %778 = vmatpush.msrb.mxu1 %v242_v22  ;;  %818 = vmatpush.msrb.mxu3 %v274_v23  ;;  %v369_v22 = vld [vmem:[%s2548_s1 + $0xa78] sm:$0xff] }
  0x8b   :  { %779 = vmatmul.f32.vlgmr.msrb.gmra.mxu1 %v1834_v32  ;;  %819 = vmatmul.f32.vlgmr.msrb.gmra.mxu3 %v1842_v33  ;;  %v352_v32 = vld [vmem:[%s2548_s1 + $0x9f0] sm:$0xff]  ;;  %v319_v33 = vld [vmem:[%s2548_s1 + $0x8e8] sm:$0xff]  ;;  %v401_v23 = vld [vmem:[%s2548_s1 + $0xb78] sm:$0xff] }
  0x8c   :  { %824 = vmatpush.msra.mxu0 %v304_v24  ;;  %843 = vmatpush.msra.mxu1 %v321_v25  ;;  %v306_v24 = vld [vmem:[%s2548_s1 + $0x880] sm:$0xff] }
  0x8d   :  { %864 = vmatpush.msra.mxu2 %v336_v26  ;;  %883 = vmatpush.msra.mxu3 %v353_v28  ;;  %v338_v25 = vld [vmem:[%s2548_s1 + $0x980] sm:$0xff]  ;;  %v469_v26 = vld.sshfl [vmem:[#allocation1 + $0x8] sm:$0xff pattern:$0x73625140] }
  0x8e   :  { %825 = vmatpush.msra.mxu0 %v303_v29  ;;  %844 = vmatpush.msra.mxu1 %v320_v31  ;;  %v471_v28 = vld.sshfl [vmem:[#allocation1 + $0x18] sm:$0xff pattern:$0x73625140]  ;;  %v368_v29 = vld [vmem:[%s2548_s1 + $0xa70] sm:$0xff] }
  0x8f   :  { %865 = vmatpush.msra.mxu2 %v335_v27  ;;  %884 = vmatpush.msra.mxu3 %v352_v32  ;;  %v385_v31 = vld [vmem:[%s2548_s1 + $0xaf8] sm:$0xff]  ;;  %v400_v27 = vld [vmem:[%s2548_s1 + $0xb70] sm:$0xff] }
  0x90   :  { %826 = vmatpush.msra.mxu0 %v302_v30  ;;  %845 = vmatpush.msra.mxu1 %v319_v33  ;;  %v417_v32 = vld [vmem:[%s2548_s1 + $0xbf8] sm:$0xff]  ;;  %v367_v30 = vld [vmem:[%s2548_s1 + $0xa68] sm:$0xff]  ;;  %v384_v33 = vld [vmem:[%s2548_s1 + $0xaf0] sm:$0xff] }
  0x91   :  { %866 = vmatpush.msra.mxu2 %v334_v34  ;;  %885 = vmatpush.msra.mxu3 %v351_v35  ;;  %v399_v34 = vld [vmem:[%s2548_s1 + $0xb68] sm:$0xff]  ;;  %v416_v35 = vld [vmem:[%s2548_s1 + $0xbf0] sm:$0xff] }
  0x92   :  { %827 = vmatpush.msra.mxu0 %v301_v36  ;;  %846 = vmatpush.msra.mxu1 %v318_v37  ;;  %v366_v36 = vld [vmem:[%s2548_s1 + $0xa60] sm:$0xff]  ;;  %v383_v37 = vld [vmem:[%s2548_s1 + $0xae8] sm:$0xff] }
  0x93   :  { %867 = vmatpush.msra.mxu2 %v333_v38  ;;  %886 = vmatpush.msra.mxu3 %v350_v39  ;;  %v398_v38 = vld [vmem:[%s2548_s1 + $0xb60] sm:$0xff]  ;;  %v415_v39 = vld [vmem:[%s2548_s1 + $0xbe8] sm:$0xff] }
  0x94   :  { %828 = vmatpush.msra.mxu0 %v300_v40  ;;  %847 = vmatpush.msra.mxu1 %v317_v41  ;;  %v365_v40 = vld [vmem:[%s2548_s1 + $0xa58] sm:$0xff]  ;;  %v382_v41 = vld [vmem:[%s2548_s1 + $0xae0] sm:$0xff] }
  0x95   :  { %868 = vmatpush.msra.mxu2 %v332_v42  ;;  %887 = vmatpush.msra.mxu3 %v349_v43  ;;  %v397_v42 = vld [vmem:[%s2548_s1 + $0xb58] sm:$0xff]  ;;  %v414_v43 = vld [vmem:[%s2548_s1 + $0xbe0] sm:$0xff] }
  0x96   :  { %829 = vmatpush.msra.mxu0 %v299_v44  ;;  %848 = vmatpush.msra.mxu1 %v316_v45  ;;  %v364_v44 = vld [vmem:[%s2548_s1 + $0xa50] sm:$0xff]  ;;  %v381_v45 = vld [vmem:[%s2548_s1 + $0xad8] sm:$0xff] }
  0x97   :  { %869 = vmatpush.msra.mxu2 %v331_v46  ;;  %888 = vmatpush.msra.mxu3 %v348_v47  ;;  %v396_v46 = vld [vmem:[%s2548_s1 + $0xb50] sm:$0xff]  ;;  %v413_v47 = vld [vmem:[%s2548_s1 + $0xbd8] sm:$0xff] }
  0x98   :  { %830 = vmatpush.msra.mxu0 %v298_v48  ;;  %849 = vmatpush.msra.mxu1 %v315_v49  ;;  %v363_v48 = vld [vmem:[%s2548_s1 + $0xa48] sm:$0xff]  ;;  %v380_v49 = vld [vmem:[%s2548_s1 + $0xad0] sm:$0xff] }
  0x99   :  { %870 = vmatpush.msra.mxu2 %v330_v50  ;;  %889 = vmatpush.msra.mxu3 %v347_v51  ;;  %v395_v50 = vld [vmem:[%s2548_s1 + $0xb48] sm:$0xff]  ;;  %v412_v51 = vld [vmem:[%s2548_s1 + $0xbd0] sm:$0xff] }
  0x9a   :  { %831 = vmatpush.msra.mxu0 %v297_v52  ;;  %850 = vmatpush.msra.mxu1 %v314_v53  ;;  %v362_v52 = vld [vmem:[%s2548_s1 + $0xa40] sm:$0xff]  ;;  %v379_v53 = vld [vmem:[%s2548_s1 + $0xac8] sm:$0xff] }
  0x9b   :  { %871 = vmatpush.msra.mxu2 %v329_v54  ;;  %890 = vmatpush.msra.mxu3 %v346_v55  ;;  %v394_v54 = vld [vmem:[%s2548_s1 + $0xb40] sm:$0xff]  ;;  %v411_v55 = vld [vmem:[%s2548_s1 + $0xbc8] sm:$0xff] }
  0x9c   :  { %832 = vmatpush.msra.mxu0 %v296_v56  ;;  %851 = vmatpush.msra.mxu1 %v313_v57  ;;  %v361_v56 = vld [vmem:[%s2548_s1 + $0xa38] sm:$0xff]  ;;  %v378_v57 = vld [vmem:[%s2548_s1 + $0xac0] sm:$0xff] }
  0x9d   :  { %872 = vmatpush.msra.mxu2 %v328_v58  ;;  %891 = vmatpush.msra.mxu3 %v345_v59  ;;  %v393_v58 = vld [vmem:[%s2548_s1 + $0xb38] sm:$0xff]  ;;  %v410_v59 = vld [vmem:[%s2548_s1 + $0xbc0] sm:$0xff] }
  0x9e   :  { %833 = vmatpush.msra.mxu0 %v295_v60  ;;  %852 = vmatpush.msra.mxu1 %v312_v61  ;;  %v360_v60 = vld [vmem:[%s2548_s1 + $0xa30] sm:$0xff]  ;;  %v377_v61 = vld [vmem:[%s2548_s1 + $0xab8] sm:$0xff] }
  0x9f   :  { %873 = vmatpush.msra.mxu2 %v327_v62  ;;  %892 = vmatpush.msra.mxu3 %v344_v63  ;;  %v392_v62 = vld [vmem:[%s2548_s1 + $0xb30] sm:$0xff]  ;;  %v409_v63 = vld [vmem:[%s2548_s1 + $0xbb8] sm:$0xff] }
  0xa0   :  { %834 = vmatpush.msra.mxu0 %v294_v0  ;;  %853 = vmatpush.msra.mxu1 %v311_v1  ;;  %v359_v0 = vld [vmem:[%s2548_s1 + $0xa28] sm:$0xff]  ;;  %v376_v1 = vld [vmem:[%s2548_s1 + $0xab0] sm:$0xff] }
  0xa1   :  { %874 = vmatpush.msra.mxu2 %v326_v2  ;;  %893 = vmatpush.msra.mxu3 %v343_v3  ;;  %v391_v2 = vld [vmem:[%s2548_s1 + $0xb28] sm:$0xff]  ;;  %v408_v3 = vld [vmem:[%s2548_s1 + $0xbb0] sm:$0xff] }
  0xa2   :  { %835 = vmatpush.msra.mxu0 %v293_v4  ;;  %854 = vmatpush.msra.mxu1 %v310_v5  ;;  %v358_v4 = vld [vmem:[%s2548_s1 + $0xa20] sm:$0xff]  ;;  %v375_v5 = vld [vmem:[%s2548_s1 + $0xaa8] sm:$0xff] }
  0xa3   :  { %875 = vmatpush.msra.mxu2 %v325_v6  ;;  %894 = vmatpush.msra.mxu3 %v342_v7  ;;  %v390_v6 = vld [vmem:[%s2548_s1 + $0xb20] sm:$0xff]  ;;  %v407_v7 = vld [vmem:[%s2548_s1 + $0xba8] sm:$0xff] }
  0xa4   :  { %836 = vmatpush.msra.mxu0 %v292_v8  ;;  %855 = vmatpush.msra.mxu1 %v309_v9  ;;  %v357_v8 = vld [vmem:[%s2548_s1 + $0xa18] sm:$0xff]  ;;  %v374_v9 = vld [vmem:[%s2548_s1 + $0xaa0] sm:$0xff] }
  0xa5   :  { %876 = vmatpush.msra.mxu2 %v324_v10  ;;  %895 = vmatpush.msra.mxu3 %v341_v11  ;;  %v389_v10 = vld [vmem:[%s2548_s1 + $0xb18] sm:$0xff]  ;;  %v406_v11 = vld [vmem:[%s2548_s1 + $0xba0] sm:$0xff] }
  0xa6   :  { %837 = vmatpush.msra.mxu0 %v291_v12  ;;  %856 = vmatpush.msra.mxu1 %v308_v13  ;;  %v356_v12 = vld [vmem:[%s2548_s1 + $0xa10] sm:$0xff]  ;;  %v373_v13 = vld [vmem:[%s2548_s1 + $0xa98] sm:$0xff] }
  0xa7   :  { %877 = vmatpush.msra.mxu2 %v323_v14  ;;  %896 = vmatpush.msra.mxu3 %v340_v15  ;;  %v33_v14 = vld [vmem:[%s2547_s0 + $0x30] sm:$0x3] }
  0xa8   :  { %838 = vmatpush.msra.mxu0 %v290_v16  ;;  %857 = vmatpush.msra.mxu1 %v307_v17  ;;  %v388_v15 = vld [vmem:[%s2548_s1 + $0xb10] sm:$0xff]  ;;  %v405_v16 = vld [vmem:[%s2548_s1 + $0xb98] sm:$0xff]  ;;  %476 = vst [vmem:[#allocation1] ss:$4 sm:$0xff] %v33_v14  ;;  %v355_v17 = vld [vmem:[%s2548_s1 + $0xa08] sm:$0xff] }
  0xa9   :  { %878 = vmatpush.msra.mxu2 %v322_v18  ;;  %897 = vmatpush.msra.mxu3 %v339_v19  ;;  %v372_v18 = vld [vmem:[%s2548_s1 + $0xa90] sm:$0xff]  ;;  %v387_v19 = vld [vmem:[%s2548_s1 + $0xb08] sm:$0xff] }
  0xaa   :  { %839 = vmatmul.f32.vlgmr.msra.gmra.mxu0 %v468_v20  ;;  %879 = vmatmul.f32.vlgmr.msra.gmra.mxu2 %v470_v21  ;;  %v404_v20 = vld [vmem:[%s2548_s1 + $0xb90] sm:$0xff]  ;;  %v354_v21 = vld [vmem:[%s2548_s1 + $0xa00] sm:$0xff] }
  0xab   :  { %903 = vmatpush.msrb.mxu0 %v369_v22  ;;  %943 = vmatpush.msrb.mxu2 %v401_v23  ;;  %v371_v22 = vld [vmem:[%s2548_s1 + $0xa88] sm:$0xff]  ;;  %v386_v23 = vld [vmem:[%s2548_s1 + $0xb00] sm:$0xff] }
  0xac   :  { %858 = vmatpush.msra.mxu1 %v306_v24  ;;  %898 = vmatpush.msra.mxu3 %v338_v25  ;;  %v403_v24 = vld [vmem:[%s2548_s1 + $0xb88] sm:$0xff]  ;;  %v472_v25 = vld.sshfl [vmem:[#allocation1 + $0x20] sm:$0xff pattern:$0x73625140] }
  0xad   :  { %859 = vmatmul.f32.vlgmr.msra.gmra.mxu1 %v469_v26  ;;  %899 = vmatmul.f32.vlgmr.msra.gmra.mxu3 %v471_v28  ;;  %v474_v26 = vld.sshfl [vmem:[#allocation1 + $0x30] sm:$0xff pattern:$0x73625140]  ;;  %v433_v28 = vld [vmem:[%s2548_s1 + $0xc78] sm:$0xff] }
  0xae   :  { %904 = vmatpush.msrb.mxu0 %v368_v29  ;;  %923 = vmatpush.msrb.mxu1 %v385_v31  ;;  %v370_v29 = vld [vmem:[%s2548_s1 + $0xa80] sm:$0xff] }
  0xaf   :  { %944 = vmatpush.msrb.mxu2 %v400_v27  ;;  %963 = vmatpush.msrb.mxu3 %v417_v32  ;;  %v402_v31 = vld [vmem:[%s2548_s1 + $0xb80] sm:$0xff]  ;;  %v473_v27 = vld.sshfl [vmem:[#allocation1 + $0x28] sm:$0xff pattern:$0x73625140] }
  0xb0   :  { %905 = vmatpush.msrb.mxu0 %v367_v30  ;;  %924 = vmatpush.msrb.mxu1 %v384_v33  ;;  %v475_v32 = vld.sshfl [vmem:[#allocation1 + $0x38] sm:$0xff pattern:$0x73625140]  ;;  %v432_v30 = vld [vmem:[%s2548_s1 + $0xc70] sm:$0xff]  ;;  %v431_v33 = vld [vmem:[%s2548_s1 + $0xc68] sm:$0xff] }
  0xb1   :  { %945 = vmatpush.msrb.mxu2 %v399_v34  ;;  %964 = vmatpush.msrb.mxu3 %v416_v35  ;;  %v430_v34 = vld [vmem:[%s2548_s1 + $0xc60] sm:$0xff]  ;;  %v429_v35 = vld [vmem:[%s2548_s1 + $0xc58] sm:$0xff] }
  0xb2   :  { %906 = vmatpush.msrb.mxu0 %v366_v36  ;;  %925 = vmatpush.msrb.mxu1 %v383_v37  ;;  %v428_v36 = vld [vmem:[%s2548_s1 + $0xc50] sm:$0xff]  ;;  %v427_v37 = vld [vmem:[%s2548_s1 + $0xc48] sm:$0xff] }
  0xb3   :  { %946 = vmatpush.msrb.mxu2 %v398_v38  ;;  %965 = vmatpush.msrb.mxu3 %v415_v39  ;;  %v426_v38 = vld [vmem:[%s2548_s1 + $0xc40] sm:$0xff]  ;;  %v425_v39 = vld [vmem:[%s2548_s1 + $0xc38] sm:$0xff] }
  0xb4   :  { %907 = vmatpush.msrb.mxu0 %v365_v40  ;;  %926 = vmatpush.msrb.mxu1 %v382_v41  ;;  %v424_v40 = vld [vmem:[%s2548_s1 + $0xc30] sm:$0xff]  ;;  %v423_v41 = vld [vmem:[%s2548_s1 + $0xc28] sm:$0xff] }
  0xb5   :  { %947 = vmatpush.msrb.mxu2 %v397_v42  ;;  %966 = vmatpush.msrb.mxu3 %v414_v43  ;;  %v422_v42 = vld [vmem:[%s2548_s1 + $0xc20] sm:$0xff]  ;;  %v421_v43 = vld [vmem:[%s2548_s1 + $0xc18] sm:$0xff] }
  0xb6   :  { %908 = vmatpush.msrb.mxu0 %v364_v44  ;;  %927 = vmatpush.msrb.mxu1 %v381_v45  ;;  %v420_v44 = vld [vmem:[%s2548_s1 + $0xc10] sm:$0xff]  ;;  %v419_v45 = vld [vmem:[%s2548_s1 + $0xc08] sm:$0xff] }
  0xb7   :  { %948 = vmatpush.msrb.mxu2 %v396_v46  ;;  %967 = vmatpush.msrb.mxu3 %v413_v47  ;;  %v418_v46 = vld [vmem:[%s2548_s1 + $0xc00] sm:$0xff] }
  0xb8   :  { %909 = vmatpush.msrb.mxu0 %v363_v48  ;;  %928 = vmatpush.msrb.mxu1 %v380_v49  ;;  %v477_v47 = vld.sshfl [vmem:[#allocation1] sm:$0xff pattern:$0x73625140] }
  0xb9   :  { %949 = vmatpush.msrb.mxu2 %v395_v50  ;;  %968 = vmatpush.msrb.mxu3 %v412_v51  ;;  %v1103_v48 = vld [vmem:[%s2549_s2] ss:$0 sm:$0xff] }
  0xba   :  { %910 = vmatpush.msrb.mxu0 %v362_v52  ;;  %929 = vmatpush.msrb.mxu1 %v379_v53 }
  0xbb   :  { %950 = vmatpush.msrb.mxu2 %v394_v54  ;;  %969 = vmatpush.msrb.mxu3 %v411_v55 }
  0xbc   :  { %911 = vmatpush.msrb.mxu0 %v361_v56  ;;  %930 = vmatpush.msrb.mxu1 %v378_v57 }
  0xbd   :  { %951 = vmatpush.msrb.mxu2 %v393_v58  ;;  %970 = vmatpush.msrb.mxu3 %v410_v59  ;;  %v1019_v59 = vld [vmem:[%s2550_s3 + $0x78] sm:$0xff] }
  0xbe   :  { %912 = vmatpush.msrb.mxu0 %v360_v60  ;;  %931 = vmatpush.msrb.mxu1 %v377_v61 }
  0xbf   :  { %952 = vmatpush.msrb.mxu2 %v392_v62  ;;  %971 = vmatpush.msrb.mxu3 %v409_v63  ;;  %v520_v49 = vpop.f32.mrf.mxu0  ;;  %v1018_v62 = vld [vmem:[%s2550_s3 + $0x70] sm:$0xff] }
  0xc0   :  { %913 = vmatpush.msrb.mxu0 %v359_v0  ;;  %932 = vmatpush.msrb.mxu1 %v376_v1  ;;  %v521_v50 = vadd.f32 %v1103_v48, %v520_v49  ;;  %v1017_v0 = vld [vmem:[%s2550_s3 + $0x68] sm:$0xff]  ;;  %v1016_v1 = vld [vmem:[%s2550_s3 + $0x60] sm:$0xff] }
  0xc1   :  { %953 = vmatpush.msrb.mxu2 %v391_v2  ;;  %972 = vmatpush.msrb.mxu3 %v408_v3  ;;  %v1015_v3 = vld [vmem:[%s2550_s3 + $0x58] sm:$0xff] }
  0xc2   :  { %914 = vmatpush.msrb.mxu0 %v358_v4  ;;  %933 = vmatpush.msrb.mxu1 %v375_v5  ;;  %v540_v51 = vpop.f32.mrf.mxu1  ;;  %v1014_v5 = vld [vmem:[%s2550_s3 + $0x50] sm:$0xff] }
  0xc3   :  { %954 = vmatpush.msrb.mxu2 %v390_v6  ;;  %973 = vmatpush.msrb.mxu3 %v407_v7  ;;  %v541_v52 = vadd.f32 %v540_v51, %v521_v50  ;;  %v560_v53 = vpop.f32.mrf.mxu2  ;;  %v1052_v50 = vld [vmem:[%s2552_s5 + $0x38] sm:$0xff] }
  0xc4   :  { %915 = vmatpush.msrb.mxu0 %v357_v8  ;;  %934 = vmatpush.msrb.mxu1 %v374_v9  ;;  %v1013_v8 = vld [vmem:[%s2550_s3 + $0x48] sm:$0xff] }
  0xc5   :  { %955 = vmatpush.msrb.mxu2 %v389_v10  ;;  %974 = vmatpush.msrb.mxu3 %v406_v11  ;;  %v561_v54 = vadd.f32 %v560_v53, %v541_v52  ;;  %v1012_v10 = vld [vmem:[%s2550_s3 + $0x40] sm:$0xff]  ;;  %v1051_v52 = vld [vmem:[%s2552_s5 + $0x30] sm:$0xff] }
  0xc6   :  { %916 = vmatpush.msrb.mxu0 %v356_v12  ;;  %935 = vmatpush.msrb.mxu1 %v373_v13  ;;  %v580_v55 = vpop.f32.mrf.mxu3  ;;  %v1011_v12 = vld [vmem:[%s2550_s3 + $0x38] sm:$0xff] }
  0xc7   :  { %956 = vmatpush.msrb.mxu2 %v388_v15  ;;  %975 = vmatpush.msrb.mxu3 %v405_v16  ;;  %v581_v56 = vadd.f32 %v580_v55, %v561_v54  ;;  %v1010_v15 = vld [vmem:[%s2550_s3 + $0x30] sm:$0xff]  ;;  %v1050_v54 = vld [vmem:[%s2552_s5 + $0x28] sm:$0xff] }
  0xc8   :  { %917 = vmatpush.msrb.mxu0 %v355_v17  ;;  %936 = vmatpush.msrb.mxu1 %v372_v18  ;;  %v1009_v17 = vld [vmem:[%s2550_s3 + $0x28] sm:$0xff] }
  0xc9   :  { %957 = vmatpush.msrb.mxu2 %v387_v19  ;;  %976 = vmatpush.msrb.mxu3 %v404_v20  ;;  %v600_v57 = vpop.f32.mrf.mxu0  ;;  %v1008_v19 = vld [vmem:[%s2550_s3 + $0x20] sm:$0xff] }
  0xca   :  { %918 = vmatpush.msrb.mxu0 %v354_v21  ;;  %937 = vmatpush.msrb.mxu1 %v371_v22  ;;  %v601_v58 = vadd.f32 %v600_v57, %v581_v56  ;;  %v1007_v22 = vld [vmem:[%s2550_s3 + $0x18] sm:$0xff]  ;;  %v1049_v57 = vld [vmem:[%s2552_s5 + $0x20] sm:$0xff] }
  0xcb   :  { %958 = vmatpush.msrb.mxu2 %v386_v23  ;;  %977 = vmatpush.msrb.mxu3 %v403_v24 }
  0xcc   :  { %919 = vmatmul.f32.vlgmr.msrb.gmra.mxu0 %v472_v25  ;;  %959 = vmatmul.f32.vlgmr.msrb.gmra.mxu2 %v474_v26  ;;  %v620_v60 = vpop.f32.mrf.mxu1  ;;  %v1006_v25 = vld [vmem:[%s2550_s3 + $0x10] sm:$0xff] }
  0xcd   :  { %983 = vmatpush.msra.mxu0 %v433_v28  ;;  %938 = vmatpush.msrb.mxu1 %v370_v29  ;;  %v621_v61 = vadd.f32 %v620_v60, %v601_v58  ;;  %v640_v63 = vpop.f32.mrf.mxu2  ;;  %v1005_v29 = vld [vmem:[%s2550_s3 + $0x8] sm:$0xff] }
  0xce   :  { %978 = vmatpush.msrb.mxu3 %v402_v31  ;;  %939 = vmatmul.f32.vlgmr.msrb.gmra.mxu1 %v473_v27  ;;  %v1004_v27 = vld [vmem:[%s2550_s3] sm:$0xff] }
  0xcf   :  { %979 = vmatmul.f32.vlgmr.msrb.gmra.mxu3 %v475_v32  ;;  %984 = vmatpush.msra.mxu0 %v432_v30  ;;  %v641_v2 = vadd.f32 %v640_v63, %v621_v61  ;;  %v1060_v30 = vld [vmem:[%s2552_s5 + $0x78] sm:$0xff] }
  0xd0   :  { %1024 = vmatpush.msra.mxu1 %v1019_v59  ;;  %v660_v4 = vpop.f32.mrf.mxu3  ;;  %1065 = vmatpush.msra.mxu2 %v1060_v30  ;;  %v1048_v59 = vld [vmem:[%s2552_s5 + $0x18] sm:$0xff] }
  0xd1   :  { %985 = vmatpush.msra.mxu0 %v431_v33  ;;  %v661_v7 = vadd.f32 %v660_v4, %v641_v2  ;;  %v1059_v33 = vld [vmem:[%s2552_s5 + $0x70] sm:$0xff]  ;;  %v1046_v2 = vld [vmem:[%s2552_s5 + $0x8] sm:$0xff]  ;;  %v1104_v4 = vld [vmem:[%s2551_s4] ss:$0 sm:$0xff] }
  0xd2   :  { %1025 = vmatpush.msra.mxu1 %v1018_v62  ;;  %1066 = vmatpush.msra.mxu2 %v1059_v33 }
  0xd3   :  { %986 = vmatpush.msra.mxu0 %v430_v34 }
  0xd4   :  { %1026 = vmatpush.msra.mxu1 %v1017_v0 }
  0xd5   :  { %987 = vmatpush.msra.mxu0 %v429_v35 }
  0xd6   :  { %1027 = vmatpush.msra.mxu1 %v1016_v1  ;;  %v1047_v1 = vld [vmem:[%s2552_s5 + $0x10] sm:$0xff] }
  0xd7   :  { %988 = vmatpush.msra.mxu0 %v428_v36  ;;  %v1058_v36 = vld [vmem:[%s2552_s5 + $0x68] sm:$0xff] }
  0xd8   :  { %1028 = vmatpush.msra.mxu1 %v1015_v3  ;;  %1067 = vmatpush.msra.mxu2 %v1058_v36  ;;  %v1045_v3 = vld [vmem:[%s2552_s5] sm:$0xff] }
  0xd9   :  { %989 = vmatpush.msra.mxu0 %v427_v37 }
  0xda   :  { %1029 = vmatpush.msra.mxu1 %v1014_v5 }
  0xdb   :  { %990 = vmatpush.msra.mxu0 %v426_v38  ;;  %v1057_v38 = vld [vmem:[%s2552_s5 + $0x60] sm:$0xff] }
  0xdc   :  { %1030 = vmatpush.msra.mxu1 %v1013_v8  ;;  %1068 = vmatpush.msra.mxu2 %v1057_v38  ;;  %v1105_v8 = vld [vmem:[%s2553_s6] ss:$0 sm:$0xff] }
  0xdd   :  { %991 = vmatpush.msra.mxu0 %v425_v39 }
  0xde   :  { %1031 = vmatpush.msra.mxu1 %v1012_v10 }
  0xdf   :  { %992 = vmatpush.msra.mxu0 %v424_v40  ;;  %v1056_v40 = vld [vmem:[%s2552_s5 + $0x58] sm:$0xff] }
  0xe0   :  { %1032 = vmatpush.msra.mxu1 %v1011_v12  ;;  %1069 = vmatpush.msra.mxu2 %v1056_v40 }
  0xe1   :  { %993 = vmatpush.msra.mxu0 %v423_v41 }
  0xe2   :  { %1033 = vmatpush.msra.mxu1 %v1010_v15 }
  0xe3   :  { %994 = vmatpush.msra.mxu0 %v422_v42  ;;  %v680_v6 = vpop.f32.mrf.mxu0 }
  0xe4   :  { %v681_v9 = vadd.f32 %v680_v6, %v661_v7  ;;  %1034 = vmatpush.msra.mxu1 %v1009_v17 }
  0xe5   :  { %995 = vmatpush.msra.mxu0 %v421_v43  ;;  %v1055_v43 = vld [vmem:[%s2552_s5 + $0x50] sm:$0xff] }
  0xe6   :  { %v700_v11 = vpop.f32.mrf.mxu1  ;;  %1035 = vmatpush.msra.mxu1 %v1008_v19  ;;  %1070 = vmatpush.msra.mxu2 %v1055_v43 }
  0xe7   :  { %996 = vmatpush.msra.mxu0 %v420_v44  ;;  %v701_v14 = vadd.f32 %v700_v11, %v681_v9 }
  0xe8   :  { %1036 = vmatpush.msra.mxu1 %v1007_v22 }
  0xe9   :  { %997 = vmatpush.msra.mxu0 %v419_v45  ;;  %v720_v13 = vpop.f32.mrf.mxu2  ;;  %v1054_v45 = vld [vmem:[%s2552_s5 + $0x48] sm:$0xff] }
  0xea   :  { %v721_v16 = vadd.f32 %v720_v13, %v701_v14  ;;  %1037 = vmatpush.msra.mxu1 %v1006_v25  ;;  %1071 = vmatpush.msra.mxu2 %v1054_v45 }
  0xeb   :  { %998 = vmatpush.msra.mxu0 %v418_v46 }
  0xec   :  { %999 = vmatmul.f32.vlgmr.msra.gmra.mxu0 %v477_v47  ;;  %v740_v18 = vpop.f32.mrf.mxu3  ;;  %1038 = vmatpush.msra.mxu1 %v1005_v29  ;;  %v1053_v47 = vld [vmem:[%s2552_s5 + $0x40] sm:$0xff] }
  0xed   :  { %v741_v21 = vadd.f32 %v740_v18, %v721_v16  ;;  %1072 = vmatpush.msra.mxu2 %v1053_v47 }
  0xee   :  { %1039 = vmatpush.msra.mxu1 %v1004_v27 }
  0xef   :  { %1073 = vmatpush.msra.mxu2 %v1052_v50 }
  0xf1   :  { %1074 = vmatpush.msra.mxu2 %v1051_v52 }
  0xf3   :  { %1075 = vmatpush.msra.mxu2 %v1050_v54 }
  0xf5   :  { %1076 = vmatpush.msra.mxu2 %v1049_v57 }
  0xf7   :  { %1077 = vmatpush.msra.mxu2 %v1048_v59 }
  0xf9   :  { %1078 = vmatpush.msra.mxu2 %v1047_v1 }
  0xfb   :  { %1079 = vmatpush.msra.mxu2 %v1046_v2 }
  0xfd   :  { %1080 = vmatpush.msra.mxu2 %v1045_v3 }
 0x105   :  { %v760_v20 = vpop.f32.mrf.mxu0 }
 0x106   :  { %v761_v23 = vadd.f32 %v760_v20, %v741_v21 }
 0x108   :  { %v780_v24 = vpop.f32.mrf.mxu1 }
 0x109   :  { %v781_v28 = vadd.f32 %v780_v24, %v761_v23 }
 0x10b   :  { %v800_v26 = vpop.f32.mrf.mxu2 }
 0x10c   :  { %v801_v31 = vadd.f32 %v800_v26, %v781_v28 }
 0x10e   :  { %v820_v32 = vpop.f32.mrf.mxu3 }
 0x10f   :  { %v821_v35 = vadd.f32 %v820_v32, %v801_v31 }
 0x127   :  { %v840_v34 = vpop.f32.mrf.mxu0 }
 0x128   :  { %v841_v37 = vadd.f32 %v840_v34, %v821_v35 }
 0x12a   :  { %v860_v39 = vpop.f32.mrf.mxu1 }
 0x12b   :  { %v861_v42 = vadd.f32 %v860_v39, %v841_v37 }
 0x12d   :  { %v880_v41 = vpop.f32.mrf.mxu2 }
 0x12e   :  { %v881_v44 = vadd.f32 %v880_v41, %v861_v42 }
 0x130   :  { %v900_v46 = vpop.f32.mrf.mxu3 }
 0x131   :  { %v901_v49 = vadd.f32 %v900_v46, %v881_v44 }
 0x149   :  { %v920_v48 = vpop.f32.mrf.mxu0 }
 0x14a   :  { %v921_v51 = vadd.f32 %v920_v48, %v901_v49 }
 0x14b   :  { %v940_v53 = vpop.f32.mrf.mxu1 }
 0x14c   :  { %v941_v56 = vadd.f32 %v940_v53, %v921_v51 }
 0x14f   :  { %v960_v55 = vpop.f32.mrf.mxu2 }
 0x150   :  { %v961_v58 = vadd.f32 %v960_v55, %v941_v56 }
 0x152   :  { %v980_v60 = vpop.f32.mrf.mxu3 }
 0x153   :  { %v981_v61 = vadd.f32 %v980_v60, %v961_v58 }
 0x169   :  { %v1000_v62 = vpop.f32.mrf.mxu0 }
 0x16a   :  { %v1001_v63 = vadd.f32 %v1000_v62, %v981_v61 }
 0x16c   :  { %v1003_v0 = vmax.f32 %v1001_v63, 0.0 }
 0x16e   :  { %1040 = vmatmul.f32.vlgmr.msra.gmra.mxu1 %v1003_v0 }
 0x1eb   :  { %v1041_v5 = vpop.f32.mrf.mxu1 }
 0x1ec   :  { %v1042_v6 = vadd.f32 %v1104_v4, %v1041_v5 }
 0x1ee   :  { %v1044_v7 = vmax.f32 %v1042_v6, 0.0 }
 0x1f0   :  { %1081 = vmatmul.f32.vlgmr.msra.gmra.mxu2 %v1044_v7 }
 0x273   :  { %v1082_v9 = vpop.f32.mrf.mxu2 }
 0x274   :  { %v1083_v10 = vadd.f32 %v1105_v8, %v1082_v9 }
 0x276   :  { %1085 = vst [vmem:[#allocation2] sm:$0x3] %v1083_v10 }
 0x277   :  { %1096 = dma.vmem_to_hbm [thread:$0]  %s1092_s22, 32, %s1094_s25, [#allocation3]  }
 0x278   :  { %1130 = dma.done.wait [#allocation3], 32  }
 0x279   :  { %1131 = vsyncadd [#allocation3], 4294967264 }
 0x27a   :  { %1101 = vsyncpa [#allocation3], 1 }

// kernel: net_forward.4
= control target key start
LH: loop header
LB: loop body
LE: loop exit
PB: predicated region body
PF: predicated region fallthrough
CT: control target
= control target key end

     0   :  { %s5514_s12 = smov 0   ;;  %s11827_s0 = inlined_call_operand.vmem [shape: f32[2,4,25,3200], index: 0, kind: input, shape index: {}]   ;;  %s11828_s1 = inlined_call_operand.vmem [shape: f32[3200,128], index: 1, kind: input, shape index: {}]   ;;  %s11829_s2 = inlined_call_operand.vmem [shape: f32[1,128], index: 2, kind: input, shape index: {}]   ;;  %s11830_s3 = inlined_call_operand.vmem [shape: f32[2,25,128], index: 3, kind: output, shape index: {}]  }
   0x1 LB: > { %s3965_s13 = sadd.s32 4294967295, %s5492_s12   ;;  %p3969_p0 = scmp.ge.s32.totalorder %s5492_s12, 1  ;;  %s5492_s12 = sphi %s5514_s12, %s13_s12  }
   0x2   : > { %p137_p1 = scmp.lt.s32.totalorder %s5492_s12, 3 }
   0x4   : > { %p138_p2 = pnand %p3969_p0, %p137_p1 }
   0x6   : > { %141 = sbr.rel (%p138_p2) target bundleno = 1171 (0x493), region = 32 }
   0xb   : > { %v186_v0 = vld [vmem:[%s11828_s1 + $0x78] sm:$0xff]  ;;  %v185_v2 = vld [vmem:[%s11828_s1 + $0x70] sm:$0xff]  ;;  %v184_v6 = vld [vmem:[%s11828_s1 + $0x68] sm:$0xff]  ;;  %p5626_p3 = scmp.lt.s32.totalorder %s3965_s13, 1 }
   0xc   : > { %v218_v1 = vld [vmem:[%s11828_s1 + $0x178] sm:$0xff]  ;;  %675 = vmatpush.msra.mxu0 %v186_v0  ;;  %v217_v4 = vld [vmem:[%s11828_s1 + $0x170] sm:$0xff]  ;;  %v216_v8 = vld [vmem:[%s11828_s1 + $0x168] sm:$0xff] }
   0xd   : > { %733 = vmatpush.msra.mxu2 %v218_v1  ;;  %v202_v3 = vld [vmem:[%s11828_s1 + $0xf8] sm:$0xff]  ;;  %v201_v7 = vld [vmem:[%s11828_s1 + $0xf0] sm:$0xff]  ;;  %v200_v10 = vld [vmem:[%s11828_s1 + $0xe8] sm:$0xff]  ;;  %s12351_s13 = smov (!%p5626_p3, %s3965_s13), 1 }
   0xe   : > { %v234_v5 = vld [vmem:[%s11828_s1 + $0x1f8] sm:$0xff]  ;;  %704 = vmatpush.msra.mxu1 %v202_v3  ;;  %676 = vmatpush.msra.mxu0 %v185_v2  ;;  %v233_v9 = vld [vmem:[%s11828_s1 + $0x1f0] sm:$0xff]  ;;  %v183_v11 = vld [vmem:[%s11828_s1 + $0x60] sm:$0xff]  ;;  %s4276_s15 = smul.u32 3200, %s12351_s13 }
   0xf   : > { %762 = vmatpush.msra.mxu3 %v234_v5  ;;  %734 = vmatpush.msra.mxu2 %v217_v4  ;;  %v215_v12 = vld [vmem:[%s11828_s1 + $0x160] sm:$0xff]  ;;  %v232_v13 = vld [vmem:[%s11828_s1 + $0x1e8] sm:$0xff]  ;;  %v182_v16 = vld [vmem:[%s11828_s1 + $0x58] sm:$0xff] }
  0x10   : > { %705 = vmatpush.msra.mxu1 %v201_v7  ;;  %677 = vmatpush.msra.mxu0 %v184_v6  ;;  %v199_v14 = vld [vmem:[%s11828_s1 + $0xe0] sm:$0xff]  ;;  %v214_v17 = vld [vmem:[%s11828_s1 + $0x158] sm:$0xff]  ;;  %v181_v20 = vld [vmem:[%s11828_s1 + $0x50] sm:$0xff]  ;;  %s5712_s7 = scalar_lea.vmem %s11827_s0, %s4276_s15 }
  0x11   : > { %763 = vmatpush.msra.mxu3 %v233_v9  ;;  %735 = vmatpush.msra.mxu2 %v216_v8  ;;  %v231_v15 = vld [vmem:[%s11828_s1 + $0x1e0] sm:$0xff]  ;;  %v198_v18 = vld [vmem:[%s11828_s1 + $0xd8] sm:$0xff]  ;;  %v213_v21 = vld [vmem:[%s11828_s1 + $0x150] sm:$0xff] }
  0x12   : > { %706 = vmatpush.msra.mxu1 %v200_v10  ;;  %678 = vmatpush.msra.mxu0 %v183_v11  ;;  %v230_v19 = vld [vmem:[%s11828_s1 + $0x1d8] sm:$0xff]  ;;  %v197_v22 = vld [vmem:[%s11828_s1 + $0xd0] sm:$0xff]  ;;  %v180_v24 = vld [vmem:[%s11828_s1 + $0x48] sm:$0xff] }
  0x13   : > { %764 = vmatpush.msra.mxu3 %v232_v13  ;;  %736 = vmatpush.msra.mxu2 %v215_v12  ;;  %v229_v23 = vld [vmem:[%s11828_s1 + $0x1d0] sm:$0xff]  ;;  %v212_v25 = vld [vmem:[%s11828_s1 + $0x148] sm:$0xff]  ;;  %v179_v28 = vld [vmem:[%s11828_s1 + $0x40] sm:$0xff] }
  0x14   : > { %707 = vmatpush.msra.mxu1 %v199_v14  ;;  %679 = vmatpush.msra.mxu0 %v182_v16  ;;  %v196_v26 = vld [vmem:[%s11828_s1 + $0xc8] sm:$0xff]  ;;  %v211_v29 = vld [vmem:[%s11828_s1 + $0x140] sm:$0xff]  ;;  %v178_v32 = vld [vmem:[%s11828_s1 + $0x38] sm:$0xff] }
  0x15   : > { %765 = vmatpush.msra.mxu3 %v231_v15  ;;  %737 = vmatpush.msra.mxu2 %v214_v17  ;;  %v228_v27 = vld [vmem:[%s11828_s1 + $0x1c8] sm:$0xff]  ;;  %v195_v30 = vld [vmem:[%s11828_s1 + $0xc0] sm:$0xff]  ;;  %v210_v33 = vld [vmem:[%s11828_s1 + $0x138] sm:$0xff] }
  0x16   : > { %708 = vmatpush.msra.mxu1 %v198_v18  ;;  %680 = vmatpush.msra.mxu0 %v181_v20  ;;  %v227_v31 = vld [vmem:[%s11828_s1 + $0x1c0] sm:$0xff]  ;;  %v194_v34 = vld [vmem:[%s11828_s1 + $0xb8] sm:$0xff]  ;;  %v177_v36 = vld [vmem:[%s11828_s1 + $0x30] sm:$0xff] }
  0x17   : > { %766 = vmatpush.msra.mxu3 %v230_v19  ;;  %738 = vmatpush.msra.mxu2 %v213_v21  ;;  %v226_v35 = vld [vmem:[%s11828_s1 + $0x1b8] sm:$0xff]  ;;  %v209_v37 = vld [vmem:[%s11828_s1 + $0x130] sm:$0xff]  ;;  %v176_v40 = vld [vmem:[%s11828_s1 + $0x28] sm:$0xff] }
  0x18   : > { %709 = vmatpush.msra.mxu1 %v197_v22  ;;  %681 = vmatpush.msra.mxu0 %v180_v24  ;;  %v193_v38 = vld [vmem:[%s11828_s1 + $0xb0] sm:$0xff]  ;;  %v208_v41 = vld [vmem:[%s11828_s1 + $0x128] sm:$0xff]  ;;  %v175_v44 = vld [vmem:[%s11828_s1 + $0x20] sm:$0xff] }
  0x19   : > { %767 = vmatpush.msra.mxu3 %v229_v23  ;;  %739 = vmatpush.msra.mxu2 %v212_v25  ;;  %v225_v39 = vld [vmem:[%s11828_s1 + $0x1b0] sm:$0xff]  ;;  %v192_v42 = vld [vmem:[%s11828_s1 + $0xa8] sm:$0xff]  ;;  %v207_v45 = vld [vmem:[%s11828_s1 + $0x120] sm:$0xff] }
  0x1a   : > { %710 = vmatpush.msra.mxu1 %v196_v26  ;;  %682 = vmatpush.msra.mxu0 %v179_v28  ;;  %v224_v43 = vld [vmem:[%s11828_s1 + $0x1a8] sm:$0xff]  ;;  %v191_v46 = vld [vmem:[%s11828_s1 + $0xa0] sm:$0xff]  ;;  %v174_v48 = vld [vmem:[%s11828_s1 + $0x18] sm:$0xff] }
  0x1b   : > { %768 = vmatpush.msra.mxu3 %v228_v27  ;;  %740 = vmatpush.msra.mxu2 %v211_v29  ;;  %v223_v47 = vld [vmem:[%s11828_s1 + $0x1a0] sm:$0xff]  ;;  %v206_v49 = vld [vmem:[%s11828_s1 + $0x118] sm:$0xff]  ;;  %v173_v52 = vld [vmem:[%s11828_s1 + $0x10] sm:$0xff] }
  0x1c   : > { %711 = vmatpush.msra.mxu1 %v195_v30  ;;  %683 = vmatpush.msra.mxu0 %v178_v32  ;;  %v190_v50 = vld [vmem:[%s11828_s1 + $0x98] sm:$0xff]  ;;  %v205_v53 = vld [vmem:[%s11828_s1 + $0x110] sm:$0xff]  ;;  %v172_v56 = vld [vmem:[%s11828_s1 + $0x8] sm:$0xff] }
  0x1d   : > { %769 = vmatpush.msra.mxu3 %v227_v31  ;;  %741 = vmatpush.msra.mxu2 %v210_v33  ;;  %v222_v51 = vld [vmem:[%s11828_s1 + $0x198] sm:$0xff]  ;;  %v189_v54 = vld [vmem:[%s11828_s1 + $0x90] sm:$0xff]  ;;  %v204_v57 = vld [vmem:[%s11828_s1 + $0x108] sm:$0xff] }
  0x1e   : > { %712 = vmatpush.msra.mxu1 %v194_v34  ;;  %684 = vmatpush.msra.mxu0 %v177_v36  ;;  %v221_v55 = vld [vmem:[%s11828_s1 + $0x190] sm:$0xff]  ;;  %v188_v58 = vld [vmem:[%s11828_s1 + $0x88] sm:$0xff]  ;;  %v171_v60 = vld [vmem:[%s11828_s1] sm:$0xff] }
  0x1f   : > { %770 = vmatpush.msra.mxu3 %v226_v35  ;;  %742 = vmatpush.msra.mxu2 %v209_v37  ;;  %v220_v59 = vld [vmem:[%s11828_s1 + $0x188] sm:$0xff]  ;;  %v203_v61 = vld [vmem:[%s11828_s1 + $0x100] sm:$0xff]  ;;  %v574_v63 = vld [vmem:[%s5712_s7 + $0x10] sm:$0xff] }
  0x20   : > { %713 = vmatpush.msra.mxu1 %v193_v38  ;;  %685 = vmatpush.msra.mxu0 %v176_v40  ;;  %v572_v62 = vld [vmem:[%s5712_s7] sm:$0xff]  ;;  %v282_v0 = vld [vmem:[%s11828_s1 + $0x378] sm:$0xff]  ;;  %v573_v4 = vld [vmem:[%s5712_s7 + $0x8] sm:$0xff] }
  0x21   : > { %771 = vmatpush.msra.mxu3 %v225_v39  ;;  %743 = vmatpush.msra.mxu2 %v208_v41  ;;  %v187_v1 = vld [vmem:[%s11828_s1 + $0x80] sm:$0xff]  ;;  %v250_v3 = vld [vmem:[%s11828_s1 + $0x278] sm:$0xff]  ;;  %v281_v6 = vld [vmem:[%s11828_s1 + $0x370] sm:$0xff] }
  0x22   : > { %714 = vmatpush.msra.mxu1 %v192_v42  ;;  %686 = vmatpush.msra.mxu0 %v175_v44  ;;  %v219_v2 = vld [vmem:[%s11828_s1 + $0x180] sm:$0xff]  ;;  %v575_v5 = vld [vmem:[%s5712_s7 + $0x18] sm:$0xff]  ;;  %v249_v8 = vld [vmem:[%s11828_s1 + $0x270] sm:$0xff] }
  0x23   : > { %772 = vmatpush.msra.mxu3 %v224_v43  ;;  %744 = vmatpush.msra.mxu2 %v207_v45  ;;  %v298_v7 = vld [vmem:[%s11828_s1 + $0x3f8] sm:$0xff]  ;;  %v280_v10 = vld [vmem:[%s11828_s1 + $0x368] sm:$0xff]  ;;  %v297_v11 = vld [vmem:[%s11828_s1 + $0x3f0] sm:$0xff] }
  0x24   : > { %715 = vmatpush.msra.mxu1 %v191_v46  ;;  %687 = vmatpush.msra.mxu0 %v174_v48  ;;  %v266_v9 = vld [vmem:[%s11828_s1 + $0x2f8] sm:$0xff]  ;;  %v248_v12 = vld [vmem:[%s11828_s1 + $0x268] sm:$0xff]  ;;  %v265_v13 = vld [vmem:[%s11828_s1 + $0x2f0] sm:$0xff] }
  0x25   : > { %773 = vmatpush.msra.mxu3 %v223_v47  ;;  %745 = vmatpush.msra.mxu2 %v206_v49  ;;  %v279_v14 = vld [vmem:[%s11828_s1 + $0x360] sm:$0xff]  ;;  %v296_v15 = vld [vmem:[%s11828_s1 + $0x3e8] sm:$0xff]  ;;  %v599_v19 = vld [vmem:[%s5712_s7 + $0xd8] sm:$0xff] }
  0x26   : > { %716 = vmatpush.msra.mxu1 %v190_v50  ;;  %688 = vmatpush.msra.mxu0 %v173_v52  ;;  %v247_v16 = vld [vmem:[%s11828_s1 + $0x260] sm:$0xff]  ;;  %v264_v17 = vld [vmem:[%s11828_s1 + $0x2e8] sm:$0xff]  ;;  %v278_v20 = vld [vmem:[%s11828_s1 + $0x358] sm:$0xff] }
  0x27   : > { %774 = vmatpush.msra.mxu3 %v222_v51  ;;  %746 = vmatpush.msra.mxu2 %v205_v53  ;;  %v597_v18 = vld [vmem:[%s5712_s7 + $0xc8] sm:$0xff]  ;;  %v295_v21 = vld [vmem:[%s11828_s1 + $0x3e0] sm:$0xff]  ;;  %v246_v22 = vld [vmem:[%s11828_s1 + $0x258] sm:$0xff] }
  0x28   : > { %717 = vmatpush.msra.mxu1 %v189_v54  ;;  %689 = vmatpush.msra.mxu0 %v172_v56  ;;  %v263_v23 = vld [vmem:[%s11828_s1 + $0x2e0] sm:$0xff]  ;;  %v598_v24 = vld [vmem:[%s5712_s7 + $0xd0] sm:$0xff]  ;;  %v294_v27 = vld [vmem:[%s11828_s1 + $0x3d8] sm:$0xff] }
  0x29   : > { %775 = vmatpush.msra.mxu3 %v221_v55  ;;  %747 = vmatpush.msra.mxu2 %v204_v57  ;;  %v600_v25 = vld [vmem:[%s5712_s7 + $0xe0] sm:$0xff]  ;;  %v277_v26 = vld [vmem:[%s11828_s1 + $0x350] sm:$0xff]  ;;  %v262_v29 = vld [vmem:[%s11828_s1 + $0x2d8] sm:$0xff] }
  0x2a   : > { %718 = vmatpush.msra.mxu1 %v188_v58  ;;  %690 = vmatpush.msra.mxu0 %v171_v60  ;;  %v245_v28 = vld [vmem:[%s11828_s1 + $0x250] sm:$0xff]  ;;  %v276_v30 = vld [vmem:[%s11828_s1 + $0x348] sm:$0xff]  ;;  %v275_v34 = vld [vmem:[%s11828_s1 + $0x340] sm:$0xff] }
  0x2b   : > { %776 = vmatpush.msra.mxu3 %v220_v59  ;;  %748 = vmatpush.msra.mxu2 %v203_v61  ;;  %v293_v31 = vld [vmem:[%s11828_s1 + $0x3d0] sm:$0xff]  ;;  %v244_v32 = vld [vmem:[%s11828_s1 + $0x248] sm:$0xff]  ;;  %v243_v36 = vld [vmem:[%s11828_s1 + $0x240] sm:$0xff] }
  0x2c   : > { %691 = vmatmul.f32.vlgmr.msra.gmra.mxu0 %v572_v62  ;;  %749 = vmatmul.f32.vlgmr.msra.gmra.mxu2 %v574_v63  ;;  %v261_v33 = vld [vmem:[%s11828_s1 + $0x2d0] sm:$0xff]  ;;  %v292_v35 = vld [vmem:[%s11828_s1 + $0x3c8] sm:$0xff]  ;;  %v624_v39 = vld [vmem:[%s5712_s7 + $0x1a0] sm:$0xff] }
  0x2d   : > { %849 = vmatpush.msrb.mxu2 %v282_v0  ;;  %719 = vmatpush.msra.mxu1 %v187_v1  ;;  %v260_v37 = vld [vmem:[%s11828_s1 + $0x2c8] sm:$0xff]  ;;  %v622_v38 = vld [vmem:[%s5712_s7 + $0x190] sm:$0xff]  ;;  %v274_v40 = vld [vmem:[%s11828_s1 + $0x338] sm:$0xff] }
  0x2e   : > { %777 = vmatpush.msra.mxu3 %v219_v2  ;;  %791 = vmatpush.msrb.mxu0 %v250_v3  ;;  %v291_v41 = vld [vmem:[%s11828_s1 + $0x3c0] sm:$0xff]  ;;  %v242_v42 = vld [vmem:[%s11828_s1 + $0x238] sm:$0xff]  ;;  %v625_v45 = vld [vmem:[%s5712_s7 + $0x1a8] sm:$0xff] }
  0x2f   : > { %720 = vmatmul.f32.vlgmr.msra.gmra.mxu1 %v573_v4  ;;  %778 = vmatmul.f32.vlgmr.msra.gmra.mxu3 %v575_v5  ;;  %v259_v43 = vld [vmem:[%s11828_s1 + $0x2c0] sm:$0xff]  ;;  %v623_v44 = vld [vmem:[%s5712_s7 + $0x198] sm:$0xff]  ;;  %v273_v46 = vld [vmem:[%s11828_s1 + $0x330] sm:$0xff] }
  0x30   : > { %850 = vmatpush.msrb.mxu2 %v281_v6  ;;  %878 = vmatpush.msrb.mxu3 %v298_v7  ;;  %v290_v47 = vld [vmem:[%s11828_s1 + $0x3b8] sm:$0xff]  ;;  %v241_v48 = vld [vmem:[%s11828_s1 + $0x230] sm:$0xff]  ;;  %v272_v50 = vld [vmem:[%s11828_s1 + $0x328] sm:$0xff] }
  0x31   : > { %792 = vmatpush.msrb.mxu0 %v249_v8  ;;  %820 = vmatpush.msrb.mxu1 %v266_v9  ;;  %v258_v49 = vld [vmem:[%s11828_s1 + $0x2b8] sm:$0xff]  ;;  %v289_v51 = vld [vmem:[%s11828_s1 + $0x3b0] sm:$0xff]  ;;  %v240_v52 = vld [vmem:[%s11828_s1 + $0x228] sm:$0xff] }
  0x32   : > { %851 = vmatpush.msrb.mxu2 %v280_v10  ;;  %879 = vmatpush.msrb.mxu3 %v297_v11  ;;  %v257_v53 = vld [vmem:[%s11828_s1 + $0x2b0] sm:$0xff]  ;;  %v271_v54 = vld [vmem:[%s11828_s1 + $0x320] sm:$0xff]  ;;  %v288_v55 = vld [vmem:[%s11828_s1 + $0x3a8] sm:$0xff] }
  0x33   : > { %793 = vmatpush.msrb.mxu0 %v248_v12  ;;  %821 = vmatpush.msrb.mxu1 %v265_v13  ;;  %v239_v56 = vld [vmem:[%s11828_s1 + $0x220] sm:$0xff]  ;;  %v256_v57 = vld [vmem:[%s11828_s1 + $0x2a8] sm:$0xff]  ;;  %v647_v58 = vld [vmem:[%s5712_s7 + $0x258] sm:$0x1] }
  0x34   : > { %852 = vmatpush.msrb.mxu2 %v279_v14  ;;  %880 = vmatpush.msrb.mxu3 %v296_v15  ;;  %v649_v59 = vld [vmem:[%s5712_s7 + $0x268] sm:$0x1]  ;;  %v270_v60 = vld [vmem:[%s11828_s1 + $0x318] sm:$0xff]  ;;  %v287_v61 = vld [vmem:[%s11828_s1 + $0x3a0] sm:$0xff] }
  0x35   : > { %794 = vmatpush.msrb.mxu0 %v247_v16  ;;  %822 = vmatpush.msrb.mxu1 %v264_v17  ;;  %v238_v62 = vld [vmem:[%s11828_s1 + $0x218] sm:$0xff]  ;;  %v255_v63 = vld [vmem:[%s11828_s1 + $0x2a0] sm:$0xff]  ;;  %v650_v1 = vld [vmem:[%s5712_s7 + $0x270] sm:$0x1] }
  0x36   : > { %694 = vmatmul.f32.gmra.mxu0 %v597_v18  ;;  %752 = vmatmul.f32.gmra.mxu2 %v599_v19  ;;  %v648_v0 = vld [vmem:[%s5712_s7 + $0x260] sm:$0x1]  ;;  %v269_v2 = vld [vmem:[%s11828_s1 + $0x310] sm:$0xff]  ;;  %v286_v3 = vld [vmem:[%s11828_s1 + $0x398] sm:$0xff] }
  0x37   : > { %853 = vmatpush.msrb.mxu2 %v278_v20  ;;  %881 = vmatpush.msrb.mxu3 %v295_v21  ;;  %v237_v4 = vld [vmem:[%s11828_s1 + $0x210] sm:$0xff]  ;;  %v254_v5 = vld [vmem:[%s11828_s1 + $0x298] sm:$0xff]  ;;  %v268_v6 = vld [vmem:[%s11828_s1 + $0x308] sm:$0xff] }
  0x38   : > { %795 = vmatpush.msrb.mxu0 %v246_v22  ;;  %823 = vmatpush.msrb.mxu1 %v263_v23  ;;  %v285_v7 = vld [vmem:[%s11828_s1 + $0x390] sm:$0xff]  ;;  %v236_v8 = vld [vmem:[%s11828_s1 + $0x208] sm:$0xff]  ;;  %v267_v10 = vld [vmem:[%s11828_s1 + $0x300] sm:$0xff] }
  0x39   : > { %723 = vmatmul.f32.gmra.mxu1 %v598_v24  ;;  %781 = vmatmul.f32.gmra.mxu3 %v600_v25  ;;  %v253_v9 = vld [vmem:[%s11828_s1 + $0x290] sm:$0xff]  ;;  %v284_v11 = vld [vmem:[%s11828_s1 + $0x388] sm:$0xff]  ;;  %v235_v12 = vld [vmem:[%s11828_s1 + $0x200] sm:$0xff] }
  0x3a   : > { %854 = vmatpush.msrb.mxu2 %v277_v26  ;;  %882 = vmatpush.msrb.mxu3 %v294_v27  ;;  %v252_v13 = vld [vmem:[%s11828_s1 + $0x288] sm:$0xff]  ;;  %v576_v14 = vld [vmem:[%s5712_s7 + $0x20] sm:$0xff]  ;;  %v578_v15 = vld [vmem:[%s5712_s7 + $0x30] sm:$0xff] }
  0x3b   : > { %796 = vmatpush.msrb.mxu0 %v245_v28  ;;  %824 = vmatpush.msrb.mxu1 %v262_v29  ;;  %v283_v16 = vld [vmem:[%s11828_s1 + $0x380] sm:$0xff]  ;;  %v346_v17 = vld [vmem:[%s11828_s1 + $0x578] sm:$0xff]  ;;  %v577_v20 = vld [vmem:[%s5712_s7 + $0x28] sm:$0xff] }
  0x3c   : > { %855 = vmatpush.msrb.mxu2 %v276_v30  ;;  %883 = vmatpush.msrb.mxu3 %v293_v31  ;;  %v251_v18 = vld [vmem:[%s11828_s1 + $0x280] sm:$0xff]  ;;  %v314_v19 = vld [vmem:[%s11828_s1 + $0x478] sm:$0xff]  ;;  %v345_v22 = vld [vmem:[%s11828_s1 + $0x570] sm:$0xff] }
  0x3d   : > { %797 = vmatpush.msrb.mxu0 %v244_v32  ;;  %825 = vmatpush.msrb.mxu1 %v261_v33  ;;  %v579_v21 = vld [vmem:[%s5712_s7 + $0x38] sm:$0xff]  ;;  %v313_v24 = vld [vmem:[%s11828_s1 + $0x470] sm:$0xff]  ;;  %v344_v26 = vld [vmem:[%s11828_s1 + $0x568] sm:$0xff] }
  0x3e   : > { %856 = vmatpush.msrb.mxu2 %v275_v34  ;;  %884 = vmatpush.msrb.mxu3 %v292_v35  ;;  %v362_v23 = vld [vmem:[%s11828_s1 + $0x5f8] sm:$0xff]  ;;  %v361_v27 = vld [vmem:[%s11828_s1 + $0x5f0] sm:$0xff]  ;;  %v312_v28 = vld [vmem:[%s11828_s1 + $0x468] sm:$0xff] }
  0x3f   : > { %798 = vmatpush.msrb.mxu0 %v243_v36  ;;  %826 = vmatpush.msrb.mxu1 %v260_v37  ;;  %v330_v25 = vld [vmem:[%s11828_s1 + $0x4f8] sm:$0xff]  ;;  %v329_v29 = vld [vmem:[%s11828_s1 + $0x4f0] sm:$0xff]  ;;  %v343_v30 = vld [vmem:[%s11828_s1 + $0x560] sm:$0xff] }
  0x40   : > { %697 = vmatmul.f32.gmra.mxu0 %v622_v38  ;;  %755 = vmatmul.f32.gmra.mxu2 %v624_v39  ;;  %v360_v31 = vld [vmem:[%s11828_s1 + $0x5e8] sm:$0xff]  ;;  %v311_v32 = vld [vmem:[%s11828_s1 + $0x460] sm:$0xff]  ;;  %v603_v35 = vld [vmem:[%s5712_s7 + $0xf8] sm:$0xff] }
  0x41   : > { %857 = vmatpush.msrb.mxu2 %v274_v40  ;;  %885 = vmatpush.msrb.mxu3 %v291_v41  ;;  %v328_v33 = vld [vmem:[%s11828_s1 + $0x4e8] sm:$0xff]  ;;  %v342_v36 = vld [vmem:[%s11828_s1 + $0x558] sm:$0xff]  ;;  %v359_v37 = vld [vmem:[%s11828_s1 + $0x5e0] sm:$0xff] }
  0x42   : > { %799 = vmatpush.msrb.mxu0 %v242_v42  ;;  %827 = vmatpush.msrb.mxu1 %v259_v43  ;;  %v601_v34 = vld [vmem:[%s5712_s7 + $0xe8] sm:$0xff]  ;;  %v310_v38 = vld [vmem:[%s11828_s1 + $0x458] sm:$0xff]  ;;  %v327_v39 = vld [vmem:[%s11828_s1 + $0x4e0] sm:$0xff] }
  0x43   : > { %726 = vmatmul.f32.gmra.mxu1 %v623_v44  ;;  %784 = vmatmul.f32.gmra.mxu3 %v625_v45  ;;  %v602_v40 = vld [vmem:[%s5712_s7 + $0xf0] sm:$0xff]  ;;  %v604_v41 = vld [vmem:[%s5712_s7 + $0x100] sm:$0xff]  ;;  %v358_v43 = vld [vmem:[%s11828_s1 + $0x5d8] sm:$0xff] }
  0x44   : > { %858 = vmatpush.msrb.mxu2 %v273_v46  ;;  %886 = vmatpush.msrb.mxu3 %v290_v47  ;;  %v341_v42 = vld [vmem:[%s11828_s1 + $0x550] sm:$0xff]  ;;  %v326_v45 = vld [vmem:[%s11828_s1 + $0x4d8] sm:$0xff]  ;;  %v340_v46 = vld [vmem:[%s11828_s1 + $0x548] sm:$0xff] }
  0x45   : > { %800 = vmatpush.msrb.mxu0 %v241_v48  ;;  %828 = vmatpush.msrb.mxu1 %v258_v49  ;;  %v309_v44 = vld [vmem:[%s11828_s1 + $0x450] sm:$0xff]  ;;  %v308_v48 = vld [vmem:[%s11828_s1 + $0x448] sm:$0xff] }
  0x46   : > { %859 = vmatpush.msrb.mxu2 %v272_v50  ;;  %887 = vmatpush.msrb.mxu3 %v289_v51  ;;  %v357_v47 = vld [vmem:[%s11828_s1 + $0x5d0] sm:$0xff]  ;;  %v339_v50 = vld [vmem:[%s11828_s1 + $0x540] sm:$0xff]  ;;  %v356_v51 = vld [vmem:[%s11828_s1 + $0x5c8] sm:$0xff] }
  0x47   : > { %801 = vmatpush.msrb.mxu0 %v240_v52  ;;  %829 = vmatpush.msrb.mxu1 %v257_v53  ;;  %v325_v49 = vld [vmem:[%s11828_s1 + $0x4d0] sm:$0xff]  ;;  %v307_v52 = vld [vmem:[%s11828_s1 + $0x440] sm:$0xff]  ;;  %v324_v53 = vld [vmem:[%s11828_s1 + $0x4c8] sm:$0xff] }
  0x48   : > { %860 = vmatpush.msrb.mxu2 %v271_v54  ;;  %888 = vmatpush.msrb.mxu3 %v288_v55  ;;  %v626_v54 = vld [vmem:[%s5712_s7 + $0x1b0] sm:$0xff]  ;;  %v628_v55 = vld [vmem:[%s5712_s7 + $0x1c0] sm:$0xff] }
  0x49   : > { %802 = vmatpush.msrb.mxu0 %v239_v56  ;;  %830 = vmatpush.msrb.mxu1 %v256_v57  ;;  %v338_v56 = vld [vmem:[%s11828_s1 + $0x538] sm:$0xff]  ;;  %v355_v57 = vld [vmem:[%s11828_s1 + $0x5c0] sm:$0xff] }
  0x4a   : > { %700 = vmatmul.f32.gmra.mxu0 %v647_v58  ;;  %758 = vmatmul.f32.gmra.mxu2 %v649_v59  ;;  %v306_v58 = vld [vmem:[%s11828_s1 + $0x438] sm:$0xff]  ;;  %v323_v59 = vld [vmem:[%s11828_s1 + $0x4c0] sm:$0xff] }
  0x4b   : > { %861 = vmatpush.msrb.mxu2 %v270_v60  ;;  %889 = vmatpush.msrb.mxu3 %v287_v61  ;;  %v627_v60 = vld [vmem:[%s5712_s7 + $0x1b8] sm:$0xff]  ;;  %v629_v61 = vld [vmem:[%s5712_s7 + $0x1c8] sm:$0xff] }
  0x4c   : > { %803 = vmatpush.msrb.mxu0 %v238_v62  ;;  %831 = vmatpush.msrb.mxu1 %v255_v63  ;;  %v337_v62 = vld [vmem:[%s11828_s1 + $0x530] sm:$0xff]  ;;  %v354_v63 = vld [vmem:[%s11828_s1 + $0x5b8] sm:$0xff] }
  0x4d   : > { %729 = vmatmul.f32.gmra.mxu1 %v648_v0  ;;  %787 = vmatmul.f32.gmra.mxu3 %v650_v1  ;;  %v305_v0 = vld [vmem:[%s11828_s1 + $0x430] sm:$0xff]  ;;  %v322_v1 = vld [vmem:[%s11828_s1 + $0x4b8] sm:$0xff] }
  0x4e   : > { %862 = vmatpush.msrb.mxu2 %v269_v2  ;;  %890 = vmatpush.msrb.mxu3 %v286_v3  ;;  %v336_v2 = vld [vmem:[%s11828_s1 + $0x528] sm:$0xff]  ;;  %v353_v3 = vld [vmem:[%s11828_s1 + $0x5b0] sm:$0xff] }
  0x4f   : > { %804 = vmatpush.msrb.mxu0 %v237_v4  ;;  %832 = vmatpush.msrb.mxu1 %v254_v5  ;;  %v304_v4 = vld [vmem:[%s11828_s1 + $0x428] sm:$0xff]  ;;  %v321_v5 = vld [vmem:[%s11828_s1 + $0x4b0] sm:$0xff] }
  0x50   : > { %863 = vmatpush.msrb.mxu2 %v268_v6  ;;  %891 = vmatpush.msrb.mxu3 %v285_v7  ;;  %v335_v6 = vld [vmem:[%s11828_s1 + $0x520] sm:$0xff]  ;;  %v352_v7 = vld [vmem:[%s11828_s1 + $0x5a8] sm:$0xff] }
  0x51   : > { %805 = vmatpush.msrb.mxu0 %v236_v8  ;;  %833 = vmatpush.msrb.mxu1 %v253_v9  ;;  %v303_v8 = vld [vmem:[%s11828_s1 + $0x420] sm:$0xff]  ;;  %v320_v9 = vld [vmem:[%s11828_s1 + $0x4a8] sm:$0xff] }
  0x52   : > { %864 = vmatpush.msrb.mxu2 %v267_v10  ;;  %892 = vmatpush.msrb.mxu3 %v284_v11  ;;  %v651_v10 = vld [vmem:[%s5712_s7 + $0x278] sm:$0x1]  ;;  %v653_v11 = vld [vmem:[%s5712_s7 + $0x288] sm:$0x1] }
  0x53   : > { %806 = vmatpush.msrb.mxu0 %v235_v12  ;;  %834 = vmatpush.msrb.mxu1 %v252_v13  ;;  %v334_v12 = vld [vmem:[%s11828_s1 + $0x518] sm:$0xff]  ;;  %v351_v13 = vld [vmem:[%s11828_s1 + $0x5a0] sm:$0xff] }
  0x54   : > { %807 = vmatmul.f32.vlgmr.msrb.gmra.mxu0 %v576_v14  ;;  %865 = vmatmul.f32.vlgmr.msrb.gmra.mxu2 %v578_v15  ;;  %v302_v14 = vld [vmem:[%s11828_s1 + $0x418] sm:$0xff]  ;;  %v319_v15 = vld [vmem:[%s11828_s1 + $0x4a0] sm:$0xff] }
  0x55   : > { %893 = vmatpush.msrb.mxu3 %v283_v16  ;;  %965 = vmatpush.msra.mxu2 %v346_v17  ;;  %v652_v16 = vld [vmem:[%s5712_s7 + $0x280] sm:$0x1]  ;;  %v654_v17 = vld [vmem:[%s5712_s7 + $0x290] sm:$0x1] }
  0x56   : > { %835 = vmatpush.msrb.mxu1 %v251_v18  ;;  %907 = vmatpush.msra.mxu0 %v314_v19  ;;  %v333_v18 = vld [vmem:[%s11828_s1 + $0x510] sm:$0xff]  ;;  %v350_v19 = vld [vmem:[%s11828_s1 + $0x598] sm:$0xff] }
  0x57   : > { %836 = vmatmul.f32.vlgmr.msrb.gmra.mxu1 %v577_v20  ;;  %894 = vmatmul.f32.vlgmr.msrb.gmra.mxu3 %v579_v21  ;;  %v301_v20 = vld [vmem:[%s11828_s1 + $0x410] sm:$0xff]  ;;  %v318_v21 = vld [vmem:[%s11828_s1 + $0x498] sm:$0xff] }
  0x58   : > { %966 = vmatpush.msra.mxu2 %v345_v22  ;;  %994 = vmatpush.msra.mxu3 %v362_v23  ;;  %v332_v22 = vld [vmem:[%s11828_s1 + $0x508] sm:$0xff]  ;;  %v349_v23 = vld [vmem:[%s11828_s1 + $0x590] sm:$0xff] }
  0x59   : > { %908 = vmatpush.msra.mxu0 %v313_v24  ;;  %936 = vmatpush.msra.mxu1 %v330_v25  ;;  %v300_v24 = vld [vmem:[%s11828_s1 + $0x408] sm:$0xff]  ;;  %v317_v25 = vld [vmem:[%s11828_s1 + $0x490] sm:$0xff] }
  0x5a   : > { %967 = vmatpush.msra.mxu2 %v344_v26  ;;  %995 = vmatpush.msra.mxu3 %v361_v27  ;;  %v331_v26 = vld [vmem:[%s11828_s1 + $0x500] sm:$0xff]  ;;  %v348_v27 = vld [vmem:[%s11828_s1 + $0x588] sm:$0xff] }
  0x5b   : > { %909 = vmatpush.msra.mxu0 %v312_v28  ;;  %937 = vmatpush.msra.mxu1 %v329_v29  ;;  %v299_v28 = vld [vmem:[%s11828_s1 + $0x400] sm:$0xff]  ;;  %v316_v29 = vld [vmem:[%s11828_s1 + $0x488] sm:$0xff] }
  0x5c   : > { %968 = vmatpush.msra.mxu2 %v343_v30  ;;  %996 = vmatpush.msra.mxu3 %v360_v31  ;;  %v580_v30 = vld [vmem:[%s5712_s7 + $0x40] sm:$0xff]  ;;  %v582_v31 = vld [vmem:[%s5712_s7 + $0x50] sm:$0xff] }
  0x5d   : > { %910 = vmatpush.msra.mxu0 %v311_v32  ;;  %938 = vmatpush.msra.mxu1 %v328_v33  ;;  %v347_v32 = vld [vmem:[%s11828_s1 + $0x580] sm:$0xff]  ;;  %v410_v33 = vld [vmem:[%s11828_s1 + $0x778] sm:$0xff] }
  0x5e   : > { %810 = vmatmul.f32.gmra.mxu0 %v601_v34  ;;  %868 = vmatmul.f32.gmra.mxu2 %v603_v35  ;;  %v315_v34 = vld [vmem:[%s11828_s1 + $0x480] sm:$0xff]  ;;  %v378_v35 = vld [vmem:[%s11828_s1 + $0x678] sm:$0xff] }
  0x5f   : > { %969 = vmatpush.msra.mxu2 %v342_v36  ;;  %997 = vmatpush.msra.mxu3 %v359_v37  ;;  %v581_v36 = vld [vmem:[%s5712_s7 + $0x48] sm:$0xff]  ;;  %v583_v37 = vld [vmem:[%s5712_s7 + $0x58] sm:$0xff] }
  0x60   : > { %911 = vmatpush.msra.mxu0 %v310_v38  ;;  %939 = vmatpush.msra.mxu1 %v327_v39  ;;  %v409_v38 = vld [vmem:[%s11828_s1 + $0x770] sm:$0xff]  ;;  %v426_v39 = vld [vmem:[%s11828_s1 + $0x7f8] sm:$0xff] }
  0x61   : > { %839 = vmatmul.f32.gmra.mxu1 %v602_v40  ;;  %897 = vmatmul.f32.gmra.mxu3 %v604_v41  ;;  %v377_v40 = vld [vmem:[%s11828_s1 + $0x670] sm:$0xff]  ;;  %v394_v41 = vld [vmem:[%s11828_s1 + $0x6f8] sm:$0xff] }
  0x62   : > { %970 = vmatpush.msra.mxu2 %v341_v42  ;;  %998 = vmatpush.msra.mxu3 %v358_v43  ;;  %v408_v42 = vld [vmem:[%s11828_s1 + $0x768] sm:$0xff]  ;;  %v425_v43 = vld [vmem:[%s11828_s1 + $0x7f0] sm:$0xff] }
  0x63   : > { %912 = vmatpush.msra.mxu0 %v309_v44  ;;  %940 = vmatpush.msra.mxu1 %v326_v45  ;;  %v376_v44 = vld [vmem:[%s11828_s1 + $0x668] sm:$0xff]  ;;  %v393_v45 = vld [vmem:[%s11828_s1 + $0x6f0] sm:$0xff] }
  0x64   : > { %971 = vmatpush.msra.mxu2 %v340_v46  ;;  %999 = vmatpush.msra.mxu3 %v357_v47  ;;  %v407_v46 = vld [vmem:[%s11828_s1 + $0x760] sm:$0xff]  ;;  %v424_v47 = vld [vmem:[%s11828_s1 + $0x7e8] sm:$0xff] }
  0x65   : > { %913 = vmatpush.msra.mxu0 %v308_v48  ;;  %941 = vmatpush.msra.mxu1 %v325_v49  ;;  %v375_v48 = vld [vmem:[%s11828_s1 + $0x660] sm:$0xff]  ;;  %v392_v49 = vld [vmem:[%s11828_s1 + $0x6e8] sm:$0xff] }
  0x66   : > { %972 = vmatpush.msra.mxu2 %v339_v50  ;;  %1000 = vmatpush.msra.mxu3 %v356_v51  ;;  %v605_v50 = vld [vmem:[%s5712_s7 + $0x108] sm:$0xff]  ;;  %v607_v51 = vld [vmem:[%s5712_s7 + $0x118] sm:$0xff] }
  0x67   : > { %914 = vmatpush.msra.mxu0 %v307_v52  ;;  %942 = vmatpush.msra.mxu1 %v324_v53  ;;  %v406_v52 = vld [vmem:[%s11828_s1 + $0x758] sm:$0xff]  ;;  %v423_v53 = vld [vmem:[%s11828_s1 + $0x7e0] sm:$0xff] }
  0x68   : > { %813 = vmatmul.f32.gmra.mxu0 %v626_v54  ;;  %871 = vmatmul.f32.gmra.mxu2 %v628_v55  ;;  %v374_v54 = vld [vmem:[%s11828_s1 + $0x658] sm:$0xff]  ;;  %v391_v55 = vld [vmem:[%s11828_s1 + $0x6e0] sm:$0xff] }
  0x69   : > { %973 = vmatpush.msra.mxu2 %v338_v56  ;;  %1001 = vmatpush.msra.mxu3 %v355_v57  ;;  %v606_v56 = vld [vmem:[%s5712_s7 + $0x110] sm:$0xff]  ;;  %v608_v57 = vld [vmem:[%s5712_s7 + $0x120] sm:$0xff] }
  0x6a   : > { %915 = vmatpush.msra.mxu0 %v306_v58  ;;  %943 = vmatpush.msra.mxu1 %v323_v59  ;;  %v405_v58 = vld [vmem:[%s11828_s1 + $0x750] sm:$0xff]  ;;  %v422_v59 = vld [vmem:[%s11828_s1 + $0x7d8] sm:$0xff] }
  0x6b   : > { %842 = vmatmul.f32.gmra.mxu1 %v627_v60  ;;  %900 = vmatmul.f32.gmra.mxu3 %v629_v61  ;;  %v373_v60 = vld [vmem:[%s11828_s1 + $0x650] sm:$0xff]  ;;  %v390_v61 = vld [vmem:[%s11828_s1 + $0x6d8] sm:$0xff] }
  0x6c   : > { %974 = vmatpush.msra.mxu2 %v337_v62  ;;  %1002 = vmatpush.msra.mxu3 %v354_v63  ;;  %v404_v62 = vld [vmem:[%s11828_s1 + $0x748] sm:$0xff]  ;;  %v421_v63 = vld [vmem:[%s11828_s1 + $0x7d0] sm:$0xff] }
  0x6d   : > { %916 = vmatpush.msra.mxu0 %v305_v0  ;;  %944 = vmatpush.msra.mxu1 %v322_v1  ;;  %v372_v0 = vld [vmem:[%s11828_s1 + $0x648] sm:$0xff]  ;;  %v389_v1 = vld [vmem:[%s11828_s1 + $0x6d0] sm:$0xff] }
  0x6e   : > { %975 = vmatpush.msra.mxu2 %v336_v2  ;;  %1003 = vmatpush.msra.mxu3 %v353_v3  ;;  %v403_v2 = vld [vmem:[%s11828_s1 + $0x740] sm:$0xff]  ;;  %v420_v3 = vld [vmem:[%s11828_s1 + $0x7c8] sm:$0xff] }
  0x6f   : > { %917 = vmatpush.msra.mxu0 %v304_v4  ;;  %945 = vmatpush.msra.mxu1 %v321_v5  ;;  %v371_v4 = vld [vmem:[%s11828_s1 + $0x640] sm:$0xff]  ;;  %v388_v5 = vld [vmem:[%s11828_s1 + $0x6c8] sm:$0xff] }
  0x70   : > { %976 = vmatpush.msra.mxu2 %v335_v6  ;;  %1004 = vmatpush.msra.mxu3 %v352_v7  ;;  %v630_v6 = vld [vmem:[%s5712_s7 + $0x1d0] sm:$0xff]  ;;  %v632_v7 = vld [vmem:[%s5712_s7 + $0x1e0] sm:$0xff] }
  0x71   : > { %918 = vmatpush.msra.mxu0 %v303_v8  ;;  %946 = vmatpush.msra.mxu1 %v320_v9  ;;  %v402_v8 = vld [vmem:[%s11828_s1 + $0x738] sm:$0xff]  ;;  %v419_v9 = vld [vmem:[%s11828_s1 + $0x7c0] sm:$0xff] }
  0x72   : > { %816 = vmatmul.f32.gmra.mxu0 %v651_v10  ;;  %874 = vmatmul.f32.gmra.mxu2 %v653_v11  ;;  %v370_v10 = vld [vmem:[%s11828_s1 + $0x638] sm:$0xff]  ;;  %v387_v11 = vld [vmem:[%s11828_s1 + $0x6c0] sm:$0xff] }
  0x73   : > { %977 = vmatpush.msra.mxu2 %v334_v12  ;;  %1005 = vmatpush.msra.mxu3 %v351_v13  ;;  %v631_v12 = vld [vmem:[%s5712_s7 + $0x1d8] sm:$0xff]  ;;  %v633_v13 = vld [vmem:[%s5712_s7 + $0x1e8] sm:$0xff] }
  0x74   : > { %919 = vmatpush.msra.mxu0 %v302_v14  ;;  %947 = vmatpush.msra.mxu1 %v319_v15  ;;  %v401_v14 = vld [vmem:[%s11828_s1 + $0x730] sm:$0xff]  ;;  %v418_v15 = vld [vmem:[%s11828_s1 + $0x7b8] sm:$0xff] }
  0x75   : > { %845 = vmatmul.f32.gmra.mxu1 %v652_v16  ;;  %903 = vmatmul.f32.gmra.mxu3 %v654_v17  ;;  %v369_v16 = vld [vmem:[%s11828_s1 + $0x630] sm:$0xff]  ;;  %v386_v17 = vld [vmem:[%s11828_s1 + $0x6b8] sm:$0xff] }
  0x76   : > { %978 = vmatpush.msra.mxu2 %v333_v18  ;;  %1006 = vmatpush.msra.mxu3 %v350_v19  ;;  %v400_v18 = vld [vmem:[%s11828_s1 + $0x728] sm:$0xff]  ;;  %v417_v19 = vld [vmem:[%s11828_s1 + $0x7b0] sm:$0xff] }
  0x77   : > { %920 = vmatpush.msra.mxu0 %v301_v20  ;;  %948 = vmatpush.msra.mxu1 %v318_v21  ;;  %v368_v20 = vld [vmem:[%s11828_s1 + $0x628] sm:$0xff]  ;;  %v385_v21 = vld [vmem:[%s11828_s1 + $0x6b0] sm:$0xff] }
  0x78   : > { %979 = vmatpush.msra.mxu2 %v332_v22  ;;  %1007 = vmatpush.msra.mxu3 %v349_v23  ;;  %v399_v22 = vld [vmem:[%s11828_s1 + $0x720] sm:$0xff]  ;;  %v416_v23 = vld [vmem:[%s11828_s1 + $0x7a8] sm:$0xff] }
  0x79   : > { %921 = vmatpush.msra.mxu0 %v300_v24  ;;  %949 = vmatpush.msra.mxu1 %v317_v25  ;;  %v367_v24 = vld [vmem:[%s11828_s1 + $0x620] sm:$0xff]  ;;  %v384_v25 = vld [vmem:[%s11828_s1 + $0x6a8] sm:$0xff] }
  0x7a   : > { %980 = vmatpush.msra.mxu2 %v331_v26  ;;  %1008 = vmatpush.msra.mxu3 %v348_v27  ;;  %v655_v26 = vld [vmem:[%s5712_s7 + $0x298] sm:$0x1]  ;;  %v657_v27 = vld [vmem:[%s5712_s7 + $0x2a8] sm:$0x1] }
  0x7b   : > { %922 = vmatpush.msra.mxu0 %v299_v28  ;;  %950 = vmatpush.msra.mxu1 %v316_v29  ;;  %v398_v28 = vld [vmem:[%s11828_s1 + $0x718] sm:$0xff]  ;;  %v415_v29 = vld [vmem:[%s11828_s1 + $0x7a0] sm:$0xff] }
  0x7c   : > { %923 = vmatmul.f32.vlgmr.msra.gmra.mxu0 %v580_v30  ;;  %981 = vmatmul.f32.vlgmr.msra.gmra.mxu2 %v582_v31  ;;  %v366_v30 = vld [vmem:[%s11828_s1 + $0x618] sm:$0xff]  ;;  %v383_v31 = vld [vmem:[%s11828_s1 + $0x6a0] sm:$0xff] }
  0x7d   : > { %1009 = vmatpush.msra.mxu3 %v347_v32  ;;  %1081 = vmatpush.msrb.mxu2 %v410_v33  ;;  %v656_v32 = vld [vmem:[%s5712_s7 + $0x2a0] sm:$0x1]  ;;  %v658_v33 = vld [vmem:[%s5712_s7 + $0x2b0] sm:$0x1] }
  0x7e   : > { %951 = vmatpush.msra.mxu1 %v315_v34  ;;  %1023 = vmatpush.msrb.mxu0 %v378_v35  ;;  %v397_v34 = vld [vmem:[%s11828_s1 + $0x710] sm:$0xff]  ;;  %v414_v35 = vld [vmem:[%s11828_s1 + $0x798] sm:$0xff] }
  0x7f   : > { %952 = vmatmul.f32.vlgmr.msra.gmra.mxu1 %v581_v36  ;;  %1010 = vmatmul.f32.vlgmr.msra.gmra.mxu3 %v583_v37  ;;  %v365_v36 = vld [vmem:[%s11828_s1 + $0x610] sm:$0xff]  ;;  %v382_v37 = vld [vmem:[%s11828_s1 + $0x698] sm:$0xff] }
  0x80   : > { %1082 = vmatpush.msrb.mxu2 %v409_v38  ;;  %1110 = vmatpush.msrb.mxu3 %v426_v39  ;;  %v396_v38 = vld [vmem:[%s11828_s1 + $0x708] sm:$0xff]  ;;  %v413_v39 = vld [vmem:[%s11828_s1 + $0x790] sm:$0xff] }
  0x81   : > { %1024 = vmatpush.msrb.mxu0 %v377_v40  ;;  %1052 = vmatpush.msrb.mxu1 %v394_v41  ;;  %v364_v40 = vld [vmem:[%s11828_s1 + $0x608] sm:$0xff]  ;;  %v381_v41 = vld [vmem:[%s11828_s1 + $0x690] sm:$0xff] }
  0x82   : > { %1083 = vmatpush.msrb.mxu2 %v408_v42  ;;  %1111 = vmatpush.msrb.mxu3 %v425_v43  ;;  %v395_v42 = vld [vmem:[%s11828_s1 + $0x700] sm:$0xff]  ;;  %v412_v43 = vld [vmem:[%s11828_s1 + $0x788] sm:$0xff] }
  0x83   : > { %1025 = vmatpush.msrb.mxu0 %v376_v44  ;;  %1053 = vmatpush.msrb.mxu1 %v393_v45  ;;  %v363_v44 = vld [vmem:[%s11828_s1 + $0x600] sm:$0xff]  ;;  %v380_v45 = vld [vmem:[%s11828_s1 + $0x688] sm:$0xff] }
  0x84   : > { %1084 = vmatpush.msrb.mxu2 %v407_v46  ;;  %1112 = vmatpush.msrb.mxu3 %v424_v47  ;;  %v584_v46 = vld [vmem:[%s5712_s7 + $0x60] sm:$0xff]  ;;  %v586_v47 = vld [vmem:[%s5712_s7 + $0x70] sm:$0xff] }
  0x85   : > { %1026 = vmatpush.msrb.mxu0 %v375_v48  ;;  %1054 = vmatpush.msrb.mxu1 %v392_v49  ;;  %v411_v48 = vld [vmem:[%s11828_s1 + $0x780] sm:$0xff]  ;;  %v474_v49 = vld [vmem:[%s11828_s1 + $0x978] sm:$0xff] }
  0x86   : > { %926 = vmatmul.f32.gmra.mxu0 %v605_v50  ;;  %984 = vmatmul.f32.gmra.mxu2 %v607_v51  ;;  %v379_v50 = vld [vmem:[%s11828_s1 + $0x680] sm:$0xff]  ;;  %v442_v51 = vld [vmem:[%s11828_s1 + $0x878] sm:$0xff] }
  0x87   : > { %1085 = vmatpush.msrb.mxu2 %v406_v52  ;;  %1113 = vmatpush.msrb.mxu3 %v423_v53  ;;  %v585_v52 = vld [vmem:[%s5712_s7 + $0x68] sm:$0xff]  ;;  %v587_v53 = vld [vmem:[%s5712_s7 + $0x78] sm:$0xff] }
  0x88   : > { %1027 = vmatpush.msrb.mxu0 %v374_v54  ;;  %1055 = vmatpush.msrb.mxu1 %v391_v55  ;;  %v473_v54 = vld [vmem:[%s11828_s1 + $0x970] sm:$0xff]  ;;  %v490_v55 = vld [vmem:[%s11828_s1 + $0x9f8] sm:$0xff] }
  0x89   : > { %955 = vmatmul.f32.gmra.mxu1 %v606_v56  ;;  %1013 = vmatmul.f32.gmra.mxu3 %v608_v57  ;;  %v441_v56 = vld [vmem:[%s11828_s1 + $0x870] sm:$0xff]  ;;  %v458_v57 = vld [vmem:[%s11828_s1 + $0x8f8] sm:$0xff] }
  0x8a   : > { %1086 = vmatpush.msrb.mxu2 %v405_v58  ;;  %1114 = vmatpush.msrb.mxu3 %v422_v59  ;;  %v472_v58 = vld [vmem:[%s11828_s1 + $0x968] sm:$0xff]  ;;  %v489_v59 = vld [vmem:[%s11828_s1 + $0x9f0] sm:$0xff] }
  0x8b   : > { %1028 = vmatpush.msrb.mxu0 %v373_v60  ;;  %1056 = vmatpush.msrb.mxu1 %v390_v61  ;;  %v440_v60 = vld [vmem:[%s11828_s1 + $0x868] sm:$0xff]  ;;  %v457_v61 = vld [vmem:[%s11828_s1 + $0x8f0] sm:$0xff] }
  0x8c   : > { %1087 = vmatpush.msrb.mxu2 %v404_v62  ;;  %1115 = vmatpush.msrb.mxu3 %v421_v63  ;;  %v471_v62 = vld [vmem:[%s11828_s1 + $0x960] sm:$0xff]  ;;  %v488_v63 = vld [vmem:[%s11828_s1 + $0x9e8] sm:$0xff] }
  0x8d   : > { %1029 = vmatpush.msrb.mxu0 %v372_v0  ;;  %1057 = vmatpush.msrb.mxu1 %v389_v1  ;;  %v439_v1 = vld [vmem:[%s11828_s1 + $0x860] sm:$0xff] }
  0x8e   : > { %1088 = vmatpush.msrb.mxu2 %v403_v2  ;;  %1116 = vmatpush.msrb.mxu3 %v420_v3  ;;  %v456_v2 = vld [vmem:[%s11828_s1 + $0x8e8] sm:$0xff] }
  0x8f   : > { %1030 = vmatpush.msrb.mxu0 %v371_v4  ;;  %1058 = vmatpush.msrb.mxu1 %v388_v5  ;;  %v609_v3 = vld [vmem:[%s5712_s7 + $0x128] sm:$0xff]  ;;  %v611_v4 = vld [vmem:[%s5712_s7 + $0x138] sm:$0xff] }
  0x90   : > { %929 = vmatmul.f32.gmra.mxu0 %v630_v6  ;;  %987 = vmatmul.f32.gmra.mxu2 %v632_v7  ;;  %v470_v5 = vld [vmem:[%s11828_s1 + $0x958] sm:$0xff]  ;;  %v487_v6 = vld [vmem:[%s11828_s1 + $0x9e0] sm:$0xff] }
  0x91   : > { %1089 = vmatpush.msrb.mxu2 %v402_v8  ;;  %1117 = vmatpush.msrb.mxu3 %v419_v9  ;;  %v438_v8 = vld [vmem:[%s11828_s1 + $0x858] sm:$0xff]  ;;  %v455_v9 = vld [vmem:[%s11828_s1 + $0x8e0] sm:$0xff] }
  0x92   : > { %1031 = vmatpush.msrb.mxu0 %v370_v10  ;;  %1059 = vmatpush.msrb.mxu1 %v387_v11  ;;  %v610_v10 = vld [vmem:[%s5712_s7 + $0x130] sm:$0xff]  ;;  %v612_v11 = vld [vmem:[%s5712_s7 + $0x140] sm:$0xff] }
  0x93   : > { %958 = vmatmul.f32.gmra.mxu1 %v631_v12  ;;  %1016 = vmatmul.f32.gmra.mxu3 %v633_v13  ;;  %v469_v12 = vld [vmem:[%s11828_s1 + $0x950] sm:$0xff]  ;;  %v486_v13 = vld [vmem:[%s11828_s1 + $0x9d8] sm:$0xff] }
  0x94   : > { %1090 = vmatpush.msrb.mxu2 %v401_v14  ;;  %1118 = vmatpush.msrb.mxu3 %v418_v15  ;;  %v437_v14 = vld [vmem:[%s11828_s1 + $0x850] sm:$0xff]  ;;  %v454_v15 = vld [vmem:[%s11828_s1 + $0x8d8] sm:$0xff] }
  0x95   : > { %1032 = vmatpush.msrb.mxu0 %v369_v16  ;;  %1060 = vmatpush.msrb.mxu1 %v386_v17  ;;  %v468_v17 = vld [vmem:[%s11828_s1 + $0x948] sm:$0xff] }
  0x96   : > { %1091 = vmatpush.msrb.mxu2 %v400_v18  ;;  %1119 = vmatpush.msrb.mxu3 %v417_v19  ;;  %v485_v18 = vld [vmem:[%s11828_s1 + $0x9d0] sm:$0xff]  ;;  %v436_v19 = vld [vmem:[%s11828_s1 + $0x848] sm:$0xff] }
  0x97   : > { %1033 = vmatpush.msrb.mxu0 %v368_v20  ;;  %1061 = vmatpush.msrb.mxu1 %v385_v21  ;;  %v453_v20 = vld [vmem:[%s11828_s1 + $0x8d0] sm:$0xff] }
  0x98   : > { %1092 = vmatpush.msrb.mxu2 %v399_v22  ;;  %1120 = vmatpush.msrb.mxu3 %v416_v23  ;;  %v467_v22 = vld [vmem:[%s11828_s1 + $0x940] sm:$0xff]  ;;  %v484_v23 = vld [vmem:[%s11828_s1 + $0x9c8] sm:$0xff] }
  0x99   : > { %1034 = vmatpush.msrb.mxu0 %v367_v24  ;;  %1062 = vmatpush.msrb.mxu1 %v384_v25  ;;  %v435_v25 = vld [vmem:[%s11828_s1 + $0x840] sm:$0xff] }
  0x9a   : > { %932 = vmatmul.f32.gmra.mxu0 %v655_v26  ;;  %990 = vmatmul.f32.gmra.mxu2 %v657_v27  ;;  %v452_v26 = vld [vmem:[%s11828_s1 + $0x8c8] sm:$0xff]  ;;  %v634_v27 = vld [vmem:[%s5712_s7 + $0x1f0] sm:$0xff] }
  0x9b   : > { %1093 = vmatpush.msrb.mxu2 %v398_v28  ;;  %1121 = vmatpush.msrb.mxu3 %v415_v29  ;;  %v636_v28 = vld [vmem:[%s5712_s7 + $0x200] sm:$0xff]  ;;  %v466_v29 = vld [vmem:[%s11828_s1 + $0x938] sm:$0xff] }
  0x9c   : > { %1035 = vmatpush.msrb.mxu0 %v366_v30  ;;  %1063 = vmatpush.msrb.mxu1 %v383_v31  ;;  %v483_v30 = vld [vmem:[%s11828_s1 + $0x9c0] sm:$0xff] }
  0x9d   : > { %961 = vmatmul.f32.gmra.mxu1 %v656_v32  ;;  %1019 = vmatmul.f32.gmra.mxu3 %v658_v33  ;;  %v434_v32 = vld [vmem:[%s11828_s1 + $0x838] sm:$0xff]  ;;  %v451_v33 = vld [vmem:[%s11828_s1 + $0x8c0] sm:$0xff] }
  0x9e   : > { %1094 = vmatpush.msrb.mxu2 %v397_v34  ;;  %1122 = vmatpush.msrb.mxu3 %v414_v35  ;;  %v635_v34 = vld [vmem:[%s5712_s7 + $0x1f8] sm:$0xff]  ;;  %v637_v35 = vld [vmem:[%s5712_s7 + $0x208] sm:$0xff] }
  0x9f   : > { %1036 = vmatpush.msrb.mxu0 %v365_v36  ;;  %1064 = vmatpush.msrb.mxu1 %v382_v37  ;;  %v465_v36 = vld [vmem:[%s11828_s1 + $0x930] sm:$0xff]  ;;  %v482_v37 = vld [vmem:[%s11828_s1 + $0x9b8] sm:$0xff] }
  0xa0   : > { %1095 = vmatpush.msrb.mxu2 %v396_v38  ;;  %1123 = vmatpush.msrb.mxu3 %v413_v39  ;;  %v433_v38 = vld [vmem:[%s11828_s1 + $0x830] sm:$0xff]  ;;  %v450_v39 = vld [vmem:[%s11828_s1 + $0x8b8] sm:$0xff] }
  0xa1   : > { %1037 = vmatpush.msrb.mxu0 %v364_v40  ;;  %1065 = vmatpush.msrb.mxu1 %v381_v41  ;;  %v464_v41 = vld [vmem:[%s11828_s1 + $0x928] sm:$0xff] }
  0xa2   : > { %1096 = vmatpush.msrb.mxu2 %v395_v42  ;;  %1124 = vmatpush.msrb.mxu3 %v412_v43  ;;  %v481_v42 = vld [vmem:[%s11828_s1 + $0x9b0] sm:$0xff]  ;;  %v432_v43 = vld [vmem:[%s11828_s1 + $0x828] sm:$0xff] }
  0xa3   : > { %1038 = vmatpush.msrb.mxu0 %v363_v44  ;;  %1066 = vmatpush.msrb.mxu1 %v380_v45  ;;  %v449_v44 = vld [vmem:[%s11828_s1 + $0x8b0] sm:$0xff] }
  0xa4   : > { %1039 = vmatmul.f32.vlgmr.msrb.gmra.mxu0 %v584_v46  ;;  %1097 = vmatmul.f32.vlgmr.msrb.gmra.mxu2 %v586_v47  ;;  %v463_v46 = vld [vmem:[%s11828_s1 + $0x920] sm:$0xff]  ;;  %v480_v47 = vld [vmem:[%s11828_s1 + $0x9a8] sm:$0xff] }
  0xa5   : > { %1125 = vmatpush.msrb.mxu3 %v411_v48  ;;  %1197 = vmatpush.msra.mxu2 %v474_v49  ;;  %v431_v49 = vld [vmem:[%s11828_s1 + $0x820] sm:$0xff] }
  0xa6   : > { %1067 = vmatpush.msrb.mxu1 %v379_v50  ;;  %1139 = vmatpush.msra.mxu0 %v442_v51  ;;  %v448_v50 = vld [vmem:[%s11828_s1 + $0x8a8] sm:$0xff]  ;;  %v659_v51 = vld [vmem:[%s5712_s7 + $0x2b8] sm:$0x1] }
  0xa7   : > { %1068 = vmatmul.f32.vlgmr.msrb.gmra.mxu1 %v585_v52  ;;  %1126 = vmatmul.f32.vlgmr.msrb.gmra.mxu3 %v587_v53  ;;  %v661_v52 = vld [vmem:[%s5712_s7 + $0x2c8] sm:$0x1]  ;;  %v462_v53 = vld [vmem:[%s11828_s1 + $0x918] sm:$0xff] }
  0xa8   : > { %1198 = vmatpush.msra.mxu2 %v473_v54  ;;  %1226 = vmatpush.msra.mxu3 %v490_v55  ;;  %v479_v54 = vld [vmem:[%s11828_s1 + $0x9a0] sm:$0xff] }
  0xa9   : > { %1140 = vmatpush.msra.mxu0 %v441_v56  ;;  %1168 = vmatpush.msra.mxu1 %v458_v57  ;;  %v6396_v0 = vpop.f32.mrf.mxu0  ;;  %v430_v56 = vld [vmem:[%s11828_s1 + $0x818] sm:$0xff]  ;;  %v447_v57 = vld [vmem:[%s11828_s1 + $0x8a0] sm:$0xff] }
  0xaa   : > { %1199 = vmatpush.msra.mxu2 %v472_v58  ;;  %1227 = vmatpush.msra.mxu3 %v489_v59  ;;  %v660_v58 = vld [vmem:[%s5712_s7 + $0x2c0] sm:$0x1]  ;;  %v662_v59 = vld [vmem:[%s5712_s7 + $0x2d0] sm:$0x1] }
  0xab   : > { %1141 = vmatpush.msra.mxu0 %v440_v60  ;;  %1169 = vmatpush.msra.mxu1 %v457_v61  ;;  %v461_v60 = vld [vmem:[%s11828_s1 + $0x910] sm:$0xff]  ;;  %v478_v61 = vld [vmem:[%s11828_s1 + $0x998] sm:$0xff] }
  0xac   : > { %1200 = vmatpush.msra.mxu2 %v471_v62  ;;  %1228 = vmatpush.msra.mxu3 %v488_v63  ;;  %v6412_v7 = vpop.f32.mrf.mxu1  ;;  %v429_v62 = vld [vmem:[%s11828_s1 + $0x810] sm:$0xff]  ;;  %v446_v63 = vld [vmem:[%s11828_s1 + $0x898] sm:$0xff] }
  0xad   : > { %1142 = vmatpush.msra.mxu0 %v439_v1  ;;  %1170 = vmatpush.msra.mxu1 %v456_v2  ;;  %v460_v2 = vld [vmem:[%s11828_s1 + $0x908] sm:$0xff] }
  0xae   : > { %1042 = vmatmul.f32.gmra.mxu0 %v609_v3  ;;  %1100 = vmatmul.f32.gmra.mxu2 %v611_v4  ;;  %v477_v3 = vld [vmem:[%s11828_s1 + $0x990] sm:$0xff]  ;;  %v428_v4 = vld [vmem:[%s11828_s1 + $0x808] sm:$0xff] }
  0xaf   : > { %1201 = vmatpush.msra.mxu2 %v470_v5  ;;  %1229 = vmatpush.msra.mxu3 %v487_v6  ;;  %v6434_v16 = vpop.f32.mrf.mxu2  ;;  %v445_v5 = vld [vmem:[%s11828_s1 + $0x890] sm:$0xff] }
  0xb0   : > { %1143 = vmatpush.msra.mxu0 %v438_v8  ;;  %1171 = vmatpush.msra.mxu1 %v455_v9  ;;  %v459_v8 = vld [vmem:[%s11828_s1 + $0x900] sm:$0xff]  ;;  %v476_v9 = vld [vmem:[%s11828_s1 + $0x988] sm:$0xff] }
  0xb1   : > { %1071 = vmatmul.f32.gmra.mxu1 %v610_v10  ;;  %1129 = vmatmul.f32.gmra.mxu3 %v612_v11  ;;  %v427_v11 = vld [vmem:[%s11828_s1 + $0x800] sm:$0xff] }
  0xb2   : > { %1202 = vmatpush.msra.mxu2 %v469_v12  ;;  %1230 = vmatpush.msra.mxu3 %v486_v13  ;;  %v6448_v21 = vpop.f32.mrf.mxu3  ;;  %v444_v12 = vld [vmem:[%s11828_s1 + $0x888] sm:$0xff]  ;;  %v588_v13 = vld [vmem:[%s5712_s7 + $0x80] sm:$0xff] }
  0xb3   : > { %1144 = vmatpush.msra.mxu0 %v437_v14  ;;  %1172 = vmatpush.msra.mxu1 %v454_v15  ;;  %v6456_v24 = vpop.f32.mrf.mxu0  ;;  %v590_v14 = vld [vmem:[%s5712_s7 + $0x90] sm:$0xff]  ;;  %v475_v15 = vld [vmem:[%s11828_s1 + $0x980] sm:$0xff] }
  0xb4   : > { %1203 = vmatpush.msra.mxu2 %v468_v17  ;;  %1231 = vmatpush.msra.mxu3 %v485_v18  ;;  %v538_v17 = vld [vmem:[%s11828_s1 + $0xb78] sm:$0xff] }
  0xb5   : > { %1145 = vmatpush.msra.mxu0 %v436_v19  ;;  %1173 = vmatpush.msra.mxu1 %v453_v20  ;;  %v443_v19 = vld [vmem:[%s11828_s1 + $0x880] sm:$0xff]  ;;  %v506_v20 = vld [vmem:[%s11828_s1 + $0xa78] sm:$0xff] }
  0xb6   : > { %1204 = vmatpush.msra.mxu2 %v467_v22  ;;  %1232 = vmatpush.msra.mxu3 %v484_v23  ;;  %v6472_v31 = vpop.f32.mrf.mxu1  ;;  %v589_v22 = vld [vmem:[%s5712_s7 + $0x88] sm:$0xff]  ;;  %v591_v23 = vld [vmem:[%s5712_s7 + $0x98] sm:$0xff] }
  0xb7   : > { %1146 = vmatpush.msra.mxu0 %v435_v25  ;;  %1174 = vmatpush.msra.mxu1 %v452_v26  ;;  %v537_v25 = vld [vmem:[%s11828_s1 + $0xb70] sm:$0xff]  ;;  %v554_v26 = vld [vmem:[%s11828_s1 + $0xbf8] sm:$0xff] }
  0xb8   : > { %1045 = vmatmul.f32.gmra.mxu0 %v634_v27  ;;  %1103 = vmatmul.f32.gmra.mxu2 %v636_v28  ;;  %v505_v27 = vld [vmem:[%s11828_s1 + $0xa70] sm:$0xff]  ;;  %v522_v28 = vld [vmem:[%s11828_s1 + $0xaf8] sm:$0xff] }
  0xb9   : > { %1205 = vmatpush.msra.mxu2 %v466_v29  ;;  %1233 = vmatpush.msra.mxu3 %v483_v30  ;;  %v6494_v40 = vpop.f32.mrf.mxu2  ;;  %v536_v30 = vld [vmem:[%s11828_s1 + $0xb68] sm:$0xff] }
  0xba   : > { %1147 = vmatpush.msra.mxu0 %v434_v32  ;;  %1175 = vmatpush.msra.mxu1 %v451_v33  ;;  %v553_v32 = vld [vmem:[%s11828_s1 + $0xbf0] sm:$0xff]  ;;  %v504_v33 = vld [vmem:[%s11828_s1 + $0xa68] sm:$0xff] }
  0xbb   : > { %1074 = vmatmul.f32.gmra.mxu1 %v635_v34  ;;  %1132 = vmatmul.f32.gmra.mxu3 %v637_v35  ;;  %v521_v34 = vld [vmem:[%s11828_s1 + $0xaf0] sm:$0xff] }
  0xbc   : > { %1206 = vmatpush.msra.mxu2 %v465_v36  ;;  %1234 = vmatpush.msra.mxu3 %v482_v37  ;;  %v6508_v45 = vpop.f32.mrf.mxu3  ;;  %v535_v36 = vld [vmem:[%s11828_s1 + $0xb60] sm:$0xff]  ;;  %v552_v37 = vld [vmem:[%s11828_s1 + $0xbe8] sm:$0xff] }
  0xbd   : > { %1148 = vmatpush.msra.mxu0 %v433_v38  ;;  %1176 = vmatpush.msra.mxu1 %v450_v39  ;;  %v6516_v48 = vpop.f32.mrf.mxu0  ;;  %v503_v39 = vld [vmem:[%s11828_s1 + $0xa60] sm:$0xff] }
  0xbe   : > { %1207 = vmatpush.msra.mxu2 %v464_v41  ;;  %1235 = vmatpush.msra.mxu3 %v481_v42  ;;  %v520_v41 = vld [vmem:[%s11828_s1 + $0xae8] sm:$0xff] }
  0xbf   : > { %1149 = vmatpush.msra.mxu0 %v432_v43  ;;  %1177 = vmatpush.msra.mxu1 %v449_v44  ;;  %v613_v42 = vld [vmem:[%s5712_s7 + $0x148] sm:$0xff]  ;;  %v615_v43 = vld [vmem:[%s5712_s7 + $0x158] sm:$0xff] }
  0xc0   : > { %1208 = vmatpush.msra.mxu2 %v463_v46  ;;  %1236 = vmatpush.msra.mxu3 %v480_v47  ;;  %v6532_v55 = vpop.f32.mrf.mxu1  ;;  %v534_v44 = vld [vmem:[%s11828_s1 + $0xb58] sm:$0xff]  ;;  %v551_v46 = vld [vmem:[%s11828_s1 + $0xbe0] sm:$0xff] }
  0xc1   : > { %1150 = vmatpush.msra.mxu0 %v431_v49  ;;  %1178 = vmatpush.msra.mxu1 %v448_v50  ;;  %v502_v49 = vld [vmem:[%s11828_s1 + $0xa58] sm:$0xff]  ;;  %v519_v50 = vld [vmem:[%s11828_s1 + $0xae0] sm:$0xff] }
  0xc2   : > { %1048 = vmatmul.f32.gmra.mxu0 %v659_v51  ;;  %1106 = vmatmul.f32.gmra.mxu2 %v661_v52  ;;  %v614_v51 = vld [vmem:[%s5712_s7 + $0x150] sm:$0xff]  ;;  %v616_v52 = vld [vmem:[%s5712_s7 + $0x160] sm:$0xff] }
  0xc3   : > { %1209 = vmatpush.msra.mxu2 %v462_v53  ;;  %1237 = vmatpush.msra.mxu3 %v479_v54  ;;  %v6554_v1 = vpop.f32.mrf.mxu2  ;;  %v533_v53 = vld [vmem:[%s11828_s1 + $0xb50] sm:$0xff]  ;;  %v550_v54 = vld [vmem:[%s11828_s1 + $0xbd8] sm:$0xff] }
  0xc4   : > { %1151 = vmatpush.msra.mxu0 %v430_v56  ;;  %1179 = vmatpush.msra.mxu1 %v447_v57  ;;  %v501_v56 = vld [vmem:[%s11828_s1 + $0xa50] sm:$0xff]  ;;  %v518_v57 = vld [vmem:[%s11828_s1 + $0xad8] sm:$0xff] }
  0xc5   : > { %1077 = vmatmul.f32.gmra.mxu1 %v660_v58  ;;  %1135 = vmatmul.f32.gmra.mxu3 %v662_v59  ;;  %v532_v59 = vld [vmem:[%s11828_s1 + $0xb48] sm:$0xff] }
  0xc6   : > { %1210 = vmatpush.msra.mxu2 %v461_v60  ;;  %1238 = vmatpush.msra.mxu3 %v478_v61  ;;  %v6568_v6 = vpop.f32.mrf.mxu3  ;;  %v549_v60 = vld [vmem:[%s11828_s1 + $0xbd0] sm:$0xff]  ;;  %v500_v61 = vld [vmem:[%s11828_s1 + $0xa48] sm:$0xff] }
  0xc7   : > { %1152 = vmatpush.msra.mxu0 %v429_v62  ;;  %1180 = vmatpush.msra.mxu1 %v446_v63  ;;  %v6576_v10 = vpop.f32.mrf.mxu0  ;;  %v517_v62 = vld [vmem:[%s11828_s1 + $0xad0] sm:$0xff] }
  0xc8   : > { %1211 = vmatpush.msra.mxu2 %v460_v2  ;;  %1239 = vmatpush.msra.mxu3 %v477_v3  ;;  %v531_v2 = vld [vmem:[%s11828_s1 + $0xb40] sm:$0xff]  ;;  %v548_v3 = vld [vmem:[%s11828_s1 + $0xbc8] sm:$0xff] }
  0xc9   : > { %1153 = vmatpush.msra.mxu0 %v428_v4  ;;  %1181 = vmatpush.msra.mxu1 %v445_v5  ;;  %v499_v5 = vld [vmem:[%s11828_s1 + $0xa40] sm:$0xff] }
  0xca   : > { %1212 = vmatpush.msra.mxu2 %v459_v8  ;;  %1240 = vmatpush.msra.mxu3 %v476_v9  ;;  %v6592_v18 = vpop.f32.mrf.mxu1  ;;  %v516_v8 = vld [vmem:[%s11828_s1 + $0xac8] sm:$0xff]  ;;  %v638_v9 = vld [vmem:[%s5712_s7 + $0x210] sm:$0xff] }
  0xcb   : > { %1154 = vmatpush.msra.mxu0 %v427_v11  ;;  %1182 = vmatpush.msra.mxu1 %v444_v12  ;;  %v640_v11 = vld [vmem:[%s5712_s7 + $0x220] sm:$0xff]  ;;  %v530_v12 = vld [vmem:[%s11828_s1 + $0xb38] sm:$0xff] }
  0xcc   : > { %1155 = vmatmul.f32.vlgmr.msra.gmra.mxu0 %v588_v13  ;;  %1213 = vmatmul.f32.vlgmr.msra.gmra.mxu2 %v590_v14  ;;  %v547_v13 = vld [vmem:[%s11828_s1 + $0xbc0] sm:$0xff] }
  0xcd   : > { %1241 = vmatpush.msra.mxu3 %v475_v15  ;;  %1313 = vmatpush.msrb.mxu2 %v538_v17  ;;  %v6614_v29 = vpop.f32.mrf.mxu2  ;;  %v498_v15 = vld [vmem:[%s11828_s1 + $0xa38] sm:$0xff]  ;;  %v515_v17 = vld [vmem:[%s11828_s1 + $0xac0] sm:$0xff] }
  0xce   : > { %1183 = vmatpush.msra.mxu1 %v443_v19  ;;  %1255 = vmatpush.msrb.mxu0 %v506_v20  ;;  %v639_v19 = vld [vmem:[%s5712_s7 + $0x218] sm:$0xff]  ;;  %v641_v20 = vld [vmem:[%s5712_s7 + $0x228] sm:$0xff] }
  0xcf   : > { %1184 = vmatmul.f32.vlgmr.msra.gmra.mxu1 %v589_v22  ;;  %1242 = vmatmul.f32.vlgmr.msra.gmra.mxu3 %v591_v23  ;;  %v529_v22 = vld [vmem:[%s11828_s1 + $0xb30] sm:$0xff]  ;;  %v546_v23 = vld [vmem:[%s11828_s1 + $0xbb8] sm:$0xff] }
  0xd0   : > { %1314 = vmatpush.msrb.mxu2 %v537_v25  ;;  %1342 = vmatpush.msrb.mxu3 %v554_v26  ;;  %v6628_v35 = vpop.f32.mrf.mxu3  ;;  %v497_v25 = vld [vmem:[%s11828_s1 + $0xa30] sm:$0xff]  ;;  %v514_v26 = vld [vmem:[%s11828_s1 + $0xab8] sm:$0xff] }
  0xd1   : > { %1256 = vmatpush.msrb.mxu0 %v505_v27  ;;  %1284 = vmatpush.msrb.mxu1 %v522_v28  ;;  %v6636_v38 = vpop.f32.mrf.mxu0  ;;  %v528_v28 = vld [vmem:[%s11828_s1 + $0xb28] sm:$0xff] }
  0xd2   : > { %1315 = vmatpush.msrb.mxu2 %v536_v30  ;;  %1343 = vmatpush.msrb.mxu3 %v553_v32  ;;  %v545_v30 = vld [vmem:[%s11828_s1 + $0xbb0] sm:$0xff]  ;;  %v496_v32 = vld [vmem:[%s11828_s1 + $0xa28] sm:$0xff] }
  0xd3   : > { %1257 = vmatpush.msrb.mxu0 %v504_v33  ;;  %1285 = vmatpush.msrb.mxu1 %v521_v34  ;;  %v513_v33 = vld [vmem:[%s11828_s1 + $0xab0] sm:$0xff] }
  0xd4   : > { %1316 = vmatpush.msrb.mxu2 %v535_v36  ;;  %1344 = vmatpush.msrb.mxu3 %v552_v37  ;;  %v6652_v47 = vpop.f32.mrf.mxu1  ;;  %v527_v36 = vld [vmem:[%s11828_s1 + $0xb20] sm:$0xff]  ;;  %v544_v37 = vld [vmem:[%s11828_s1 + $0xba8] sm:$0xff] }
  0xd5   : > { %1258 = vmatpush.msrb.mxu0 %v503_v39  ;;  %1286 = vmatpush.msrb.mxu1 %v520_v41  ;;  %v495_v41 = vld [vmem:[%s11828_s1 + $0xa20] sm:$0xff] }
  0xd6   : > { %1158 = vmatmul.f32.gmra.mxu0 %v613_v42  ;;  %1216 = vmatmul.f32.gmra.mxu2 %v615_v43  ;;  %v512_v42 = vld [vmem:[%s11828_s1 + $0xaa8] sm:$0xff]  ;;  %v663_v43 = vld [vmem:[%s5712_s7 + $0x2d8] sm:$0x1] }
  0xd7   : > { %1317 = vmatpush.msrb.mxu2 %v534_v44  ;;  %1345 = vmatpush.msrb.mxu3 %v551_v46  ;;  %v6674_v58 = vpop.f32.mrf.mxu2  ;;  %v665_v44 = vld [vmem:[%s5712_s7 + $0x2e8] sm:$0x1]  ;;  %v526_v46 = vld [vmem:[%s11828_s1 + $0xb18] sm:$0xff] }
  0xd8   : > { %1259 = vmatpush.msrb.mxu0 %v502_v49  ;;  %1287 = vmatpush.msrb.mxu1 %v519_v50  ;;  %v543_v49 = vld [vmem:[%s11828_s1 + $0xba0] sm:$0xff] }
  0xd9   : > { %1187 = vmatmul.f32.gmra.mxu1 %v614_v51  ;;  %1245 = vmatmul.f32.gmra.mxu3 %v616_v52  ;;  %v494_v51 = vld [vmem:[%s11828_s1 + $0xa18] sm:$0xff]  ;;  %v511_v52 = vld [vmem:[%s11828_s1 + $0xaa0] sm:$0xff] }
  0xda   : > { %1318 = vmatpush.msrb.mxu2 %v533_v53  ;;  %1346 = vmatpush.msrb.mxu3 %v550_v54  ;;  %v6688_v63 = vpop.f32.mrf.mxu3  ;;  %v664_v53 = vld [vmem:[%s5712_s7 + $0x2e0] sm:$0x1]  ;;  %v666_v54 = vld [vmem:[%s5712_s7 + $0x2f0] sm:$0x1] }
  0xdb   : > { %1260 = vmatpush.msrb.mxu0 %v501_v56  ;;  %1288 = vmatpush.msrb.mxu1 %v518_v57  ;;  %v6696_v4 = vpop.f32.mrf.mxu0  ;;  %v525_v56 = vld [vmem:[%s11828_s1 + $0xb10] sm:$0xff]  ;;  %v542_v57 = vld [vmem:[%s11828_s1 + $0xb98] sm:$0xff] }
  0xdc   : > { %1319 = vmatpush.msrb.mxu2 %v532_v59  ;;  %1347 = vmatpush.msrb.mxu3 %v549_v60  ;;  %v493_v59 = vld [vmem:[%s11828_s1 + $0xa10] sm:$0xff]  ;;  %v510_v60 = vld [vmem:[%s11828_s1 + $0xa98] sm:$0xff] }
  0xdd   : > { %1261 = vmatpush.msrb.mxu0 %v500_v61  ;;  %1289 = vmatpush.msrb.mxu1 %v517_v62  ;;  %v524_v62 = vld [vmem:[%s11828_s1 + $0xb08] sm:$0xff] }
  0xde   : > { %1320 = vmatpush.msrb.mxu2 %v531_v2  ;;  %1348 = vmatpush.msrb.mxu3 %v548_v3  ;;  %v6712_v14 = vpop.f32.mrf.mxu1  ;;  %v541_v2 = vld [vmem:[%s11828_s1 + $0xb90] sm:$0xff]  ;;  %v492_v3 = vld [vmem:[%s11828_s1 + $0xa08] sm:$0xff] }
  0xdf   : > { %1262 = vmatpush.msrb.mxu0 %v499_v5  ;;  %1290 = vmatpush.msrb.mxu1 %v516_v8  ;;  %v509_v5 = vld [vmem:[%s11828_s1 + $0xa90] sm:$0xff] }
  0xe0   : > { %1161 = vmatmul.f32.gmra.mxu0 %v638_v9  ;;  %1219 = vmatmul.f32.gmra.mxu2 %v640_v11  ;;  %v523_v9 = vld [vmem:[%s11828_s1 + $0xb00] sm:$0xff]  ;;  %v540_v11 = vld [vmem:[%s11828_s1 + $0xb88] sm:$0xff] }
  0xe1   : > { %1321 = vmatpush.msrb.mxu2 %v530_v12  ;;  %1349 = vmatpush.msrb.mxu3 %v547_v13  ;;  %v6734_v27 = vpop.f32.mrf.mxu2  ;;  %v491_v13 = vld [vmem:[%s11828_s1 + $0xa00] sm:$0xff] }
  0xe2   : > { %1263 = vmatpush.msrb.mxu0 %v498_v15  ;;  %1291 = vmatpush.msrb.mxu1 %v515_v17  ;;  %v508_v15 = vld [vmem:[%s11828_s1 + $0xa88] sm:$0xff]  ;;  %v592_v17 = vld [vmem:[%s5712_s7 + $0xa0] sm:$0xff] }
  0xe3   : > { %1190 = vmatmul.f32.gmra.mxu1 %v639_v19  ;;  %1248 = vmatmul.f32.gmra.mxu3 %v641_v20  ;;  %v594_v19 = vld [vmem:[%s5712_s7 + $0xb0] sm:$0xff]  ;;  %v539_v20 = vld [vmem:[%s11828_s1 + $0xb80] sm:$0xff] }
  0xe4   : > { %1322 = vmatpush.msrb.mxu2 %v529_v22  ;;  %1350 = vmatpush.msrb.mxu3 %v546_v23  ;;  %v6748_v34 = vpop.f32.mrf.mxu3  ;;  %v507_v23 = vld [vmem:[%s11828_s1 + $0xa80] sm:$0xff] }
  0xe5   : > { %1264 = vmatpush.msrb.mxu0 %v497_v25  ;;  %1292 = vmatpush.msrb.mxu1 %v514_v26  ;;  %v6756_v39 = vpop.f32.mrf.mxu0  ;;  %v570_v25 = vld [vmem:[%s11828_s1 + $0xc78] sm:$0xff]  ;;  %v593_v26 = vld [vmem:[%s5712_s7 + $0xa8] sm:$0xff] }
  0xe6   : > { %1323 = vmatpush.msrb.mxu2 %v528_v28  ;;  %1351 = vmatpush.msrb.mxu3 %v545_v30  ;;  %v595_v28 = vld [vmem:[%s5712_s7 + $0xb8] sm:$0xff] }
  0xe7   : > { %1265 = vmatpush.msrb.mxu0 %v496_v32  ;;  %1293 = vmatpush.msrb.mxu1 %v513_v33  ;;  %v4286_v30 = vld [vmem:[%s11828_s1 + $0xf8] sm:$0xff]  ;;  %v569_v32 = vld [vmem:[%s11828_s1 + $0xc70] sm:$0xff] }
  0xe8   : > { %1324 = vmatpush.msrb.mxu2 %v527_v36  ;;  %1352 = vmatpush.msrb.mxu3 %v544_v37  ;;  %v6772_v50 = vpop.f32.mrf.mxu1  ;;  %v4287_v36 = vld [vmem:[%s11828_s1 + $0xf0] sm:$0xff]  ;;  %v4288_v37 = vld [vmem:[%s11828_s1 + $0x178] sm:$0xff] }
  0xe9   : > { %1266 = vmatpush.msrb.mxu0 %v495_v41  ;;  %1294 = vmatpush.msrb.mxu1 %v512_v42  ;;  %v568_v41 = vld [vmem:[%s11828_s1 + $0xc68] sm:$0xff] }
  0xea   : > { %1164 = vmatmul.f32.gmra.mxu0 %v663_v43  ;;  %1222 = vmatmul.f32.gmra.mxu2 %v665_v44  ;;  %v4289_v43 = vld [vmem:[%s11828_s1 + $0x78] sm:$0xff] }
  0xeb   : > { %1325 = vmatpush.msrb.mxu2 %v526_v46  ;;  %1353 = vmatpush.msrb.mxu3 %v543_v49  ;;  %v6794_v61 = vpop.f32.mrf.mxu2  ;;  %v4290_v46 = vld [vmem:[%s11828_s1 + $0xe8] sm:$0xff]  ;;  %v4291_v49 = vld [vmem:[%s11828_s1 + $0x170] sm:$0xff] }
  0xec   : > { %1267 = vmatpush.msrb.mxu0 %v494_v51  ;;  %1295 = vmatpush.msrb.mxu1 %v511_v52  ;;  %v567_v51 = vld [vmem:[%s11828_s1 + $0xc60] sm:$0xff]  ;;  %v4292_v52 = vld [vmem:[%s11828_s1 + $0x70] sm:$0xff] }
  0xed   : > { %1193 = vmatmul.f32.gmra.mxu1 %v664_v53  ;;  %1251 = vmatmul.f32.gmra.mxu3 %v666_v54  ;;  %v617_v53 = vld [vmem:[%s5712_s7 + $0x168] sm:$0xff]  ;;  %v619_v54 = vld [vmem:[%s5712_s7 + $0x178] sm:$0xff] }
  0xee   : > { %1326 = vmatpush.msrb.mxu2 %v525_v56  ;;  %1354 = vmatpush.msrb.mxu3 %v542_v57  ;;  %v6808_v8 = vpop.f32.mrf.mxu3  ;;  %v4293_v56 = vld [vmem:[%s11828_s1 + $0xe0] sm:$0xff]  ;;  %v4294_v57 = vld [vmem:[%s11828_s1 + $0x168] sm:$0xff] }
  0xef   : > { %11832 = vst [vmem:[#allocation2_spill] sm:$0xff] %v6808_v8  ;;  %1268 = vmatpush.msrb.mxu0 %v493_v59  ;;  %1296 = vmatpush.msrb.mxu1 %v510_v60  ;;  %v6816_v12 = vpop.f32.mrf.mxu0  ;;  %v4295_v60 = vld [vmem:[%s11828_s1 + $0x68] sm:$0xff] }
  0xf0   : > { %1327 = vmatpush.msrb.mxu2 %v524_v62  ;;  %1355 = vmatpush.msrb.mxu3 %v541_v2  ;;  %v566_v62 = vld [vmem:[%s11828_s1 + $0xc58] sm:$0xff]  ;;  %v618_v2 = vld [vmem:[%s5712_s7 + $0x170] sm:$0xff] }
  0xf1   : > { %1269 = vmatpush.msrb.mxu0 %v492_v3  ;;  %1297 = vmatpush.msrb.mxu1 %v509_v5  ;;  %v620_v3 = vld [vmem:[%s5712_s7 + $0x180] sm:$0xff]  ;;  %v4296_v5 = vld [vmem:[%s11828_s1 + $0xd8] sm:$0xff] }
  0xf2   : > { %1328 = vmatpush.msrb.mxu2 %v523_v9  ;;  %1356 = vmatpush.msrb.mxu3 %v540_v11  ;;  %v6829_v22 = vpop.f32.mrf.mxu1  ;;  %v4297_v9 = vld [vmem:[%s11828_s1 + $0x160] sm:$0xff] }
  0xf3   : > { %1270 = vmatpush.msrb.mxu0 %v491_v13  ;;  %1298 = vmatpush.msrb.mxu1 %v508_v15  ;;  %v4298_v11 = vld [vmem:[%s11828_s1 + $0x60] sm:$0xff]  ;;  %v565_v13 = vld [vmem:[%s11828_s1 + $0xc50] sm:$0xff] }
  0xf4   : > { %1271 = vmatmul.f32.vlgmr.msrb.gmra.mxu0 %v592_v17  ;;  %1329 = vmatmul.f32.vlgmr.msrb.gmra.mxu2 %v594_v19  ;;  %v4299_v17 = vld [vmem:[%s11828_s1 + $0xd0] sm:$0xff]  ;;  %v4300_v19 = vld [vmem:[%s11828_s1 + $0x158] sm:$0xff] }
  0xf5   : > { %1357 = vmatpush.msrb.mxu3 %v539_v20  ;;  %1534 = vmatpush.msra.mxu2 %v4286_v30  ;;  %v6845_v33 = vpop.f32.mrf.mxu2  ;;  %v564_v20 = vld [vmem:[%s11828_s1 + $0xc48] sm:$0xff]  ;;  %v4303_v30 = vld [vmem:[%s11828_s1 + $0x150] sm:$0xff] }
  0xf6   : > { %1299 = vmatpush.msrb.mxu1 %v507_v23  ;;  %1371 = vmatpush.msra.mxu0 %v570_v25  ;;  %11833 = vst [vmem:[#allocation3_spill] sm:$0xff] %v6845_v33  ;;  %v4301_v25 = vld [vmem:[%s11828_s1 + $0x58] sm:$0xff] }
  0xf7   : > { %1300 = vmatmul.f32.vlgmr.msrb.gmra.mxu1 %v593_v26  ;;  %1358 = vmatmul.f32.vlgmr.msrb.gmra.mxu3 %v595_v28  ;;  %v4302_v28 = vld [vmem:[%s11828_s1 + $0xc8] sm:$0xff] }
  0xf8   : > { %1535 = vmatpush.msra.mxu2 %v4287_v36  ;;  %1563 = vmatpush.msra.mxu3 %v4288_v37  ;;  %v6856_v42 = vpop.f32.mrf.mxu3  ;;  %v4304_v36 = vld [vmem:[%s11828_s1 + $0x50] sm:$0xff] }
  0xf9   : > { %11834 = vst [vmem:[#allocation4_spill] sm:$0xff] %v6856_v42  ;;  %1372 = vmatpush.msra.mxu0 %v569_v32  ;;  %1505 = vmatpush.msra.mxu1 %v4289_v43  ;;  %v6861_v44 = vpop.f32.mrf.mxu0  ;;  %v563_v32 = vld [vmem:[%s11828_s1 + $0xc40] sm:$0xff]  ;;  %v642_v37 = vld [vmem:[%s5712_s7 + $0x230] sm:$0xff] }
  0xfa   : > { %1536 = vmatpush.msra.mxu2 %v4290_v46  ;;  %1564 = vmatpush.msra.mxu3 %v4291_v49  ;;  %v4305_v43 = vld [vmem:[%s11828_s1 + $0xc0] sm:$0xff]  ;;  %v4306_v46 = vld [vmem:[%s11828_s1 + $0x148] sm:$0xff] }
  0xfb   : > { %1373 = vmatpush.msra.mxu0 %v568_v41  ;;  %1506 = vmatpush.msra.mxu1 %v4292_v52  ;;  %v644_v41 = vld [vmem:[%s5712_s7 + $0x240] sm:$0xff]  ;;  %v562_v52 = vld [vmem:[%s11828_s1 + $0xc38] sm:$0xff] }
  0xfc   : > { %1537 = vmatpush.msra.mxu2 %v4293_v56  ;;  %1565 = vmatpush.msra.mxu3 %v4294_v57  ;;  %v6883_v59 = vpop.f32.mrf.mxu1  ;;  %v4308_v56 = vld [vmem:[%s11828_s1 + $0xb8] sm:$0xff]  ;;  %v4309_v57 = vld [vmem:[%s11828_s1 + $0x140] sm:$0xff] }
  0xfd   : > { %11835 = vst [vmem:[#allocation5_spill] sm:$0xff] %v6883_v59  ;;  %1374 = vmatpush.msra.mxu0 %v567_v51  ;;  %1507 = vmatpush.msra.mxu1 %v4295_v60  ;;  %v4307_v51 = vld [vmem:[%s11828_s1 + $0x48] sm:$0xff]  ;;  %v4310_v60 = vld [vmem:[%s11828_s1 + $0x40] sm:$0xff]  ;;  %v4247_v59 = vld [vmem:[%s5712_s7 + $0xbb0] sm:$0xff] }
  0xfe   : > { %1274 = vmatmul.f32.gmra.mxu0 %v617_v53  ;;  %1332 = vmatmul.f32.gmra.mxu2 %v619_v54  ;;  %v643_v53 = vld [vmem:[%s5712_s7 + $0x238] sm:$0xff]  ;;  %v645_v54 = vld [vmem:[%s5712_s7 + $0x248] sm:$0xff] }
  0xff   : > { %1538 = vmatpush.msra.mxu2 %v4296_v5  ;;  %1566 = vmatpush.msra.mxu3 %v4297_v9  ;;  %v6905_v15 = vpop.f32.mrf.mxu2  ;;  %v4312_v5 = vld [vmem:[%s11828_s1 + $0x138] sm:$0xff]  ;;  %v560_v9 = vld [vmem:[%s11828_s1 + $0xc28] sm:$0xff] }
 0x100   : > { %1375 = vmatpush.msra.mxu0 %v566_v62  ;;  %1508 = vmatpush.msra.mxu1 %v4298_v11  ;;  %11836 = vst [vmem:[#allocation6_spill] sm:$0xff] %v6905_v15  ;;  %v561_v62 = vld [vmem:[%s11828_s1 + $0xc30] sm:$0xff]  ;;  %v4189_v15 = vld [vmem:[%s5712_s7 + $0x9e0] sm:$0xff] }
 0x101   : > { %1303 = vmatmul.f32.gmra.mxu1 %v618_v2  ;;  %1361 = vmatmul.f32.gmra.mxu3 %v620_v3  ;;  %v4311_v3 = vld [vmem:[%s11828_s1 + $0xb0] sm:$0xff] }
 0x102   : > { %1539 = vmatpush.msra.mxu2 %v4299_v17  ;;  %1567 = vmatpush.msra.mxu3 %v4300_v19  ;;  %v6916_v23 = vpop.f32.mrf.mxu3  ;;  %v4314_v19 = vld [vmem:[%s11828_s1 + $0xa8] sm:$0xff] }
 0x103   : > { %11837 = vst [vmem:[#allocation7_spill] sm:$0xff] %v6916_v23  ;;  %1376 = vmatpush.msra.mxu0 %v565_v13  ;;  %1509 = vmatpush.msra.mxu1 %v4301_v25  ;;  %v6921_v26 = vpop.f32.mrf.mxu0  ;;  %v4313_v13 = vld [vmem:[%s11828_s1 + $0x38] sm:$0xff]  ;;  %v559_v25 = vld [vmem:[%s11828_s1 + $0xc20] sm:$0xff] }
 0x104   : > { %1540 = vmatpush.msra.mxu2 %v4302_v28  ;;  %1568 = vmatpush.msra.mxu3 %v4303_v30  ;;  %v4316_v28 = vld [vmem:[%s11828_s1 + $0x30] sm:$0xff]  ;;  %v667_v30 = vld [vmem:[%s5712_s7 + $0x2f8] sm:$0x1] }
 0x105   : > { %1377 = vmatpush.msra.mxu0 %v564_v20  ;;  %1510 = vmatpush.msra.mxu1 %v4304_v36  ;;  %v4315_v20 = vld [vmem:[%s11828_s1 + $0x130] sm:$0xff]  ;;  %v4317_v36 = vld [vmem:[%s11828_s1 + $0xa0] sm:$0xff]  ;;  %v4136_v23 = vld [vmem:[%s5712_s7 + $0x838] sm:$0xff] }
 0x106   : > { %1541 = vmatpush.msra.mxu2 %v4305_v43  ;;  %1569 = vmatpush.msra.mxu3 %v4306_v46  ;;  %v6943_v49 = vpop.f32.mrf.mxu1  ;;  %v4319_v43 = vld [vmem:[%s11828_s1 + $0x28] sm:$0xff]  ;;  %v558_v46 = vld [vmem:[%s11828_s1 + $0xc18] sm:$0xff] }
 0x107   : > { %11838 = vst [vmem:[#allocation8_spill] sm:$0xff] %v6943_v49  ;;  %1378 = vmatpush.msra.mxu0 %v563_v32  ;;  %1511 = vmatpush.msra.mxu1 %v4307_v51  ;;  %v669_v32 = vld [vmem:[%s5712_s7 + $0x308] sm:$0x1]  ;;  %v668_v51 = vld [vmem:[%s5712_s7 + $0x300] sm:$0x1] }
 0x108   : > { %1277 = vmatmul.f32.gmra.mxu0 %v642_v37  ;;  %1335 = vmatmul.f32.gmra.mxu2 %v644_v41  ;;  %v4318_v37 = vld [vmem:[%s11828_s1 + $0x128] sm:$0xff] }
 0x109   : > { %1542 = vmatpush.msra.mxu2 %v4308_v56  ;;  %1570 = vmatpush.msra.mxu3 %v4309_v57  ;;  %v6965_v2 = vpop.f32.mrf.mxu2  ;;  %v4322_v56 = vld [vmem:[%s11828_s1 + $0x20] sm:$0xff]  ;;  %v557_v57 = vld [vmem:[%s11828_s1 + $0xc10] sm:$0xff] }
 0x10a   : > { %1379 = vmatpush.msra.mxu0 %v562_v52  ;;  %1512 = vmatpush.msra.mxu1 %v4310_v60  ;;  %11839 = vst [vmem:[#allocation9_spill] sm:$0xff] %v6965_v2  ;;  %v670_v52 = vld [vmem:[%s5712_s7 + $0x310] sm:$0x1] }
 0x10b   : > { %1306 = vmatmul.f32.gmra.mxu1 %v643_v53  ;;  %1364 = vmatmul.f32.gmra.mxu3 %v645_v54  ;;  %v4320_v53 = vld [vmem:[%s11828_s1 + $0x98] sm:$0xff]  ;;  %v4321_v54 = vld [vmem:[%s11828_s1 + $0x120] sm:$0xff]  ;;  %v4235_v2 = vld [vmem:[%s5712_s7 + $0xb50] sm:$0xff] }
 0x10c   : > { %1543 = vmatpush.msra.mxu2 %v4311_v3  ;;  %1571 = vmatpush.msra.mxu3 %v4312_v5  ;;  %v6976_v11 = vpop.f32.mrf.mxu3  ;;  %v4324_v3 = vld [vmem:[%s11828_s1 + $0x118] sm:$0xff]  ;;  %v556_v5 = vld [vmem:[%s11828_s1 + $0xc08] sm:$0xff] }
 0x10d   : > { %11840 = vst [vmem:[#allocation10_spill] sm:$0xff] %v6976_v11  ;;  %1380 = vmatpush.msra.mxu0 %v561_v62  ;;  %1513 = vmatpush.msra.mxu1 %v4313_v13  ;;  %v6981_v17 = vpop.f32.mrf.mxu0  ;;  %v4323_v62 = vld [vmem:[%s11828_s1 + $0x90] sm:$0xff]  ;;  %v4325_v13 = vld [vmem:[%s11828_s1 + $0x18] sm:$0xff]  ;;  %v4041_v11 = vld [vmem:[%s5712_s7 + $0x540] sm:$0xff] }
 0x10e   : > { %11841 = vst [vmem:[#allocation11_spill] sm:$0xff] %v6981_v17  ;;  %1544 = vmatpush.msra.mxu2 %v4314_v19  ;;  %1572 = vmatpush.msra.mxu3 %v4315_v20  ;;  %v4326_v20 = vld [vmem:[%s11828_s1 + $0x88] sm:$0xff] }
 0x10f   : > { %1381 = vmatpush.msra.mxu0 %v560_v9  ;;  %1514 = vmatpush.msra.mxu1 %v4316_v28  ;;  %v555_v28 = vld [vmem:[%s11828_s1 + $0xc00] sm:$0xff]  ;;  %v4222_v17 = vld [vmem:[%s5712_s7 + $0xae8] sm:$0xff] }
 0x110   : > { %1545 = vmatpush.msra.mxu2 %v4317_v36  ;;  %1573 = vmatpush.msra.mxu3 %v4318_v37  ;;  %v7003_v41 = vpop.f32.mrf.mxu1  ;;  %v3974_v36 = vld [vmem:[%s5712_s7 + $0x328] sm:$0xff]  ;;  %v4329_v37 = vld [vmem:[%s11828_s1 + $0x80] sm:$0xff] }
 0x111   : > { %11842 = vst [vmem:[#allocation12_spill] sm:$0xff] %v7003_v41  ;;  %1382 = vmatpush.msra.mxu0 %v559_v25  ;;  %1515 = vmatpush.msra.mxu1 %v4319_v43  ;;  %v4327_v25 = vld [vmem:[%s11828_s1 + $0x110] sm:$0xff]  ;;  %v4330_v43 = vld [vmem:[%s11828_s1 + $0x108] sm:$0xff]  ;;  %v4989_v41 = vld [vmem:[%s11828_s1 + $0xae0] sm:$0xff] }
 0x112   : > { %1280 = vmatmul.f32.gmra.mxu0 %v667_v30  ;;  %1338 = vmatmul.f32.gmra.mxu2 %v669_v32  ;;  %v4328_v30 = vld [vmem:[%s11828_s1 + $0x10] sm:$0xff]  ;;  %v596_v32 = vld [vmem:[%s5712_s7 + $0xc0] sm:$0xff] }
 0x113   : > { %1546 = vmatpush.msra.mxu2 %v4320_v53  ;;  %1574 = vmatpush.msra.mxu3 %v4321_v54  ;;  %v7025_v60 = vpop.f32.mrf.mxu2  ;;  %v3975_v53 = vld [vmem:[%s5712_s7 + $0x330] sm:$0xff]  ;;  %v4332_v54 = vld [vmem:[%s11828_s1 + $0x100] sm:$0xff] }
 0x114   : > { %1383 = vmatpush.msra.mxu0 %v558_v46  ;;  %1516 = vmatpush.msra.mxu1 %v4322_v56  ;;  %11843 = vst [vmem:[#allocation13_spill] sm:$0xff] %v7025_v60  ;;  %v4333_v56 = vld [vmem:[%s11828_s1 + $0x2f8] sm:$0xff]  ;;  %v4938_v60 = vld [vmem:[%s11828_s1 + $0x740] sm:$0xff] }
 0x115   : > { %1309 = vmatmul.f32.gmra.mxu1 %v668_v51  ;;  %1367 = vmatmul.f32.gmra.mxu3 %v670_v52  ;;  %v4331_v51 = vld [vmem:[%s11828_s1 + $0x8] sm:$0xff]  ;;  %v3973_v52 = vld [vmem:[%s5712_s7 + $0x320] sm:$0xff] }
 0x116   : > { %1547 = vmatpush.msra.mxu2 %v4323_v62  ;;  %1575 = vmatpush.msra.mxu3 %v4324_v3  ;;  %v7036_v9 = vpop.f32.mrf.mxu3  ;;  %v4335_v62 = vld [vmem:[%s11828_s1 + $0x1f8] sm:$0xff] }
 0x117   : > { %11844 = vst [vmem:[#allocation14_spill] sm:$0xff] %v7036_v9  ;;  %1384 = vmatpush.msra.mxu0 %v557_v57  ;;  %1517 = vmatpush.msra.mxu1 %v4325_v13  ;;  %v7041_v19 = vpop.f32.mrf.mxu0  ;;  %v4334_v57 = vld [vmem:[%s11828_s1] sm:$0xff]  ;;  %v4337_v13 = vld [vmem:[%s11828_s1 + $0x378] sm:$0xff] }
 0x118   : > { %11845 = vst [vmem:[#allocation15_spill] sm:$0xff] %v7041_v19  ;;  %1548 = vmatpush.msra.mxu2 %v4326_v20  ;;  %1576 = vmatpush.msra.mxu3 %v4327_v25  ;;  %v4338_v25 = vld [vmem:[%s11828_s1 + $0x1f0] sm:$0xff]  ;;  %v4589_v9 = vld [vmem:[%s11828_s1 + $0xaf8] sm:$0xff] }
 0x119   : > { %1385 = vmatpush.msra.mxu0 %v556_v5  ;;  %1518 = vmatpush.msra.mxu1 %v4328_v30  ;;  %v4336_v5 = vld [vmem:[%s11828_s1 + $0x2f0] sm:$0xff] }
 0x11a   : > { %1549 = vmatpush.msra.mxu2 %v4329_v37  ;;  %1577 = vmatpush.msra.mxu3 %v4330_v43  ;;  %v7063_v46 = vpop.f32.mrf.mxu1  ;;  %v4342_v37 = vld [vmem:[%s11828_s1 + $0x1e8] sm:$0xff]  ;;  %v4343_v43 = vld [vmem:[%s11828_s1 + $0x270] sm:$0xff] }
 0x11b   : > { %11846 = vst [vmem:[#allocation16_spill] sm:$0xff] %v7063_v46  ;;  %1386 = vmatpush.msra.mxu0 %v555_v28  ;;  %1519 = vmatpush.msra.mxu1 %v4331_v51  ;;  %v4339_v28 = vld [vmem:[%s11828_s1 + $0x278] sm:$0xff]  ;;  %v621_v51 = vld [vmem:[%s5712_s7 + $0x188] sm:$0xff]  ;;  %v4618_v46 = vld [vmem:[%s11828_s1 + $0x9c0] sm:$0xff] }
 0x11c   : > { %1387 = vmatmul.f32.vlgmr.msra.gmra.mxu0 %v596_v32  ;;  %1550 = vmatmul.f32.vlgmr.msra.gmra.mxu2 %v3974_v36  ;;  %v4340_v32 = vld [vmem:[%s11828_s1 + $0x2e8] sm:$0xff]  ;;  %v4341_v36 = vld [vmem:[%s11828_s1 + $0x370] sm:$0xff] }
 0x11d   : > { %1578 = vmatpush.msra.mxu3 %v4332_v54  ;;  %1650 = vmatpush.msrb.mxu2 %v4333_v56  ;;  %v7082_v3 = vpop.f32.mrf.mxu2  ;;  %v4345_v54 = vld [vmem:[%s11828_s1 + $0x368] sm:$0xff]  ;;  %v4115_v19 = vld [vmem:[%s5712_s7 + $0x790] sm:$0xff] }
 0x11e   : > { %1520 = vmatpush.msra.mxu1 %v4334_v57  ;;  %1592 = vmatpush.msrb.mxu0 %v4335_v62  ;;  %11847 = vst [vmem:[#allocation17_spill] sm:$0xff] %v7082_v3  ;;  %v4346_v57 = vld [vmem:[%s11828_s1 + $0x1e0] sm:$0xff]  ;;  %v4347_v62 = vld [vmem:[%s11828_s1 + $0x268] sm:$0xff]  ;;  %v3991_v3 = vld [vmem:[%s5712_s7 + $0x3b0] sm:$0xff] }
 0x11f   : > { %1521 = vmatmul.f32.vlgmr.msra.gmra.mxu1 %v3973_v52  ;;  %1579 = vmatmul.f32.vlgmr.msra.gmra.mxu3 %v3975_v53  ;;  %v3999_v52 = vld [vmem:[%s5712_s7 + $0x3f0] sm:$0xff]  ;;  %v4344_v53 = vld [vmem:[%s11828_s1 + $0x2e0] sm:$0xff] }
 0x120   : > { %1651 = vmatpush.msrb.mxu2 %v4336_v5  ;;  %1679 = vmatpush.msrb.mxu3 %v4337_v13  ;;  %v7090_v20 = vpop.f32.mrf.mxu3  ;;  %v3998_v5 = vld [vmem:[%s5712_s7 + $0x3e8] sm:$0xff]  ;;  %v4000_v13 = vld [vmem:[%s5712_s7 + $0x3f8] sm:$0xff] }
 0x121   : > { %11848 = vst [vmem:[#allocation18_spill] sm:$0xff] %v7090_v20  ;;  %1593 = vmatpush.msrb.mxu0 %v4338_v25  ;;  %1621 = vmatpush.msrb.mxu1 %v4339_v28  ;;  %v7098_v30 = vpop.f32.mrf.mxu0  ;;  %v4348_v25 = vld [vmem:[%s11828_s1 + $0x2d8] sm:$0xff]  ;;  %v4349_v28 = vld [vmem:[%s11828_s1 + $0x360] sm:$0xff] }
 0x122   : > { %11849 = vst [vmem:[#allocation19_spill] sm:$0xff] %v7098_v30  ;;  %1652 = vmatpush.msrb.mxu2 %v4340_v32  ;;  %1680 = vmatpush.msrb.mxu3 %v4341_v36  ;;  %v4350_v32 = vld [vmem:[%s11828_s1 + $0x1d8] sm:$0xff]  ;;  %v4351_v36 = vld [vmem:[%s11828_s1 + $0x260] sm:$0xff] }
 0x123   : > { %1594 = vmatpush.msrb.mxu0 %v4342_v37  ;;  %1622 = vmatpush.msrb.mxu1 %v4343_v43  ;;  %v4352_v43 = vld [vmem:[%s11828_s1 + $0x2d0] sm:$0xff]  ;;  %v4570_v20 = vld [vmem:[%s11828_s1 + $0x7a0] sm:$0xff]  ;;  %v4040_v30 = vld [vmem:[%s5712_s7 + $0x538] sm:$0xff] }
 0x124   : > { %1653 = vmatpush.msrb.mxu2 %v4344_v53  ;;  %1681 = vmatpush.msrb.mxu3 %v4345_v54  ;;  %v7120_v56 = vpop.f32.mrf.mxu1  ;;  %v4354_v53 = vld [vmem:[%s11828_s1 + $0x1d0] sm:$0xff]  ;;  %v4355_v54 = vld [vmem:[%s11828_s1 + $0x258] sm:$0xff] }
 0x125   : > { %11850 = vst [vmem:[#allocation20_spill] sm:$0xff] %v7120_v56  ;;  %1595 = vmatpush.msrb.mxu0 %v4346_v57  ;;  %1623 = vmatpush.msrb.mxu1 %v4347_v62  ;;  %v4356_v62 = vld [vmem:[%s11828_s1 + $0x2c8] sm:$0xff]  ;;  %v4573_v56 = vld [vmem:[%s11828_s1 + $0x920] sm:$0xff] }
 0x126   : > { %1390 = vmatmul.f32.gmra.mxu0 %v621_v51  ;;  %1553 = vmatmul.f32.gmra.mxu2 %v3999_v52  ;;  %v4353_v51 = vld [vmem:[%s11828_s1 + $0x358] sm:$0xff] }
 0x127   : > { %1654 = vmatpush.msrb.mxu2 %v4348_v25  ;;  %1682 = vmatpush.msrb.mxu3 %v4349_v28  ;;  %v7142_v37 = vpop.f32.mrf.mxu2  ;;  %v4359_v25 = vld [vmem:[%s11828_s1 + $0x250] sm:$0xff] }
 0x128   : > { %1596 = vmatpush.msrb.mxu0 %v4350_v32  ;;  %1624 = vmatpush.msrb.mxu1 %v4351_v36  ;;  %11851 = vst [vmem:[#allocation21_spill] sm:$0xff] %v7142_v37  ;;  %v646_v28 = vld [vmem:[%s5712_s7 + $0x250] sm:$0xff]  ;;  %v4024_v32 = vld [vmem:[%s5712_s7 + $0x4b8] sm:$0xff]  ;;  %v4360_v36 = vld [vmem:[%s11828_s1 + $0x2c0] sm:$0xff] }
 0x129   : > { %1524 = vmatmul.f32.gmra.mxu1 %v3998_v5  ;;  %1582 = vmatmul.f32.gmra.mxu3 %v4000_v13  ;;  %v4357_v5 = vld [vmem:[%s11828_s1 + $0x350] sm:$0xff]  ;;  %v4358_v13 = vld [vmem:[%s11828_s1 + $0x1c8] sm:$0xff]  ;;  %v4557_v37 = vld [vmem:[%s11828_s1 + $0x940] sm:$0xff] }
 0x12a   : > { %1655 = vmatpush.msrb.mxu2 %v4352_v43  ;;  %1683 = vmatpush.msrb.mxu3 %v4353_v51  ;;  %v7150_v52 = vpop.f32.mrf.mxu3  ;;  %v4361_v43 = vld [vmem:[%s11828_s1 + $0x348] sm:$0xff] }
 0x12b   : > { %11852 = vst [vmem:[#allocation22_spill] sm:$0xff] %v7150_v52  ;;  %1597 = vmatpush.msrb.mxu0 %v4354_v53  ;;  %1625 = vmatpush.msrb.mxu1 %v4355_v54  ;;  %v7158_v57 = vpop.f32.mrf.mxu0  ;;  %v4362_v53 = vld [vmem:[%s11828_s1 + $0x1c0] sm:$0xff]  ;;  %v4363_v54 = vld [vmem:[%s11828_s1 + $0x248] sm:$0xff] }
 0x12c   : > { %11853 = vst [vmem:[#allocation23_spill] sm:$0xff] %v7158_v57  ;;  %1656 = vmatpush.msrb.mxu2 %v4356_v62  ;;  %1684 = vmatpush.msrb.mxu3 %v4357_v5  ;;  %v4023_v62 = vld [vmem:[%s5712_s7 + $0x4b0] sm:$0xff]  ;;  %v4025_v5 = vld [vmem:[%s5712_s7 + $0x4c0] sm:$0xff] }
 0x12d   : > { %1598 = vmatpush.msrb.mxu0 %v4358_v13  ;;  %1626 = vmatpush.msrb.mxu1 %v4359_v25  ;;  %v4364_v13 = vld [vmem:[%s11828_s1 + $0x2b8] sm:$0xff]  ;;  %v4365_v25 = vld [vmem:[%s11828_s1 + $0x340] sm:$0xff] }
 0x12e   : > { %1657 = vmatpush.msrb.mxu2 %v4360_v36  ;;  %1685 = vmatpush.msrb.mxu3 %v4361_v43  ;;  %v7180_v51 = vpop.f32.mrf.mxu1  ;;  %v4366_v36 = vld [vmem:[%s11828_s1 + $0x1b8] sm:$0xff]  ;;  %v4368_v43 = vld [vmem:[%s11828_s1 + $0x2b0] sm:$0xff]  ;;  %v4381_v52 = vld [vmem:[%s11828_s1 + $0x320] sm:$0xff] }
 0x12f   : > { %11854 = vst [vmem:[#allocation24_spill] sm:$0xff] %v7180_v51  ;;  %1599 = vmatpush.msrb.mxu0 %v4362_v53  ;;  %1627 = vmatpush.msrb.mxu1 %v4363_v54  ;;  %v4369_v53 = vld [vmem:[%s11828_s1 + $0x338] sm:$0xff]  ;;  %v4037_v51 = vld [vmem:[%s5712_s7 + $0x520] sm:$0xff] }
 0x130   : > { %1393 = vmatmul.f32.gmra.mxu0 %v646_v28  ;;  %1556 = vmatmul.f32.gmra.mxu2 %v4024_v32  ;;  %v4367_v28 = vld [vmem:[%s11828_s1 + $0x240] sm:$0xff] }
 0x131   : > { %1658 = vmatpush.msrb.mxu2 %v4364_v13  ;;  %1686 = vmatpush.msrb.mxu3 %v4365_v25  ;;  %v7202_v32 = vpop.f32.mrf.mxu2  ;;  %v4370_v13 = vld [vmem:[%s11828_s1 + $0x1b0] sm:$0xff]  ;;  %v4372_v25 = vld [vmem:[%s11828_s1 + $0x2a8] sm:$0xff]  ;;  %v4586_v57 = vld [vmem:[%s11828_s1 + $0x780] sm:$0xff] }
 0x132   : > { %1600 = vmatpush.msrb.mxu0 %v4366_v36  ;;  %1628 = vmatpush.msrb.mxu1 %v4367_v28  ;;  %11855 = vst [vmem:[#allocation25_spill] sm:$0xff] %v7202_v32  ;;  %v4373_v36 = vld [vmem:[%s11828_s1 + $0x330] sm:$0xff]  ;;  %v4374_v28 = vld [vmem:[%s11828_s1 + $0x1a8] sm:$0xff]  ;;  %v4554_v32 = vld [vmem:[%s11828_s1 + $0x7c0] sm:$0xff] }
 0x133   : > { %1527 = vmatmul.f32.gmra.mxu1 %v4023_v62  ;;  %1585 = vmatmul.f32.gmra.mxu3 %v4025_v5  ;;  %v4371_v62 = vld [vmem:[%s11828_s1 + $0x238] sm:$0xff] }
 0x134   : > { %1659 = vmatpush.msrb.mxu2 %v4368_v43  ;;  %1687 = vmatpush.msrb.mxu3 %v4369_v53  ;;  %v7210_v54 = vpop.f32.mrf.mxu3  ;;  %v4375_v43 = vld [vmem:[%s11828_s1 + $0x230] sm:$0xff]  ;;  %v671_v53 = vld [vmem:[%s5712_s7 + $0x318] sm:$0x1] }
 0x135   : > { %11856 = vst [vmem:[#allocation26_spill] sm:$0xff] %v7210_v54  ;;  %1601 = vmatpush.msrb.mxu0 %v4370_v13  ;;  %1629 = vmatpush.msrb.mxu1 %v4371_v62  ;;  %v7218_v5 = vpop.f32.mrf.mxu0  ;;  %v4049_v13 = vld [vmem:[%s5712_s7 + $0x580] sm:$0x1]  ;;  %v4050_v54 = vld [vmem:[%s5712_s7 + $0x588] sm:$0x1] }
 0x136   : > { %11857 = vst [vmem:[#allocation27_spill] sm:$0xff] %v7218_v5  ;;  %1660 = vmatpush.msrb.mxu2 %v4372_v25  ;;  %1688 = vmatpush.msrb.mxu3 %v4373_v36  ;;  %v4376_v62 = vld [vmem:[%s11828_s1 + $0x2a0] sm:$0xff]  ;;  %v4377_v25 = vld [vmem:[%s11828_s1 + $0x328] sm:$0xff] }
 0x137   : > { %1602 = vmatpush.msrb.mxu0 %v4374_v28  ;;  %1630 = vmatpush.msrb.mxu1 %v4375_v43  ;;  %v4378_v28 = vld [vmem:[%s11828_s1 + $0x1a0] sm:$0xff]  ;;  %v4379_v43 = vld [vmem:[%s11828_s1 + $0x228] sm:$0xff] }
 0x138   : > { %1661 = vmatpush.msrb.mxu2 %v4376_v62  ;;  %1689 = vmatpush.msrb.mxu3 %v4377_v25  ;;  %v7240_v36 = vpop.f32.mrf.mxu1  ;;  %v4048_v62 = vld [vmem:[%s5712_s7 + $0x578] sm:$0x1]  ;;  %v4062_v5 = vld [vmem:[%s5712_s7 + $0x5e8] sm:$0x1] }
 0x139   : > { %11858 = vst [vmem:[#allocation28_spill] sm:$0xff] %v7240_v36  ;;  %1603 = vmatpush.msrb.mxu0 %v4378_v28  ;;  %1631 = vmatpush.msrb.mxu1 %v4379_v43  ;;  %v4380_v25 = vld [vmem:[%s11828_s1 + $0x298] sm:$0xff]  ;;  %v4384_v43 = vld [vmem:[%s11828_s1 + $0x290] sm:$0xff]  ;;  %v4541_v36 = vld [vmem:[%s11828_s1 + $0x960] sm:$0xff] }
 0x13a   : > { %1396 = vmatmul.f32.gmra.mxu0 %v671_v53  ;;  %1559 = vmatmul.f32.gmra.mxu2 %v4049_v13  ;;  %v4382_v28 = vld [vmem:[%s11828_s1 + $0x198] sm:$0xff]  ;;  %v4383_v53 = vld [vmem:[%s11828_s1 + $0x220] sm:$0xff] }
 0x13b   : > { %1662 = vmatpush.msrb.mxu2 %v4380_v25  ;;  %1690 = vmatpush.msrb.mxu3 %v4381_v52  ;;  %v7262_v13 = vpop.f32.mrf.mxu2  ;;  %v4385_v52 = vld [vmem:[%s11828_s1 + $0x318] sm:$0xff] }
 0x13c   : > { %1604 = vmatpush.msrb.mxu0 %v4382_v28  ;;  %1632 = vmatpush.msrb.mxu1 %v4383_v53  ;;  %11859 = vst [vmem:[#allocation29_spill] sm:$0xff] %v7262_v13  ;;  %v4386_v28 = vld [vmem:[%s11828_s1 + $0x190] sm:$0xff]  ;;  %v4388_v53 = vld [vmem:[%s11828_s1 + $0x288] sm:$0xff]  ;;  %v4394_v13 = vld [vmem:[%s11828_s1 + $0x180] sm:$0xff] }
 0x13d   : > { %1530 = vmatmul.f32.gmra.mxu1 %v4048_v62  ;;  %1588 = vmatmul.f32.gmra.mxu3 %v4050_v54  ;;  %v4387_v54 = vld [vmem:[%s11828_s1 + $0x218] sm:$0xff] }
 0x13e   : > { %1663 = vmatpush.msrb.mxu2 %v4384_v43  ;;  %1691 = vmatpush.msrb.mxu3 %v4385_v52  ;;  %v7270_v25 = vpop.f32.mrf.mxu3  ;;  %v4389_v43 = vld [vmem:[%s11828_s1 + $0x310] sm:$0xff]  ;;  %v4390_v52 = vld [vmem:[%s11828_s1 + $0x188] sm:$0xff] }
 0x13f   : > { %11860 = vst [vmem:[#allocation30_spill] sm:$0xff] %v7270_v25  ;;  %1605 = vmatpush.msrb.mxu0 %v4386_v28  ;;  %1633 = vmatpush.msrb.mxu1 %v4387_v54  ;;  %v7278_v62 = vpop.f32.mrf.mxu0  ;;  %v4391_v28 = vld [vmem:[%s11828_s1 + $0x210] sm:$0xff]  ;;  %v3976_v54 = vld [vmem:[%s5712_s7 + $0x338] sm:$0xff]  ;;  %v3978_v25 = vld [vmem:[%s5712_s7 + $0x348] sm:$0xff] }
 0x140   : > { %11861 = vst [vmem:[#allocation31_spill] sm:$0xff] %v7278_v62  ;;  %1664 = vmatpush.msrb.mxu2 %v4388_v53  ;;  %1692 = vmatpush.msrb.mxu3 %v4389_v43  ;;  %v4392_v53 = vld [vmem:[%s11828_s1 + $0x280] sm:$0xff]  ;;  %v4393_v43 = vld [vmem:[%s11828_s1 + $0x308] sm:$0xff]  ;;  %v3979_v62 = vld [vmem:[%s5712_s7 + $0x350] sm:$0xff] }
 0x141   : > { %1606 = vmatpush.msrb.mxu0 %v4390_v52  ;;  %1634 = vmatpush.msrb.mxu1 %v4391_v28  ;;  %v4395_v28 = vld [vmem:[%s11828_s1 + $0x208] sm:$0xff] }
 0x142   : > { %1665 = vmatpush.msrb.mxu2 %v4392_v53  ;;  %1693 = vmatpush.msrb.mxu3 %v4393_v43  ;;  %v7300_v52 = vpop.f32.mrf.mxu1  ;;  %v3977_v53 = vld [vmem:[%s5712_s7 + $0x340] sm:$0xff] }
 0x143   : > { %11862 = vst [vmem:[#allocation32_spill] sm:$0xff] %v7300_v52  ;;  %1607 = vmatpush.msrb.mxu0 %v4394_v13  ;;  %1635 = vmatpush.msrb.mxu1 %v4395_v28  ;;  %v4396_v43 = vld [vmem:[%s11828_s1 + $0x300] sm:$0xff]  ;;  %v4397_v52 = vld [vmem:[%s11828_s1 + $0x4f8] sm:$0xff]  ;;  %v4400_v28 = vld [vmem:[%s11828_s1 + $0x4f0] sm:$0xff] }
 0x144   : > { %1608 = vmatmul.f32.vlgmr.msrb.gmra.mxu0 %v3976_v54  ;;  %1666 = vmatmul.f32.vlgmr.msrb.gmra.mxu2 %v3978_v25  ;;  %v4398_v13 = vld [vmem:[%s11828_s1 + $0x200] sm:$0xff]  ;;  %v4399_v25 = vld [vmem:[%s11828_s1 + $0x3f8] sm:$0xff] }
 0x145   : > { %1694 = vmatpush.msrb.mxu3 %v4396_v43  ;;  %1766 = vmatpush.msra.mxu2 %v4397_v52  ;;  %v7322_v54 = vpop.f32.mrf.mxu2  ;;  %v4401_v52 = vld [vmem:[%s11828_s1 + $0x578] sm:$0xff] }
 0x146   : > { %1636 = vmatpush.msrb.mxu1 %v4398_v13  ;;  %1708 = vmatpush.msra.mxu0 %v4399_v25  ;;  %11863 = vst [vmem:[#allocation33_spill] sm:$0xff] %v7322_v54  ;;  %v4402_v13 = vld [vmem:[%s11828_s1 + $0x3f0] sm:$0xff]  ;;  %v4404_v25 = vld [vmem:[%s11828_s1 + $0x4e8] sm:$0xff]  ;;  %v4410_v54 = vld [vmem:[%s11828_s1 + $0x3e0] sm:$0xff] }
 0x147   : > { %1637 = vmatmul.f32.vlgmr.msrb.gmra.mxu1 %v3977_v53  ;;  %1695 = vmatmul.f32.vlgmr.msrb.gmra.mxu3 %v3979_v62  ;;  %v4403_v62 = vld [vmem:[%s11828_s1 + $0x478] sm:$0xff] }
 0x148   : > { %1767 = vmatpush.msra.mxu2 %v4400_v28  ;;  %1795 = vmatpush.msra.mxu3 %v4401_v52  ;;  %v7330_v43 = vpop.f32.mrf.mxu3  ;;  %v4405_v28 = vld [vmem:[%s11828_s1 + $0x570] sm:$0xff]  ;;  %v4406_v52 = vld [vmem:[%s11828_s1 + $0x3e8] sm:$0xff] }
 0x149   : > { %11864 = vst [vmem:[#allocation34_spill] sm:$0xff] %v7330_v43  ;;  %1709 = vmatpush.msra.mxu0 %v4402_v13  ;;  %1737 = vmatpush.msra.mxu1 %v4403_v62  ;;  %v7338_v53 = vpop.f32.mrf.mxu0  ;;  %v4407_v13 = vld [vmem:[%s11828_s1 + $0x470] sm:$0xff]  ;;  %v4001_v62 = vld [vmem:[%s5712_s7 + $0x400] sm:$0xff] }
 0x14a   : > { %11865 = vst [vmem:[#allocation35_spill] sm:$0xff] %v7338_v53  ;;  %1768 = vmatpush.msra.mxu2 %v4404_v25  ;;  %1796 = vmatpush.msra.mxu3 %v4405_v28  ;;  %v4003_v43 = vld [vmem:[%s5712_s7 + $0x410] sm:$0xff]  ;;  %v4408_v25 = vld [vmem:[%s11828_s1 + $0x4e0] sm:$0xff]  ;;  %v4409_v28 = vld [vmem:[%s11828_s1 + $0x568] sm:$0xff] }
 0x14b   : > { %1710 = vmatpush.msra.mxu0 %v4406_v52  ;;  %1738 = vmatpush.msra.mxu1 %v4407_v13  ;;  %v4411_v13 = vld [vmem:[%s11828_s1 + $0x468] sm:$0xff]  ;;  %v4004_v53 = vld [vmem:[%s5712_s7 + $0x418] sm:$0xff] }
 0x14c   : > { %1769 = vmatpush.msra.mxu2 %v4408_v25  ;;  %1797 = vmatpush.msra.mxu3 %v4409_v28  ;;  %v7360_v52 = vpop.f32.mrf.mxu1  ;;  %v4002_v25 = vld [vmem:[%s5712_s7 + $0x408] sm:$0xff]  ;;  %v4412_v28 = vld [vmem:[%s11828_s1 + $0x4d8] sm:$0xff] }
 0x14d   : > { %11866 = vst [vmem:[#allocation36_spill] sm:$0xff] %v7360_v52  ;;  %1711 = vmatpush.msra.mxu0 %v4410_v54  ;;  %1739 = vmatpush.msra.mxu1 %v4411_v13  ;;  %v4413_v52 = vld [vmem:[%s11828_s1 + $0x560] sm:$0xff]  ;;  %v4414_v54 = vld [vmem:[%s11828_s1 + $0x3d8] sm:$0xff]  ;;  %v4416_v13 = vld [vmem:[%s11828_s1 + $0x4d0] sm:$0xff] }
 0x14e   : > { %1611 = vmatmul.f32.gmra.mxu0 %v4001_v62  ;;  %1669 = vmatmul.f32.gmra.mxu2 %v4003_v43  ;;  %v4415_v43 = vld [vmem:[%s11828_s1 + $0x460] sm:$0xff] }
 0x14f   : > { %1770 = vmatpush.msra.mxu2 %v4412_v28  ;;  %1798 = vmatpush.msra.mxu3 %v4413_v52  ;;  %v7382_v62 = vpop.f32.mrf.mxu2  ;;  %v4417_v52 = vld [vmem:[%s11828_s1 + $0x558] sm:$0xff] }
 0x150   : > { %1712 = vmatpush.msra.mxu0 %v4414_v54  ;;  %1740 = vmatpush.msra.mxu1 %v4415_v43  ;;  %11867 = vst [vmem:[#allocation37_spill] sm:$0xff] %v7382_v62  ;;  %v4418_v54 = vld [vmem:[%s11828_s1 + $0x3d0] sm:$0xff]  ;;  %v4420_v43 = vld [vmem:[%s11828_s1 + $0x4c8] sm:$0xff]  ;;  %v4426_v62 = vld [vmem:[%s11828_s1 + $0x3c0] sm:$0xff] }
 0x151   : > { %1640 = vmatmul.f32.gmra.mxu1 %v4002_v25  ;;  %1698 = vmatmul.f32.gmra.mxu3 %v4004_v53  ;;  %v4419_v53 = vld [vmem:[%s11828_s1 + $0x458] sm:$0xff] }
 0x152   : > { %1771 = vmatpush.msra.mxu2 %v4416_v13  ;;  %1799 = vmatpush.msra.mxu3 %v4417_v52  ;;  %v7390_v28 = vpop.f32.mrf.mxu3  ;;  %v4421_v13 = vld [vmem:[%s11828_s1 + $0x550] sm:$0xff]  ;;  %v4422_v52 = vld [vmem:[%s11828_s1 + $0x3c8] sm:$0xff] }
 0x153   : > { %11868 = vst [vmem:[#allocation38_spill] sm:$0xff] %v7390_v28  ;;  %1713 = vmatpush.msra.mxu0 %v4418_v54  ;;  %1741 = vmatpush.msra.mxu1 %v4419_v53  ;;  %v7398_v25 = vpop.f32.mrf.mxu0  ;;  %v4423_v54 = vld [vmem:[%s11828_s1 + $0x450] sm:$0xff]  ;;  %v4026_v53 = vld [vmem:[%s5712_s7 + $0x4c8] sm:$0xff]  ;;  %v4028_v28 = vld [vmem:[%s5712_s7 + $0x4d8] sm:$0xff] }
 0x154   : > { %11869 = vst [vmem:[#allocation39_spill] sm:$0xff] %v7398_v25  ;;  %1772 = vmatpush.msra.mxu2 %v4420_v43  ;;  %1800 = vmatpush.msra.mxu3 %v4421_v13  ;;  %v4424_v43 = vld [vmem:[%s11828_s1 + $0x4c0] sm:$0xff]  ;;  %v4425_v13 = vld [vmem:[%s11828_s1 + $0x548] sm:$0xff] }
 0x155   : > { %1714 = vmatpush.msra.mxu0 %v4422_v52  ;;  %1742 = vmatpush.msra.mxu1 %v4423_v54  ;;  %v4427_v54 = vld [vmem:[%s11828_s1 + $0x448] sm:$0xff]  ;;  %v4029_v25 = vld [vmem:[%s5712_s7 + $0x4e0] sm:$0xff] }
 0x156   : > { %1773 = vmatpush.msra.mxu2 %v4424_v43  ;;  %1801 = vmatpush.msra.mxu3 %v4425_v13  ;;  %v7420_v52 = vpop.f32.mrf.mxu1  ;;  %v4027_v43 = vld [vmem:[%s5712_s7 + $0x4d0] sm:$0xff]  ;;  %v4428_v13 = vld [vmem:[%s11828_s1 + $0x4b8] sm:$0xff] }
 0x157   : > { %11870 = vst [vmem:[#allocation40_spill] sm:$0xff] %v7420_v52  ;;  %1715 = vmatpush.msra.mxu0 %v4426_v62  ;;  %1743 = vmatpush.msra.mxu1 %v4427_v54  ;;  %v4429_v52 = vld [vmem:[%s11828_s1 + $0x540] sm:$0xff]  ;;  %v4430_v62 = vld [vmem:[%s11828_s1 + $0x3b8] sm:$0xff]  ;;  %v4432_v54 = vld [vmem:[%s11828_s1 + $0x4b0] sm:$0xff] }
 0x158   : > { %1614 = vmatmul.f32.gmra.mxu0 %v4026_v53  ;;  %1672 = vmatmul.f32.gmra.mxu2 %v4028_v28  ;;  %v4431_v28 = vld [vmem:[%s11828_s1 + $0x440] sm:$0xff] }
 0x159   : > { %1774 = vmatpush.msra.mxu2 %v4428_v13  ;;  %1802 = vmatpush.msra.mxu3 %v4429_v52  ;;  %v7442_v53 = vpop.f32.mrf.mxu2  ;;  %v4433_v52 = vld [vmem:[%s11828_s1 + $0x538] sm:$0xff] }
 0x15a   : > { %1716 = vmatpush.msra.mxu0 %v4430_v62  ;;  %1744 = vmatpush.msra.mxu1 %v4431_v28  ;;  %11871 = vst [vmem:[#allocation41_spill] sm:$0xff] %v7442_v53  ;;  %v4434_v62 = vld [vmem:[%s11828_s1 + $0x3b0] sm:$0xff]  ;;  %v4436_v28 = vld [vmem:[%s11828_s1 + $0x4a8] sm:$0xff]  ;;  %v4442_v53 = vld [vmem:[%s11828_s1 + $0x3a0] sm:$0xff] }
 0x15b   : > { %1643 = vmatmul.f32.gmra.mxu1 %v4027_v43  ;;  %1701 = vmatmul.f32.gmra.mxu3 %v4029_v25  ;;  %v4435_v25 = vld [vmem:[%s11828_s1 + $0x438] sm:$0xff] }
 0x15c   : > { %1775 = vmatpush.msra.mxu2 %v4432_v54  ;;  %1803 = vmatpush.msra.mxu3 %v4433_v52  ;;  %v7450_v13 = vpop.f32.mrf.mxu3  ;;  %v4437_v54 = vld [vmem:[%s11828_s1 + $0x530] sm:$0xff]  ;;  %v4438_v52 = vld [vmem:[%s11828_s1 + $0x3a8] sm:$0xff] }
 0x15d   : > { %11872 = vst [vmem:[#allocation42_spill] sm:$0xff] %v7450_v13  ;;  %1717 = vmatpush.msra.mxu0 %v4434_v62  ;;  %1745 = vmatpush.msra.mxu1 %v4435_v25  ;;  %v7458_v43 = vpop.f32.mrf.mxu0  ;;  %v4439_v62 = vld [vmem:[%s11828_s1 + $0x430] sm:$0xff]  ;;  %v4053_v13 = vld [vmem:[%s5712_s7 + $0x5a0] sm:$0x1] }
 0x15e   : > { %11873 = vst [vmem:[#allocation43_spill] sm:$0xff] %v7458_v43  ;;  %1776 = vmatpush.msra.mxu2 %v4436_v28  ;;  %1804 = vmatpush.msra.mxu3 %v4437_v54  ;;  %v4051_v25 = vld [vmem:[%s5712_s7 + $0x590] sm:$0x1]  ;;  %v4440_v28 = vld [vmem:[%s11828_s1 + $0x4a0] sm:$0xff]  ;;  %v4441_v54 = vld [vmem:[%s11828_s1 + $0x528] sm:$0xff] }
 0x15f   : > { %1718 = vmatpush.msra.mxu0 %v4438_v52  ;;  %1746 = vmatpush.msra.mxu1 %v4439_v62  ;;  %v4443_v62 = vld [vmem:[%s11828_s1 + $0x428] sm:$0xff] }
 0x160   : > { %1777 = vmatpush.msra.mxu2 %v4440_v28  ;;  %1805 = vmatpush.msra.mxu3 %v4441_v54  ;;  %v7480_v52 = vpop.f32.mrf.mxu1  ;;  %v4052_v28 = vld [vmem:[%s5712_s7 + $0x598] sm:$0x1]  ;;  %v4054_v43 = vld [vmem:[%s5712_s7 + $0x5a8] sm:$0x1] }
 0x161   : > { %11874 = vst [vmem:[#allocation44_spill] sm:$0xff] %v7480_v52  ;;  %1719 = vmatpush.msra.mxu0 %v4442_v53  ;;  %1747 = vmatpush.msra.mxu1 %v4443_v62  ;;  %v4444_v54 = vld [vmem:[%s11828_s1 + $0x498] sm:$0xff]  ;;  %v4445_v52 = vld [vmem:[%s11828_s1 + $0x520] sm:$0xff]  ;;  %v4448_v62 = vld [vmem:[%s11828_s1 + $0x490] sm:$0xff] }
 0x162   : > { %1617 = vmatmul.f32.gmra.mxu0 %v4051_v25  ;;  %1675 = vmatmul.f32.gmra.mxu2 %v4053_v13  ;;  %v4446_v53 = vld [vmem:[%s11828_s1 + $0x398] sm:$0xff]  ;;  %v4447_v13 = vld [vmem:[%s11828_s1 + $0x420] sm:$0xff] }
 0x163   : > { %1778 = vmatpush.msra.mxu2 %v4444_v54  ;;  %1806 = vmatpush.msra.mxu3 %v4445_v52  ;;  %v7502_v25 = vpop.f32.mrf.mxu2  ;;  %v4449_v52 = vld [vmem:[%s11828_s1 + $0x518] sm:$0xff] }
 0x164   : > { %1720 = vmatpush.msra.mxu0 %v4446_v53  ;;  %1748 = vmatpush.msra.mxu1 %v4447_v13  ;;  %11875 = vst [vmem:[#allocation45_spill] sm:$0xff] %v7502_v25  ;;  %v4450_v53 = vld [vmem:[%s11828_s1 + $0x390] sm:$0xff]  ;;  %v4452_v13 = vld [vmem:[%s11828_s1 + $0x488] sm:$0xff]  ;;  %v4458_v25 = vld [vmem:[%s11828_s1 + $0x380] sm:$0xff] }
 0x165   : > { %1646 = vmatmul.f32.gmra.mxu1 %v4052_v28  ;;  %1704 = vmatmul.f32.gmra.mxu3 %v4054_v43  ;;  %v4451_v43 = vld [vmem:[%s11828_s1 + $0x418] sm:$0xff] }
 0x166   : > { %1779 = vmatpush.msra.mxu2 %v4448_v62  ;;  %1807 = vmatpush.msra.mxu3 %v4449_v52  ;;  %v7510_v54 = vpop.f32.mrf.mxu3  ;;  %v4453_v62 = vld [vmem:[%s11828_s1 + $0x510] sm:$0xff]  ;;  %v4454_v52 = vld [vmem:[%s11828_s1 + $0x388] sm:$0xff] }
 0x167   : > { %11876 = vst [vmem:[#allocation46_spill] sm:$0xff] %v7510_v54  ;;  %1721 = vmatpush.msra.mxu0 %v4450_v53  ;;  %1749 = vmatpush.msra.mxu1 %v4451_v43  ;;  %v7518_v28 = vpop.f32.mrf.mxu0  ;;  %v4455_v53 = vld [vmem:[%s11828_s1 + $0x410] sm:$0xff]  ;;  %v3980_v43 = vld [vmem:[%s5712_s7 + $0x358] sm:$0xff]  ;;  %v3982_v54 = vld [vmem:[%s5712_s7 + $0x368] sm:$0xff] }
 0x168   : > { %11877 = vst [vmem:[#allocation47_spill] sm:$0xff] %v7518_v28  ;;  %1780 = vmatpush.msra.mxu2 %v4452_v13  ;;  %1808 = vmatpush.msra.mxu3 %v4453_v62  ;;  %v4456_v13 = vld [vmem:[%s11828_s1 + $0x480] sm:$0xff]  ;;  %v4457_v62 = vld [vmem:[%s11828_s1 + $0x508] sm:$0xff]  ;;  %v3983_v28 = vld [vmem:[%s5712_s7 + $0x370] sm:$0xff] }
 0x169   : > { %1722 = vmatpush.msra.mxu0 %v4454_v52  ;;  %1750 = vmatpush.msra.mxu1 %v4455_v53  ;;  %v4459_v53 = vld [vmem:[%s11828_s1 + $0x408] sm:$0xff] }
 0x16a   : > { %1781 = vmatpush.msra.mxu2 %v4456_v13  ;;  %1809 = vmatpush.msra.mxu3 %v4457_v62  ;;  %v7540_v52 = vpop.f32.mrf.mxu1  ;;  %v3981_v13 = vld [vmem:[%s5712_s7 + $0x360] sm:$0xff] }
 0x16b   : > { %11878 = vst [vmem:[#allocation48_spill] sm:$0xff] %v7540_v52  ;;  %1723 = vmatpush.msra.mxu0 %v4458_v25  ;;  %1751 = vmatpush.msra.mxu1 %v4459_v53  ;;  %v4460_v62 = vld [vmem:[%s11828_s1 + $0x500] sm:$0xff]  ;;  %v4461_v52 = vld [vmem:[%s11828_s1 + $0x6f8] sm:$0xff]  ;;  %v4464_v53 = vld [vmem:[%s11828_s1 + $0x6f0] sm:$0xff] }
 0x16c   : > { %1724 = vmatmul.f32.vlgmr.msra.gmra.mxu0 %v3980_v43  ;;  %1782 = vmatmul.f32.vlgmr.msra.gmra.mxu2 %v3982_v54  ;;  %v4462_v25 = vld [vmem:[%s11828_s1 + $0x400] sm:$0xff]  ;;  %v4463_v54 = vld [vmem:[%s11828_s1 + $0x5f8] sm:$0xff] }
 0x16d   : > { %1810 = vmatpush.msra.mxu3 %v4460_v62  ;;  %1882 = vmatpush.msrb.mxu2 %v4461_v52  ;;  %v7562_v43 = vpop.f32.mrf.mxu2  ;;  %v4465_v52 = vld [vmem:[%s11828_s1 + $0x778] sm:$0xff] }
 0x16e   : > { %1752 = vmatpush.msra.mxu1 %v4462_v25  ;;  %1824 = vmatpush.msrb.mxu0 %v4463_v54  ;;  %11879 = vst [vmem:[#allocation49_spill] sm:$0xff] %v7562_v43  ;;  %v4466_v25 = vld [vmem:[%s11828_s1 + $0x5f0] sm:$0xff]  ;;  %v4468_v54 = vld [vmem:[%s11828_s1 + $0x6e8] sm:$0xff]  ;;  %v4008_v43 = vld [vmem:[%s5712_s7 + $0x438] sm:$0xff] }
 0x16f   : > { %1753 = vmatmul.f32.vlgmr.msra.gmra.mxu1 %v3981_v13  ;;  %1811 = vmatmul.f32.vlgmr.msra.gmra.mxu3 %v3983_v28  ;;  %v4467_v28 = vld [vmem:[%s11828_s1 + $0x678] sm:$0xff] }
 0x170   : > { %1883 = vmatpush.msrb.mxu2 %v4464_v53  ;;  %1911 = vmatpush.msrb.mxu3 %v4465_v52  ;;  %v7570_v62 = vpop.f32.mrf.mxu3  ;;  %v4469_v53 = vld [vmem:[%s11828_s1 + $0x770] sm:$0xff]  ;;  %v4470_v52 = vld [vmem:[%s11828_s1 + $0x5e8] sm:$0xff] }
 0x171   : > { %11880 = vst [vmem:[#allocation50_spill] sm:$0xff] %v7570_v62  ;;  %1825 = vmatpush.msrb.mxu0 %v4466_v25  ;;  %1853 = vmatpush.msrb.mxu1 %v4467_v28  ;;  %v7578_v13 = vpop.f32.mrf.mxu0  ;;  %v4471_v25 = vld [vmem:[%s11828_s1 + $0x670] sm:$0xff]  ;;  %v4005_v28 = vld [vmem:[%s5712_s7 + $0x420] sm:$0xff] }
 0x172   : > { %11881 = vst [vmem:[#allocation51_spill] sm:$0xff] %v7578_v13  ;;  %1884 = vmatpush.msrb.mxu2 %v4468_v54  ;;  %1912 = vmatpush.msrb.mxu3 %v4469_v53  ;;  %v4007_v62 = vld [vmem:[%s5712_s7 + $0x430] sm:$0xff]  ;;  %v4472_v54 = vld [vmem:[%s11828_s1 + $0x6e0] sm:$0xff]  ;;  %v4473_v53 = vld [vmem:[%s11828_s1 + $0x768] sm:$0xff] }
 0x173   : > { %1826 = vmatpush.msrb.mxu0 %v4470_v52  ;;  %1854 = vmatpush.msrb.mxu1 %v4471_v25  ;;  %v4474_v13 = vld [vmem:[%s11828_s1 + $0x5e0] sm:$0xff]  ;;  %v4475_v25 = vld [vmem:[%s11828_s1 + $0x668] sm:$0xff] }
 0x174   : > { %1885 = vmatpush.msrb.mxu2 %v4472_v54  ;;  %1913 = vmatpush.msrb.mxu3 %v4473_v53  ;;  %v7600_v52 = vpop.f32.mrf.mxu1  ;;  %v4006_v54 = vld [vmem:[%s5712_s7 + $0x428] sm:$0xff]  ;;  %v4476_v53 = vld [vmem:[%s11828_s1 + $0x6d8] sm:$0xff] }
 0x175   : > { %11882 = vst [vmem:[#allocation52_spill] sm:$0xff] %v7600_v52  ;;  %1827 = vmatpush.msrb.mxu0 %v4474_v13  ;;  %1855 = vmatpush.msrb.mxu1 %v4475_v25  ;;  %v4477_v52 = vld [vmem:[%s11828_s1 + $0x760] sm:$0xff]  ;;  %v4478_v13 = vld [vmem:[%s11828_s1 + $0x5d8] sm:$0xff]  ;;  %v4480_v25 = vld [vmem:[%s11828_s1 + $0x6d0] sm:$0xff] }
 0x176   : > { %1727 = vmatmul.f32.gmra.mxu0 %v4005_v28  ;;  %1785 = vmatmul.f32.gmra.mxu2 %v4007_v62  ;;  %v4479_v62 = vld [vmem:[%s11828_s1 + $0x660] sm:$0xff] }
 0x177   : > { %1886 = vmatpush.msrb.mxu2 %v4476_v53  ;;  %1914 = vmatpush.msrb.mxu3 %v4477_v52  ;;  %v7622_v28 = vpop.f32.mrf.mxu2  ;;  %v4481_v52 = vld [vmem:[%s11828_s1 + $0x758] sm:$0xff] }
 0x178   : > { %1828 = vmatpush.msrb.mxu0 %v4478_v13  ;;  %1856 = vmatpush.msrb.mxu1 %v4479_v62  ;;  %11883 = vst [vmem:[#allocation53_spill] sm:$0xff] %v7622_v28  ;;  %v4482_v13 = vld [vmem:[%s11828_s1 + $0x5d0] sm:$0xff]  ;;  %v4484_v62 = vld [vmem:[%s11828_s1 + $0x6c8] sm:$0xff]  ;;  %v4490_v28 = vld [vmem:[%s11828_s1 + $0x5c0] sm:$0xff] }
 0x179   : > { %1756 = vmatmul.f32.gmra.mxu1 %v4006_v54  ;;  %1814 = vmatmul.f32.gmra.mxu3 %v4008_v43  ;;  %v4483_v43 = vld [vmem:[%s11828_s1 + $0x658] sm:$0xff] }
 0x17a   : > { %1887 = vmatpush.msrb.mxu2 %v4480_v25  ;;  %1915 = vmatpush.msrb.mxu3 %v4481_v52  ;;  %v7630_v53 = vpop.f32.mrf.mxu3  ;;  %v4485_v25 = vld [vmem:[%s11828_s1 + $0x750] sm:$0xff]  ;;  %v4486_v52 = vld [vmem:[%s11828_s1 + $0x5c8] sm:$0xff] }
 0x17b   : > { %11884 = vst [vmem:[#allocation54_spill] sm:$0xff] %v7630_v53  ;;  %1829 = vmatpush.msrb.mxu0 %v4482_v13  ;;  %1857 = vmatpush.msrb.mxu1 %v4483_v43  ;;  %v7638_v54 = vpop.f32.mrf.mxu0  ;;  %v4487_v13 = vld [vmem:[%s11828_s1 + $0x650] sm:$0xff]  ;;  %v4030_v43 = vld [vmem:[%s5712_s7 + $0x4e8] sm:$0xff]  ;;  %v4032_v53 = vld [vmem:[%s5712_s7 + $0x4f8] sm:$0xff] }
 0x17c   : > { %11885 = vst [vmem:[#allocation55_spill] sm:$0xff] %v7638_v54  ;;  %1888 = vmatpush.msrb.mxu2 %v4484_v62  ;;  %1916 = vmatpush.msrb.mxu3 %v4485_v25  ;;  %v4488_v62 = vld [vmem:[%s11828_s1 + $0x6c0] sm:$0xff]  ;;  %v4489_v25 = vld [vmem:[%s11828_s1 + $0x748] sm:$0xff] }
 0x17d   : > { %1830 = vmatpush.msrb.mxu0 %v4486_v52  ;;  %1858 = vmatpush.msrb.mxu1 %v4487_v13  ;;  %v4491_v13 = vld [vmem:[%s11828_s1 + $0x648] sm:$0xff]  ;;  %v4033_v54 = vld [vmem:[%s5712_s7 + $0x500] sm:$0xff] }
 0x17e   : > { %1889 = vmatpush.msrb.mxu2 %v4488_v62  ;;  %1917 = vmatpush.msrb.mxu3 %v4489_v25  ;;  %v7660_v52 = vpop.f32.mrf.mxu1  ;;  %v4031_v62 = vld [vmem:[%s5712_s7 + $0x4f0] sm:$0xff]  ;;  %v4492_v25 = vld [vmem:[%s11828_s1 + $0x6b8] sm:$0xff] }
 0x17f   : > { %11886 = vst [vmem:[#allocation56_spill] sm:$0xff] %v7660_v52  ;;  %1831 = vmatpush.msrb.mxu0 %v4490_v28  ;;  %1859 = vmatpush.msrb.mxu1 %v4491_v13  ;;  %v4493_v52 = vld [vmem:[%s11828_s1 + $0x740] sm:$0xff]  ;;  %v4494_v28 = vld [vmem:[%s11828_s1 + $0x5b8] sm:$0xff]  ;;  %v4496_v13 = vld [vmem:[%s11828_s1 + $0x6b0] sm:$0xff] }
 0x180   : > { %1730 = vmatmul.f32.gmra.mxu0 %v4030_v43  ;;  %1788 = vmatmul.f32.gmra.mxu2 %v4032_v53  ;;  %v4495_v53 = vld [vmem:[%s11828_s1 + $0x640] sm:$0xff] }
 0x181   : > { %1890 = vmatpush.msrb.mxu2 %v4492_v25  ;;  %1918 = vmatpush.msrb.mxu3 %v4493_v52  ;;  %v7682_v43 = vpop.f32.mrf.mxu2  ;;  %v4497_v52 = vld [vmem:[%s11828_s1 + $0x738] sm:$0xff] }
 0x182   : > { %1832 = vmatpush.msrb.mxu0 %v4494_v28  ;;  %1860 = vmatpush.msrb.mxu1 %v4495_v53  ;;  %11887 = vst [vmem:[#allocation57_spill] sm:$0xff] %v7682_v43  ;;  %v4498_v28 = vld [vmem:[%s11828_s1 + $0x5b0] sm:$0xff]  ;;  %v4500_v53 = vld [vmem:[%s11828_s1 + $0x6a8] sm:$0xff] }
 0x183   : > { %1759 = vmatmul.f32.gmra.mxu1 %v4031_v62  ;;  %1817 = vmatmul.f32.gmra.mxu3 %v4033_v54  ;;  %v4499_v54 = vld [vmem:[%s11828_s1 + $0x638] sm:$0xff]  ;;  %v4058_v43 = vld [vmem:[%s5712_s7 + $0x5c8] sm:$0x1] }
 0x184   : > { %1891 = vmatpush.msrb.mxu2 %v4496_v13  ;;  %1919 = vmatpush.msrb.mxu3 %v4497_v52  ;;  %v7690_v25 = vpop.f32.mrf.mxu3  ;;  %v4501_v13 = vld [vmem:[%s11828_s1 + $0x730] sm:$0xff]  ;;  %v4502_v52 = vld [vmem:[%s11828_s1 + $0x5a8] sm:$0xff] }
 0x185   : > { %11888 = vst [vmem:[#allocation58_spill] sm:$0xff] %v7690_v25  ;;  %1833 = vmatpush.msrb.mxu0 %v4498_v28  ;;  %1861 = vmatpush.msrb.mxu1 %v4499_v54  ;;  %v7698_v62 = vpop.f32.mrf.mxu0  ;;  %v4503_v28 = vld [vmem:[%s11828_s1 + $0x630] sm:$0xff]  ;;  %v4057_v25 = vld [vmem:[%s5712_s7 + $0x5c0] sm:$0x1] }
 0x186   : > { %11889 = vst [vmem:[#allocation59_spill] sm:$0xff] %v7698_v62  ;;  %1892 = vmatpush.msrb.mxu2 %v4500_v53  ;;  %1920 = vmatpush.msrb.mxu3 %v4501_v13  ;;  %v4055_v54 = vld [vmem:[%s5712_s7 + $0x5b0] sm:$0x1]  ;;  %v4504_v53 = vld [vmem:[%s11828_s1 + $0x6a0] sm:$0xff]  ;;  %v4505_v13 = vld [vmem:[%s11828_s1 + $0x728] sm:$0xff] }
 0x187   : > { %1834 = vmatpush.msrb.mxu0 %v4502_v52  ;;  %1862 = vmatpush.msrb.mxu1 %v4503_v28  ;;  %v4506_v62 = vld [vmem:[%s11828_s1 + $0x5a0] sm:$0xff]  ;;  %v4507_v28 = vld [vmem:[%s11828_s1 + $0x628] sm:$0xff] }
 0x188   : > { %1893 = vmatpush.msrb.mxu2 %v4504_v53  ;;  %1921 = vmatpush.msrb.mxu3 %v4505_v13  ;;  %v7720_v52 = vpop.f32.mrf.mxu1  ;;  %v4056_v53 = vld [vmem:[%s5712_s7 + $0x5b8] sm:$0x1] }
 0x189   : > { %11890 = vst [vmem:[#allocation60_spill] sm:$0xff] %v7720_v52  ;;  %1835 = vmatpush.msrb.mxu0 %v4506_v62  ;;  %1863 = vmatpush.msrb.mxu1 %v4507_v28  ;;  %v4508_v13 = vld [vmem:[%s11828_s1 + $0x698] sm:$0xff]  ;;  %v4509_v52 = vld [vmem:[%s11828_s1 + $0x720] sm:$0xff]  ;;  %v4512_v28 = vld [vmem:[%s11828_s1 + $0x690] sm:$0xff] }
 0x18a   : > { %1733 = vmatmul.f32.gmra.mxu0 %v4055_v54  ;;  %1791 = vmatmul.f32.gmra.mxu2 %v4057_v25  ;;  %v4510_v62 = vld [vmem:[%s11828_s1 + $0x598] sm:$0xff]  ;;  %v4511_v25 = vld [vmem:[%s11828_s1 + $0x620] sm:$0xff] }
 0x18b   : > { %1894 = vmatpush.msrb.mxu2 %v4508_v13  ;;  %1922 = vmatpush.msrb.mxu3 %v4509_v52  ;;  %v7742_v54 = vpop.f32.mrf.mxu2  ;;  %v4513_v52 = vld [vmem:[%s11828_s1 + $0x718] sm:$0xff] }
 0x18c   : > { %1836 = vmatpush.msrb.mxu0 %v4510_v62  ;;  %1864 = vmatpush.msrb.mxu1 %v4511_v25  ;;  %11891 = vst [vmem:[#allocation61_spill] sm:$0xff] %v7742_v54  ;;  %v4514_v62 = vld [vmem:[%s11828_s1 + $0x590] sm:$0xff]  ;;  %v4516_v25 = vld [vmem:[%s11828_s1 + $0x688] sm:$0xff] }
 0x18d   : > { %1762 = vmatmul.f32.gmra.mxu1 %v4056_v53  ;;  %1820 = vmatmul.f32.gmra.mxu3 %v4058_v43  ;;  %v4515_v43 = vld [vmem:[%s11828_s1 + $0x618] sm:$0xff]  ;;  %v3987_v54 = vld [vmem:[%s5712_s7 + $0x390] sm:$0xff] }
 0x18e   : > { %1895 = vmatpush.msrb.mxu2 %v4512_v28  ;;  %1923 = vmatpush.msrb.mxu3 %v4513_v52  ;;  %v7750_v13 = vpop.f32.mrf.mxu3  ;;  %v4517_v28 = vld [vmem:[%s11828_s1 + $0x710] sm:$0xff]  ;;  %v4518_v52 = vld [vmem:[%s11828_s1 + $0x588] sm:$0xff] }
 0x18f   : > { %11892 = vst [vmem:[#allocation62_spill] sm:$0xff] %v7750_v13  ;;  %1837 = vmatpush.msrb.mxu0 %v4514_v62  ;;  %1865 = vmatpush.msrb.mxu1 %v4515_v43  ;;  %v7758_v53 = vpop.f32.mrf.mxu0  ;;  %v4519_v62 = vld [vmem:[%s11828_s1 + $0x610] sm:$0xff]  ;;  %v3984_v43 = vld [vmem:[%s5712_s7 + $0x378] sm:$0xff]  ;;  %v3986_v13 = vld [vmem:[%s5712_s7 + $0x388] sm:$0xff] }
 0x190   : > { %11893 = vst [vmem:[#allocation63_spill] sm:$0xff] %v7758_v53  ;;  %1896 = vmatpush.msrb.mxu2 %v4516_v25  ;;  %1924 = vmatpush.msrb.mxu3 %v4517_v28  ;;  %v4520_v25 = vld [vmem:[%s11828_s1 + $0x680] sm:$0xff]  ;;  %v4521_v28 = vld [vmem:[%s11828_s1 + $0x708] sm:$0xff] }
 0x191   : > { %1838 = vmatpush.msrb.mxu0 %v4518_v52  ;;  %1866 = vmatpush.msrb.mxu1 %v4519_v62  ;;  %v4522_v53 = vld [vmem:[%s11828_s1 + $0x580] sm:$0xff]  ;;  %v4523_v62 = vld [vmem:[%s11828_s1 + $0x608] sm:$0xff] }
 0x192   : > { %1897 = vmatpush.msrb.mxu2 %v4520_v25  ;;  %1925 = vmatpush.msrb.mxu3 %v4521_v28  ;;  %v7780_v52 = vpop.f32.mrf.mxu1  ;;  %v3985_v25 = vld [vmem:[%s5712_s7 + $0x380] sm:$0xff] }
 0x193   : > { %11894 = vst [vmem:[#allocation64_spill] sm:$0xff] %v7780_v52  ;;  %1839 = vmatpush.msrb.mxu0 %v4522_v53  ;;  %1867 = vmatpush.msrb.mxu1 %v4523_v62  ;;  %v4524_v28 = vld [vmem:[%s11828_s1 + $0x700] sm:$0xff]  ;;  %v4525_v52 = vld [vmem:[%s11828_s1 + $0x8f8] sm:$0xff]  ;;  %v4528_v62 = vld [vmem:[%s11828_s1 + $0x8f0] sm:$0xff] }
 0x194   : > { %1840 = vmatmul.f32.vlgmr.msrb.gmra.mxu0 %v3984_v43  ;;  %1898 = vmatmul.f32.vlgmr.msrb.gmra.mxu2 %v3986_v13  ;;  %v4526_v53 = vld [vmem:[%s11828_s1 + $0x600] sm:$0xff]  ;;  %v4527_v13 = vld [vmem:[%s11828_s1 + $0x7f8] sm:$0xff] }
 0x195   : > { %1926 = vmatpush.msrb.mxu3 %v4524_v28  ;;  %1998 = vmatpush.msra.mxu2 %v4525_v52  ;;  %v7802_v43 = vpop.f32.mrf.mxu2  ;;  %v4529_v52 = vld [vmem:[%s11828_s1 + $0x978] sm:$0xff] }
 0x196   : > { %1868 = vmatpush.msrb.mxu1 %v4526_v53  ;;  %1940 = vmatpush.msra.mxu0 %v4527_v13  ;;  %11895 = vst [vmem:[#allocation65_spill] sm:$0xff] %v7802_v43  ;;  %v4530_v53 = vld [vmem:[%s11828_s1 + $0x7f0] sm:$0xff]  ;;  %v4532_v13 = vld [vmem:[%s11828_s1 + $0x8e8] sm:$0xff]  ;;  %v4538_v43 = vld [vmem:[%s11828_s1 + $0x7e0] sm:$0xff] }
 0x197   : > { %1869 = vmatmul.f32.vlgmr.msrb.gmra.mxu1 %v3985_v25  ;;  %1927 = vmatmul.f32.vlgmr.msrb.gmra.mxu3 %v3987_v54  ;;  %v4531_v54 = vld [vmem:[%s11828_s1 + $0x878] sm:$0xff] }
 0x198   : > { %1999 = vmatpush.msra.mxu2 %v4528_v62  ;;  %2027 = vmatpush.msra.mxu3 %v4529_v52  ;;  %v7810_v28 = vpop.f32.mrf.mxu3  ;;  %v4533_v62 = vld [vmem:[%s11828_s1 + $0x970] sm:$0xff]  ;;  %v4534_v52 = vld [vmem:[%s11828_s1 + $0x7e8] sm:$0xff] }
 0x199   : > { %11896 = vst [vmem:[#allocation66_spill] sm:$0xff] %v7810_v28  ;;  %1941 = vmatpush.msra.mxu0 %v4530_v53  ;;  %1969 = vmatpush.msra.mxu1 %v4531_v54  ;;  %v7818_v25 = vpop.f32.mrf.mxu0  ;;  %v4535_v53 = vld [vmem:[%s11828_s1 + $0x870] sm:$0xff]  ;;  %v4009_v54 = vld [vmem:[%s5712_s7 + $0x440] sm:$0xff] }
 0x19a   : > { %11897 = vst [vmem:[#allocation67_spill] sm:$0xff] %v7818_v25  ;;  %2000 = vmatpush.msra.mxu2 %v4532_v13  ;;  %2028 = vmatpush.msra.mxu3 %v4533_v62  ;;  %v4011_v28 = vld [vmem:[%s5712_s7 + $0x450] sm:$0xff]  ;;  %v4536_v13 = vld [vmem:[%s11828_s1 + $0x8e0] sm:$0xff]  ;;  %v4537_v62 = vld [vmem:[%s11828_s1 + $0x968] sm:$0xff] }
 0x19b   : > { %1942 = vmatpush.msra.mxu0 %v4534_v52  ;;  %1970 = vmatpush.msra.mxu1 %v4535_v53  ;;  %v4539_v53 = vld [vmem:[%s11828_s1 + $0x868] sm:$0xff]  ;;  %v4012_v25 = vld [vmem:[%s5712_s7 + $0x458] sm:$0xff] }
 0x19c   : > { %2001 = vmatpush.msra.mxu2 %v4536_v13  ;;  %2029 = vmatpush.msra.mxu3 %v4537_v62  ;;  %v7840_v52 = vpop.f32.mrf.mxu1  ;;  %v4010_v13 = vld [vmem:[%s5712_s7 + $0x448] sm:$0xff]  ;;  %v4540_v62 = vld [vmem:[%s11828_s1 + $0x8d8] sm:$0xff] }
 0x19d   : > { %1943 = vmatpush.msra.mxu0 %v4538_v43  ;;  %1971 = vmatpush.msra.mxu1 %v4539_v53  ;;  %v4542_v43 = vld [vmem:[%s11828_s1 + $0x7d8] sm:$0xff]  ;;  %v4544_v53 = vld [vmem:[%s11828_s1 + $0x8d0] sm:$0xff] }
 0x19e   : > { %1843 = vmatmul.f32.gmra.mxu0 %v4009_v54  ;;  %1901 = vmatmul.f32.gmra.mxu2 %v4011_v28  ;;  %v4543_v28 = vld [vmem:[%s11828_s1 + $0x860] sm:$0xff] }
 0x19f   : > { %2002 = vmatpush.msra.mxu2 %v4540_v62  ;;  %2030 = vmatpush.msra.mxu3 %v4541_v36  ;;  %v7862_v54 = vpop.f32.mrf.mxu2  ;;  %v4545_v36 = vld [vmem:[%s11828_s1 + $0x958] sm:$0xff] }
 0x1a0   : > { %1944 = vmatpush.msra.mxu0 %v4542_v43  ;;  %1972 = vmatpush.msra.mxu1 %v4543_v28  ;;  %v4546_v43 = vld [vmem:[%s11828_s1 + $0x7d0] sm:$0xff]  ;;  %v4548_v28 = vld [vmem:[%s11828_s1 + $0x8c8] sm:$0xff] }
 0x1a1   : > { %1872 = vmatmul.f32.gmra.mxu1 %v4010_v13  ;;  %1930 = vmatmul.f32.gmra.mxu3 %v4012_v25  ;;  %v4547_v25 = vld [vmem:[%s11828_s1 + $0x858] sm:$0xff] }
 0x1a2   : > { %2003 = vmatpush.msra.mxu2 %v4544_v53  ;;  %2031 = vmatpush.msra.mxu3 %v4545_v36  ;;  %v7870_v62 = vpop.f32.mrf.mxu3  ;;  %v4549_v53 = vld [vmem:[%s11828_s1 + $0x950] sm:$0xff]  ;;  %v4550_v36 = vld [vmem:[%s11828_s1 + $0x7c8] sm:$0xff] }
 0x1a3   : > { %1945 = vmatpush.msra.mxu0 %v4546_v43  ;;  %1973 = vmatpush.msra.mxu1 %v4547_v25  ;;  %v7878_v13 = vpop.f32.mrf.mxu0  ;;  %v4551_v43 = vld [vmem:[%s11828_s1 + $0x850] sm:$0xff]  ;;  %v4034_v25 = vld [vmem:[%s5712_s7 + $0x508] sm:$0xff] }
 0x1a4   : > { %11898 = vst [vmem:[#allocation68_spill] sm:$0xff] %v7878_v13  ;;  %2004 = vmatpush.msra.mxu2 %v4548_v28  ;;  %2032 = vmatpush.msra.mxu3 %v4549_v53  ;;  %v4036_v13 = vld [vmem:[%s5712_s7 + $0x518] sm:$0xff]  ;;  %v4552_v28 = vld [vmem:[%s11828_s1 + $0x8c0] sm:$0xff]  ;;  %v4553_v53 = vld [vmem:[%s11828_s1 + $0x948] sm:$0xff] }
 0x1a5   : > { %1946 = vmatpush.msra.mxu0 %v4550_v36  ;;  %1974 = vmatpush.msra.mxu1 %v4551_v43  ;;  %v4555_v43 = vld [vmem:[%s11828_s1 + $0x848] sm:$0xff] }
 0x1a6   : > { %2005 = vmatpush.msra.mxu2 %v4552_v28  ;;  %2033 = vmatpush.msra.mxu3 %v4553_v53  ;;  %v7900_v36 = vpop.f32.mrf.mxu1  ;;  %v4035_v28 = vld [vmem:[%s5712_s7 + $0x510] sm:$0xff]  ;;  %v4556_v53 = vld [vmem:[%s11828_s1 + $0x8b8] sm:$0xff] }
 0x1a7   : > { %1947 = vmatpush.msra.mxu0 %v4554_v32  ;;  %1975 = vmatpush.msra.mxu1 %v4555_v43  ;;  %v4558_v32 = vld [vmem:[%s11828_s1 + $0x7b8] sm:$0xff]  ;;  %v4560_v43 = vld [vmem:[%s11828_s1 + $0x8b0] sm:$0xff] }
 0x1a8   : > { %1846 = vmatmul.f32.gmra.mxu0 %v4034_v25  ;;  %1904 = vmatmul.f32.gmra.mxu2 %v4036_v13  ;;  %v4559_v13 = vld [vmem:[%s11828_s1 + $0x840] sm:$0xff] }
 0x1a9   : > { %2006 = vmatpush.msra.mxu2 %v4556_v53  ;;  %2034 = vmatpush.msra.mxu3 %v4557_v37  ;;  %v7922_v25 = vpop.f32.mrf.mxu2  ;;  %v4561_v37 = vld [vmem:[%s11828_s1 + $0x938] sm:$0xff] }
 0x1aa   : > { %1948 = vmatpush.msra.mxu0 %v4558_v32  ;;  %1976 = vmatpush.msra.mxu1 %v4559_v13  ;;  %v4562_v32 = vld [vmem:[%s11828_s1 + $0x7b0] sm:$0xff]  ;;  %v4564_v13 = vld [vmem:[%s11828_s1 + $0x8a8] sm:$0xff] }
 0x1ab   : > { %1875 = vmatmul.f32.gmra.mxu1 %v4035_v28  ;;  %1933 = vmatmul.f32.gmra.mxu3 %v4037_v51  ;;  %v4563_v51 = vld [vmem:[%s11828_s1 + $0x838] sm:$0xff] }
 0x1ac   : > { %2007 = vmatpush.msra.mxu2 %v4560_v43  ;;  %2035 = vmatpush.msra.mxu3 %v4561_v37  ;;  %v7930_v53 = vpop.f32.mrf.mxu3  ;;  %v4565_v43 = vld [vmem:[%s11828_s1 + $0x930] sm:$0xff]  ;;  %v4566_v37 = vld [vmem:[%s11828_s1 + $0x7a8] sm:$0xff] }
 0x1ad   : > { %11899 = vst [vmem:[#allocation69_spill] sm:$0xff] %v7930_v53  ;;  %1949 = vmatpush.msra.mxu0 %v4562_v32  ;;  %1977 = vmatpush.msra.mxu1 %v4563_v51  ;;  %v7938_v28 = vpop.f32.mrf.mxu0  ;;  %v4567_v32 = vld [vmem:[%s11828_s1 + $0x830] sm:$0xff] }
 0x1ae   : > { %11900 = vst [vmem:[#allocation70_spill] sm:$0xff] %v7938_v28  ;;  %2008 = vmatpush.msra.mxu2 %v4564_v13  ;;  %2036 = vmatpush.msra.mxu3 %v4565_v43  ;;  %v4059_v51 = vld [vmem:[%s5712_s7 + $0x5d0] sm:$0x1]  ;;  %v4061_v28 = vld [vmem:[%s5712_s7 + $0x5e0] sm:$0x1]  ;;  %v4569_v43 = vld [vmem:[%s11828_s1 + $0x928] sm:$0xff] }
 0x1af   : > { %1950 = vmatpush.msra.mxu0 %v4566_v37  ;;  %1978 = vmatpush.msra.mxu1 %v4567_v32  ;;  %v4568_v13 = vld [vmem:[%s11828_s1 + $0x8a0] sm:$0xff]  ;;  %v4571_v32 = vld [vmem:[%s11828_s1 + $0x828] sm:$0xff] }
 0x1b0   : > { %2009 = vmatpush.msra.mxu2 %v4568_v13  ;;  %2037 = vmatpush.msra.mxu3 %v4569_v43  ;;  %v7960_v37 = vpop.f32.mrf.mxu1  ;;  %v4060_v13 = vld [vmem:[%s5712_s7 + $0x5d8] sm:$0x1] }
 0x1b1   : > { %11901 = vst [vmem:[#allocation71_spill] sm:$0xff] %v7960_v37  ;;  %1951 = vmatpush.msra.mxu0 %v4570_v20  ;;  %1979 = vmatpush.msra.mxu1 %v4571_v32  ;;  %v4572_v43 = vld [vmem:[%s11828_s1 + $0x898] sm:$0xff]  ;;  %v4576_v32 = vld [vmem:[%s11828_s1 + $0x890] sm:$0xff]  ;;  %v5373_v37 = vld [vmem:[%s11828_s1 + $0xa60] sm:$0xff] }
 0x1b2   : > { %1849 = vmatmul.f32.gmra.mxu0 %v4059_v51  ;;  %1907 = vmatmul.f32.gmra.mxu2 %v4061_v28  ;;  %v4574_v20 = vld [vmem:[%s11828_s1 + $0x798] sm:$0xff]  ;;  %v4575_v28 = vld [vmem:[%s11828_s1 + $0x820] sm:$0xff] }
 0x1b3   : > { %2010 = vmatpush.msra.mxu2 %v4572_v43  ;;  %2038 = vmatpush.msra.mxu3 %v4573_v56  ;;  %v7982_v51 = vpop.f32.mrf.mxu2  ;;  %v4577_v56 = vld [vmem:[%s11828_s1 + $0x918] sm:$0xff] }
 0x1b4   : > { %1952 = vmatpush.msra.mxu0 %v4574_v20  ;;  %1980 = vmatpush.msra.mxu1 %v4575_v28  ;;  %11902 = vst [vmem:[#allocation72_spill] sm:$0xff] %v7982_v51  ;;  %v4578_v20 = vld [vmem:[%s11828_s1 + $0x790] sm:$0xff]  ;;  %v4580_v28 = vld [vmem:[%s11828_s1 + $0x888] sm:$0xff]  ;;  %v4161_v51 = vld [vmem:[%s5712_s7 + $0x900] sm:$0x1] }
 0x1b5   : > { %1878 = vmatmul.f32.gmra.mxu1 %v4060_v13  ;;  %1936 = vmatmul.f32.gmra.mxu3 %v4062_v5  ;;  %v4579_v5 = vld [vmem:[%s11828_s1 + $0x818] sm:$0xff] }
 0x1b6   : > { %2011 = vmatpush.msra.mxu2 %v4576_v32  ;;  %2039 = vmatpush.msra.mxu3 %v4577_v56  ;;  %v7990_v43 = vpop.f32.mrf.mxu3  ;;  %v4581_v32 = vld [vmem:[%s11828_s1 + $0x910] sm:$0xff]  ;;  %v4582_v56 = vld [vmem:[%s11828_s1 + $0x788] sm:$0xff] }
 0x1b7   : > { %11903 = vst [vmem:[#allocation73_spill] sm:$0xff] %v7990_v43  ;;  %1953 = vmatpush.msra.mxu0 %v4578_v20  ;;  %1981 = vmatpush.msra.mxu1 %v4579_v5  ;;  %v7998_v13 = vpop.f32.mrf.mxu0  ;;  %v4583_v20 = vld [vmem:[%s11828_s1 + $0x810] sm:$0xff]  ;;  %v3988_v5 = vld [vmem:[%s5712_s7 + $0x398] sm:$0xff] }
 0x1b8   : > { %11904 = vst [vmem:[#allocation74_spill] sm:$0xff] %v7998_v13  ;;  %2012 = vmatpush.msra.mxu2 %v4580_v28  ;;  %2040 = vmatpush.msra.mxu3 %v4581_v32  ;;  %v3990_v13 = vld [vmem:[%s5712_s7 + $0x3a8] sm:$0xff]  ;;  %v4584_v28 = vld [vmem:[%s11828_s1 + $0x880] sm:$0xff]  ;;  %v4016_v43 = vld [vmem:[%s5712_s7 + $0x478] sm:$0xff] }
 0x1b9   : > { %1954 = vmatpush.msra.mxu0 %v4582_v56  ;;  %1982 = vmatpush.msra.mxu1 %v4583_v20  ;;  %v4585_v32 = vld [vmem:[%s11828_s1 + $0x908] sm:$0xff] }
 0x1ba   : > { %2013 = vmatpush.msra.mxu2 %v4584_v28  ;;  %2041 = vmatpush.msra.mxu3 %v4585_v32  ;;  %v8020_v56 = vpop.f32.mrf.mxu1  ;;  %v4587_v20 = vld [vmem:[%s11828_s1 + $0x808] sm:$0xff]  ;;  %v3989_v28 = vld [vmem:[%s5712_s7 + $0x3a0] sm:$0xff] }
 0x1bb   : > { %11905 = vst [vmem:[#allocation75_spill] sm:$0xff] %v8020_v56  ;;  %1955 = vmatpush.msra.mxu0 %v4586_v57  ;;  %1983 = vmatpush.msra.mxu1 %v4587_v20  ;;  %v4588_v32 = vld [vmem:[%s11828_s1 + $0x900] sm:$0xff]  ;;  %v4592_v20 = vld [vmem:[%s11828_s1 + $0xaf0] sm:$0xff] }
 0x1bc   : > { %1956 = vmatmul.f32.vlgmr.msra.gmra.mxu0 %v3988_v5  ;;  %2014 = vmatmul.f32.vlgmr.msra.gmra.mxu2 %v3990_v13  ;;  %v4590_v57 = vld [vmem:[%s11828_s1 + $0x800] sm:$0xff]  ;;  %v4591_v13 = vld [vmem:[%s11828_s1 + $0x9f8] sm:$0xff] }
 0x1bd   : > { %2042 = vmatpush.msra.mxu3 %v4588_v32  ;;  %2114 = vmatpush.msrb.mxu2 %v4589_v9  ;;  %v8042_v5 = vpop.f32.mrf.mxu2  ;;  %v4593_v9 = vld [vmem:[%s11828_s1 + $0xb78] sm:$0xff]  ;;  %v4605_v56 = vld [vmem:[%s11828_s1 + $0xb60] sm:$0xff] }
 0x1be   : > { %1984 = vmatpush.msra.mxu1 %v4590_v57  ;;  %2056 = vmatpush.msrb.mxu0 %v4591_v13  ;;  %11906 = vst [vmem:[#allocation76_spill] sm:$0xff] %v8042_v5  ;;  %v4594_v57 = vld [vmem:[%s11828_s1 + $0x9f0] sm:$0xff]  ;;  %v4596_v13 = vld [vmem:[%s11828_s1 + $0xae8] sm:$0xff]  ;;  %v4602_v5 = vld [vmem:[%s11828_s1 + $0x9e0] sm:$0xff] }
 0x1bf   : > { %1985 = vmatmul.f32.vlgmr.msra.gmra.mxu1 %v3989_v28  ;;  %2043 = vmatmul.f32.vlgmr.msra.gmra.mxu3 %v3991_v3  ;;  %v4595_v3 = vld [vmem:[%s11828_s1 + $0xa78] sm:$0xff] }
 0x1c0   : > { %2115 = vmatpush.msrb.mxu2 %v4592_v20  ;;  %2143 = vmatpush.msrb.mxu3 %v4593_v9  ;;  %v8050_v32 = vpop.f32.mrf.mxu3  ;;  %v4597_v20 = vld [vmem:[%s11828_s1 + $0xb70] sm:$0xff]  ;;  %v4598_v9 = vld [vmem:[%s11828_s1 + $0x9e8] sm:$0xff] }
 0x1c1   : > { %11907 = vst [vmem:[#allocation77_spill] sm:$0xff] %v8050_v32  ;;  %2057 = vmatpush.msrb.mxu0 %v4594_v57  ;;  %2085 = vmatpush.msrb.mxu1 %v4595_v3  ;;  %v8058_v28 = vpop.f32.mrf.mxu0  ;;  %v4599_v57 = vld [vmem:[%s11828_s1 + $0xa70] sm:$0xff]  ;;  %v4013_v3 = vld [vmem:[%s5712_s7 + $0x460] sm:$0xff] }
 0x1c2   : > { %2116 = vmatpush.msrb.mxu2 %v4596_v13  ;;  %2144 = vmatpush.msrb.mxu3 %v4597_v20  ;;  %v4015_v32 = vld [vmem:[%s5712_s7 + $0x470] sm:$0xff]  ;;  %v4600_v13 = vld [vmem:[%s11828_s1 + $0xae0] sm:$0xff]  ;;  %v4601_v20 = vld [vmem:[%s11828_s1 + $0xb68] sm:$0xff] }
 0x1c3   : > { %2058 = vmatpush.msrb.mxu0 %v4598_v9  ;;  %2086 = vmatpush.msrb.mxu1 %v4599_v57  ;;  %v4603_v57 = vld [vmem:[%s11828_s1 + $0xa68] sm:$0xff] }
 0x1c4   : > { %2117 = vmatpush.msrb.mxu2 %v4600_v13  ;;  %2145 = vmatpush.msrb.mxu3 %v4601_v20  ;;  %v8080_v9 = vpop.f32.mrf.mxu1  ;;  %v4014_v13 = vld [vmem:[%s5712_s7 + $0x468] sm:$0xff]  ;;  %v4604_v20 = vld [vmem:[%s11828_s1 + $0xad8] sm:$0xff] }
 0x1c5   : > { %11908 = vst [vmem:[#allocation78_spill] sm:$0xff] %v8080_v9  ;;  %2059 = vmatpush.msrb.mxu0 %v4602_v5  ;;  %2087 = vmatpush.msrb.mxu1 %v4603_v57  ;;  %v4606_v5 = vld [vmem:[%s11828_s1 + $0x9d8] sm:$0xff]  ;;  %v4608_v57 = vld [vmem:[%s11828_s1 + $0xad0] sm:$0xff] }
 0x1c6   : > { %1959 = vmatmul.f32.gmra.mxu0 %v4013_v3  ;;  %2017 = vmatmul.f32.gmra.mxu2 %v4015_v32  ;;  %v4607_v32 = vld [vmem:[%s11828_s1 + $0xa60] sm:$0xff]  ;;  %v4272_v9 = vld [vmem:[%s5712_s7 + $0xc78] sm:$0x1] }
 0x1c7   : > { %2118 = vmatpush.msrb.mxu2 %v4604_v20  ;;  %2146 = vmatpush.msrb.mxu3 %v4605_v56  ;;  %v8102_v3 = vpop.f32.mrf.mxu2  ;;  %v4609_v56 = vld [vmem:[%s11828_s1 + $0xb58] sm:$0xff] }
 0x1c8   : > { %2060 = vmatpush.msrb.mxu0 %v4606_v5  ;;  %2088 = vmatpush.msrb.mxu1 %v4607_v32  ;;  %11909 = vst [vmem:[#allocation79_spill] sm:$0xff] %v8102_v3  ;;  %v4610_v5 = vld [vmem:[%s11828_s1 + $0x9d0] sm:$0xff]  ;;  %v4612_v32 = vld [vmem:[%s11828_s1 + $0xac8] sm:$0xff] }
 0x1c9   : > { %1988 = vmatmul.f32.gmra.mxu1 %v4014_v13  ;;  %2046 = vmatmul.f32.gmra.mxu3 %v4016_v43  ;;  %v4611_v43 = vld [vmem:[%s11828_s1 + $0xa58] sm:$0xff]  ;;  %v4214_v3 = vld [vmem:[%s5712_s7 + $0xaa8] sm:$0xff] }
 0x1ca   : > { %2119 = vmatpush.msrb.mxu2 %v4608_v57  ;;  %2147 = vmatpush.msrb.mxu3 %v4609_v56  ;;  %v8110_v20 = vpop.f32.mrf.mxu3  ;;  %v4613_v57 = vld [vmem:[%s11828_s1 + $0xb50] sm:$0xff]  ;;  %v4614_v56 = vld [vmem:[%s11828_s1 + $0x9c8] sm:$0xff] }
 0x1cb   : > { %11910 = vst [vmem:[#allocation80_spill] sm:$0xff] %v8110_v20  ;;  %2061 = vmatpush.msrb.mxu0 %v4610_v5  ;;  %2089 = vmatpush.msrb.mxu1 %v4611_v43  ;;  %v8118_v13 = vpop.f32.mrf.mxu0  ;;  %v4615_v5 = vld [vmem:[%s11828_s1 + $0xa50] sm:$0xff]  ;;  %v4038_v43 = vld [vmem:[%s5712_s7 + $0x528] sm:$0xff]  ;;  %v4954_v20 = vld [vmem:[%s11828_s1 + $0x720] sm:$0xff] }
 0x1cc   : > { %11911 = vst [vmem:[#allocation81_spill] sm:$0xff] %v8118_v13  ;;  %2120 = vmatpush.msrb.mxu2 %v4612_v32  ;;  %2148 = vmatpush.msrb.mxu3 %v4613_v57  ;;  %v4616_v32 = vld [vmem:[%s11828_s1 + $0xac0] sm:$0xff]  ;;  %v4617_v57 = vld [vmem:[%s11828_s1 + $0xb48] sm:$0xff]  ;;  %v4140_v13 = vld [vmem:[%s5712_s7 + $0x858] sm:$0xff] }
 0x1cd   : > { %2062 = vmatpush.msrb.mxu0 %v4614_v56  ;;  %2090 = vmatpush.msrb.mxu1 %v4615_v5  ;;  %v4619_v5 = vld [vmem:[%s11828_s1 + $0xa48] sm:$0xff] }
 0x1ce   : > { %2121 = vmatpush.msrb.mxu2 %v4616_v32  ;;  %2149 = vmatpush.msrb.mxu3 %v4617_v57  ;;  %v8140_v56 = vpop.f32.mrf.mxu1  ;;  %v4039_v32 = vld [vmem:[%s5712_s7 + $0x530] sm:$0xff]  ;;  %v4620_v57 = vld [vmem:[%s11828_s1 + $0xab8] sm:$0xff] }
 0x1cf   : > { %11912 = vst [vmem:[#allocation82_spill] sm:$0xff] %v8140_v56  ;;  %2063 = vmatpush.msrb.mxu0 %v4618_v46  ;;  %2091 = vmatpush.msrb.mxu1 %v4619_v5  ;;  %v4621_v56 = vld [vmem:[%s11828_s1 + $0xb40] sm:$0xff]  ;;  %v4622_v46 = vld [vmem:[%s11828_s1 + $0x9b8] sm:$0xff]  ;;  %v4624_v5 = vld [vmem:[%s11828_s1 + $0xab0] sm:$0xff] }
 0x1d0   : > { %1962 = vmatmul.f32.gmra.mxu0 %v4038_v43  ;;  %2020 = vmatmul.f32.gmra.mxu2 %v4040_v30  ;;  %v4623_v30 = vld [vmem:[%s11828_s1 + $0xa40] sm:$0xff] }
 0x1d1   : > { %2122 = vmatpush.msrb.mxu2 %v4620_v57  ;;  %2150 = vmatpush.msrb.mxu3 %v4621_v56  ;;  %v8162_v43 = vpop.f32.mrf.mxu2  ;;  %v4625_v56 = vld [vmem:[%s11828_s1 + $0xb38] sm:$0xff] }
 0x1d2   : > { %2064 = vmatpush.msrb.mxu0 %v4622_v46  ;;  %2092 = vmatpush.msrb.mxu1 %v4623_v30  ;;  %11913 = vst [vmem:[#allocation83_spill] sm:$0xff] %v8162_v43  ;;  %v4626_v46 = vld [vmem:[%s11828_s1 + $0x9b0] sm:$0xff]  ;;  %v4628_v30 = vld [vmem:[%s11828_s1 + $0xaa8] sm:$0xff] }
 0x1d3   : > { %1991 = vmatmul.f32.gmra.mxu1 %v4039_v32  ;;  %2049 = vmatmul.f32.gmra.mxu3 %v4041_v11  ;;  %v4627_v11 = vld [vmem:[%s11828_s1 + $0xa38] sm:$0xff]  ;;  %v4066_v43 = vld [vmem:[%s5712_s7 + $0x608] sm:$0x1] }
 0x1d4   : > { %2123 = vmatpush.msrb.mxu2 %v4624_v5  ;;  %2151 = vmatpush.msrb.mxu3 %v4625_v56  ;;  %v8170_v57 = vpop.f32.mrf.mxu3  ;;  %v4629_v5 = vld [vmem:[%s11828_s1 + $0xb30] sm:$0xff]  ;;  %v4630_v56 = vld [vmem:[%s11828_s1 + $0x9a8] sm:$0xff] }
 0x1d5   : > { %11914 = vst [vmem:[#allocation84_spill] sm:$0xff] %v8170_v57  ;;  %2065 = vmatpush.msrb.mxu0 %v4626_v46  ;;  %2093 = vmatpush.msrb.mxu1 %v4627_v11  ;;  %v8178_v32 = vpop.f32.mrf.mxu0  ;;  %v4631_v46 = vld [vmem:[%s11828_s1 + $0xa30] sm:$0xff]  ;;  %v4065_v57 = vld [vmem:[%s5712_s7 + $0x600] sm:$0x1] }
 0x1d6   : > { %11915 = vst [vmem:[#allocation85_spill] sm:$0xff] %v8178_v32  ;;  %2124 = vmatpush.msrb.mxu2 %v4628_v30  ;;  %2152 = vmatpush.msrb.mxu3 %v4629_v5  ;;  %v4063_v11 = vld [vmem:[%s5712_s7 + $0x5f0] sm:$0x1]  ;;  %v4632_v30 = vld [vmem:[%s11828_s1 + $0xaa0] sm:$0xff]  ;;  %v4633_v5 = vld [vmem:[%s11828_s1 + $0xb28] sm:$0xff] }
 0x1d7   : > { %2066 = vmatpush.msrb.mxu0 %v4630_v56  ;;  %2094 = vmatpush.msrb.mxu1 %v4631_v46  ;;  %v4634_v32 = vld [vmem:[%s11828_s1 + $0x9a0] sm:$0xff]  ;;  %v4635_v46 = vld [vmem:[%s11828_s1 + $0xa28] sm:$0xff] }
 0x1d8   : > { %2125 = vmatpush.msrb.mxu2 %v4632_v30  ;;  %2153 = vmatpush.msrb.mxu3 %v4633_v5  ;;  %v8200_v56 = vpop.f32.mrf.mxu1  ;;  %v4064_v30 = vld [vmem:[%s5712_s7 + $0x5f8] sm:$0x1] }
 0x1d9   : > { %11916 = vst [vmem:[#allocation86_spill] sm:$0xff] %v8200_v56  ;;  %2067 = vmatpush.msrb.mxu0 %v4634_v32  ;;  %2095 = vmatpush.msrb.mxu1 %v4635_v46  ;;  %v4636_v5 = vld [vmem:[%s11828_s1 + $0xa98] sm:$0xff]  ;;  %v4637_v56 = vld [vmem:[%s11828_s1 + $0xb20] sm:$0xff]  ;;  %v4640_v46 = vld [vmem:[%s11828_s1 + $0xa90] sm:$0xff] }
 0x1da   : > { %1965 = vmatmul.f32.gmra.mxu0 %v4063_v11  ;;  %2023 = vmatmul.f32.gmra.mxu2 %v4065_v57  ;;  %v4638_v32 = vld [vmem:[%s11828_s1 + $0x998] sm:$0xff]  ;;  %v4639_v57 = vld [vmem:[%s11828_s1 + $0xa20] sm:$0xff] }
 0x1db   : > { %2126 = vmatpush.msrb.mxu2 %v4636_v5  ;;  %2154 = vmatpush.msrb.mxu3 %v4637_v56  ;;  %v8222_v11 = vpop.f32.mrf.mxu2  ;;  %v4641_v56 = vld [vmem:[%s11828_s1 + $0xb18] sm:$0xff] }
 0x1dc   : > { %2068 = vmatpush.msrb.mxu0 %v4638_v32  ;;  %2096 = vmatpush.msrb.mxu1 %v4639_v57  ;;  %11917 = vst [vmem:[#allocation87_spill] sm:$0xff] %v8222_v11  ;;  %v4642_v32 = vld [vmem:[%s11828_s1 + $0x990] sm:$0xff]  ;;  %v4644_v57 = vld [vmem:[%s11828_s1 + $0xa88] sm:$0xff] }
 0x1dd   : > { %1994 = vmatmul.f32.gmra.mxu1 %v4064_v30  ;;  %2052 = vmatmul.f32.gmra.mxu3 %v4066_v43  ;;  %v4643_v43 = vld [vmem:[%s11828_s1 + $0xa18] sm:$0xff]  ;;  %v3995_v11 = vld [vmem:[%s5712_s7 + $0x3d0] sm:$0xff] }
 0x1de   : > { %2127 = vmatpush.msrb.mxu2 %v4640_v46  ;;  %2155 = vmatpush.msrb.mxu3 %v4641_v56  ;;  %v8230_v5 = vpop.f32.mrf.mxu3  ;;  %v4645_v46 = vld [vmem:[%s11828_s1 + $0xb10] sm:$0xff]  ;;  %v4646_v56 = vld [vmem:[%s11828_s1 + $0x988] sm:$0xff] }
 0x1df   : > { %11918 = vst [vmem:[#allocation88_spill] sm:$0xff] %v8230_v5  ;;  %2069 = vmatpush.msrb.mxu0 %v4642_v32  ;;  %2097 = vmatpush.msrb.mxu1 %v4643_v43  ;;  %v8238_v30 = vpop.f32.mrf.mxu0  ;;  %v4647_v32 = vld [vmem:[%s11828_s1 + $0xa10] sm:$0xff]  ;;  %v3992_v43 = vld [vmem:[%s5712_s7 + $0x3b8] sm:$0xff]  ;;  %v3994_v5 = vld [vmem:[%s5712_s7 + $0x3c8] sm:$0xff] }
 0x1e0   : > { %11919 = vst [vmem:[#allocation89_spill] sm:$0xff] %v8238_v30  ;;  %2128 = vmatpush.msrb.mxu2 %v4644_v57  ;;  %2156 = vmatpush.msrb.mxu3 %v4645_v46  ;;  %v4648_v57 = vld [vmem:[%s11828_s1 + $0xa80] sm:$0xff]  ;;  %v4649_v46 = vld [vmem:[%s11828_s1 + $0xb08] sm:$0xff] }
 0x1e1   : > { %2070 = vmatpush.msrb.mxu0 %v4646_v56  ;;  %2098 = vmatpush.msrb.mxu1 %v4647_v32  ;;  %v4650_v30 = vld [vmem:[%s11828_s1 + $0x980] sm:$0xff]  ;;  %v4651_v32 = vld [vmem:[%s11828_s1 + $0xa08] sm:$0xff] }
 0x1e2   : > { %2129 = vmatpush.msrb.mxu2 %v4648_v57  ;;  %2157 = vmatpush.msrb.mxu3 %v4649_v46  ;;  %v8260_v56 = vpop.f32.mrf.mxu1  ;;  %v3993_v57 = vld [vmem:[%s5712_s7 + $0x3c0] sm:$0xff] }
 0x1e3   : > { %11920 = vst [vmem:[#allocation90_spill] sm:$0xff] %v8260_v56  ;;  %2071 = vmatpush.msrb.mxu0 %v4650_v30  ;;  %2099 = vmatpush.msrb.mxu1 %v4651_v32  ;;  %v4652_v46 = vld [vmem:[%s11828_s1 + $0xb00] sm:$0xff]  ;;  %v4653_v56 = vld [vmem:[%s11828_s1 + $0x78] sm:$0xff]  ;;  %v4656_v32 = vld [vmem:[%s11828_s1 + $0x70] sm:$0xff] }
 0x1e4   : > { %2072 = vmatmul.f32.vlgmr.msrb.gmra.mxu0 %v3992_v43  ;;  %2130 = vmatmul.f32.vlgmr.msrb.gmra.mxu2 %v3994_v5  ;;  %v4654_v30 = vld [vmem:[%s11828_s1 + $0xa00] sm:$0xff]  ;;  %v4655_v5 = vld [vmem:[%s11828_s1 + $0xbf8] sm:$0xff] }
 0x1e5   : > { %2158 = vmatpush.msrb.mxu3 %v4652_v46  ;;  %2339 = vmatpush.msra.mxu2 %v4653_v56  ;;  %v8282_v43 = vpop.f32.mrf.mxu2  ;;  %v4657_v56 = vld [vmem:[%s11828_s1 + $0xf8] sm:$0xff] }
 0x1e6   : > { %2100 = vmatpush.msrb.mxu1 %v4654_v30  ;;  %2172 = vmatpush.msra.mxu0 %v4655_v5  ;;  %11921 = vst [vmem:[#allocation91_spill] sm:$0xff] %v8282_v43  ;;  %v4658_v30 = vld [vmem:[%s11828_s1 + $0xbf0] sm:$0xff]  ;;  %v4660_v5 = vld [vmem:[%s11828_s1 + $0x68] sm:$0xff]  ;;  %v4666_v43 = vld [vmem:[%s11828_s1 + $0xbe0] sm:$0xff] }
 0x1e7   : > { %2101 = vmatmul.f32.vlgmr.msrb.gmra.mxu1 %v3993_v57  ;;  %2159 = vmatmul.f32.vlgmr.msrb.gmra.mxu3 %v3995_v11  ;;  %v4659_v11 = vld [vmem:[%s11828_s1 + $0xc78] sm:$0xff] }
 0x1e8   : > { %2340 = vmatpush.msra.mxu2 %v4656_v32  ;;  %2368 = vmatpush.msra.mxu3 %v4657_v56  ;;  %v8290_v46 = vpop.f32.mrf.mxu3  ;;  %v4661_v32 = vld [vmem:[%s11828_s1 + $0xf0] sm:$0xff]  ;;  %v4662_v56 = vld [vmem:[%s11828_s1 + $0xbe8] sm:$0xff] }
 0x1e9   : > { %11922 = vst [vmem:[#allocation92_spill] sm:$0xff] %v8290_v46  ;;  %2173 = vmatpush.msra.mxu0 %v4658_v30  ;;  %2201 = vmatpush.msra.mxu1 %v4659_v11  ;;  %v8298_v57 = vpop.f32.mrf.mxu0  ;;  %v4663_v30 = vld [vmem:[%s11828_s1 + $0xc70] sm:$0xff]  ;;  %v4017_v11 = vld [vmem:[%s5712_s7 + $0x480] sm:$0xff] }
 0x1ea   : > { %11923 = vst [vmem:[#allocation93_spill] sm:$0xff] %v8298_v57  ;;  %2341 = vmatpush.msra.mxu2 %v4660_v5  ;;  %2369 = vmatpush.msra.mxu3 %v4661_v32  ;;  %v4019_v46 = vld [vmem:[%s5712_s7 + $0x490] sm:$0xff]  ;;  %v4664_v5 = vld [vmem:[%s11828_s1 + $0x60] sm:$0xff]  ;;  %v4665_v32 = vld [vmem:[%s11828_s1 + $0xe8] sm:$0xff] }
 0x1eb   : > { %2174 = vmatpush.msra.mxu0 %v4662_v56  ;;  %2202 = vmatpush.msra.mxu1 %v4663_v30  ;;  %v4667_v30 = vld [vmem:[%s11828_s1 + $0xc68] sm:$0xff]  ;;  %v4020_v57 = vld [vmem:[%s5712_s7 + $0x498] sm:$0xff] }
 0x1ec   : > { %2342 = vmatpush.msra.mxu2 %v4664_v5  ;;  %2370 = vmatpush.msra.mxu3 %v4665_v32  ;;  %v8320_v56 = vpop.f32.mrf.mxu1  ;;  %v4018_v5 = vld [vmem:[%s5712_s7 + $0x488] sm:$0xff]  ;;  %v4668_v32 = vld [vmem:[%s11828_s1 + $0x58] sm:$0xff] }
 0x1ed   : > { %11924 = vst [vmem:[#allocation94_spill] sm:$0xff] %v8320_v56  ;;  %2175 = vmatpush.msra.mxu0 %v4666_v43  ;;  %2203 = vmatpush.msra.mxu1 %v4667_v30  ;;  %v4669_v56 = vld [vmem:[%s11828_s1 + $0xe0] sm:$0xff]  ;;  %v4670_v43 = vld [vmem:[%s11828_s1 + $0xbd8] sm:$0xff]  ;;  %v4672_v30 = vld [vmem:[%s11828_s1 + $0x50] sm:$0xff] }
 0x1ee   : > { %2075 = vmatmul.f32.gmra.mxu0 %v4017_v11  ;;  %2133 = vmatmul.f32.gmra.mxu2 %v4019_v46  ;;  %v4671_v46 = vld [vmem:[%s11828_s1 + $0xc60] sm:$0xff] }
 0x1ef   : > { %2343 = vmatpush.msra.mxu2 %v4668_v32  ;;  %2371 = vmatpush.msra.mxu3 %v4669_v56  ;;  %v8342_v11 = vpop.f32.mrf.mxu2  ;;  %v4673_v56 = vld [vmem:[%s11828_s1 + $0xd8] sm:$0xff] }
 0x1f0   : > { %2176 = vmatpush.msra.mxu0 %v4670_v43  ;;  %2204 = vmatpush.msra.mxu1 %v4671_v46  ;;  %11925 = vst [vmem:[#allocation95_spill] sm:$0xff] %v8342_v11  ;;  %v4674_v43 = vld [vmem:[%s11828_s1 + $0xbd0] sm:$0xff]  ;;  %v4676_v46 = vld [vmem:[%s11828_s1 + $0x48] sm:$0xff]  ;;  %v4045_v11 = vld [vmem:[%s5712_s7 + $0x560] sm:$0xff] }
 0x1f1   : > { %2104 = vmatmul.f32.gmra.mxu1 %v4018_v5  ;;  %2162 = vmatmul.f32.gmra.mxu3 %v4020_v57  ;;  %v4675_v57 = vld [vmem:[%s11828_s1 + $0xc58] sm:$0xff] }
 0x1f2   : > { %2344 = vmatpush.msra.mxu2 %v4672_v30  ;;  %2372 = vmatpush.msra.mxu3 %v4673_v56  ;;  %v8350_v32 = vpop.f32.mrf.mxu3  ;;  %v4677_v30 = vld [vmem:[%s11828_s1 + $0xd0] sm:$0xff]  ;;  %v4678_v56 = vld [vmem:[%s11828_s1 + $0xbc8] sm:$0xff] }
 0x1f3   : > { %11926 = vst [vmem:[#allocation96_spill] sm:$0xff] %v8350_v32  ;;  %2177 = vmatpush.msra.mxu0 %v4674_v43  ;;  %2205 = vmatpush.msra.mxu1 %v4675_v57  ;;  %v8358_v5 = vpop.f32.mrf.mxu0  ;;  %v4679_v43 = vld [vmem:[%s11828_s1 + $0xc50] sm:$0xff]  ;;  %v4042_v57 = vld [vmem:[%s5712_s7 + $0x548] sm:$0xff]  ;;  %v4044_v32 = vld [vmem:[%s5712_s7 + $0x558] sm:$0xff] }
 0x1f4   : > { %11927 = vst [vmem:[#allocation97_spill] sm:$0xff] %v8358_v5  ;;  %2345 = vmatpush.msra.mxu2 %v4676_v46  ;;  %2373 = vmatpush.msra.mxu3 %v4677_v30  ;;  %v4680_v46 = vld [vmem:[%s11828_s1 + $0x40] sm:$0xff]  ;;  %v4681_v30 = vld [vmem:[%s11828_s1 + $0xc8] sm:$0xff] }
 0x1f5   : > { %2178 = vmatpush.msra.mxu0 %v4678_v56  ;;  %2206 = vmatpush.msra.mxu1 %v4679_v43  ;;  %v4682_v5 = vld [vmem:[%s11828_s1 + $0xbc0] sm:$0xff]  ;;  %v4683_v43 = vld [vmem:[%s11828_s1 + $0xc48] sm:$0xff] }
 0x1f6   : > { %2346 = vmatpush.msra.mxu2 %v4680_v46  ;;  %2374 = vmatpush.msra.mxu3 %v4681_v30  ;;  %v8380_v56 = vpop.f32.mrf.mxu1  ;;  %v4043_v46 = vld [vmem:[%s5712_s7 + $0x550] sm:$0xff]  ;;  %v4684_v30 = vld [vmem:[%s11828_s1 + $0x38] sm:$0xff] }
 0x1f7   : > { %11928 = vst [vmem:[#allocation98_spill] sm:$0xff] %v8380_v56  ;;  %2179 = vmatpush.msra.mxu0 %v4682_v5  ;;  %2207 = vmatpush.msra.mxu1 %v4683_v43  ;;  %v4685_v56 = vld [vmem:[%s11828_s1 + $0xc0] sm:$0xff]  ;;  %v4686_v5 = vld [vmem:[%s11828_s1 + $0xbb8] sm:$0xff]  ;;  %v4688_v43 = vld [vmem:[%s11828_s1 + $0x30] sm:$0xff] }
 0x1f8   : > { %2078 = vmatmul.f32.gmra.mxu0 %v4042_v57  ;;  %2136 = vmatmul.f32.gmra.mxu2 %v4044_v32  ;;  %v4687_v32 = vld [vmem:[%s11828_s1 + $0xc40] sm:$0xff] }
 0x1f9   : > { %2347 = vmatpush.msra.mxu2 %v4684_v30  ;;  %2375 = vmatpush.msra.mxu3 %v4685_v56  ;;  %v8402_v57 = vpop.f32.mrf.mxu2  ;;  %v4689_v56 = vld [vmem:[%s11828_s1 + $0xb8] sm:$0xff] }
 0x1fa   : > { %2180 = vmatpush.msra.mxu0 %v4686_v5  ;;  %2208 = vmatpush.msra.mxu1 %v4687_v32  ;;  %11929 = vst [vmem:[#allocation99_spill] sm:$0xff] %v8402_v57  ;;  %v4690_v5 = vld [vmem:[%s11828_s1 + $0xbb0] sm:$0xff]  ;;  %v4692_v32 = vld [vmem:[%s11828_s1 + $0x28] sm:$0xff] }
 0x1fb   : > { %2107 = vmatmul.f32.gmra.mxu1 %v4043_v46  ;;  %2165 = vmatmul.f32.gmra.mxu3 %v4045_v11  ;;  %v4691_v11 = vld [vmem:[%s11828_s1 + $0xc38] sm:$0xff]  ;;  %v4070_v57 = vld [vmem:[%s5712_s7 + $0x628] sm:$0x1] }
 0x1fc   : > { %2348 = vmatpush.msra.mxu2 %v4688_v43  ;;  %2376 = vmatpush.msra.mxu3 %v4689_v56  ;;  %v8410_v30 = vpop.f32.mrf.mxu3  ;;  %v4693_v43 = vld [vmem:[%s11828_s1 + $0xb0] sm:$0xff]  ;;  %v4694_v56 = vld [vmem:[%s11828_s1 + $0xba8] sm:$0xff] }
 0x1fd   : > { %11930 = vst [vmem:[#allocation100_spill] sm:$0xff] %v8410_v30  ;;  %2181 = vmatpush.msra.mxu0 %v4690_v5  ;;  %2209 = vmatpush.msra.mxu1 %v4691_v11  ;;  %v8418_v46 = vpop.f32.mrf.mxu0  ;;  %v4695_v5 = vld [vmem:[%s11828_s1 + $0xc30] sm:$0xff]  ;;  %v4069_v30 = vld [vmem:[%s5712_s7 + $0x620] sm:$0x1] }
 0x1fe   : > { %11931 = vst [vmem:[#allocation101_spill] sm:$0xff] %v8418_v46  ;;  %2349 = vmatpush.msra.mxu2 %v4692_v32  ;;  %2377 = vmatpush.msra.mxu3 %v4693_v43  ;;  %v4067_v11 = vld [vmem:[%s5712_s7 + $0x610] sm:$0x1]  ;;  %v4696_v32 = vld [vmem:[%s11828_s1 + $0x20] sm:$0xff]  ;;  %v4697_v43 = vld [vmem:[%s11828_s1 + $0xa8] sm:$0xff] }
 0x1ff   : > { %2182 = vmatpush.msra.mxu0 %v4694_v56  ;;  %2210 = vmatpush.msra.mxu1 %v4695_v5  ;;  %v4698_v46 = vld [vmem:[%s11828_s1 + $0xba0] sm:$0xff]  ;;  %v4699_v5 = vld [vmem:[%s11828_s1 + $0xc28] sm:$0xff] }
 0x200   : > { %2350 = vmatpush.msra.mxu2 %v4696_v32  ;;  %2378 = vmatpush.msra.mxu3 %v4697_v43  ;;  %v8440_v56 = vpop.f32.mrf.mxu1  ;;  %v4068_v32 = vld [vmem:[%s5712_s7 + $0x618] sm:$0x1] }
 0x201   : > { %11932 = vst [vmem:[#allocation102_spill] sm:$0xff] %v8440_v56  ;;  %2183 = vmatpush.msra.mxu0 %v4698_v46  ;;  %2211 = vmatpush.msra.mxu1 %v4699_v5  ;;  %v4700_v43 = vld [vmem:[%s11828_s1 + $0x18] sm:$0xff]  ;;  %v4701_v56 = vld [vmem:[%s11828_s1 + $0xa0] sm:$0xff]  ;;  %v4704_v5 = vld [vmem:[%s11828_s1 + $0x10] sm:$0xff] }
 0x202   : > { %2081 = vmatmul.f32.gmra.mxu0 %v4067_v11  ;;  %2139 = vmatmul.f32.gmra.mxu2 %v4069_v30  ;;  %v4702_v46 = vld [vmem:[%s11828_s1 + $0xb98] sm:$0xff]  ;;  %v4703_v30 = vld [vmem:[%s11828_s1 + $0xc20] sm:$0xff] }
 0x203   : > { %2351 = vmatpush.msra.mxu2 %v4700_v43  ;;  %2379 = vmatpush.msra.mxu3 %v4701_v56  ;;  %v8462_v11 = vpop.f32.mrf.mxu2  ;;  %v4705_v56 = vld [vmem:[%s11828_s1 + $0x98] sm:$0xff] }
 0x204   : > { %2184 = vmatpush.msra.mxu0 %v4702_v46  ;;  %2212 = vmatpush.msra.mxu1 %v4703_v30  ;;  %11933 = vst [vmem:[#allocation103_spill] sm:$0xff] %v8462_v11  ;;  %v4706_v46 = vld [vmem:[%s11828_s1 + $0xb90] sm:$0xff]  ;;  %v4708_v30 = vld [vmem:[%s11828_s1 + $0x8] sm:$0xff] }
 0x205   : > { %2110 = vmatmul.f32.gmra.mxu1 %v4068_v32  ;;  %2168 = vmatmul.f32.gmra.mxu3 %v4070_v57  ;;  %v4707_v57 = vld [vmem:[%s11828_s1 + $0xc18] sm:$0xff]  ;;  %v4074_v11 = vld [vmem:[%s5712_s7 + $0x648] sm:$0xff] }
 0x206   : > { %2352 = vmatpush.msra.mxu2 %v4704_v5  ;;  %2380 = vmatpush.msra.mxu3 %v4705_v56  ;;  %v8470_v43 = vpop.f32.mrf.mxu3  ;;  %v4709_v5 = vld [vmem:[%s11828_s1 + $0x90] sm:$0xff]  ;;  %v4710_v56 = vld [vmem:[%s11828_s1 + $0xb88] sm:$0xff] }
 0x207   : > { %11934 = vst [vmem:[#allocation104_spill] sm:$0xff] %v8470_v43  ;;  %2185 = vmatpush.msra.mxu0 %v4706_v46  ;;  %2213 = vmatpush.msra.mxu1 %v4707_v57  ;;  %v8478_v32 = vpop.f32.mrf.mxu0  ;;  %v4711_v46 = vld [vmem:[%s11828_s1 + $0xc10] sm:$0xff]  ;;  %v3996_v57 = vld [vmem:[%s5712_s7 + $0x3d8] sm:$0xff]  ;;  %v4073_v43 = vld [vmem:[%s5712_s7 + $0x640] sm:$0xff] }
 0x208   : > { %11935 = vst [vmem:[#allocation105_spill] sm:$0xff] %v8478_v32  ;;  %2353 = vmatpush.msra.mxu2 %v4708_v30  ;;  %2381 = vmatpush.msra.mxu3 %v4709_v5  ;;  %v4712_v30 = vld [vmem:[%s11828_s1] sm:$0xff]  ;;  %v4713_v5 = vld [vmem:[%s11828_s1 + $0x88] sm:$0xff] }
 0x209   : > { %2186 = vmatpush.msra.mxu0 %v4710_v56  ;;  %2214 = vmatpush.msra.mxu1 %v4711_v46  ;;  %v4714_v32 = vld [vmem:[%s11828_s1 + $0xb80] sm:$0xff]  ;;  %v4715_v46 = vld [vmem:[%s11828_s1 + $0xc08] sm:$0xff] }
 0x20a   : > { %2354 = vmatpush.msra.mxu2 %v4712_v30  ;;  %2382 = vmatpush.msra.mxu3 %v4713_v5  ;;  %v8500_v56 = vpop.f32.mrf.mxu1  ;;  %v3997_v30 = vld [vmem:[%s5712_s7 + $0x3e0] sm:$0xff] }
 0x20b   : > { %11936 = vst [vmem:[#allocation106_spill] sm:$0xff] %v8500_v56  ;;  %2187 = vmatpush.msra.mxu0 %v4714_v32  ;;  %2215 = vmatpush.msra.mxu1 %v4715_v46  ;;  %v4716_v5 = vld [vmem:[%s11828_s1 + $0x80] sm:$0xff]  ;;  %v4717_v56 = vld [vmem:[%s11828_s1 + $0x278] sm:$0xff]  ;;  %v4720_v46 = vld [vmem:[%s11828_s1 + $0x270] sm:$0xff] }
 0x20c   : > { %2188 = vmatmul.f32.vlgmr.msra.gmra.mxu0 %v3996_v57  ;;  %2355 = vmatmul.f32.vlgmr.msra.gmra.mxu2 %v4073_v43  ;;  %v4718_v32 = vld [vmem:[%s11828_s1 + $0xc00] sm:$0xff]  ;;  %v4719_v43 = vld [vmem:[%s11828_s1 + $0x178] sm:$0xff] }
 0x20d   : > { %2383 = vmatpush.msra.mxu3 %v4716_v5  ;;  %2455 = vmatpush.msrb.mxu2 %v4717_v56  ;;  %v8522_v57 = vpop.f32.mrf.mxu2  ;;  %v4721_v56 = vld [vmem:[%s11828_s1 + $0x2f8] sm:$0xff] }
 0x20e   : > { %2216 = vmatpush.msra.mxu1 %v4718_v32  ;;  %2397 = vmatpush.msrb.mxu0 %v4719_v43  ;;  %11937 = vst [vmem:[#allocation107_spill] sm:$0xff] %v8522_v57  ;;  %v4722_v32 = vld [vmem:[%s11828_s1 + $0x170] sm:$0xff]  ;;  %v4724_v43 = vld [vmem:[%s11828_s1 + $0x268] sm:$0xff]  ;;  %v4730_v57 = vld [vmem:[%s11828_s1 + $0x160] sm:$0xff] }
 0x20f   : > { %2217 = vmatmul.f32.vlgmr.msra.gmra.mxu1 %v3997_v30  ;;  %2384 = vmatmul.f32.vlgmr.msra.gmra.mxu3 %v4074_v11  ;;  %v4723_v11 = vld [vmem:[%s11828_s1 + $0x1f8] sm:$0xff] }
 0x210   : > { %2456 = vmatpush.msrb.mxu2 %v4720_v46  ;;  %2484 = vmatpush.msrb.mxu3 %v4721_v56  ;;  %v8530_v5 = vpop.f32.mrf.mxu3  ;;  %v4725_v46 = vld [vmem:[%s11828_s1 + $0x2f0] sm:$0xff]  ;;  %v4726_v56 = vld [vmem:[%s11828_s1 + $0x168] sm:$0xff] }
 0x211   : > { %11938 = vst [vmem:[#allocation108_spill] sm:$0xff] %v8530_v5  ;;  %2398 = vmatpush.msrb.mxu0 %v4722_v32  ;;  %2426 = vmatpush.msrb.mxu1 %v4723_v11  ;;  %v8538_v30 = vpop.f32.mrf.mxu0  ;;  %v4727_v32 = vld [vmem:[%s11828_s1 + $0x1f0] sm:$0xff]  ;;  %v4021_v11 = vld [vmem:[%s5712_s7 + $0x4a0] sm:$0xff]  ;;  %v4098_v5 = vld [vmem:[%s5712_s7 + $0x708] sm:$0xff] }
 0x212   : > { %11939 = vst [vmem:[#allocation109_spill] sm:$0xff] %v8538_v30  ;;  %2457 = vmatpush.msrb.mxu2 %v4724_v43  ;;  %2485 = vmatpush.msrb.mxu3 %v4725_v46  ;;  %v4728_v43 = vld [vmem:[%s11828_s1 + $0x260] sm:$0xff]  ;;  %v4729_v46 = vld [vmem:[%s11828_s1 + $0x2e8] sm:$0xff]  ;;  %v4099_v30 = vld [vmem:[%s5712_s7 + $0x710] sm:$0xff] }
 0x213   : > { %2399 = vmatpush.msrb.mxu0 %v4726_v56  ;;  %2427 = vmatpush.msrb.mxu1 %v4727_v32  ;;  %v4731_v32 = vld [vmem:[%s11828_s1 + $0x1e8] sm:$0xff] }
 0x214   : > { %2458 = vmatpush.msrb.mxu2 %v4728_v43  ;;  %2486 = vmatpush.msrb.mxu3 %v4729_v46  ;;  %v8560_v56 = vpop.f32.mrf.mxu1  ;;  %v4022_v43 = vld [vmem:[%s5712_s7 + $0x4a8] sm:$0xff]  ;;  %v4732_v46 = vld [vmem:[%s11828_s1 + $0x258] sm:$0xff] }
 0x215   : > { %11940 = vst [vmem:[#allocation110_spill] sm:$0xff] %v8560_v56  ;;  %2400 = vmatpush.msrb.mxu0 %v4730_v57  ;;  %2428 = vmatpush.msrb.mxu1 %v4731_v32  ;;  %v4733_v56 = vld [vmem:[%s11828_s1 + $0x2e0] sm:$0xff]  ;;  %v4734_v57 = vld [vmem:[%s11828_s1 + $0x158] sm:$0xff]  ;;  %v4736_v32 = vld [vmem:[%s11828_s1 + $0x250] sm:$0xff] }
 0x216   : > { %2191 = vmatmul.f32.gmra.mxu0 %v4021_v11  ;;  %2358 = vmatmul.f32.gmra.mxu2 %v4098_v5  ;;  %v4735_v5 = vld [vmem:[%s11828_s1 + $0x1e0] sm:$0xff] }
 0x217   : > { %2459 = vmatpush.msrb.mxu2 %v4732_v46  ;;  %2487 = vmatpush.msrb.mxu3 %v4733_v56  ;;  %v8582_v11 = vpop.f32.mrf.mxu2  ;;  %v4737_v56 = vld [vmem:[%s11828_s1 + $0x2d8] sm:$0xff] }
 0x218   : > { %2401 = vmatpush.msrb.mxu0 %v4734_v57  ;;  %2429 = vmatpush.msrb.mxu1 %v4735_v5  ;;  %11941 = vst [vmem:[#allocation111_spill] sm:$0xff] %v8582_v11  ;;  %v4738_v57 = vld [vmem:[%s11828_s1 + $0x150] sm:$0xff]  ;;  %v4740_v5 = vld [vmem:[%s11828_s1 + $0x248] sm:$0xff]  ;;  %v4124_v11 = vld [vmem:[%s5712_s7 + $0x7d8] sm:$0xff] }
 0x219   : > { %2220 = vmatmul.f32.gmra.mxu1 %v4022_v43  ;;  %2387 = vmatmul.f32.gmra.mxu3 %v4099_v30  ;;  %v4739_v30 = vld [vmem:[%s11828_s1 + $0x1d8] sm:$0xff] }
 0x21a   : > { %2460 = vmatpush.msrb.mxu2 %v4736_v32  ;;  %2488 = vmatpush.msrb.mxu3 %v4737_v56  ;;  %v8590_v46 = vpop.f32.mrf.mxu3  ;;  %v4741_v32 = vld [vmem:[%s11828_s1 + $0x2d0] sm:$0xff]  ;;  %v4742_v56 = vld [vmem:[%s11828_s1 + $0x148] sm:$0xff] }
 0x21b   : > { %11942 = vst [vmem:[#allocation112_spill] sm:$0xff] %v8590_v46  ;;  %2402 = vmatpush.msrb.mxu0 %v4738_v57  ;;  %2430 = vmatpush.msrb.mxu1 %v4739_v30  ;;  %v8598_v43 = vpop.f32.mrf.mxu0  ;;  %v4743_v57 = vld [vmem:[%s11828_s1 + $0x1d0] sm:$0xff]  ;;  %v4046_v30 = vld [vmem:[%s5712_s7 + $0x568] sm:$0xff] }
 0x21c   : > { %11943 = vst [vmem:[#allocation113_spill] sm:$0xff] %v8598_v43  ;;  %2461 = vmatpush.msrb.mxu2 %v4740_v5  ;;  %2489 = vmatpush.msrb.mxu3 %v4741_v32  ;;  %v4123_v46 = vld [vmem:[%s5712_s7 + $0x7d0] sm:$0xff]  ;;  %v4744_v5 = vld [vmem:[%s11828_s1 + $0x240] sm:$0xff]  ;;  %v4745_v32 = vld [vmem:[%s11828_s1 + $0x2c8] sm:$0xff] }
 0x21d   : > { %2403 = vmatpush.msrb.mxu0 %v4742_v56  ;;  %2431 = vmatpush.msrb.mxu1 %v4743_v57  ;;  %v4746_v43 = vld [vmem:[%s11828_s1 + $0x140] sm:$0xff]  ;;  %v4747_v57 = vld [vmem:[%s11828_s1 + $0x1c8] sm:$0xff] }
 0x21e   : > { %2462 = vmatpush.msrb.mxu2 %v4744_v5  ;;  %2490 = vmatpush.msrb.mxu3 %v4745_v32  ;;  %v8620_v56 = vpop.f32.mrf.mxu1  ;;  %v4047_v5 = vld [vmem:[%s5712_s7 + $0x570] sm:$0xff]  ;;  %v4748_v32 = vld [vmem:[%s11828_s1 + $0x238] sm:$0xff] }
 0x21f   : > { %11944 = vst [vmem:[#allocation114_spill] sm:$0xff] %v8620_v56  ;;  %2404 = vmatpush.msrb.mxu0 %v4746_v43  ;;  %2432 = vmatpush.msrb.mxu1 %v4747_v57  ;;  %v4749_v56 = vld [vmem:[%s11828_s1 + $0x2c0] sm:$0xff]  ;;  %v4750_v43 = vld [vmem:[%s11828_s1 + $0x138] sm:$0xff]  ;;  %v4752_v57 = vld [vmem:[%s11828_s1 + $0x230] sm:$0xff] }
 0x220   : > { %2194 = vmatmul.f32.gmra.mxu0 %v4046_v30  ;;  %2361 = vmatmul.f32.gmra.mxu2 %v4123_v46  ;;  %v4751_v46 = vld [vmem:[%s11828_s1 + $0x1c0] sm:$0xff] }
 0x221   : > { %2463 = vmatpush.msrb.mxu2 %v4748_v32  ;;  %2491 = vmatpush.msrb.mxu3 %v4749_v56  ;;  %v8642_v30 = vpop.f32.mrf.mxu2  ;;  %v4753_v56 = vld [vmem:[%s11828_s1 + $0x2b8] sm:$0xff] }
 0x222   : > { %2405 = vmatpush.msrb.mxu0 %v4750_v43  ;;  %2433 = vmatpush.msrb.mxu1 %v4751_v46  ;;  %11945 = vst [vmem:[#allocation115_spill] sm:$0xff] %v8642_v30  ;;  %v4754_v43 = vld [vmem:[%s11828_s1 + $0x130] sm:$0xff]  ;;  %v4756_v46 = vld [vmem:[%s11828_s1 + $0x228] sm:$0xff]  ;;  %v4149_v30 = vld [vmem:[%s5712_s7 + $0x8a0] sm:$0x1] }
 0x223   : > { %2223 = vmatmul.f32.gmra.mxu1 %v4047_v5  ;;  %2390 = vmatmul.f32.gmra.mxu3 %v4124_v11  ;;  %v4755_v11 = vld [vmem:[%s11828_s1 + $0x1b8] sm:$0xff] }
 0x224   : > { %2464 = vmatpush.msrb.mxu2 %v4752_v57  ;;  %2492 = vmatpush.msrb.mxu3 %v4753_v56  ;;  %v8650_v32 = vpop.f32.mrf.mxu3  ;;  %v4757_v57 = vld [vmem:[%s11828_s1 + $0x2b0] sm:$0xff]  ;;  %v4758_v56 = vld [vmem:[%s11828_s1 + $0x128] sm:$0xff] }
 0x225   : > { %11946 = vst [vmem:[#allocation116_spill] sm:$0xff] %v8650_v32  ;;  %2406 = vmatpush.msrb.mxu0 %v4754_v43  ;;  %2434 = vmatpush.msrb.mxu1 %v4755_v11  ;;  %v8658_v5 = vpop.f32.mrf.mxu0  ;;  %v4759_v43 = vld [vmem:[%s11828_s1 + $0x1b0] sm:$0xff]  ;;  %v4148_v32 = vld [vmem:[%s5712_s7 + $0x898] sm:$0x1] }
 0x226   : > { %11947 = vst [vmem:[#allocation117_spill] sm:$0xff] %v8658_v5  ;;  %2465 = vmatpush.msrb.mxu2 %v4756_v46  ;;  %2493 = vmatpush.msrb.mxu3 %v4757_v57  ;;  %v4071_v11 = vld [vmem:[%s5712_s7 + $0x630] sm:$0x1]  ;;  %v4760_v46 = vld [vmem:[%s11828_s1 + $0x220] sm:$0xff]  ;;  %v4761_v57 = vld [vmem:[%s11828_s1 + $0x2a8] sm:$0xff] }
 0x227   : > { %2407 = vmatpush.msrb.mxu0 %v4758_v56  ;;  %2435 = vmatpush.msrb.mxu1 %v4759_v43  ;;  %v4762_v5 = vld [vmem:[%s11828_s1 + $0x120] sm:$0xff]  ;;  %v4763_v43 = vld [vmem:[%s11828_s1 + $0x1a8] sm:$0xff] }
 0x228   : > { %2466 = vmatpush.msrb.mxu2 %v4760_v46  ;;  %2494 = vmatpush.msrb.mxu3 %v4761_v57  ;;  %v8680_v56 = vpop.f32.mrf.mxu1  ;;  %v4072_v46 = vld [vmem:[%s5712_s7 + $0x638] sm:$0x1] }
 0x229   : > { %11948 = vst [vmem:[#allocation118_spill] sm:$0xff] %v8680_v56  ;;  %2408 = vmatpush.msrb.mxu0 %v4762_v5  ;;  %2436 = vmatpush.msrb.mxu1 %v4763_v43  ;;  %v4764_v57 = vld [vmem:[%s11828_s1 + $0x218] sm:$0xff]  ;;  %v4765_v56 = vld [vmem:[%s11828_s1 + $0x2a0] sm:$0xff]  ;;  %v4768_v43 = vld [vmem:[%s11828_s1 + $0x210] sm:$0xff] }
 0x22a   : > { %2197 = vmatmul.f32.gmra.mxu0 %v4071_v11  ;;  %2364 = vmatmul.f32.gmra.mxu2 %v4148_v32  ;;  %v4766_v5 = vld [vmem:[%s11828_s1 + $0x118] sm:$0xff]  ;;  %v4767_v32 = vld [vmem:[%s11828_s1 + $0x1a0] sm:$0xff] }
 0x22b   : > { %2467 = vmatpush.msrb.mxu2 %v4764_v57  ;;  %2495 = vmatpush.msrb.mxu3 %v4765_v56  ;;  %v8702_v11 = vpop.f32.mrf.mxu2  ;;  %v4769_v56 = vld [vmem:[%s11828_s1 + $0x298] sm:$0xff] }
 0x22c   : > { %2409 = vmatpush.msrb.mxu0 %v4766_v5  ;;  %2437 = vmatpush.msrb.mxu1 %v4767_v32  ;;  %11949 = vst [vmem:[#allocation119_spill] sm:$0xff] %v8702_v11  ;;  %v4770_v5 = vld [vmem:[%s11828_s1 + $0x110] sm:$0xff]  ;;  %v4772_v32 = vld [vmem:[%s11828_s1 + $0x208] sm:$0xff] }
 0x22d   : > { %2226 = vmatmul.f32.gmra.mxu1 %v4072_v46  ;;  %2393 = vmatmul.f32.gmra.mxu3 %v4149_v30  ;;  %v4771_v30 = vld [vmem:[%s11828_s1 + $0x198] sm:$0xff]  ;;  %v4078_v11 = vld [vmem:[%s5712_s7 + $0x668] sm:$0xff] }
 0x22e   : > { %2468 = vmatpush.msrb.mxu2 %v4768_v43  ;;  %2496 = vmatpush.msrb.mxu3 %v4769_v56  ;;  %v8710_v57 = vpop.f32.mrf.mxu3  ;;  %v4773_v43 = vld [vmem:[%s11828_s1 + $0x290] sm:$0xff]  ;;  %v4774_v56 = vld [vmem:[%s11828_s1 + $0x108] sm:$0xff] }
 0x22f   : > { %11950 = vst [vmem:[#allocation120_spill] sm:$0xff] %v8710_v57  ;;  %2410 = vmatpush.msrb.mxu0 %v4770_v5  ;;  %2438 = vmatpush.msrb.mxu1 %v4771_v30  ;;  %v8718_v46 = vpop.f32.mrf.mxu0  ;;  %v4775_v5 = vld [vmem:[%s11828_s1 + $0x190] sm:$0xff]  ;;  %v4077_v57 = vld [vmem:[%s5712_s7 + $0x660] sm:$0xff] }
 0x230   : > { %11951 = vst [vmem:[#allocation121_spill] sm:$0xff] %v8718_v46  ;;  %2469 = vmatpush.msrb.mxu2 %v4772_v32  ;;  %2497 = vmatpush.msrb.mxu3 %v4773_v43  ;;  %v4075_v30 = vld [vmem:[%s5712_s7 + $0x650] sm:$0xff]  ;;  %v4776_v32 = vld [vmem:[%s11828_s1 + $0x200] sm:$0xff]  ;;  %v4777_v43 = vld [vmem:[%s11828_s1 + $0x288] sm:$0xff] }
 0x231   : > { %2411 = vmatpush.msrb.mxu0 %v4774_v56  ;;  %2439 = vmatpush.msrb.mxu1 %v4775_v5  ;;  %v4778_v46 = vld [vmem:[%s11828_s1 + $0x100] sm:$0xff]  ;;  %v4779_v5 = vld [vmem:[%s11828_s1 + $0x188] sm:$0xff] }
 0x232   : > { %2470 = vmatpush.msrb.mxu2 %v4776_v32  ;;  %2498 = vmatpush.msrb.mxu3 %v4777_v43  ;;  %v8740_v56 = vpop.f32.mrf.mxu1  ;;  %v4076_v32 = vld [vmem:[%s5712_s7 + $0x658] sm:$0xff]  ;;  %v4780_v43 = vld [vmem:[%s11828_s1 + $0x280] sm:$0xff] }
 0x233   : > { %11952 = vst [vmem:[#allocation122_spill] sm:$0xff] %v8740_v56  ;;  %2412 = vmatpush.msrb.mxu0 %v4778_v46  ;;  %2440 = vmatpush.msrb.mxu1 %v4779_v5  ;;  %v4781_v56 = vld [vmem:[%s11828_s1 + $0x478] sm:$0xff]  ;;  %v4782_v46 = vld [vmem:[%s11828_s1 + $0x180] sm:$0xff]  ;;  %v4784_v5 = vld [vmem:[%s11828_s1 + $0x470] sm:$0xff] }
 0x234   : > { %2413 = vmatmul.f32.vlgmr.msrb.gmra.mxu0 %v4075_v30  ;;  %2471 = vmatmul.f32.vlgmr.msrb.gmra.mxu2 %v4077_v57  ;;  %v4783_v57 = vld [vmem:[%s11828_s1 + $0x378] sm:$0xff] }
 0x235   : > { %2499 = vmatpush.msrb.mxu3 %v4780_v43  ;;  %2571 = vmatpush.msra.mxu2 %v4781_v56  ;;  %v8762_v30 = vpop.f32.mrf.mxu2  ;;  %v4785_v56 = vld [vmem:[%s11828_s1 + $0x4f8] sm:$0xff] }
 0x236   : > { %2441 = vmatpush.msrb.mxu1 %v4782_v46  ;;  %2513 = vmatpush.msra.mxu0 %v4783_v57  ;;  %11953 = vst [vmem:[#allocation123_spill] sm:$0xff] %v8762_v30  ;;  %v4786_v46 = vld [vmem:[%s11828_s1 + $0x370] sm:$0xff]  ;;  %v4788_v57 = vld [vmem:[%s11828_s1 + $0x468] sm:$0xff]  ;;  %v4794_v30 = vld [vmem:[%s11828_s1 + $0x360] sm:$0xff] }
 0x237   : > { %2442 = vmatmul.f32.vlgmr.msrb.gmra.mxu1 %v4076_v32  ;;  %2500 = vmatmul.f32.vlgmr.msrb.gmra.mxu3 %v4078_v11  ;;  %v4787_v11 = vld [vmem:[%s11828_s1 + $0x3f8] sm:$0xff] }
 0x238   : > { %2572 = vmatpush.msra.mxu2 %v4784_v5  ;;  %2600 = vmatpush.msra.mxu3 %v4785_v56  ;;  %v8770_v43 = vpop.f32.mrf.mxu3  ;;  %v4789_v5 = vld [vmem:[%s11828_s1 + $0x4f0] sm:$0xff]  ;;  %v4790_v56 = vld [vmem:[%s11828_s1 + $0x368] sm:$0xff] }
 0x239   : > { %11954 = vst [vmem:[#allocation124_spill] sm:$0xff] %v8770_v43  ;;  %2514 = vmatpush.msra.mxu0 %v4786_v46  ;;  %2542 = vmatpush.msra.mxu1 %v4787_v11  ;;  %v8778_v32 = vpop.f32.mrf.mxu0  ;;  %v4791_v46 = vld [vmem:[%s11828_s1 + $0x3f0] sm:$0xff]  ;;  %v4100_v11 = vld [vmem:[%s5712_s7 + $0x718] sm:$0xff]  ;;  %v4102_v43 = vld [vmem:[%s5712_s7 + $0x728] sm:$0xff] }
 0x23a   : > { %11955 = vst [vmem:[#allocation125_spill] sm:$0xff] %v8778_v32  ;;  %2573 = vmatpush.msra.mxu2 %v4788_v57  ;;  %2601 = vmatpush.msra.mxu3 %v4789_v5  ;;  %v4792_v57 = vld [vmem:[%s11828_s1 + $0x460] sm:$0xff]  ;;  %v4793_v5 = vld [vmem:[%s11828_s1 + $0x4e8] sm:$0xff]  ;;  %v4103_v32 = vld [vmem:[%s5712_s7 + $0x730] sm:$0xff] }
 0x23b   : > { %2515 = vmatpush.msra.mxu0 %v4790_v56  ;;  %2543 = vmatpush.msra.mxu1 %v4791_v46  ;;  %v4795_v46 = vld [vmem:[%s11828_s1 + $0x3e8] sm:$0xff] }
 0x23c   : > { %2574 = vmatpush.msra.mxu2 %v4792_v57  ;;  %2602 = vmatpush.msra.mxu3 %v4793_v5  ;;  %v8800_v56 = vpop.f32.mrf.mxu1  ;;  %v4101_v57 = vld [vmem:[%s5712_s7 + $0x720] sm:$0xff]  ;;  %v4796_v5 = vld [vmem:[%s11828_s1 + $0x458] sm:$0xff] }
 0x23d   : > { %11956 = vst [vmem:[#allocation126_spill] sm:$0xff] %v8800_v56  ;;  %2516 = vmatpush.msra.mxu0 %v4794_v30  ;;  %2544 = vmatpush.msra.mxu1 %v4795_v46  ;;  %v4797_v56 = vld [vmem:[%s11828_s1 + $0x4e0] sm:$0xff]  ;;  %v4798_v30 = vld [vmem:[%s11828_s1 + $0x358] sm:$0xff]  ;;  %v4800_v46 = vld [vmem:[%s11828_s1 + $0x450] sm:$0xff] }
 0x23e   : > { %2416 = vmatmul.f32.gmra.mxu0 %v4100_v11  ;;  %2474 = vmatmul.f32.gmra.mxu2 %v4102_v43  ;;  %v4799_v43 = vld [vmem:[%s11828_s1 + $0x3e0] sm:$0xff] }
 0x23f   : > { %2575 = vmatpush.msra.mxu2 %v4796_v5  ;;  %2603 = vmatpush.msra.mxu3 %v4797_v56  ;;  %v8822_v11 = vpop.f32.mrf.mxu2  ;;  %v4801_v56 = vld [vmem:[%s11828_s1 + $0x4d8] sm:$0xff] }
 0x240   : > { %2517 = vmatpush.msra.mxu0 %v4798_v30  ;;  %2545 = vmatpush.msra.mxu1 %v4799_v43  ;;  %11957 = vst [vmem:[#allocation127_spill] sm:$0xff] %v8822_v11  ;;  %v4802_v30 = vld [vmem:[%s11828_s1 + $0x350] sm:$0xff]  ;;  %v4804_v43 = vld [vmem:[%s11828_s1 + $0x448] sm:$0xff]  ;;  %v4128_v11 = vld [vmem:[%s5712_s7 + $0x7f8] sm:$0xff] }
 0x241   : > { %2445 = vmatmul.f32.gmra.mxu1 %v4101_v57  ;;  %2503 = vmatmul.f32.gmra.mxu3 %v4103_v32  ;;  %v4803_v32 = vld [vmem:[%s11828_s1 + $0x3d8] sm:$0xff] }
 0x242   : > { %2576 = vmatpush.msra.mxu2 %v4800_v46  ;;  %2604 = vmatpush.msra.mxu3 %v4801_v56  ;;  %v8830_v5 = vpop.f32.mrf.mxu3  ;;  %v4805_v46 = vld [vmem:[%s11828_s1 + $0x4d0] sm:$0xff]  ;;  %v4806_v56 = vld [vmem:[%s11828_s1 + $0x348] sm:$0xff] }
 0x243   : > { %11958 = vst [vmem:[#allocation128_spill] sm:$0xff] %v8830_v5  ;;  %2518 = vmatpush.msra.mxu0 %v4802_v30  ;;  %2546 = vmatpush.msra.mxu1 %v4803_v32  ;;  %v8838_v57 = vpop.f32.mrf.mxu0  ;;  %v4807_v30 = vld [vmem:[%s11828_s1 + $0x3d0] sm:$0xff]  ;;  %v4125_v32 = vld [vmem:[%s5712_s7 + $0x7e0] sm:$0xff] }
 0x244   : > { %11959 = vst [vmem:[#allocation129_spill] sm:$0xff] %v8838_v57  ;;  %2577 = vmatpush.msra.mxu2 %v4804_v43  ;;  %2605 = vmatpush.msra.mxu3 %v4805_v46  ;;  %v4127_v5 = vld [vmem:[%s5712_s7 + $0x7f0] sm:$0xff]  ;;  %v4808_v43 = vld [vmem:[%s11828_s1 + $0x440] sm:$0xff]  ;;  %v4809_v46 = vld [vmem:[%s11828_s1 + $0x4c8] sm:$0xff] }
 0x245   : > { %2519 = vmatpush.msra.mxu0 %v4806_v56  ;;  %2547 = vmatpush.msra.mxu1 %v4807_v30  ;;  %v4810_v57 = vld [vmem:[%s11828_s1 + $0x340] sm:$0xff]  ;;  %v4811_v30 = vld [vmem:[%s11828_s1 + $0x3c8] sm:$0xff] }
 0x246   : > { %2578 = vmatpush.msra.mxu2 %v4808_v43  ;;  %2606 = vmatpush.msra.mxu3 %v4809_v46  ;;  %v8860_v56 = vpop.f32.mrf.mxu1  ;;  %v4126_v43 = vld [vmem:[%s5712_s7 + $0x7e8] sm:$0xff]  ;;  %v4812_v46 = vld [vmem:[%s11828_s1 + $0x438] sm:$0xff] }
 0x247   : > { %11960 = vst [vmem:[#allocation130_spill] sm:$0xff] %v8860_v56  ;;  %2520 = vmatpush.msra.mxu0 %v4810_v57  ;;  %2548 = vmatpush.msra.mxu1 %v4811_v30  ;;  %v4813_v56 = vld [vmem:[%s11828_s1 + $0x4c0] sm:$0xff]  ;;  %v4814_v57 = vld [vmem:[%s11828_s1 + $0x338] sm:$0xff]  ;;  %v4816_v30 = vld [vmem:[%s11828_s1 + $0x430] sm:$0xff] }
 0x248   : > { %2419 = vmatmul.f32.gmra.mxu0 %v4125_v32  ;;  %2477 = vmatmul.f32.gmra.mxu2 %v4127_v5  ;;  %v4815_v5 = vld [vmem:[%s11828_s1 + $0x3c0] sm:$0xff] }
 0x249   : > { %2579 = vmatpush.msra.mxu2 %v4812_v46  ;;  %2607 = vmatpush.msra.mxu3 %v4813_v56  ;;  %v8882_v32 = vpop.f32.mrf.mxu2  ;;  %v4817_v56 = vld [vmem:[%s11828_s1 + $0x4b8] sm:$0xff] }
 0x24a   : > { %2521 = vmatpush.msra.mxu0 %v4814_v57  ;;  %2549 = vmatpush.msra.mxu1 %v4815_v5  ;;  %11961 = vst [vmem:[#allocation131_spill] sm:$0xff] %v8882_v32  ;;  %v4818_v57 = vld [vmem:[%s11828_s1 + $0x330] sm:$0xff]  ;;  %v4820_v5 = vld [vmem:[%s11828_s1 + $0x428] sm:$0xff]  ;;  %v4153_v32 = vld [vmem:[%s5712_s7 + $0x8c0] sm:$0x1] }
 0x24b   : > { %2448 = vmatmul.f32.gmra.mxu1 %v4126_v43  ;;  %2506 = vmatmul.f32.gmra.mxu3 %v4128_v11  ;;  %v4819_v11 = vld [vmem:[%s11828_s1 + $0x3b8] sm:$0xff] }
 0x24c   : > { %2580 = vmatpush.msra.mxu2 %v4816_v30  ;;  %2608 = vmatpush.msra.mxu3 %v4817_v56  ;;  %v8890_v46 = vpop.f32.mrf.mxu3  ;;  %v4821_v30 = vld [vmem:[%s11828_s1 + $0x4b0] sm:$0xff]  ;;  %v4822_v56 = vld [vmem:[%s11828_s1 + $0x328] sm:$0xff] }
 0x24d   : > { %11962 = vst [vmem:[#allocation132_spill] sm:$0xff] %v8890_v46  ;;  %2522 = vmatpush.msra.mxu0 %v4818_v57  ;;  %2550 = vmatpush.msra.mxu1 %v4819_v11  ;;  %v8898_v43 = vpop.f32.mrf.mxu0  ;;  %v4823_v57 = vld [vmem:[%s11828_s1 + $0x3b0] sm:$0xff]  ;;  %v4150_v11 = vld [vmem:[%s5712_s7 + $0x8a8] sm:$0x1]  ;;  %v4152_v46 = vld [vmem:[%s5712_s7 + $0x8b8] sm:$0x1] }
 0x24e   : > { %11963 = vst [vmem:[#allocation133_spill] sm:$0xff] %v8898_v43  ;;  %2581 = vmatpush.msra.mxu2 %v4820_v5  ;;  %2609 = vmatpush.msra.mxu3 %v4821_v30  ;;  %v4824_v5 = vld [vmem:[%s11828_s1 + $0x420] sm:$0xff]  ;;  %v4825_v30 = vld [vmem:[%s11828_s1 + $0x4a8] sm:$0xff] }
 0x24f   : > { %2523 = vmatpush.msra.mxu0 %v4822_v56  ;;  %2551 = vmatpush.msra.mxu1 %v4823_v57  ;;  %v4826_v43 = vld [vmem:[%s11828_s1 + $0x320] sm:$0xff]  ;;  %v4827_v57 = vld [vmem:[%s11828_s1 + $0x3a8] sm:$0xff] }
 0x250   : > { %2582 = vmatpush.msra.mxu2 %v4824_v5  ;;  %2610 = vmatpush.msra.mxu3 %v4825_v30  ;;  %v8920_v56 = vpop.f32.mrf.mxu1  ;;  %v4151_v5 = vld [vmem:[%s5712_s7 + $0x8b0] sm:$0x1]  ;;  %v4828_v30 = vld [vmem:[%s11828_s1 + $0x418] sm:$0xff] }
 0x251   : > { %11964 = vst [vmem:[#allocation134_spill] sm:$0xff] %v8920_v56  ;;  %2524 = vmatpush.msra.mxu0 %v4826_v43  ;;  %2552 = vmatpush.msra.mxu1 %v4827_v57  ;;  %v4829_v56 = vld [vmem:[%s11828_s1 + $0x4a0] sm:$0xff]  ;;  %v4830_v43 = vld [vmem:[%s11828_s1 + $0x318] sm:$0xff]  ;;  %v4832_v57 = vld [vmem:[%s11828_s1 + $0x410] sm:$0xff] }
 0x252   : > { %2422 = vmatmul.f32.gmra.mxu0 %v4150_v11  ;;  %2480 = vmatmul.f32.gmra.mxu2 %v4152_v46  ;;  %v4831_v46 = vld [vmem:[%s11828_s1 + $0x3a0] sm:$0xff] }
 0x253   : > { %2583 = vmatpush.msra.mxu2 %v4828_v30  ;;  %2611 = vmatpush.msra.mxu3 %v4829_v56  ;;  %v8942_v11 = vpop.f32.mrf.mxu2  ;;  %v4833_v56 = vld [vmem:[%s11828_s1 + $0x498] sm:$0xff] }
 0x254   : > { %2525 = vmatpush.msra.mxu0 %v4830_v43  ;;  %2553 = vmatpush.msra.mxu1 %v4831_v46  ;;  %11965 = vst [vmem:[#allocation135_spill] sm:$0xff] %v8942_v11  ;;  %v4834_v43 = vld [vmem:[%s11828_s1 + $0x310] sm:$0xff]  ;;  %v4836_v46 = vld [vmem:[%s11828_s1 + $0x408] sm:$0xff] }
 0x255   : > { %2451 = vmatmul.f32.gmra.mxu1 %v4151_v5  ;;  %2509 = vmatmul.f32.gmra.mxu3 %v4153_v32  ;;  %v4835_v32 = vld [vmem:[%s11828_s1 + $0x398] sm:$0xff]  ;;  %v4082_v11 = vld [vmem:[%s5712_s7 + $0x688] sm:$0xff] }
 0x256   : > { %2584 = vmatpush.msra.mxu2 %v4832_v57  ;;  %2612 = vmatpush.msra.mxu3 %v4833_v56  ;;  %v8950_v30 = vpop.f32.mrf.mxu3  ;;  %v4837_v57 = vld [vmem:[%s11828_s1 + $0x490] sm:$0xff]  ;;  %v4838_v56 = vld [vmem:[%s11828_s1 + $0x308] sm:$0xff] }
 0x257   : > { %11966 = vst [vmem:[#allocation136_spill] sm:$0xff] %v8950_v30  ;;  %2526 = vmatpush.msra.mxu0 %v4834_v43  ;;  %2554 = vmatpush.msra.mxu1 %v4835_v32  ;;  %v8958_v5 = vpop.f32.mrf.mxu0  ;;  %v4839_v43 = vld [vmem:[%s11828_s1 + $0x390] sm:$0xff]  ;;  %v4081_v30 = vld [vmem:[%s5712_s7 + $0x680] sm:$0xff] }
 0x258   : > { %11967 = vst [vmem:[#allocation137_spill] sm:$0xff] %v8958_v5  ;;  %2585 = vmatpush.msra.mxu2 %v4836_v46  ;;  %2613 = vmatpush.msra.mxu3 %v4837_v57  ;;  %v4079_v32 = vld [vmem:[%s5712_s7 + $0x670] sm:$0xff]  ;;  %v4840_v46 = vld [vmem:[%s11828_s1 + $0x400] sm:$0xff]  ;;  %v4841_v57 = vld [vmem:[%s11828_s1 + $0x488] sm:$0xff] }
 0x259   : > { %2527 = vmatpush.msra.mxu0 %v4838_v56  ;;  %2555 = vmatpush.msra.mxu1 %v4839_v43  ;;  %v4842_v5 = vld [vmem:[%s11828_s1 + $0x300] sm:$0xff]  ;;  %v4843_v43 = vld [vmem:[%s11828_s1 + $0x388] sm:$0xff] }
 0x25a   : > { %2586 = vmatpush.msra.mxu2 %v4840_v46  ;;  %2614 = vmatpush.msra.mxu3 %v4841_v57  ;;  %v8980_v56 = vpop.f32.mrf.mxu1  ;;  %v4080_v46 = vld [vmem:[%s5712_s7 + $0x678] sm:$0xff]  ;;  %v4844_v57 = vld [vmem:[%s11828_s1 + $0x480] sm:$0xff] }
 0x25b   : > { %11968 = vst [vmem:[#allocation138_spill] sm:$0xff] %v8980_v56  ;;  %2528 = vmatpush.msra.mxu0 %v4842_v5  ;;  %2556 = vmatpush.msra.mxu1 %v4843_v43  ;;  %v4845_v56 = vld [vmem:[%s11828_s1 + $0x678] sm:$0xff]  ;;  %v4846_v5 = vld [vmem:[%s11828_s1 + $0x380] sm:$0xff]  ;;  %v4848_v43 = vld [vmem:[%s11828_s1 + $0x670] sm:$0xff] }
 0x25c   : > { %2529 = vmatmul.f32.vlgmr.msra.gmra.mxu0 %v4079_v32  ;;  %2587 = vmatmul.f32.vlgmr.msra.gmra.mxu2 %v4081_v30  ;;  %v4847_v30 = vld [vmem:[%s11828_s1 + $0x578] sm:$0xff] }
 0x25d   : > { %2615 = vmatpush.msra.mxu3 %v4844_v57  ;;  %2687 = vmatpush.msrb.mxu2 %v4845_v56  ;;  %v9002_v32 = vpop.f32.mrf.mxu2  ;;  %v4849_v56 = vld [vmem:[%s11828_s1 + $0x6f8] sm:$0xff] }
 0x25e   : > { %2557 = vmatpush.msra.mxu1 %v4846_v5  ;;  %2629 = vmatpush.msrb.mxu0 %v4847_v30  ;;  %11969 = vst [vmem:[#allocation139_spill] sm:$0xff] %v9002_v32  ;;  %v4850_v5 = vld [vmem:[%s11828_s1 + $0x570] sm:$0xff]  ;;  %v4852_v30 = vld [vmem:[%s11828_s1 + $0x668] sm:$0xff]  ;;  %v4858_v32 = vld [vmem:[%s11828_s1 + $0x560] sm:$0xff] }
 0x25f   : > { %2558 = vmatmul.f32.vlgmr.msra.gmra.mxu1 %v4080_v46  ;;  %2616 = vmatmul.f32.vlgmr.msra.gmra.mxu3 %v4082_v11  ;;  %v4851_v11 = vld [vmem:[%s11828_s1 + $0x5f8] sm:$0xff] }
 0x260   : > { %2688 = vmatpush.msrb.mxu2 %v4848_v43  ;;  %2716 = vmatpush.msrb.mxu3 %v4849_v56  ;;  %v9010_v57 = vpop.f32.mrf.mxu3  ;;  %v4853_v43 = vld [vmem:[%s11828_s1 + $0x6f0] sm:$0xff]  ;;  %v4854_v56 = vld [vmem:[%s11828_s1 + $0x568] sm:$0xff] }
 0x261   : > { %11970 = vst [vmem:[#allocation140_spill] sm:$0xff] %v9010_v57  ;;  %2630 = vmatpush.msrb.mxu0 %v4850_v5  ;;  %2658 = vmatpush.msrb.mxu1 %v4851_v11  ;;  %v9018_v46 = vpop.f32.mrf.mxu0  ;;  %v4855_v5 = vld [vmem:[%s11828_s1 + $0x5f0] sm:$0xff]  ;;  %v4104_v11 = vld [vmem:[%s5712_s7 + $0x738] sm:$0xff]  ;;  %v4106_v57 = vld [vmem:[%s5712_s7 + $0x748] sm:$0xff] }
 0x262   : > { %11971 = vst [vmem:[#allocation141_spill] sm:$0xff] %v9018_v46  ;;  %2689 = vmatpush.msrb.mxu2 %v4852_v30  ;;  %2717 = vmatpush.msrb.mxu3 %v4853_v43  ;;  %v4856_v30 = vld [vmem:[%s11828_s1 + $0x660] sm:$0xff]  ;;  %v4857_v43 = vld [vmem:[%s11828_s1 + $0x6e8] sm:$0xff]  ;;  %v4107_v46 = vld [vmem:[%s5712_s7 + $0x750] sm:$0xff] }
 0x263   : > { %2631 = vmatpush.msrb.mxu0 %v4854_v56  ;;  %2659 = vmatpush.msrb.mxu1 %v4855_v5  ;;  %v4859_v5 = vld [vmem:[%s11828_s1 + $0x5e8] sm:$0xff] }
 0x264   : > { %2690 = vmatpush.msrb.mxu2 %v4856_v30  ;;  %2718 = vmatpush.msrb.mxu3 %v4857_v43  ;;  %v9040_v56 = vpop.f32.mrf.mxu1  ;;  %v4105_v30 = vld [vmem:[%s5712_s7 + $0x740] sm:$0xff]  ;;  %v4860_v43 = vld [vmem:[%s11828_s1 + $0x658] sm:$0xff] }
 0x265   : > { %11972 = vst [vmem:[#allocation142_spill] sm:$0xff] %v9040_v56  ;;  %2632 = vmatpush.msrb.mxu0 %v4858_v32  ;;  %2660 = vmatpush.msrb.mxu1 %v4859_v5  ;;  %v4861_v56 = vld [vmem:[%s11828_s1 + $0x6e0] sm:$0xff]  ;;  %v4862_v32 = vld [vmem:[%s11828_s1 + $0x558] sm:$0xff]  ;;  %v4864_v5 = vld [vmem:[%s11828_s1 + $0x650] sm:$0xff] }
 0x266   : > { %2532 = vmatmul.f32.gmra.mxu0 %v4104_v11  ;;  %2590 = vmatmul.f32.gmra.mxu2 %v4106_v57  ;;  %v4863_v57 = vld [vmem:[%s11828_s1 + $0x5e0] sm:$0xff] }
 0x267   : > { %2691 = vmatpush.msrb.mxu2 %v4860_v43  ;;  %2719 = vmatpush.msrb.mxu3 %v4861_v56  ;;  %v9062_v11 = vpop.f32.mrf.mxu2  ;;  %v4865_v56 = vld [vmem:[%s11828_s1 + $0x6d8] sm:$0xff] }
 0x268   : > { %2633 = vmatpush.msrb.mxu0 %v4862_v32  ;;  %2661 = vmatpush.msrb.mxu1 %v4863_v57  ;;  %11973 = vst [vmem:[#allocation143_spill] sm:$0xff] %v9062_v11  ;;  %v4866_v32 = vld [vmem:[%s11828_s1 + $0x550] sm:$0xff]  ;;  %v4868_v57 = vld [vmem:[%s11828_s1 + $0x648] sm:$0xff]  ;;  %v4132_v11 = vld [vmem:[%s5712_s7 + $0x818] sm:$0xff] }
 0x269   : > { %2561 = vmatmul.f32.gmra.mxu1 %v4105_v30  ;;  %2619 = vmatmul.f32.gmra.mxu3 %v4107_v46  ;;  %v4867_v46 = vld [vmem:[%s11828_s1 + $0x5d8] sm:$0xff] }
 0x26a   : > { %2692 = vmatpush.msrb.mxu2 %v4864_v5  ;;  %2720 = vmatpush.msrb.mxu3 %v4865_v56  ;;  %v9070_v43 = vpop.f32.mrf.mxu3  ;;  %v4869_v5 = vld [vmem:[%s11828_s1 + $0x6d0] sm:$0xff]  ;;  %v4870_v56 = vld [vmem:[%s11828_s1 + $0x548] sm:$0xff] }
 0x26b   : > { %11974 = vst [vmem:[#allocation144_spill] sm:$0xff] %v9070_v43  ;;  %2634 = vmatpush.msrb.mxu0 %v4866_v32  ;;  %2662 = vmatpush.msrb.mxu1 %v4867_v46  ;;  %v9078_v30 = vpop.f32.mrf.mxu0  ;;  %v4871_v32 = vld [vmem:[%s11828_s1 + $0x5d0] sm:$0xff]  ;;  %v4129_v46 = vld [vmem:[%s5712_s7 + $0x800] sm:$0xff] }
 0x26c   : > { %11975 = vst [vmem:[#allocation145_spill] sm:$0xff] %v9078_v30  ;;  %2693 = vmatpush.msrb.mxu2 %v4868_v57  ;;  %2721 = vmatpush.msrb.mxu3 %v4869_v5  ;;  %v4131_v43 = vld [vmem:[%s5712_s7 + $0x810] sm:$0xff]  ;;  %v4872_v57 = vld [vmem:[%s11828_s1 + $0x640] sm:$0xff]  ;;  %v4873_v5 = vld [vmem:[%s11828_s1 + $0x6c8] sm:$0xff] }
 0x26d   : > { %2635 = vmatpush.msrb.mxu0 %v4870_v56  ;;  %2663 = vmatpush.msrb.mxu1 %v4871_v32  ;;  %v4874_v30 = vld [vmem:[%s11828_s1 + $0x540] sm:$0xff]  ;;  %v4875_v32 = vld [vmem:[%s11828_s1 + $0x5c8] sm:$0xff] }
 0x26e   : > { %2694 = vmatpush.msrb.mxu2 %v4872_v57  ;;  %2722 = vmatpush.msrb.mxu3 %v4873_v5  ;;  %v9100_v56 = vpop.f32.mrf.mxu1  ;;  %v4130_v57 = vld [vmem:[%s5712_s7 + $0x808] sm:$0xff]  ;;  %v4876_v5 = vld [vmem:[%s11828_s1 + $0x638] sm:$0xff] }
 0x26f   : > { %11976 = vst [vmem:[#allocation146_spill] sm:$0xff] %v9100_v56  ;;  %2636 = vmatpush.msrb.mxu0 %v4874_v30  ;;  %2664 = vmatpush.msrb.mxu1 %v4875_v32  ;;  %v4877_v56 = vld [vmem:[%s11828_s1 + $0x6c0] sm:$0xff]  ;;  %v4878_v30 = vld [vmem:[%s11828_s1 + $0x538] sm:$0xff]  ;;  %v4880_v32 = vld [vmem:[%s11828_s1 + $0x630] sm:$0xff] }
 0x270   : > { %2535 = vmatmul.f32.gmra.mxu0 %v4129_v46  ;;  %2593 = vmatmul.f32.gmra.mxu2 %v4131_v43  ;;  %v4879_v43 = vld [vmem:[%s11828_s1 + $0x5c0] sm:$0xff] }
 0x271   : > { %2695 = vmatpush.msrb.mxu2 %v4876_v5  ;;  %2723 = vmatpush.msrb.mxu3 %v4877_v56  ;;  %v9122_v46 = vpop.f32.mrf.mxu2  ;;  %v4881_v56 = vld [vmem:[%s11828_s1 + $0x6b8] sm:$0xff] }
 0x272   : > { %2637 = vmatpush.msrb.mxu0 %v4878_v30  ;;  %2665 = vmatpush.msrb.mxu1 %v4879_v43  ;;  %11977 = vst [vmem:[#allocation147_spill] sm:$0xff] %v9122_v46  ;;  %v4882_v30 = vld [vmem:[%s11828_s1 + $0x530] sm:$0xff]  ;;  %v4884_v43 = vld [vmem:[%s11828_s1 + $0x628] sm:$0xff]  ;;  %v4157_v46 = vld [vmem:[%s5712_s7 + $0x8e0] sm:$0x1] }
 0x273   : > { %2564 = vmatmul.f32.gmra.mxu1 %v4130_v57  ;;  %2622 = vmatmul.f32.gmra.mxu3 %v4132_v11  ;;  %v4883_v11 = vld [vmem:[%s11828_s1 + $0x5b8] sm:$0xff] }
 0x274   : > { %2696 = vmatpush.msrb.mxu2 %v4880_v32  ;;  %2724 = vmatpush.msrb.mxu3 %v4881_v56  ;;  %v9130_v5 = vpop.f32.mrf.mxu3  ;;  %v4885_v32 = vld [vmem:[%s11828_s1 + $0x6b0] sm:$0xff]  ;;  %v4886_v56 = vld [vmem:[%s11828_s1 + $0x528] sm:$0xff] }
 0x275   : > { %11978 = vst [vmem:[#allocation148_spill] sm:$0xff] %v9130_v5  ;;  %2638 = vmatpush.msrb.mxu0 %v4882_v30  ;;  %2666 = vmatpush.msrb.mxu1 %v4883_v11  ;;  %v9138_v57 = vpop.f32.mrf.mxu0  ;;  %v4887_v30 = vld [vmem:[%s11828_s1 + $0x5b0] sm:$0xff]  ;;  %v4154_v11 = vld [vmem:[%s5712_s7 + $0x8c8] sm:$0x1]  ;;  %v4156_v5 = vld [vmem:[%s5712_s7 + $0x8d8] sm:$0x1] }
 0x276   : > { %11979 = vst [vmem:[#allocation149_spill] sm:$0xff] %v9138_v57  ;;  %2697 = vmatpush.msrb.mxu2 %v4884_v43  ;;  %2725 = vmatpush.msrb.mxu3 %v4885_v32  ;;  %v4888_v43 = vld [vmem:[%s11828_s1 + $0x620] sm:$0xff]  ;;  %v4889_v32 = vld [vmem:[%s11828_s1 + $0x6a8] sm:$0xff] }
 0x277   : > { %2639 = vmatpush.msrb.mxu0 %v4886_v56  ;;  %2667 = vmatpush.msrb.mxu1 %v4887_v30  ;;  %v4890_v57 = vld [vmem:[%s11828_s1 + $0x520] sm:$0xff]  ;;  %v4891_v30 = vld [vmem:[%s11828_s1 + $0x5a8] sm:$0xff] }
 0x278   : > { %2698 = vmatpush.msrb.mxu2 %v4888_v43  ;;  %2726 = vmatpush.msrb.mxu3 %v4889_v32  ;;  %v9160_v56 = vpop.f32.mrf.mxu1  ;;  %v4155_v43 = vld [vmem:[%s5712_s7 + $0x8d0] sm:$0x1]  ;;  %v4892_v32 = vld [vmem:[%s11828_s1 + $0x618] sm:$0xff] }
 0x279   : > { %11980 = vst [vmem:[#allocation150_spill] sm:$0xff] %v9160_v56  ;;  %2640 = vmatpush.msrb.mxu0 %v4890_v57  ;;  %2668 = vmatpush.msrb.mxu1 %v4891_v30  ;;  %v4893_v56 = vld [vmem:[%s11828_s1 + $0x6a0] sm:$0xff]  ;;  %v4894_v57 = vld [vmem:[%s11828_s1 + $0x518] sm:$0xff]  ;;  %v4896_v30 = vld [vmem:[%s11828_s1 + $0x610] sm:$0xff] }
 0x27a   : > { %2538 = vmatmul.f32.gmra.mxu0 %v4154_v11  ;;  %2596 = vmatmul.f32.gmra.mxu2 %v4156_v5  ;;  %v4895_v5 = vld [vmem:[%s11828_s1 + $0x5a0] sm:$0xff] }
 0x27b   : > { %2699 = vmatpush.msrb.mxu2 %v4892_v32  ;;  %2727 = vmatpush.msrb.mxu3 %v4893_v56  ;;  %v9182_v11 = vpop.f32.mrf.mxu2  ;;  %v4897_v56 = vld [vmem:[%s11828_s1 + $0x698] sm:$0xff] }
 0x27c   : > { %2641 = vmatpush.msrb.mxu0 %v4894_v57  ;;  %2669 = vmatpush.msrb.mxu1 %v4895_v5  ;;  %11981 = vst [vmem:[#allocation151_spill] sm:$0xff] %v9182_v11  ;;  %v4898_v57 = vld [vmem:[%s11828_s1 + $0x510] sm:$0xff]  ;;  %v4900_v5 = vld [vmem:[%s11828_s1 + $0x608] sm:$0xff] }
 0x27d   : > { %2567 = vmatmul.f32.gmra.mxu1 %v4155_v43  ;;  %2625 = vmatmul.f32.gmra.mxu3 %v4157_v46  ;;  %v4899_v46 = vld [vmem:[%s11828_s1 + $0x598] sm:$0xff]  ;;  %v4086_v11 = vld [vmem:[%s5712_s7 + $0x6a8] sm:$0xff] }
 0x27e   : > { %2700 = vmatpush.msrb.mxu2 %v4896_v30  ;;  %2728 = vmatpush.msrb.mxu3 %v4897_v56  ;;  %v9190_v32 = vpop.f32.mrf.mxu3  ;;  %v4901_v30 = vld [vmem:[%s11828_s1 + $0x690] sm:$0xff]  ;;  %v4902_v56 = vld [vmem:[%s11828_s1 + $0x508] sm:$0xff] }
 0x27f   : > { %11982 = vst [vmem:[#allocation152_spill] sm:$0xff] %v9190_v32  ;;  %2642 = vmatpush.msrb.mxu0 %v4898_v57  ;;  %2670 = vmatpush.msrb.mxu1 %v4899_v46  ;;  %v9198_v43 = vpop.f32.mrf.mxu0  ;;  %v4903_v57 = vld [vmem:[%s11828_s1 + $0x590] sm:$0xff]  ;;  %v4085_v32 = vld [vmem:[%s5712_s7 + $0x6a0] sm:$0xff] }
 0x280   : > { %11983 = vst [vmem:[#allocation153_spill] sm:$0xff] %v9198_v43  ;;  %2701 = vmatpush.msrb.mxu2 %v4900_v5  ;;  %2729 = vmatpush.msrb.mxu3 %v4901_v30  ;;  %v4083_v46 = vld [vmem:[%s5712_s7 + $0x690] sm:$0xff]  ;;  %v4904_v5 = vld [vmem:[%s11828_s1 + $0x600] sm:$0xff]  ;;  %v4905_v30 = vld [vmem:[%s11828_s1 + $0x688] sm:$0xff] }
 0x281   : > { %2643 = vmatpush.msrb.mxu0 %v4902_v56  ;;  %2671 = vmatpush.msrb.mxu1 %v4903_v57  ;;  %v4906_v43 = vld [vmem:[%s11828_s1 + $0x500] sm:$0xff]  ;;  %v4907_v57 = vld [vmem:[%s11828_s1 + $0x588] sm:$0xff] }
 0x282   : > { %2702 = vmatpush.msrb.mxu2 %v4904_v5  ;;  %2730 = vmatpush.msrb.mxu3 %v4905_v30  ;;  %v9220_v56 = vpop.f32.mrf.mxu1  ;;  %v4084_v5 = vld [vmem:[%s5712_s7 + $0x698] sm:$0xff]  ;;  %v4908_v30 = vld [vmem:[%s11828_s1 + $0x680] sm:$0xff] }
 0x283   : > { %11984 = vst [vmem:[#allocation154_spill] sm:$0xff] %v9220_v56  ;;  %2644 = vmatpush.msrb.mxu0 %v4906_v43  ;;  %2672 = vmatpush.msrb.mxu1 %v4907_v57  ;;  %v4909_v56 = vld [vmem:[%s11828_s1 + $0x878] sm:$0xff]  ;;  %v4910_v43 = vld [vmem:[%s11828_s1 + $0x580] sm:$0xff]  ;;  %v4912_v57 = vld [vmem:[%s11828_s1 + $0x870] sm:$0xff] }
 0x284   : > { %2645 = vmatmul.f32.vlgmr.msrb.gmra.mxu0 %v4083_v46  ;;  %2703 = vmatmul.f32.vlgmr.msrb.gmra.mxu2 %v4085_v32  ;;  %v4911_v32 = vld [vmem:[%s11828_s1 + $0x778] sm:$0xff] }
 0x285   : > { %2731 = vmatpush.msrb.mxu3 %v4908_v30  ;;  %2803 = vmatpush.msra.mxu2 %v4909_v56  ;;  %v9242_v46 = vpop.f32.mrf.mxu2  ;;  %v4913_v56 = vld [vmem:[%s11828_s1 + $0x8f8] sm:$0xff] }
 0x286   : > { %2673 = vmatpush.msrb.mxu1 %v4910_v43  ;;  %2745 = vmatpush.msra.mxu0 %v4911_v32  ;;  %11985 = vst [vmem:[#allocation155_spill] sm:$0xff] %v9242_v46  ;;  %v4914_v43 = vld [vmem:[%s11828_s1 + $0x770] sm:$0xff]  ;;  %v4916_v32 = vld [vmem:[%s11828_s1 + $0x868] sm:$0xff]  ;;  %v4922_v46 = vld [vmem:[%s11828_s1 + $0x760] sm:$0xff] }
 0x287   : > { %2674 = vmatmul.f32.vlgmr.msrb.gmra.mxu1 %v4084_v5  ;;  %2732 = vmatmul.f32.vlgmr.msrb.gmra.mxu3 %v4086_v11  ;;  %v4915_v11 = vld [vmem:[%s11828_s1 + $0x7f8] sm:$0xff] }
 0x288   : > { %2804 = vmatpush.msra.mxu2 %v4912_v57  ;;  %2832 = vmatpush.msra.mxu3 %v4913_v56  ;;  %v9250_v30 = vpop.f32.mrf.mxu3  ;;  %v4917_v57 = vld [vmem:[%s11828_s1 + $0x8f0] sm:$0xff]  ;;  %v4918_v56 = vld [vmem:[%s11828_s1 + $0x768] sm:$0xff] }
 0x289   : > { %11986 = vst [vmem:[#allocation156_spill] sm:$0xff] %v9250_v30  ;;  %2746 = vmatpush.msra.mxu0 %v4914_v43  ;;  %2774 = vmatpush.msra.mxu1 %v4915_v11  ;;  %v9258_v5 = vpop.f32.mrf.mxu0  ;;  %v4919_v43 = vld [vmem:[%s11828_s1 + $0x7f0] sm:$0xff]  ;;  %v4108_v11 = vld [vmem:[%s5712_s7 + $0x758] sm:$0xff]  ;;  %v4110_v30 = vld [vmem:[%s5712_s7 + $0x768] sm:$0xff] }
 0x28a   : > { %11987 = vst [vmem:[#allocation157_spill] sm:$0xff] %v9258_v5  ;;  %2805 = vmatpush.msra.mxu2 %v4916_v32  ;;  %2833 = vmatpush.msra.mxu3 %v4917_v57  ;;  %v4920_v32 = vld [vmem:[%s11828_s1 + $0x860] sm:$0xff]  ;;  %v4921_v57 = vld [vmem:[%s11828_s1 + $0x8e8] sm:$0xff]  ;;  %v4111_v5 = vld [vmem:[%s5712_s7 + $0x770] sm:$0xff] }
 0x28b   : > { %2747 = vmatpush.msra.mxu0 %v4918_v56  ;;  %2775 = vmatpush.msra.mxu1 %v4919_v43  ;;  %v4923_v43 = vld [vmem:[%s11828_s1 + $0x7e8] sm:$0xff] }
 0x28c   : > { %2806 = vmatpush.msra.mxu2 %v4920_v32  ;;  %2834 = vmatpush.msra.mxu3 %v4921_v57  ;;  %v9280_v56 = vpop.f32.mrf.mxu1  ;;  %v4109_v32 = vld [vmem:[%s5712_s7 + $0x760] sm:$0xff]  ;;  %v4924_v57 = vld [vmem:[%s11828_s1 + $0x858] sm:$0xff] }
 0x28d   : > { %11988 = vst [vmem:[#allocation158_spill] sm:$0xff] %v9280_v56  ;;  %2748 = vmatpush.msra.mxu0 %v4922_v46  ;;  %2776 = vmatpush.msra.mxu1 %v4923_v43  ;;  %v4925_v56 = vld [vmem:[%s11828_s1 + $0x8e0] sm:$0xff]  ;;  %v4926_v46 = vld [vmem:[%s11828_s1 + $0x758] sm:$0xff]  ;;  %v4928_v43 = vld [vmem:[%s11828_s1 + $0x850] sm:$0xff] }
 0x28e   : > { %2648 = vmatmul.f32.gmra.mxu0 %v4108_v11  ;;  %2706 = vmatmul.f32.gmra.mxu2 %v4110_v30  ;;  %v4927_v30 = vld [vmem:[%s11828_s1 + $0x7e0] sm:$0xff] }
 0x28f   : > { %2807 = vmatpush.msra.mxu2 %v4924_v57  ;;  %2835 = vmatpush.msra.mxu3 %v4925_v56  ;;  %v9302_v11 = vpop.f32.mrf.mxu2  ;;  %v4929_v56 = vld [vmem:[%s11828_s1 + $0x8d8] sm:$0xff] }
 0x290   : > { %2749 = vmatpush.msra.mxu0 %v4926_v46  ;;  %2777 = vmatpush.msra.mxu1 %v4927_v30  ;;  %v4930_v46 = vld [vmem:[%s11828_s1 + $0x750] sm:$0xff]  ;;  %v4932_v30 = vld [vmem:[%s11828_s1 + $0x848] sm:$0xff] }
 0x291   : > { %2677 = vmatmul.f32.gmra.mxu1 %v4109_v32  ;;  %2735 = vmatmul.f32.gmra.mxu3 %v4111_v5  ;;  %v4931_v5 = vld [vmem:[%s11828_s1 + $0x7d8] sm:$0xff] }
 0x292   : > { %2808 = vmatpush.msra.mxu2 %v4928_v43  ;;  %2836 = vmatpush.msra.mxu3 %v4929_v56  ;;  %v9310_v57 = vpop.f32.mrf.mxu3  ;;  %v4933_v43 = vld [vmem:[%s11828_s1 + $0x8d0] sm:$0xff]  ;;  %v4934_v56 = vld [vmem:[%s11828_s1 + $0x748] sm:$0xff] }
 0x293   : > { %2750 = vmatpush.msra.mxu0 %v4930_v46  ;;  %2778 = vmatpush.msra.mxu1 %v4931_v5  ;;  %v9318_v32 = vpop.f32.mrf.mxu0  ;;  %v4935_v46 = vld [vmem:[%s11828_s1 + $0x7d0] sm:$0xff]  ;;  %v4133_v5 = vld [vmem:[%s5712_s7 + $0x820] sm:$0xff] }
 0x294   : > { %11989 = vst [vmem:[#allocation159_spill] sm:$0xff] %v9318_v32  ;;  %2809 = vmatpush.msra.mxu2 %v4932_v30  ;;  %2837 = vmatpush.msra.mxu3 %v4933_v43  ;;  %v4135_v32 = vld [vmem:[%s5712_s7 + $0x830] sm:$0xff]  ;;  %v4936_v30 = vld [vmem:[%s11828_s1 + $0x840] sm:$0xff]  ;;  %v4937_v43 = vld [vmem:[%s11828_s1 + $0x8c8] sm:$0xff] }
 0x295   : > { %2751 = vmatpush.msra.mxu0 %v4934_v56  ;;  %2779 = vmatpush.msra.mxu1 %v4935_v46  ;;  %v4939_v46 = vld [vmem:[%s11828_s1 + $0x7c8] sm:$0xff] }
 0x296   : > { %2810 = vmatpush.msra.mxu2 %v4936_v30  ;;  %2838 = vmatpush.msra.mxu3 %v4937_v43  ;;  %v9340_v56 = vpop.f32.mrf.mxu1  ;;  %v4134_v30 = vld [vmem:[%s5712_s7 + $0x828] sm:$0xff]  ;;  %v4940_v43 = vld [vmem:[%s11828_s1 + $0x838] sm:$0xff] }
 0x297   : > { %11990 = vst [vmem:[#allocation160_spill] sm:$0xff] %v9340_v56  ;;  %2752 = vmatpush.msra.mxu0 %v4938_v60  ;;  %2780 = vmatpush.msra.mxu1 %v4939_v46  ;;  %v4941_v56 = vld [vmem:[%s11828_s1 + $0x8c0] sm:$0xff]  ;;  %v4942_v60 = vld [vmem:[%s11828_s1 + $0x738] sm:$0xff]  ;;  %v4944_v46 = vld [vmem:[%s11828_s1 + $0x830] sm:$0xff] }
 0x298   : > { %2651 = vmatmul.f32.gmra.mxu0 %v4133_v5  ;;  %2709 = vmatmul.f32.gmra.mxu2 %v4135_v32  ;;  %v4943_v32 = vld [vmem:[%s11828_s1 + $0x7c0] sm:$0xff] }
 0x299   : > { %2811 = vmatpush.msra.mxu2 %v4940_v43  ;;  %2839 = vmatpush.msra.mxu3 %v4941_v56  ;;  %v9362_v5 = vpop.f32.mrf.mxu2  ;;  %v4945_v56 = vld [vmem:[%s11828_s1 + $0x8b8] sm:$0xff] }
 0x29a   : > { %2753 = vmatpush.msra.mxu0 %v4942_v60  ;;  %2781 = vmatpush.msra.mxu1 %v4943_v32  ;;  %v4946_v60 = vld [vmem:[%s11828_s1 + $0x730] sm:$0xff]  ;;  %v4948_v32 = vld [vmem:[%s11828_s1 + $0x828] sm:$0xff] }
 0x29b   : > { %2680 = vmatmul.f32.gmra.mxu1 %v4134_v30  ;;  %2738 = vmatmul.f32.gmra.mxu3 %v4136_v23  ;;  %v4947_v23 = vld [vmem:[%s11828_s1 + $0x7b8] sm:$0xff] }
 0x29c   : > { %2812 = vmatpush.msra.mxu2 %v4944_v46  ;;  %2840 = vmatpush.msra.mxu3 %v4945_v56  ;;  %v9370_v43 = vpop.f32.mrf.mxu3  ;;  %v4949_v46 = vld [vmem:[%s11828_s1 + $0x8b0] sm:$0xff]  ;;  %v4950_v56 = vld [vmem:[%s11828_s1 + $0x728] sm:$0xff] }
 0x29d   : > { %11991 = vst [vmem:[#allocation161_spill] sm:$0xff] %v9370_v43  ;;  %2754 = vmatpush.msra.mxu0 %v4946_v60  ;;  %2782 = vmatpush.msra.mxu1 %v4947_v23  ;;  %v9378_v30 = vpop.f32.mrf.mxu0  ;;  %v4951_v60 = vld [vmem:[%s11828_s1 + $0x7b0] sm:$0xff]  ;;  %v4158_v23 = vld [vmem:[%s5712_s7 + $0x8e8] sm:$0x1]  ;;  %v5368_v43 = vld [vmem:[%s11828_s1 + $0x9e0] sm:$0xff] }
 0x29e   : > { %11992 = vst [vmem:[#allocation162_spill] sm:$0xff] %v9378_v30  ;;  %2813 = vmatpush.msra.mxu2 %v4948_v32  ;;  %2841 = vmatpush.msra.mxu3 %v4949_v46  ;;  %v4160_v30 = vld [vmem:[%s5712_s7 + $0x8f8] sm:$0x1]  ;;  %v4952_v32 = vld [vmem:[%s11828_s1 + $0x820] sm:$0xff]  ;;  %v4953_v46 = vld [vmem:[%s11828_s1 + $0x8a8] sm:$0xff] }
 0x29f   : > { %2755 = vmatpush.msra.mxu0 %v4950_v56  ;;  %2783 = vmatpush.msra.mxu1 %v4951_v60  ;;  %v4955_v60 = vld [vmem:[%s11828_s1 + $0x7a8] sm:$0xff] }
 0x2a0   : > { %2814 = vmatpush.msra.mxu2 %v4952_v32  ;;  %2842 = vmatpush.msra.mxu3 %v4953_v46  ;;  %v9400_v56 = vpop.f32.mrf.mxu1  ;;  %v4159_v32 = vld [vmem:[%s5712_s7 + $0x8f0] sm:$0x1]  ;;  %v4956_v46 = vld [vmem:[%s11828_s1 + $0x818] sm:$0xff] }
 0x2a1   : > { %11993 = vst [vmem:[#allocation163_spill] sm:$0xff] %v9400_v56  ;;  %2756 = vmatpush.msra.mxu0 %v4954_v20  ;;  %2784 = vmatpush.msra.mxu1 %v4955_v60  ;;  %v4957_v56 = vld [vmem:[%s11828_s1 + $0x8a0] sm:$0xff]  ;;  %v4958_v20 = vld [vmem:[%s11828_s1 + $0x718] sm:$0xff]  ;;  %v4960_v60 = vld [vmem:[%s11828_s1 + $0x810] sm:$0xff] }
 0x2a2   : > { %2654 = vmatmul.f32.gmra.mxu0 %v4158_v23  ;;  %2712 = vmatmul.f32.gmra.mxu2 %v4160_v30  ;;  %v4959_v30 = vld [vmem:[%s11828_s1 + $0x7a0] sm:$0xff] }
 0x2a3   : > { %2815 = vmatpush.msra.mxu2 %v4956_v46  ;;  %2843 = vmatpush.msra.mxu3 %v4957_v56  ;;  %v9422_v23 = vpop.f32.mrf.mxu2  ;;  %v4961_v56 = vld [vmem:[%s11828_s1 + $0x898] sm:$0xff] }
 0x2a4   : > { %2757 = vmatpush.msra.mxu0 %v4958_v20  ;;  %2785 = vmatpush.msra.mxu1 %v4959_v30  ;;  %11994 = vst [vmem:[#allocation164_spill] sm:$0xff] %v9422_v23  ;;  %v4962_v20 = vld [vmem:[%s11828_s1 + $0x710] sm:$0xff]  ;;  %v4964_v30 = vld [vmem:[%s11828_s1 + $0x808] sm:$0xff] }
 0x2a5   : > { %2683 = vmatmul.f32.gmra.mxu1 %v4159_v32  ;;  %2741 = vmatmul.f32.gmra.mxu3 %v4161_v51  ;;  %v4963_v51 = vld [vmem:[%s11828_s1 + $0x798] sm:$0xff]  ;;  %v4090_v23 = vld [vmem:[%s5712_s7 + $0x6c8] sm:$0xff] }
 0x2a6   : > { %2816 = vmatpush.msra.mxu2 %v4960_v60  ;;  %2844 = vmatpush.msra.mxu3 %v4961_v56  ;;  %v9430_v46 = vpop.f32.mrf.mxu3  ;;  %v4965_v60 = vld [vmem:[%s11828_s1 + $0x890] sm:$0xff]  ;;  %v4966_v56 = vld [vmem:[%s11828_s1 + $0x708] sm:$0xff] }
 0x2a7   : > { %11995 = vst [vmem:[#allocation165_spill] sm:$0xff] %v9430_v46  ;;  %2758 = vmatpush.msra.mxu0 %v4962_v20  ;;  %2786 = vmatpush.msra.mxu1 %v4963_v51  ;;  %v9438_v32 = vpop.f32.mrf.mxu0  ;;  %v4967_v20 = vld [vmem:[%s11828_s1 + $0x790] sm:$0xff]  ;;  %v4970_v46 = vld [vmem:[%s11828_s1 + $0x700] sm:$0xff] }
 0x2a8   : > { %11996 = vst [vmem:[#allocation166_spill] sm:$0xff] %v9438_v32  ;;  %2817 = vmatpush.msra.mxu2 %v4964_v30  ;;  %2845 = vmatpush.msra.mxu3 %v4965_v60  ;;  %v4087_v51 = vld [vmem:[%s5712_s7 + $0x6b0] sm:$0xff]  ;;  %v4089_v32 = vld [vmem:[%s5712_s7 + $0x6c0] sm:$0xff]  ;;  %v4969_v60 = vld [vmem:[%s11828_s1 + $0x888] sm:$0xff] }
 0x2a9   : > { %2759 = vmatpush.msra.mxu0 %v4966_v56  ;;  %2787 = vmatpush.msra.mxu1 %v4967_v20  ;;  %v4968_v30 = vld [vmem:[%s11828_s1 + $0x800] sm:$0xff]  ;;  %v4971_v20 = vld [vmem:[%s11828_s1 + $0x788] sm:$0xff] }
 0x2aa   : > { %2818 = vmatpush.msra.mxu2 %v4968_v30  ;;  %2846 = vmatpush.msra.mxu3 %v4969_v60  ;;  %v9460_v56 = vpop.f32.mrf.mxu1  ;;  %v4088_v30 = vld [vmem:[%s5712_s7 + $0x6b8] sm:$0xff]  ;;  %v4972_v60 = vld [vmem:[%s11828_s1 + $0x880] sm:$0xff] }
 0x2ab   : > { %11997 = vst [vmem:[#allocation167_spill] sm:$0xff] %v9460_v56  ;;  %2760 = vmatpush.msra.mxu0 %v4970_v46  ;;  %2788 = vmatpush.msra.mxu1 %v4971_v20  ;;  %v4973_v56 = vld [vmem:[%s11828_s1 + $0xa78] sm:$0xff]  ;;  %v4974_v46 = vld [vmem:[%s11828_s1 + $0x780] sm:$0xff]  ;;  %v4976_v20 = vld [vmem:[%s11828_s1 + $0xa70] sm:$0xff] }
 0x2ac   : > { %2761 = vmatmul.f32.vlgmr.msra.gmra.mxu0 %v4087_v51  ;;  %2819 = vmatmul.f32.vlgmr.msra.gmra.mxu2 %v4089_v32  ;;  %v4975_v32 = vld [vmem:[%s11828_s1 + $0x978] sm:$0xff] }
 0x2ad   : > { %2847 = vmatpush.msra.mxu3 %v4972_v60  ;;  %2919 = vmatpush.msrb.mxu2 %v4973_v56  ;;  %v9482_v51 = vpop.f32.mrf.mxu2  ;;  %v4977_v56 = vld [vmem:[%s11828_s1 + $0xaf8] sm:$0xff] }
 0x2ae   : > { %2789 = vmatpush.msra.mxu1 %v4974_v46  ;;  %2861 = vmatpush.msrb.mxu0 %v4975_v32  ;;  %11998 = vst [vmem:[#allocation168_spill] sm:$0xff] %v9482_v51  ;;  %v4978_v46 = vld [vmem:[%s11828_s1 + $0x970] sm:$0xff]  ;;  %v4980_v32 = vld [vmem:[%s11828_s1 + $0xa68] sm:$0xff]  ;;  %v4986_v51 = vld [vmem:[%s11828_s1 + $0x960] sm:$0xff] }
 0x2af   : > { %2790 = vmatmul.f32.vlgmr.msra.gmra.mxu1 %v4088_v30  ;;  %2848 = vmatmul.f32.vlgmr.msra.gmra.mxu3 %v4090_v23  ;;  %v4979_v23 = vld [vmem:[%s11828_s1 + $0x9f8] sm:$0xff] }
 0x2b0   : > { %2920 = vmatpush.msrb.mxu2 %v4976_v20  ;;  %2948 = vmatpush.msrb.mxu3 %v4977_v56  ;;  %v9490_v60 = vpop.f32.mrf.mxu3  ;;  %v4981_v20 = vld [vmem:[%s11828_s1 + $0xaf0] sm:$0xff]  ;;  %v4982_v56 = vld [vmem:[%s11828_s1 + $0x968] sm:$0xff] }
 0x2b1   : > { %11999 = vst [vmem:[#allocation169_spill] sm:$0xff] %v9490_v60  ;;  %2862 = vmatpush.msrb.mxu0 %v4978_v46  ;;  %2890 = vmatpush.msrb.mxu1 %v4979_v23  ;;  %v9498_v30 = vpop.f32.mrf.mxu0  ;;  %v4983_v46 = vld [vmem:[%s11828_s1 + $0x9f0] sm:$0xff]  ;;  %v4112_v23 = vld [vmem:[%s5712_s7 + $0x778] sm:$0xff]  ;;  %v4114_v60 = vld [vmem:[%s5712_s7 + $0x788] sm:$0xff] }
 0x2b2   : > { %2921 = vmatpush.msrb.mxu2 %v4980_v32  ;;  %2949 = vmatpush.msrb.mxu3 %v4981_v20  ;;  %v4984_v32 = vld [vmem:[%s11828_s1 + $0xa60] sm:$0xff]  ;;  %v4985_v20 = vld [vmem:[%s11828_s1 + $0xae8] sm:$0xff] }
 0x2b3   : > { %2863 = vmatpush.msrb.mxu0 %v4982_v56  ;;  %2891 = vmatpush.msrb.mxu1 %v4983_v46  ;;  %v4987_v46 = vld [vmem:[%s11828_s1 + $0x9e8] sm:$0xff] }
 0x2b4   : > { %2922 = vmatpush.msrb.mxu2 %v4984_v32  ;;  %2950 = vmatpush.msrb.mxu3 %v4985_v20  ;;  %v9520_v56 = vpop.f32.mrf.mxu1  ;;  %v4113_v32 = vld [vmem:[%s5712_s7 + $0x780] sm:$0xff]  ;;  %v4988_v20 = vld [vmem:[%s11828_s1 + $0xa58] sm:$0xff] }
 0x2b5   : > { %12000 = vst [vmem:[#allocation170_spill] sm:$0xff] %v9520_v56  ;;  %2864 = vmatpush.msrb.mxu0 %v4986_v51  ;;  %2892 = vmatpush.msrb.mxu1 %v4987_v46  ;;  %v4990_v51 = vld [vmem:[%s11828_s1 + $0x958] sm:$0xff]  ;;  %v4992_v46 = vld [vmem:[%s11828_s1 + $0xa50] sm:$0xff] }
 0x2b6   : > { %2764 = vmatmul.f32.gmra.mxu0 %v4112_v23  ;;  %2822 = vmatmul.f32.gmra.mxu2 %v4114_v60  ;;  %v4991_v60 = vld [vmem:[%s11828_s1 + $0x9e0] sm:$0xff]  ;;  %v4220_v56 = vld [vmem:[%s5712_s7 + $0xad8] sm:$0xff] }
 0x2b7   : > { %2923 = vmatpush.msrb.mxu2 %v4988_v20  ;;  %2951 = vmatpush.msrb.mxu3 %v4989_v41  ;;  %v9542_v23 = vpop.f32.mrf.mxu2  ;;  %v4993_v41 = vld [vmem:[%s11828_s1 + $0xad8] sm:$0xff] }
 0x2b8   : > { %2865 = vmatpush.msrb.mxu0 %v4990_v51  ;;  %2893 = vmatpush.msrb.mxu1 %v4991_v60  ;;  %12001 = vst [vmem:[#allocation171_spill] sm:$0xff] %v9542_v23  ;;  %v4994_v51 = vld [vmem:[%s11828_s1 + $0x950] sm:$0xff]  ;;  %v4996_v60 = vld [vmem:[%s11828_s1 + $0xa48] sm:$0xff]  ;;  %v4260_v23 = vld [vmem:[%s5712_s7 + $0xc18] sm:$0x1] }
 0x2b9   : > { %2793 = vmatmul.f32.gmra.mxu1 %v4113_v32  ;;  %2851 = vmatmul.f32.gmra.mxu3 %v4115_v19  ;;  %v4995_v19 = vld [vmem:[%s11828_s1 + $0x9d8] sm:$0xff] }
 0x2ba   : > { %2924 = vmatpush.msrb.mxu2 %v4992_v46  ;;  %2952 = vmatpush.msrb.mxu3 %v4993_v41  ;;  %v9550_v20 = vpop.f32.mrf.mxu3  ;;  %v4997_v46 = vld [vmem:[%s11828_s1 + $0xad0] sm:$0xff]  ;;  %v4998_v41 = vld [vmem:[%s11828_s1 + $0x948] sm:$0xff] }
 0x2bb   : > { %12002 = vst [vmem:[#allocation172_spill] sm:$0xff] %v9550_v20  ;;  %2866 = vmatpush.msrb.mxu0 %v4994_v51  ;;  %2894 = vmatpush.msrb.mxu1 %v4995_v19  ;;  %v9558_v32 = vpop.f32.mrf.mxu0  ;;  %v4999_v51 = vld [vmem:[%s11828_s1 + $0x9d0] sm:$0xff]  ;;  %v4137_v19 = vld [vmem:[%s5712_s7 + $0x840] sm:$0xff] }
 0x2bc   : > { %12003 = vst [vmem:[#allocation173_spill] sm:$0xff] %v9558_v32  ;;  %2925 = vmatpush.msrb.mxu2 %v4996_v60  ;;  %2953 = vmatpush.msrb.mxu3 %v4997_v46  ;;  %v4139_v20 = vld [vmem:[%s5712_s7 + $0x850] sm:$0xff]  ;;  %v5000_v60 = vld [vmem:[%s11828_s1 + $0xa40] sm:$0xff]  ;;  %v5001_v46 = vld [vmem:[%s11828_s1 + $0xac8] sm:$0xff] }
 0x2bd   : > { %2867 = vmatpush.msrb.mxu0 %v4998_v41  ;;  %2895 = vmatpush.msrb.mxu1 %v4999_v51  ;;  %v5002_v32 = vld [vmem:[%s11828_s1 + $0x940] sm:$0xff]  ;;  %v5003_v51 = vld [vmem:[%s11828_s1 + $0x9c8] sm:$0xff] }
 0x2be   : > { %2926 = vmatpush.msrb.mxu2 %v5000_v60  ;;  %2954 = vmatpush.msrb.mxu3 %v5001_v46  ;;  %v9580_v41 = vpop.f32.mrf.mxu1  ;;  %v4138_v60 = vld [vmem:[%s5712_s7 + $0x848] sm:$0xff]  ;;  %v5004_v46 = vld [vmem:[%s11828_s1 + $0xa38] sm:$0xff] }
 0x2bf   : > { %12004 = vst [vmem:[#allocation174_spill] sm:$0xff] %v9580_v41  ;;  %2868 = vmatpush.msrb.mxu0 %v5002_v32  ;;  %2896 = vmatpush.msrb.mxu1 %v5003_v51  ;;  %v5005_v41 = vld [vmem:[%s11828_s1 + $0xac0] sm:$0xff]  ;;  %v5006_v32 = vld [vmem:[%s11828_s1 + $0x938] sm:$0xff]  ;;  %v5008_v51 = vld [vmem:[%s11828_s1 + $0xa30] sm:$0xff] }
 0x2c0   : > { %2767 = vmatmul.f32.gmra.mxu0 %v4137_v19  ;;  %2825 = vmatmul.f32.gmra.mxu2 %v4139_v20  ;;  %v5007_v20 = vld [vmem:[%s11828_s1 + $0x9c0] sm:$0xff] }
 0x2c1   : > { %2927 = vmatpush.msrb.mxu2 %v5004_v46  ;;  %2955 = vmatpush.msrb.mxu3 %v5005_v41  ;;  %v9602_v19 = vpop.f32.mrf.mxu2  ;;  %v5009_v41 = vld [vmem:[%s11828_s1 + $0xab8] sm:$0xff] }
 0x2c2   : > { %2869 = vmatpush.msrb.mxu0 %v5006_v32  ;;  %2897 = vmatpush.msrb.mxu1 %v5007_v20  ;;  %12005 = vst [vmem:[#allocation175_spill] sm:$0xff] %v9602_v19  ;;  %v5010_v32 = vld [vmem:[%s11828_s1 + $0x930] sm:$0xff]  ;;  %v5012_v20 = vld [vmem:[%s11828_s1 + $0xa28] sm:$0xff]  ;;  %v4165_v19 = vld [vmem:[%s5712_s7 + $0x920] sm:$0x1] }
 0x2c3   : > { %2796 = vmatmul.f32.gmra.mxu1 %v4138_v60  ;;  %2854 = vmatmul.f32.gmra.mxu3 %v4140_v13  ;;  %v5011_v13 = vld [vmem:[%s11828_s1 + $0x9b8] sm:$0xff] }
 0x2c4   : > { %2928 = vmatpush.msrb.mxu2 %v5008_v51  ;;  %2956 = vmatpush.msrb.mxu3 %v5009_v41  ;;  %v9610_v46 = vpop.f32.mrf.mxu3  ;;  %v5013_v51 = vld [vmem:[%s11828_s1 + $0xab0] sm:$0xff]  ;;  %v5014_v41 = vld [vmem:[%s11828_s1 + $0x928] sm:$0xff] }
 0x2c5   : > { %12006 = vst [vmem:[#allocation176_spill] sm:$0xff] %v9610_v46  ;;  %2870 = vmatpush.msrb.mxu0 %v5010_v32  ;;  %2898 = vmatpush.msrb.mxu1 %v5011_v13  ;;  %v9618_v60 = vpop.f32.mrf.mxu0  ;;  %v5015_v32 = vld [vmem:[%s11828_s1 + $0x9b0] sm:$0xff]  ;;  %v4162_v13 = vld [vmem:[%s5712_s7 + $0x908] sm:$0x1]  ;;  %v4164_v46 = vld [vmem:[%s5712_s7 + $0x918] sm:$0x1] }
 0x2c6   : > { %12007 = vst [vmem:[#allocation177_spill] sm:$0xff] %v9618_v60  ;;  %2929 = vmatpush.msrb.mxu2 %v5012_v20  ;;  %2957 = vmatpush.msrb.mxu3 %v5013_v51  ;;  %v5016_v20 = vld [vmem:[%s11828_s1 + $0xa20] sm:$0xff]  ;;  %v5017_v51 = vld [vmem:[%s11828_s1 + $0xaa8] sm:$0xff] }
 0x2c7   : > { %2871 = vmatpush.msrb.mxu0 %v5014_v41  ;;  %2899 = vmatpush.msrb.mxu1 %v5015_v32  ;;  %v5018_v60 = vld [vmem:[%s11828_s1 + $0x920] sm:$0xff]  ;;  %v5019_v32 = vld [vmem:[%s11828_s1 + $0x9a8] sm:$0xff] }
 0x2c8   : > { %2930 = vmatpush.msrb.mxu2 %v5016_v20  ;;  %2958 = vmatpush.msrb.mxu3 %v5017_v51  ;;  %v9640_v41 = vpop.f32.mrf.mxu1  ;;  %v4163_v20 = vld [vmem:[%s5712_s7 + $0x910] sm:$0x1]  ;;  %v5020_v51 = vld [vmem:[%s11828_s1 + $0xa18] sm:$0xff] }
 0x2c9   : > { %12008 = vst [vmem:[#allocation178_spill] sm:$0xff] %v9640_v41  ;;  %2872 = vmatpush.msrb.mxu0 %v5018_v60  ;;  %2900 = vmatpush.msrb.mxu1 %v5019_v32  ;;  %v5021_v41 = vld [vmem:[%s11828_s1 + $0xaa0] sm:$0xff]  ;;  %v5022_v60 = vld [vmem:[%s11828_s1 + $0x918] sm:$0xff]  ;;  %v5024_v32 = vld [vmem:[%s11828_s1 + $0xa10] sm:$0xff] }
 0x2ca   : > { %2770 = vmatmul.f32.gmra.mxu0 %v4162_v13  ;;  %2828 = vmatmul.f32.gmra.mxu2 %v4164_v46  ;;  %v5023_v46 = vld [vmem:[%s11828_s1 + $0x9a0] sm:$0xff] }
 0x2cb   : > { %2931 = vmatpush.msrb.mxu2 %v5020_v51  ;;  %2959 = vmatpush.msrb.mxu3 %v5021_v41  ;;  %v9662_v13 = vpop.f32.mrf.mxu2  ;;  %v5025_v41 = vld [vmem:[%s11828_s1 + $0xa98] sm:$0xff] }
 0x2cc   : > { %2873 = vmatpush.msrb.mxu0 %v5022_v60  ;;  %2901 = vmatpush.msrb.mxu1 %v5023_v46  ;;  %12009 = vst [vmem:[#allocation179_spill] sm:$0xff] %v9662_v13  ;;  %v5026_v60 = vld [vmem:[%s11828_s1 + $0x910] sm:$0xff]  ;;  %v5028_v46 = vld [vmem:[%s11828_s1 + $0xa08] sm:$0xff] }
 0x2cd   : > { %2799 = vmatmul.f32.gmra.mxu1 %v4163_v20  ;;  %2857 = vmatmul.f32.gmra.mxu3 %v4165_v19  ;;  %v5027_v19 = vld [vmem:[%s11828_s1 + $0x998] sm:$0xff]  ;;  %v4094_v13 = vld [vmem:[%s5712_s7 + $0x6e8] sm:$0xff] }
 0x2ce   : > { %2932 = vmatpush.msrb.mxu2 %v5024_v32  ;;  %2960 = vmatpush.msrb.mxu3 %v5025_v41  ;;  %v9670_v51 = vpop.f32.mrf.mxu3  ;;  %v5029_v32 = vld [vmem:[%s11828_s1 + $0xa90] sm:$0xff]  ;;  %v5030_v41 = vld [vmem:[%s11828_s1 + $0x908] sm:$0xff] }
 0x2cf   : > { %12010 = vst [vmem:[#allocation180_spill] sm:$0xff] %v9670_v51  ;;  %2874 = vmatpush.msrb.mxu0 %v5026_v60  ;;  %2902 = vmatpush.msrb.mxu1 %v5027_v19  ;;  %v9678_v20 = vpop.f32.mrf.mxu0  ;;  %v5031_v60 = vld [vmem:[%s11828_s1 + $0x990] sm:$0xff]  ;;  %v4093_v51 = vld [vmem:[%s5712_s7 + $0x6e0] sm:$0xff] }
 0x2d0   : > { %12011 = vst [vmem:[#allocation181_spill] sm:$0xff] %v9678_v20  ;;  %2933 = vmatpush.msrb.mxu2 %v5028_v46  ;;  %2961 = vmatpush.msrb.mxu3 %v5029_v32  ;;  %v4091_v19 = vld [vmem:[%s5712_s7 + $0x6d0] sm:$0xff]  ;;  %v5032_v46 = vld [vmem:[%s11828_s1 + $0xa00] sm:$0xff]  ;;  %v5033_v32 = vld [vmem:[%s11828_s1 + $0xa88] sm:$0xff] }
 0x2d1   : > { %2875 = vmatpush.msrb.mxu0 %v5030_v41  ;;  %2903 = vmatpush.msrb.mxu1 %v5031_v60  ;;  %v5034_v20 = vld [vmem:[%s11828_s1 + $0x900] sm:$0xff]  ;;  %v5035_v60 = vld [vmem:[%s11828_s1 + $0x988] sm:$0xff] }
 0x2d2   : > { %2934 = vmatpush.msrb.mxu2 %v5032_v46  ;;  %2962 = vmatpush.msrb.mxu3 %v5033_v32  ;;  %v9700_v41 = vpop.f32.mrf.mxu1  ;;  %v4092_v46 = vld [vmem:[%s5712_s7 + $0x6d8] sm:$0xff]  ;;  %v5036_v32 = vld [vmem:[%s11828_s1 + $0xa80] sm:$0xff] }
 0x2d3   : > { %12012 = vst [vmem:[#allocation182_spill] sm:$0xff] %v9700_v41  ;;  %2876 = vmatpush.msrb.mxu0 %v5034_v20  ;;  %2904 = vmatpush.msrb.mxu1 %v5035_v60  ;;  %v5037_v41 = vld [vmem:[%s11828_s1 + $0xc78] sm:$0xff]  ;;  %v5038_v20 = vld [vmem:[%s11828_s1 + $0x980] sm:$0xff]  ;;  %v5040_v60 = vld [vmem:[%s11828_s1 + $0xc70] sm:$0xff] }
 0x2d4   : > { %2877 = vmatmul.f32.vlgmr.msrb.gmra.mxu0 %v4091_v19  ;;  %2935 = vmatmul.f32.vlgmr.msrb.gmra.mxu2 %v4093_v51  ;;  %v5039_v51 = vld [vmem:[%s11828_s1 + $0xb78] sm:$0xff] }
 0x2d5   : > { %2963 = vmatpush.msrb.mxu3 %v5036_v32  ;;  %3035 = vmatpush.msra.mxu2 %v5037_v41  ;;  %v9722_v19 = vpop.f32.mrf.mxu2  ;;  %v5041_v41 = vld [vmem:[%s11828_s1 + $0x78] sm:$0xff] }
 0x2d6   : > { %2905 = vmatpush.msrb.mxu1 %v5038_v20  ;;  %2977 = vmatpush.msra.mxu0 %v5039_v51  ;;  %12013 = vst [vmem:[#allocation183_spill] sm:$0xff] %v9722_v19  ;;  %v5042_v20 = vld [vmem:[%s11828_s1 + $0xb70] sm:$0xff]  ;;  %v5044_v51 = vld [vmem:[%s11828_s1 + $0xc68] sm:$0xff]  ;;  %v5050_v19 = vld [vmem:[%s11828_s1 + $0xb60] sm:$0xff] }
 0x2d7   : > { %2906 = vmatmul.f32.vlgmr.msrb.gmra.mxu1 %v4092_v46  ;;  %2964 = vmatmul.f32.vlgmr.msrb.gmra.mxu3 %v4094_v13  ;;  %v5043_v13 = vld [vmem:[%s11828_s1 + $0xbf8] sm:$0xff] }
 0x2d8   : > { %3036 = vmatpush.msra.mxu2 %v5040_v60  ;;  %3169 = vmatpush.msra.mxu3 %v5041_v41  ;;  %v9730_v32 = vpop.f32.mrf.mxu3  ;;  %v5045_v60 = vld [vmem:[%s11828_s1 + $0x70] sm:$0xff]  ;;  %v5046_v41 = vld [vmem:[%s11828_s1 + $0xb68] sm:$0xff] }
 0x2d9   : > { %12014 = vst [vmem:[#allocation184_spill] sm:$0xff] %v9730_v32  ;;  %2978 = vmatpush.msra.mxu0 %v5042_v20  ;;  %3006 = vmatpush.msra.mxu1 %v5043_v13  ;;  %v9738_v46 = vpop.f32.mrf.mxu0  ;;  %v5047_v20 = vld [vmem:[%s11828_s1 + $0xbf0] sm:$0xff]  ;;  %v4116_v13 = vld [vmem:[%s5712_s7 + $0x798] sm:$0xff]  ;;  %v4118_v32 = vld [vmem:[%s5712_s7 + $0x7a8] sm:$0xff] }
 0x2da   : > { %12015 = vst [vmem:[#allocation185_spill] sm:$0xff] %v9738_v46  ;;  %3037 = vmatpush.msra.mxu2 %v5044_v51  ;;  %3170 = vmatpush.msra.mxu3 %v5045_v60  ;;  %v5048_v51 = vld [vmem:[%s11828_s1 + $0xc60] sm:$0xff]  ;;  %v5049_v60 = vld [vmem:[%s11828_s1 + $0x68] sm:$0xff]  ;;  %v4119_v46 = vld [vmem:[%s5712_s7 + $0x7b0] sm:$0xff] }
 0x2db   : > { %2979 = vmatpush.msra.mxu0 %v5046_v41  ;;  %3007 = vmatpush.msra.mxu1 %v5047_v20  ;;  %v5051_v20 = vld [vmem:[%s11828_s1 + $0xbe8] sm:$0xff] }
 0x2dc   : > { %3038 = vmatpush.msra.mxu2 %v5048_v51  ;;  %3171 = vmatpush.msra.mxu3 %v5049_v60  ;;  %v9760_v41 = vpop.f32.mrf.mxu1  ;;  %v4117_v51 = vld [vmem:[%s5712_s7 + $0x7a0] sm:$0xff]  ;;  %v5052_v60 = vld [vmem:[%s11828_s1 + $0xc58] sm:$0xff] }
 0x2dd   : > { %12016 = vst [vmem:[#allocation186_spill] sm:$0xff] %v9760_v41  ;;  %2980 = vmatpush.msra.mxu0 %v5050_v19  ;;  %3008 = vmatpush.msra.mxu1 %v5051_v20  ;;  %v5053_v41 = vld [vmem:[%s11828_s1 + $0x60] sm:$0xff]  ;;  %v5054_v19 = vld [vmem:[%s11828_s1 + $0xb58] sm:$0xff]  ;;  %v5056_v20 = vld [vmem:[%s11828_s1 + $0xc50] sm:$0xff] }
 0x2de   : > { %2880 = vmatmul.f32.gmra.mxu0 %v4116_v13  ;;  %2938 = vmatmul.f32.gmra.mxu2 %v4118_v32  ;;  %v5055_v32 = vld [vmem:[%s11828_s1 + $0xbe0] sm:$0xff] }
 0x2df   : > { %3039 = vmatpush.msra.mxu2 %v5052_v60  ;;  %3172 = vmatpush.msra.mxu3 %v5053_v41  ;;  %v9782_v13 = vpop.f32.mrf.mxu2  ;;  %v5057_v41 = vld [vmem:[%s11828_s1 + $0x58] sm:$0xff] }
 0x2e0   : > { %2981 = vmatpush.msra.mxu0 %v5054_v19  ;;  %3009 = vmatpush.msra.mxu1 %v5055_v32  ;;  %12017 = vst [vmem:[#allocation187_spill] sm:$0xff] %v9782_v13  ;;  %v5058_v19 = vld [vmem:[%s11828_s1 + $0xb50] sm:$0xff]  ;;  %v5060_v32 = vld [vmem:[%s11828_s1 + $0xc48] sm:$0xff]  ;;  %v4144_v13 = vld [vmem:[%s5712_s7 + $0x878] sm:$0xff] }
 0x2e1   : > { %2909 = vmatmul.f32.gmra.mxu1 %v4117_v51  ;;  %2967 = vmatmul.f32.gmra.mxu3 %v4119_v46  ;;  %v5059_v46 = vld [vmem:[%s11828_s1 + $0xbd8] sm:$0xff] }
 0x2e2   : > { %3040 = vmatpush.msra.mxu2 %v5056_v20  ;;  %3173 = vmatpush.msra.mxu3 %v5057_v41  ;;  %v9790_v60 = vpop.f32.mrf.mxu3  ;;  %v5061_v20 = vld [vmem:[%s11828_s1 + $0x50] sm:$0xff]  ;;  %v5062_v41 = vld [vmem:[%s11828_s1 + $0xb48] sm:$0xff] }
 0x2e3   : > { %12018 = vst [vmem:[#allocation188_spill] sm:$0xff] %v9790_v60  ;;  %2982 = vmatpush.msra.mxu0 %v5058_v19  ;;  %3010 = vmatpush.msra.mxu1 %v5059_v46  ;;  %v9798_v51 = vpop.f32.mrf.mxu0  ;;  %v5063_v19 = vld [vmem:[%s11828_s1 + $0xbd0] sm:$0xff]  ;;  %v4141_v46 = vld [vmem:[%s5712_s7 + $0x860] sm:$0xff] }
 0x2e4   : > { %12019 = vst [vmem:[#allocation189_spill] sm:$0xff] %v9798_v51  ;;  %3041 = vmatpush.msra.mxu2 %v5060_v32  ;;  %3174 = vmatpush.msra.mxu3 %v5061_v20  ;;  %v4143_v60 = vld [vmem:[%s5712_s7 + $0x870] sm:$0xff]  ;;  %v5064_v32 = vld [vmem:[%s11828_s1 + $0xc40] sm:$0xff]  ;;  %v5065_v20 = vld [vmem:[%s11828_s1 + $0x48] sm:$0xff] }
 0x2e5   : > { %2983 = vmatpush.msra.mxu0 %v5062_v41  ;;  %3011 = vmatpush.msra.mxu1 %v5063_v19  ;;  %v5066_v51 = vld [vmem:[%s11828_s1 + $0xb40] sm:$0xff]  ;;  %v5067_v19 = vld [vmem:[%s11828_s1 + $0xbc8] sm:$0xff] }
 0x2e6   : > { %3042 = vmatpush.msra.mxu2 %v5064_v32  ;;  %3175 = vmatpush.msra.mxu3 %v5065_v20  ;;  %v9820_v41 = vpop.f32.mrf.mxu1  ;;  %v4142_v32 = vld [vmem:[%s5712_s7 + $0x868] sm:$0xff]  ;;  %v5068_v20 = vld [vmem:[%s11828_s1 + $0xc38] sm:$0xff] }
 0x2e7   : > { %12020 = vst [vmem:[#allocation190_spill] sm:$0xff] %v9820_v41  ;;  %2984 = vmatpush.msra.mxu0 %v5066_v51  ;;  %3012 = vmatpush.msra.mxu1 %v5067_v19  ;;  %v5069_v41 = vld [vmem:[%s11828_s1 + $0x40] sm:$0xff]  ;;  %v5070_v51 = vld [vmem:[%s11828_s1 + $0xb38] sm:$0xff]  ;;  %v5072_v19 = vld [vmem:[%s11828_s1 + $0xc30] sm:$0xff] }
 0x2e8   : > { %2883 = vmatmul.f32.gmra.mxu0 %v4141_v46  ;;  %2941 = vmatmul.f32.gmra.mxu2 %v4143_v60  ;;  %v5071_v60 = vld [vmem:[%s11828_s1 + $0xbc0] sm:$0xff] }
 0x2e9   : > { %3043 = vmatpush.msra.mxu2 %v5068_v20  ;;  %3176 = vmatpush.msra.mxu3 %v5069_v41  ;;  %v9842_v46 = vpop.f32.mrf.mxu2  ;;  %v5073_v41 = vld [vmem:[%s11828_s1 + $0x38] sm:$0xff] }
 0x2ea   : > { %2985 = vmatpush.msra.mxu0 %v5070_v51  ;;  %3013 = vmatpush.msra.mxu1 %v5071_v60  ;;  %12021 = vst [vmem:[#allocation191_spill] sm:$0xff] %v9842_v46  ;;  %v5074_v51 = vld [vmem:[%s11828_s1 + $0xb30] sm:$0xff]  ;;  %v5076_v60 = vld [vmem:[%s11828_s1 + $0xc28] sm:$0xff]  ;;  %v4169_v46 = vld [vmem:[%s5712_s7 + $0x940] sm:$0x1] }
 0x2eb   : > { %2912 = vmatmul.f32.gmra.mxu1 %v4142_v32  ;;  %2970 = vmatmul.f32.gmra.mxu3 %v4144_v13  ;;  %v5075_v13 = vld [vmem:[%s11828_s1 + $0xbb8] sm:$0xff] }
 0x2ec   : > { %3044 = vmatpush.msra.mxu2 %v5072_v19  ;;  %3177 = vmatpush.msra.mxu3 %v5073_v41  ;;  %v9850_v20 = vpop.f32.mrf.mxu3  ;;  %v5077_v19 = vld [vmem:[%s11828_s1 + $0x30] sm:$0xff]  ;;  %v5078_v41 = vld [vmem:[%s11828_s1 + $0xb28] sm:$0xff] }
 0x2ed   : > { %12022 = vst [vmem:[#allocation192_spill] sm:$0xff] %v9850_v20  ;;  %2986 = vmatpush.msra.mxu0 %v5074_v51  ;;  %3014 = vmatpush.msra.mxu1 %v5075_v13  ;;  %v9858_v32 = vpop.f32.mrf.mxu0  ;;  %v5079_v51 = vld [vmem:[%s11828_s1 + $0xbb0] sm:$0xff]  ;;  %v4166_v13 = vld [vmem:[%s5712_s7 + $0x928] sm:$0x1]  ;;  %v4168_v20 = vld [vmem:[%s5712_s7 + $0x938] sm:$0x1] }
 0x2ee   : > { %12023 = vst [vmem:[#allocation193_spill] sm:$0xff] %v9858_v32  ;;  %3045 = vmatpush.msra.mxu2 %v5076_v60  ;;  %3178 = vmatpush.msra.mxu3 %v5077_v19  ;;  %v5080_v60 = vld [vmem:[%s11828_s1 + $0xc20] sm:$0xff]  ;;  %v5081_v19 = vld [vmem:[%s11828_s1 + $0x28] sm:$0xff] }
 0x2ef   : > { %2987 = vmatpush.msra.mxu0 %v5078_v41  ;;  %3015 = vmatpush.msra.mxu1 %v5079_v51  ;;  %v5082_v32 = vld [vmem:[%s11828_s1 + $0xb20] sm:$0xff]  ;;  %v5083_v51 = vld [vmem:[%s11828_s1 + $0xba8] sm:$0xff] }
 0x2f0   : > { %3046 = vmatpush.msra.mxu2 %v5080_v60  ;;  %3179 = vmatpush.msra.mxu3 %v5081_v19  ;;  %v9880_v41 = vpop.f32.mrf.mxu1  ;;  %v4167_v60 = vld [vmem:[%s5712_s7 + $0x930] sm:$0x1]  ;;  %v5084_v19 = vld [vmem:[%s11828_s1 + $0xc18] sm:$0xff] }
 0x2f1   : > { %12024 = vst [vmem:[#allocation194_spill] sm:$0xff] %v9880_v41  ;;  %2988 = vmatpush.msra.mxu0 %v5082_v32  ;;  %3016 = vmatpush.msra.mxu1 %v5083_v51  ;;  %v5085_v41 = vld [vmem:[%s11828_s1 + $0x20] sm:$0xff]  ;;  %v5086_v32 = vld [vmem:[%s11828_s1 + $0xb18] sm:$0xff]  ;;  %v5088_v51 = vld [vmem:[%s11828_s1 + $0xc10] sm:$0xff] }
 0x2f2   : > { %2886 = vmatmul.f32.gmra.mxu0 %v4166_v13  ;;  %2944 = vmatmul.f32.gmra.mxu2 %v4168_v20  ;;  %v5087_v20 = vld [vmem:[%s11828_s1 + $0xba0] sm:$0xff] }
 0x2f3   : > { %3047 = vmatpush.msra.mxu2 %v5084_v19  ;;  %3180 = vmatpush.msra.mxu3 %v5085_v41  ;;  %v9902_v13 = vpop.f32.mrf.mxu2  ;;  %v5089_v41 = vld [vmem:[%s11828_s1 + $0x18] sm:$0xff] }
 0x2f4   : > { %2989 = vmatpush.msra.mxu0 %v5086_v32  ;;  %3017 = vmatpush.msra.mxu1 %v5087_v20  ;;  %12025 = vst [vmem:[#allocation195_spill] sm:$0xff] %v9902_v13  ;;  %v5090_v32 = vld [vmem:[%s11828_s1 + $0xb10] sm:$0xff]  ;;  %v5092_v20 = vld [vmem:[%s11828_s1 + $0xc08] sm:$0xff]  ;;  %v4173_v13 = vld [vmem:[%s5712_s7 + $0x960] sm:$0xff] }
 0x2f5   : > { %2915 = vmatmul.f32.gmra.mxu1 %v4167_v60  ;;  %2973 = vmatmul.f32.gmra.mxu3 %v4169_v46  ;;  %v5091_v46 = vld [vmem:[%s11828_s1 + $0xb98] sm:$0xff] }
 0x2f6   : > { %3048 = vmatpush.msra.mxu2 %v5088_v51  ;;  %3181 = vmatpush.msra.mxu3 %v5089_v41  ;;  %v9910_v19 = vpop.f32.mrf.mxu3  ;;  %v5093_v51 = vld [vmem:[%s11828_s1 + $0x10] sm:$0xff]  ;;  %v5094_v41 = vld [vmem:[%s11828_s1 + $0xb08] sm:$0xff] }
 0x2f7   : > { %12026 = vst [vmem:[#allocation196_spill] sm:$0xff] %v9910_v19  ;;  %2990 = vmatpush.msra.mxu0 %v5090_v32  ;;  %3018 = vmatpush.msra.mxu1 %v5091_v46  ;;  %v9918_v60 = vpop.f32.mrf.mxu0  ;;  %v5095_v32 = vld [vmem:[%s11828_s1 + $0xb90] sm:$0xff]  ;;  %v4097_v19 = vld [vmem:[%s5712_s7 + $0x700] sm:$0xff] }
 0x2f8   : > { %12027 = vst [vmem:[#allocation197_spill] sm:$0xff] %v9918_v60  ;;  %3049 = vmatpush.msra.mxu2 %v5092_v20  ;;  %3182 = vmatpush.msra.mxu3 %v5093_v51  ;;  %v4095_v46 = vld [vmem:[%s5712_s7 + $0x6f0] sm:$0xff]  ;;  %v5096_v20 = vld [vmem:[%s11828_s1 + $0xc00] sm:$0xff]  ;;  %v5097_v51 = vld [vmem:[%s11828_s1 + $0x8] sm:$0xff] }
 0x2f9   : > { %2991 = vmatpush.msra.mxu0 %v5094_v41  ;;  %3019 = vmatpush.msra.mxu1 %v5095_v32  ;;  %v5098_v60 = vld [vmem:[%s11828_s1 + $0xb00] sm:$0xff]  ;;  %v5099_v32 = vld [vmem:[%s11828_s1 + $0xb88] sm:$0xff] }
 0x2fa   : > { %3050 = vmatpush.msra.mxu2 %v5096_v20  ;;  %3183 = vmatpush.msra.mxu3 %v5097_v51  ;;  %v9940_v41 = vpop.f32.mrf.mxu1  ;;  %v4096_v20 = vld [vmem:[%s5712_s7 + $0x6f8] sm:$0xff]  ;;  %v5100_v51 = vld [vmem:[%s11828_s1] sm:$0xff] }
 0x2fb   : > { %12028 = vst [vmem:[#allocation198_spill] sm:$0xff] %v9940_v41  ;;  %2992 = vmatpush.msra.mxu0 %v5098_v60  ;;  %3020 = vmatpush.msra.mxu1 %v5099_v32  ;;  %v5101_v41 = vld [vmem:[%s11828_s1 + $0x1f8] sm:$0xff]  ;;  %v5102_v60 = vld [vmem:[%s11828_s1 + $0xb80] sm:$0xff]  ;;  %v5104_v32 = vld [vmem:[%s11828_s1 + $0x1f0] sm:$0xff] }
 0x2fc   : > { %2993 = vmatmul.f32.vlgmr.msra.gmra.mxu0 %v4095_v46  ;;  %3051 = vmatmul.f32.vlgmr.msra.gmra.mxu2 %v4097_v19  ;;  %v5103_v19 = vld [vmem:[%s11828_s1 + $0xf8] sm:$0xff] }
 0x2fd   : > { %3184 = vmatpush.msra.mxu3 %v5100_v51  ;;  %3256 = vmatpush.msrb.mxu2 %v5101_v41  ;;  %v9962_v46 = vpop.f32.mrf.mxu2  ;;  %v5105_v41 = vld [vmem:[%s11828_s1 + $0x278] sm:$0xff] }
 0x2fe   : > { %3021 = vmatpush.msra.mxu1 %v5102_v60  ;;  %3198 = vmatpush.msrb.mxu0 %v5103_v19  ;;  %12029 = vst [vmem:[#allocation199_spill] sm:$0xff] %v9962_v46  ;;  %v5106_v60 = vld [vmem:[%s11828_s1 + $0xf0] sm:$0xff]  ;;  %v5108_v19 = vld [vmem:[%s11828_s1 + $0x1e8] sm:$0xff]  ;;  %v5114_v46 = vld [vmem:[%s11828_s1 + $0xe0] sm:$0xff] }
 0x2ff   : > { %3022 = vmatmul.f32.vlgmr.msra.gmra.mxu1 %v4096_v20  ;;  %3185 = vmatmul.f32.vlgmr.msra.gmra.mxu3 %v4173_v13  ;;  %v5107_v13 = vld [vmem:[%s11828_s1 + $0x178] sm:$0xff] }
 0x300   : > { %3257 = vmatpush.msrb.mxu2 %v5104_v32  ;;  %3285 = vmatpush.msrb.mxu3 %v5105_v41  ;;  %v9970_v51 = vpop.f32.mrf.mxu3  ;;  %v5109_v32 = vld [vmem:[%s11828_s1 + $0x270] sm:$0xff]  ;;  %v5110_v41 = vld [vmem:[%s11828_s1 + $0xe8] sm:$0xff] }
 0x301   : > { %12030 = vst [vmem:[#allocation200_spill] sm:$0xff] %v9970_v51  ;;  %3199 = vmatpush.msrb.mxu0 %v5106_v60  ;;  %3227 = vmatpush.msrb.mxu1 %v5107_v13  ;;  %v9978_v20 = vpop.f32.mrf.mxu0  ;;  %v5111_v60 = vld [vmem:[%s11828_s1 + $0x170] sm:$0xff]  ;;  %v4120_v13 = vld [vmem:[%s5712_s7 + $0x7b8] sm:$0xff]  ;;  %v4122_v51 = vld [vmem:[%s5712_s7 + $0x7c8] sm:$0xff] }
 0x302   : > { %12031 = vst [vmem:[#allocation201_spill] sm:$0xff] %v9978_v20  ;;  %3258 = vmatpush.msrb.mxu2 %v5108_v19  ;;  %3286 = vmatpush.msrb.mxu3 %v5109_v32  ;;  %v5112_v19 = vld [vmem:[%s11828_s1 + $0x1e0] sm:$0xff]  ;;  %v5113_v32 = vld [vmem:[%s11828_s1 + $0x268] sm:$0xff] }
 0x303   : > { %3200 = vmatpush.msrb.mxu0 %v5110_v41  ;;  %3228 = vmatpush.msrb.mxu1 %v5111_v60  ;;  %v5115_v60 = vld [vmem:[%s11828_s1 + $0x168] sm:$0xff] }
 0x304   : > { %3259 = vmatpush.msrb.mxu2 %v5112_v19  ;;  %3287 = vmatpush.msrb.mxu3 %v5113_v32  ;;  %v10000_v41 = vpop.f32.mrf.mxu1  ;;  %v4121_v19 = vld [vmem:[%s5712_s7 + $0x7c0] sm:$0xff]  ;;  %v4198_v20 = vld [vmem:[%s5712_s7 + $0xa28] sm:$0xff]  ;;  %v5116_v32 = vld [vmem:[%s11828_s1 + $0x1d8] sm:$0xff] }
 0x305   : > { %12032 = vst [vmem:[#allocation202_spill] sm:$0xff] %v10000_v41  ;;  %3201 = vmatpush.msrb.mxu0 %v5114_v46  ;;  %3229 = vmatpush.msrb.mxu1 %v5115_v60  ;;  %v5117_v41 = vld [vmem:[%s11828_s1 + $0x260] sm:$0xff]  ;;  %v5118_v46 = vld [vmem:[%s11828_s1 + $0xd8] sm:$0xff]  ;;  %v5120_v60 = vld [vmem:[%s11828_s1 + $0x1d0] sm:$0xff] }
 0x306   : > { %2996 = vmatmul.f32.gmra.mxu0 %v4120_v13  ;;  %3054 = vmatmul.f32.gmra.mxu2 %v4122_v51  ;;  %v5119_v51 = vld [vmem:[%s11828_s1 + $0x160] sm:$0xff] }
 0x307   : > { %3260 = vmatpush.msrb.mxu2 %v5116_v32  ;;  %3288 = vmatpush.msrb.mxu3 %v5117_v41  ;;  %v10022_v13 = vpop.f32.mrf.mxu2  ;;  %v5121_v41 = vld [vmem:[%s11828_s1 + $0x258] sm:$0xff] }
 0x308   : > { %3202 = vmatpush.msrb.mxu0 %v5118_v46  ;;  %3230 = vmatpush.msrb.mxu1 %v5119_v51  ;;  %12033 = vst [vmem:[#allocation203_spill] sm:$0xff] %v10022_v13  ;;  %v5122_v46 = vld [vmem:[%s11828_s1 + $0xd0] sm:$0xff]  ;;  %v5124_v51 = vld [vmem:[%s11828_s1 + $0x1c8] sm:$0xff] }
 0x309   : > { %3025 = vmatmul.f32.gmra.mxu1 %v4121_v19  ;;  %3188 = vmatmul.f32.gmra.mxu3 %v4198_v20  ;;  %v5123_v20 = vld [vmem:[%s11828_s1 + $0x158] sm:$0xff]  ;;  %v4223_v13 = vld [vmem:[%s5712_s7 + $0xaf0] sm:$0xff] }
 0x30a   : > { %3261 = vmatpush.msrb.mxu2 %v5120_v60  ;;  %3289 = vmatpush.msrb.mxu3 %v5121_v41  ;;  %v10030_v32 = vpop.f32.mrf.mxu3  ;;  %v5125_v60 = vld [vmem:[%s11828_s1 + $0x250] sm:$0xff]  ;;  %v5126_v41 = vld [vmem:[%s11828_s1 + $0xc8] sm:$0xff] }
 0x30b   : > { %12034 = vst [vmem:[#allocation204_spill] sm:$0xff] %v10030_v32  ;;  %3203 = vmatpush.msrb.mxu0 %v5122_v46  ;;  %3231 = vmatpush.msrb.mxu1 %v5123_v20  ;;  %v10038_v19 = vpop.f32.mrf.mxu0  ;;  %v5127_v46 = vld [vmem:[%s11828_s1 + $0x150] sm:$0xff]  ;;  %v4145_v20 = vld [vmem:[%s5712_s7 + $0x880] sm:$0xff] }
 0x30c   : > { %12035 = vst [vmem:[#allocation205_spill] sm:$0xff] %v10038_v19  ;;  %3262 = vmatpush.msrb.mxu2 %v5124_v51  ;;  %3290 = vmatpush.msrb.mxu3 %v5125_v60  ;;  %v4147_v32 = vld [vmem:[%s5712_s7 + $0x890] sm:$0xff]  ;;  %v5128_v51 = vld [vmem:[%s11828_s1 + $0x1c0] sm:$0xff]  ;;  %v5129_v60 = vld [vmem:[%s11828_s1 + $0x248] sm:$0xff] }
 0x30d   : > { %3204 = vmatpush.msrb.mxu0 %v5126_v41  ;;  %3232 = vmatpush.msrb.mxu1 %v5127_v46  ;;  %v5130_v19 = vld [vmem:[%s11828_s1 + $0xc0] sm:$0xff]  ;;  %v5131_v46 = vld [vmem:[%s11828_s1 + $0x148] sm:$0xff] }
 0x30e   : > { %3263 = vmatpush.msrb.mxu2 %v5128_v51  ;;  %3291 = vmatpush.msrb.mxu3 %v5129_v60  ;;  %v10060_v41 = vpop.f32.mrf.mxu1  ;;  %v4146_v51 = vld [vmem:[%s5712_s7 + $0x888] sm:$0xff]  ;;  %v5132_v60 = vld [vmem:[%s11828_s1 + $0x1b8] sm:$0xff] }
 0x30f   : > { %12036 = vst [vmem:[#allocation206_spill] sm:$0xff] %v10060_v41  ;;  %3205 = vmatpush.msrb.mxu0 %v5130_v19  ;;  %3233 = vmatpush.msrb.mxu1 %v5131_v46  ;;  %v5133_v41 = vld [vmem:[%s11828_s1 + $0x240] sm:$0xff]  ;;  %v5134_v19 = vld [vmem:[%s11828_s1 + $0xb8] sm:$0xff]  ;;  %v5136_v46 = vld [vmem:[%s11828_s1 + $0x1b0] sm:$0xff] }
 0x310   : > { %2999 = vmatmul.f32.gmra.mxu0 %v4145_v20  ;;  %3057 = vmatmul.f32.gmra.mxu2 %v4147_v32  ;;  %v5135_v32 = vld [vmem:[%s11828_s1 + $0x140] sm:$0xff] }
 0x311   : > { %3264 = vmatpush.msrb.mxu2 %v5132_v60  ;;  %3292 = vmatpush.msrb.mxu3 %v5133_v41  ;;  %v10082_v20 = vpop.f32.mrf.mxu2  ;;  %v5137_v41 = vld [vmem:[%s11828_s1 + $0x238] sm:$0xff] }
 0x312   : > { %3206 = vmatpush.msrb.mxu0 %v5134_v19  ;;  %3234 = vmatpush.msrb.mxu1 %v5135_v32  ;;  %12037 = vst [vmem:[#allocation207_spill] sm:$0xff] %v10082_v20  ;;  %v5138_v19 = vld [vmem:[%s11828_s1 + $0xb0] sm:$0xff]  ;;  %v5140_v32 = vld [vmem:[%s11828_s1 + $0x1a8] sm:$0xff]  ;;  %v4248_v20 = vld [vmem:[%s5712_s7 + $0xbb8] sm:$0x1] }
 0x313   : > { %3028 = vmatmul.f32.gmra.mxu1 %v4146_v51  ;;  %3191 = vmatmul.f32.gmra.mxu3 %v4223_v13  ;;  %v5139_v13 = vld [vmem:[%s11828_s1 + $0x138] sm:$0xff] }
 0x314   : > { %3265 = vmatpush.msrb.mxu2 %v5136_v46  ;;  %3293 = vmatpush.msrb.mxu3 %v5137_v41  ;;  %v10090_v60 = vpop.f32.mrf.mxu3  ;;  %v5141_v46 = vld [vmem:[%s11828_s1 + $0x230] sm:$0xff]  ;;  %v5142_v41 = vld [vmem:[%s11828_s1 + $0xa8] sm:$0xff] }
 0x315   : > { %12038 = vst [vmem:[#allocation208_spill] sm:$0xff] %v10090_v60  ;;  %3207 = vmatpush.msrb.mxu0 %v5138_v19  ;;  %3235 = vmatpush.msrb.mxu1 %v5139_v13  ;;  %v10098_v51 = vpop.f32.mrf.mxu0  ;;  %v5143_v19 = vld [vmem:[%s11828_s1 + $0x130] sm:$0xff]  ;;  %v4170_v13 = vld [vmem:[%s5712_s7 + $0x948] sm:$0x1]  ;;  %v4172_v60 = vld [vmem:[%s5712_s7 + $0x958] sm:$0x1] }
 0x316   : > { %12039 = vst [vmem:[#allocation209_spill] sm:$0xff] %v10098_v51  ;;  %3266 = vmatpush.msrb.mxu2 %v5140_v32  ;;  %3294 = vmatpush.msrb.mxu3 %v5141_v46  ;;  %v5144_v32 = vld [vmem:[%s11828_s1 + $0x1a0] sm:$0xff]  ;;  %v5145_v46 = vld [vmem:[%s11828_s1 + $0x228] sm:$0xff] }
 0x317   : > { %3208 = vmatpush.msrb.mxu0 %v5142_v41  ;;  %3236 = vmatpush.msrb.mxu1 %v5143_v19  ;;  %v5146_v51 = vld [vmem:[%s11828_s1 + $0xa0] sm:$0xff]  ;;  %v5147_v19 = vld [vmem:[%s11828_s1 + $0x128] sm:$0xff] }
 0x318   : > { %3267 = vmatpush.msrb.mxu2 %v5144_v32  ;;  %3295 = vmatpush.msrb.mxu3 %v5145_v46  ;;  %v10120_v41 = vpop.f32.mrf.mxu1  ;;  %v4171_v32 = vld [vmem:[%s5712_s7 + $0x950] sm:$0x1]  ;;  %v5148_v46 = vld [vmem:[%s11828_s1 + $0x198] sm:$0xff] }
 0x319   : > { %12040 = vst [vmem:[#allocation210_spill] sm:$0xff] %v10120_v41  ;;  %3209 = vmatpush.msrb.mxu0 %v5146_v51  ;;  %3237 = vmatpush.msrb.mxu1 %v5147_v19  ;;  %v5149_v41 = vld [vmem:[%s11828_s1 + $0x220] sm:$0xff]  ;;  %v5150_v51 = vld [vmem:[%s11828_s1 + $0x98] sm:$0xff]  ;;  %v5152_v19 = vld [vmem:[%s11828_s1 + $0x190] sm:$0xff] }
 0x31a   : > { %3002 = vmatmul.f32.gmra.mxu0 %v4170_v13  ;;  %3060 = vmatmul.f32.gmra.mxu2 %v4172_v60  ;;  %v5151_v60 = vld [vmem:[%s11828_s1 + $0x120] sm:$0xff] }
 0x31b   : > { %3268 = vmatpush.msrb.mxu2 %v5148_v46  ;;  %3296 = vmatpush.msrb.mxu3 %v5149_v41  ;;  %v10142_v13 = vpop.f32.mrf.mxu2  ;;  %v5153_v41 = vld [vmem:[%s11828_s1 + $0x218] sm:$0xff] }
 0x31c   : > { %3210 = vmatpush.msrb.mxu0 %v5150_v51  ;;  %3238 = vmatpush.msrb.mxu1 %v5151_v60  ;;  %12041 = vst [vmem:[#allocation211_spill] sm:$0xff] %v10142_v13  ;;  %v5154_v51 = vld [vmem:[%s11828_s1 + $0x90] sm:$0xff]  ;;  %v5156_v60 = vld [vmem:[%s11828_s1 + $0x188] sm:$0xff]  ;;  %v4177_v13 = vld [vmem:[%s5712_s7 + $0x980] sm:$0xff] }
 0x31d   : > { %3031 = vmatmul.f32.gmra.mxu1 %v4171_v32  ;;  %3194 = vmatmul.f32.gmra.mxu3 %v4248_v20  ;;  %v5155_v20 = vld [vmem:[%s11828_s1 + $0x118] sm:$0xff] }
 0x31e   : > { %3269 = vmatpush.msrb.mxu2 %v5152_v19  ;;  %3297 = vmatpush.msrb.mxu3 %v5153_v41  ;;  %v10150_v46 = vpop.f32.mrf.mxu3  ;;  %v5157_v19 = vld [vmem:[%s11828_s1 + $0x210] sm:$0xff]  ;;  %v5158_v41 = vld [vmem:[%s11828_s1 + $0x88] sm:$0xff] }
 0x31f   : > { %12042 = vst [vmem:[#allocation212_spill] sm:$0xff] %v10150_v46  ;;  %3211 = vmatpush.msrb.mxu0 %v5154_v51  ;;  %3239 = vmatpush.msrb.mxu1 %v5155_v20  ;;  %v10158_v32 = vpop.f32.mrf.mxu0  ;;  %v5159_v51 = vld [vmem:[%s11828_s1 + $0x110] sm:$0xff]  ;;  %v4174_v20 = vld [vmem:[%s5712_s7 + $0x968] sm:$0xff]  ;;  %v4176_v46 = vld [vmem:[%s5712_s7 + $0x978] sm:$0xff] }
 0x320   : > { %12043 = vst [vmem:[#allocation213_spill] sm:$0xff] %v10158_v32  ;;  %3270 = vmatpush.msrb.mxu2 %v5156_v60  ;;  %3298 = vmatpush.msrb.mxu3 %v5157_v19  ;;  %v5160_v60 = vld [vmem:[%s11828_s1 + $0x180] sm:$0xff]  ;;  %v5161_v19 = vld [vmem:[%s11828_s1 + $0x208] sm:$0xff] }
 0x321   : > { %3212 = vmatpush.msrb.mxu0 %v5158_v41  ;;  %3240 = vmatpush.msrb.mxu1 %v5159_v51  ;;  %v5162_v32 = vld [vmem:[%s11828_s1 + $0x80] sm:$0xff]  ;;  %v5163_v51 = vld [vmem:[%s11828_s1 + $0x108] sm:$0xff] }
 0x322   : > { %3271 = vmatpush.msrb.mxu2 %v5160_v60  ;;  %3299 = vmatpush.msrb.mxu3 %v5161_v19  ;;  %v10180_v41 = vpop.f32.mrf.mxu1  ;;  %v4175_v60 = vld [vmem:[%s5712_s7 + $0x970] sm:$0xff]  ;;  %v5164_v19 = vld [vmem:[%s11828_s1 + $0x200] sm:$0xff] }
 0x323   : > { %12044 = vst [vmem:[#allocation214_spill] sm:$0xff] %v10180_v41  ;;  %3213 = vmatpush.msrb.mxu0 %v5162_v32  ;;  %3241 = vmatpush.msrb.mxu1 %v5163_v51  ;;  %v5165_v41 = vld [vmem:[%s11828_s1 + $0x3f8] sm:$0xff]  ;;  %v5166_v32 = vld [vmem:[%s11828_s1 + $0x100] sm:$0xff]  ;;  %v5168_v51 = vld [vmem:[%s11828_s1 + $0x3f0] sm:$0xff] }
 0x324   : > { %3214 = vmatmul.f32.vlgmr.msrb.gmra.mxu0 %v4174_v20  ;;  %3272 = vmatmul.f32.vlgmr.msrb.gmra.mxu2 %v4176_v46  ;;  %v5167_v46 = vld [vmem:[%s11828_s1 + $0x2f8] sm:$0xff] }
 0x325   : > { %3300 = vmatpush.msrb.mxu3 %v5164_v19  ;;  %3372 = vmatpush.msra.mxu2 %v5165_v41  ;;  %v10202_v20 = vpop.f32.mrf.mxu2  ;;  %v5169_v41 = vld [vmem:[%s11828_s1 + $0x478] sm:$0xff] }
 0x326   : > { %3242 = vmatpush.msrb.mxu1 %v5166_v32  ;;  %3314 = vmatpush.msra.mxu0 %v5167_v46  ;;  %12045 = vst [vmem:[#allocation215_spill] sm:$0xff] %v10202_v20  ;;  %v5170_v32 = vld [vmem:[%s11828_s1 + $0x2f0] sm:$0xff]  ;;  %v5172_v46 = vld [vmem:[%s11828_s1 + $0x3e8] sm:$0xff]  ;;  %v5178_v20 = vld [vmem:[%s11828_s1 + $0x2e0] sm:$0xff] }
 0x327   : > { %3243 = vmatmul.f32.vlgmr.msrb.gmra.mxu1 %v4175_v60  ;;  %3301 = vmatmul.f32.vlgmr.msrb.gmra.mxu3 %v4177_v13  ;;  %v5171_v13 = vld [vmem:[%s11828_s1 + $0x378] sm:$0xff] }
 0x328   : > { %3373 = vmatpush.msra.mxu2 %v5168_v51  ;;  %3401 = vmatpush.msra.mxu3 %v5169_v41  ;;  %v10210_v19 = vpop.f32.mrf.mxu3  ;;  %v5173_v51 = vld [vmem:[%s11828_s1 + $0x470] sm:$0xff]  ;;  %v5174_v41 = vld [vmem:[%s11828_s1 + $0x2e8] sm:$0xff] }
 0x329   : > { %12046 = vst [vmem:[#allocation216_spill] sm:$0xff] %v10210_v19  ;;  %3315 = vmatpush.msra.mxu0 %v5170_v32  ;;  %3343 = vmatpush.msra.mxu1 %v5171_v13  ;;  %v10218_v60 = vpop.f32.mrf.mxu0  ;;  %v5175_v32 = vld [vmem:[%s11828_s1 + $0x370] sm:$0xff]  ;;  %v4201_v19 = vld [vmem:[%s5712_s7 + $0xa40] sm:$0xff] }
 0x32a   : > { %12047 = vst [vmem:[#allocation217_spill] sm:$0xff] %v10218_v60  ;;  %3374 = vmatpush.msra.mxu2 %v5172_v46  ;;  %3402 = vmatpush.msra.mxu3 %v5173_v51  ;;  %v4199_v13 = vld [vmem:[%s5712_s7 + $0xa30] sm:$0xff]  ;;  %v5176_v46 = vld [vmem:[%s11828_s1 + $0x3e0] sm:$0xff]  ;;  %v5177_v51 = vld [vmem:[%s11828_s1 + $0x468] sm:$0xff] }
 0x32b   : > { %3316 = vmatpush.msra.mxu0 %v5174_v41  ;;  %3344 = vmatpush.msra.mxu1 %v5175_v32  ;;  %v5179_v32 = vld [vmem:[%s11828_s1 + $0x368] sm:$0xff] }
 0x32c   : > { %3375 = vmatpush.msra.mxu2 %v5176_v46  ;;  %3403 = vmatpush.msra.mxu3 %v5177_v51  ;;  %v10240_v41 = vpop.f32.mrf.mxu1  ;;  %v4200_v46 = vld [vmem:[%s5712_s7 + $0xa38] sm:$0xff]  ;;  %v4202_v60 = vld [vmem:[%s5712_s7 + $0xa48] sm:$0xff] }
 0x32d   : > { %12048 = vst [vmem:[#allocation218_spill] sm:$0xff] %v10240_v41  ;;  %3317 = vmatpush.msra.mxu0 %v5178_v20  ;;  %3345 = vmatpush.msra.mxu1 %v5179_v32  ;;  %v5180_v51 = vld [vmem:[%s11828_s1 + $0x3d8] sm:$0xff]  ;;  %v5181_v41 = vld [vmem:[%s11828_s1 + $0x460] sm:$0xff]  ;;  %v5184_v32 = vld [vmem:[%s11828_s1 + $0x3d0] sm:$0xff] }
 0x32e   : > { %3217 = vmatmul.f32.gmra.mxu0 %v4199_v13  ;;  %3275 = vmatmul.f32.gmra.mxu2 %v4201_v19  ;;  %v5182_v20 = vld [vmem:[%s11828_s1 + $0x2d8] sm:$0xff]  ;;  %v5183_v19 = vld [vmem:[%s11828_s1 + $0x360] sm:$0xff] }
 0x32f   : > { %3376 = vmatpush.msra.mxu2 %v5180_v51  ;;  %3404 = vmatpush.msra.mxu3 %v5181_v41  ;;  %v10262_v13 = vpop.f32.mrf.mxu2  ;;  %v5185_v41 = vld [vmem:[%s11828_s1 + $0x458] sm:$0xff] }
 0x330   : > { %3318 = vmatpush.msra.mxu0 %v5182_v20  ;;  %3346 = vmatpush.msra.mxu1 %v5183_v19  ;;  %12049 = vst [vmem:[#allocation219_spill] sm:$0xff] %v10262_v13  ;;  %v5186_v20 = vld [vmem:[%s11828_s1 + $0x2d0] sm:$0xff]  ;;  %v5188_v19 = vld [vmem:[%s11828_s1 + $0x3c8] sm:$0xff] }
 0x331   : > { %3246 = vmatmul.f32.gmra.mxu1 %v4200_v46  ;;  %3304 = vmatmul.f32.gmra.mxu3 %v4202_v60  ;;  %v5187_v60 = vld [vmem:[%s11828_s1 + $0x358] sm:$0xff]  ;;  %v4227_v13 = vld [vmem:[%s5712_s7 + $0xb10] sm:$0xff] }
 0x332   : > { %3377 = vmatpush.msra.mxu2 %v5184_v32  ;;  %3405 = vmatpush.msra.mxu3 %v5185_v41  ;;  %v10270_v51 = vpop.f32.mrf.mxu3  ;;  %v5189_v32 = vld [vmem:[%s11828_s1 + $0x450] sm:$0xff]  ;;  %v5190_v41 = vld [vmem:[%s11828_s1 + $0x2c8] sm:$0xff] }
 0x333   : > { %12050 = vst [vmem:[#allocation220_spill] sm:$0xff] %v10270_v51  ;;  %3319 = vmatpush.msra.mxu0 %v5186_v20  ;;  %3347 = vmatpush.msra.mxu1 %v5187_v60  ;;  %v10278_v46 = vpop.f32.mrf.mxu0  ;;  %v5191_v20 = vld [vmem:[%s11828_s1 + $0x350] sm:$0xff]  ;;  %v4224_v60 = vld [vmem:[%s5712_s7 + $0xaf8] sm:$0xff]  ;;  %v4226_v51 = vld [vmem:[%s5712_s7 + $0xb08] sm:$0xff] }
 0x334   : > { %12051 = vst [vmem:[#allocation221_spill] sm:$0xff] %v10278_v46  ;;  %3378 = vmatpush.msra.mxu2 %v5188_v19  ;;  %3406 = vmatpush.msra.mxu3 %v5189_v32  ;;  %v5192_v19 = vld [vmem:[%s11828_s1 + $0x3c0] sm:$0xff]  ;;  %v5193_v32 = vld [vmem:[%s11828_s1 + $0x448] sm:$0xff] }
 0x335   : > { %3320 = vmatpush.msra.mxu0 %v5190_v41  ;;  %3348 = vmatpush.msra.mxu1 %v5191_v20  ;;  %v5194_v46 = vld [vmem:[%s11828_s1 + $0x2c0] sm:$0xff]  ;;  %v5195_v20 = vld [vmem:[%s11828_s1 + $0x348] sm:$0xff] }
 0x336   : > { %3379 = vmatpush.msra.mxu2 %v5192_v19  ;;  %3407 = vmatpush.msra.mxu3 %v5193_v32  ;;  %v10300_v41 = vpop.f32.mrf.mxu1  ;;  %v4225_v19 = vld [vmem:[%s5712_s7 + $0xb00] sm:$0xff]  ;;  %v5196_v32 = vld [vmem:[%s11828_s1 + $0x3b8] sm:$0xff] }
 0x337   : > { %12052 = vst [vmem:[#allocation222_spill] sm:$0xff] %v10300_v41  ;;  %3321 = vmatpush.msra.mxu0 %v5194_v46  ;;  %3349 = vmatpush.msra.mxu1 %v5195_v20  ;;  %v5197_v41 = vld [vmem:[%s11828_s1 + $0x440] sm:$0xff]  ;;  %v5198_v46 = vld [vmem:[%s11828_s1 + $0x2b8] sm:$0xff]  ;;  %v5200_v20 = vld [vmem:[%s11828_s1 + $0x3b0] sm:$0xff] }
 0x338   : > { %3220 = vmatmul.f32.gmra.mxu0 %v4224_v60  ;;  %3278 = vmatmul.f32.gmra.mxu2 %v4226_v51  ;;  %v5199_v51 = vld [vmem:[%s11828_s1 + $0x340] sm:$0xff] }
 0x339   : > { %3380 = vmatpush.msra.mxu2 %v5196_v32  ;;  %3408 = vmatpush.msra.mxu3 %v5197_v41  ;;  %v10322_v60 = vpop.f32.mrf.mxu2  ;;  %v5201_v41 = vld [vmem:[%s11828_s1 + $0x438] sm:$0xff] }
 0x33a   : > { %3322 = vmatpush.msra.mxu0 %v5198_v46  ;;  %3350 = vmatpush.msra.mxu1 %v5199_v51  ;;  %12053 = vst [vmem:[#allocation223_spill] sm:$0xff] %v10322_v60  ;;  %v5202_v46 = vld [vmem:[%s11828_s1 + $0x2b0] sm:$0xff]  ;;  %v5204_v51 = vld [vmem:[%s11828_s1 + $0x3a8] sm:$0xff]  ;;  %v4252_v60 = vld [vmem:[%s5712_s7 + $0xbd8] sm:$0x1] }
 0x33b   : > { %3249 = vmatmul.f32.gmra.mxu1 %v4225_v19  ;;  %3307 = vmatmul.f32.gmra.mxu3 %v4227_v13  ;;  %v5203_v13 = vld [vmem:[%s11828_s1 + $0x338] sm:$0xff] }
 0x33c   : > { %3381 = vmatpush.msra.mxu2 %v5200_v20  ;;  %3409 = vmatpush.msra.mxu3 %v5201_v41  ;;  %v10330_v32 = vpop.f32.mrf.mxu3  ;;  %v5205_v20 = vld [vmem:[%s11828_s1 + $0x430] sm:$0xff]  ;;  %v5206_v41 = vld [vmem:[%s11828_s1 + $0x2a8] sm:$0xff] }
 0x33d   : > { %12054 = vst [vmem:[#allocation224_spill] sm:$0xff] %v10330_v32  ;;  %3323 = vmatpush.msra.mxu0 %v5202_v46  ;;  %3351 = vmatpush.msra.mxu1 %v5203_v13  ;;  %v10338_v19 = vpop.f32.mrf.mxu0  ;;  %v5207_v46 = vld [vmem:[%s11828_s1 + $0x330] sm:$0xff]  ;;  %v4249_v13 = vld [vmem:[%s5712_s7 + $0xbc0] sm:$0x1] }
 0x33e   : > { %12055 = vst [vmem:[#allocation225_spill] sm:$0xff] %v10338_v19  ;;  %3382 = vmatpush.msra.mxu2 %v5204_v51  ;;  %3410 = vmatpush.msra.mxu3 %v5205_v20  ;;  %v4251_v32 = vld [vmem:[%s5712_s7 + $0xbd0] sm:$0x1]  ;;  %v5208_v51 = vld [vmem:[%s11828_s1 + $0x3a0] sm:$0xff]  ;;  %v5209_v20 = vld [vmem:[%s11828_s1 + $0x428] sm:$0xff] }
 0x33f   : > { %3324 = vmatpush.msra.mxu0 %v5206_v41  ;;  %3352 = vmatpush.msra.mxu1 %v5207_v46  ;;  %v5210_v19 = vld [vmem:[%s11828_s1 + $0x2a0] sm:$0xff]  ;;  %v5211_v46 = vld [vmem:[%s11828_s1 + $0x328] sm:$0xff] }
 0x340   : > { %3383 = vmatpush.msra.mxu2 %v5208_v51  ;;  %3411 = vmatpush.msra.mxu3 %v5209_v20  ;;  %v10360_v41 = vpop.f32.mrf.mxu1  ;;  %v4250_v51 = vld [vmem:[%s5712_s7 + $0xbc8] sm:$0x1]  ;;  %v5212_v20 = vld [vmem:[%s11828_s1 + $0x398] sm:$0xff] }
 0x341   : > { %12056 = vst [vmem:[#allocation226_spill] sm:$0xff] %v10360_v41  ;;  %3325 = vmatpush.msra.mxu0 %v5210_v19  ;;  %3353 = vmatpush.msra.mxu1 %v5211_v46  ;;  %v5213_v41 = vld [vmem:[%s11828_s1 + $0x420] sm:$0xff]  ;;  %v5214_v19 = vld [vmem:[%s11828_s1 + $0x298] sm:$0xff]  ;;  %v5216_v46 = vld [vmem:[%s11828_s1 + $0x390] sm:$0xff] }
 0x342   : > { %3223 = vmatmul.f32.gmra.mxu0 %v4249_v13  ;;  %3281 = vmatmul.f32.gmra.mxu2 %v4251_v32  ;;  %v5215_v32 = vld [vmem:[%s11828_s1 + $0x320] sm:$0xff] }
 0x343   : > { %3384 = vmatpush.msra.mxu2 %v5212_v20  ;;  %3412 = vmatpush.msra.mxu3 %v5213_v41  ;;  %v10382_v13 = vpop.f32.mrf.mxu2  ;;  %v5217_v41 = vld [vmem:[%s11828_s1 + $0x418] sm:$0xff] }
 0x344   : > { %3326 = vmatpush.msra.mxu0 %v5214_v19  ;;  %3354 = vmatpush.msra.mxu1 %v5215_v32  ;;  %12057 = vst [vmem:[#allocation227_spill] sm:$0xff] %v10382_v13  ;;  %v5218_v19 = vld [vmem:[%s11828_s1 + $0x290] sm:$0xff]  ;;  %v5220_v32 = vld [vmem:[%s11828_s1 + $0x388] sm:$0xff]  ;;  %v4181_v13 = vld [vmem:[%s5712_s7 + $0x9a0] sm:$0xff] }
 0x345   : > { %3252 = vmatmul.f32.gmra.mxu1 %v4250_v51  ;;  %3310 = vmatmul.f32.gmra.mxu3 %v4252_v60  ;;  %v5219_v60 = vld [vmem:[%s11828_s1 + $0x318] sm:$0xff] }
 0x346   : > { %3385 = vmatpush.msra.mxu2 %v5216_v46  ;;  %3413 = vmatpush.msra.mxu3 %v5217_v41  ;;  %v10390_v20 = vpop.f32.mrf.mxu3  ;;  %v5221_v46 = vld [vmem:[%s11828_s1 + $0x410] sm:$0xff]  ;;  %v5222_v41 = vld [vmem:[%s11828_s1 + $0x288] sm:$0xff] }
 0x347   : > { %12058 = vst [vmem:[#allocation228_spill] sm:$0xff] %v10390_v20  ;;  %3327 = vmatpush.msra.mxu0 %v5218_v19  ;;  %3355 = vmatpush.msra.mxu1 %v5219_v60  ;;  %v10398_v51 = vpop.f32.mrf.mxu0  ;;  %v5223_v19 = vld [vmem:[%s11828_s1 + $0x310] sm:$0xff]  ;;  %v4178_v60 = vld [vmem:[%s5712_s7 + $0x988] sm:$0xff]  ;;  %v4180_v20 = vld [vmem:[%s5712_s7 + $0x998] sm:$0xff] }
 0x348   : > { %12059 = vst [vmem:[#allocation229_spill] sm:$0xff] %v10398_v51  ;;  %3386 = vmatpush.msra.mxu2 %v5220_v32  ;;  %3414 = vmatpush.msra.mxu3 %v5221_v46  ;;  %v5224_v32 = vld [vmem:[%s11828_s1 + $0x380] sm:$0xff]  ;;  %v5225_v46 = vld [vmem:[%s11828_s1 + $0x408] sm:$0xff] }
 0x349   : > { %3328 = vmatpush.msra.mxu0 %v5222_v41  ;;  %3356 = vmatpush.msra.mxu1 %v5223_v19  ;;  %v5226_v51 = vld [vmem:[%s11828_s1 + $0x280] sm:$0xff]  ;;  %v5227_v19 = vld [vmem:[%s11828_s1 + $0x308] sm:$0xff] }
 0x34a   : > { %3387 = vmatpush.msra.mxu2 %v5224_v32  ;;  %3415 = vmatpush.msra.mxu3 %v5225_v46  ;;  %v10420_v41 = vpop.f32.mrf.mxu1  ;;  %v4179_v32 = vld [vmem:[%s5712_s7 + $0x990] sm:$0xff]  ;;  %v5228_v46 = vld [vmem:[%s11828_s1 + $0x400] sm:$0xff] }
 0x34b   : > { %12060 = vst [vmem:[#allocation230_spill] sm:$0xff] %v10420_v41  ;;  %3329 = vmatpush.msra.mxu0 %v5226_v51  ;;  %3357 = vmatpush.msra.mxu1 %v5227_v19  ;;  %v5229_v41 = vld [vmem:[%s11828_s1 + $0x5f8] sm:$0xff]  ;;  %v5230_v51 = vld [vmem:[%s11828_s1 + $0x300] sm:$0xff]  ;;  %v5232_v19 = vld [vmem:[%s11828_s1 + $0x5f0] sm:$0xff] }
 0x34c   : > { %3330 = vmatmul.f32.vlgmr.msra.gmra.mxu0 %v4178_v60  ;;  %3388 = vmatmul.f32.vlgmr.msra.gmra.mxu2 %v4180_v20  ;;  %v5231_v20 = vld [vmem:[%s11828_s1 + $0x4f8] sm:$0xff] }
 0x34d   : > { %3416 = vmatpush.msra.mxu3 %v5228_v46  ;;  %3488 = vmatpush.msrb.mxu2 %v5229_v41  ;;  %v10442_v60 = vpop.f32.mrf.mxu2  ;;  %v5233_v41 = vld [vmem:[%s11828_s1 + $0x678] sm:$0xff] }
 0x34e   : > { %3358 = vmatpush.msra.mxu1 %v5230_v51  ;;  %3430 = vmatpush.msrb.mxu0 %v5231_v20  ;;  %12061 = vst [vmem:[#allocation231_spill] sm:$0xff] %v10442_v60  ;;  %v5234_v51 = vld [vmem:[%s11828_s1 + $0x4f0] sm:$0xff]  ;;  %v5236_v20 = vld [vmem:[%s11828_s1 + $0x5e8] sm:$0xff]  ;;  %v5242_v60 = vld [vmem:[%s11828_s1 + $0x4e0] sm:$0xff] }
 0x34f   : > { %3359 = vmatmul.f32.vlgmr.msra.gmra.mxu1 %v4179_v32  ;;  %3417 = vmatmul.f32.vlgmr.msra.gmra.mxu3 %v4181_v13  ;;  %v5235_v13 = vld [vmem:[%s11828_s1 + $0x578] sm:$0xff] }
 0x350   : > { %3489 = vmatpush.msrb.mxu2 %v5232_v19  ;;  %3517 = vmatpush.msrb.mxu3 %v5233_v41  ;;  %v10450_v46 = vpop.f32.mrf.mxu3  ;;  %v5237_v19 = vld [vmem:[%s11828_s1 + $0x670] sm:$0xff]  ;;  %v5238_v41 = vld [vmem:[%s11828_s1 + $0x4e8] sm:$0xff] }
 0x351   : > { %12062 = vst [vmem:[#allocation232_spill] sm:$0xff] %v10450_v46  ;;  %3431 = vmatpush.msrb.mxu0 %v5234_v51  ;;  %3459 = vmatpush.msrb.mxu1 %v5235_v13  ;;  %v10458_v32 = vpop.f32.mrf.mxu0  ;;  %v5239_v51 = vld [vmem:[%s11828_s1 + $0x570] sm:$0xff]  ;;  %v4205_v46 = vld [vmem:[%s5712_s7 + $0xa60] sm:$0xff] }
 0x352   : > { %12063 = vst [vmem:[#allocation233_spill] sm:$0xff] %v10458_v32  ;;  %3490 = vmatpush.msrb.mxu2 %v5236_v20  ;;  %3518 = vmatpush.msrb.mxu3 %v5237_v19  ;;  %v4203_v13 = vld [vmem:[%s5712_s7 + $0xa50] sm:$0xff]  ;;  %v5240_v20 = vld [vmem:[%s11828_s1 + $0x5e0] sm:$0xff]  ;;  %v5241_v19 = vld [vmem:[%s11828_s1 + $0x668] sm:$0xff] }
 0x353   : > { %3432 = vmatpush.msrb.mxu0 %v5238_v41  ;;  %3460 = vmatpush.msrb.mxu1 %v5239_v51  ;;  %v5243_v51 = vld [vmem:[%s11828_s1 + $0x568] sm:$0xff] }
 0x354   : > { %3491 = vmatpush.msrb.mxu2 %v5240_v20  ;;  %3519 = vmatpush.msrb.mxu3 %v5241_v19  ;;  %v10480_v41 = vpop.f32.mrf.mxu1  ;;  %v4204_v20 = vld [vmem:[%s5712_s7 + $0xa58] sm:$0xff]  ;;  %v4206_v32 = vld [vmem:[%s5712_s7 + $0xa68] sm:$0xff] }
 0x355   : > { %12064 = vst [vmem:[#allocation234_spill] sm:$0xff] %v10480_v41  ;;  %3433 = vmatpush.msrb.mxu0 %v5242_v60  ;;  %3461 = vmatpush.msrb.mxu1 %v5243_v51  ;;  %v5244_v19 = vld [vmem:[%s11828_s1 + $0x5d8] sm:$0xff]  ;;  %v5245_v41 = vld [vmem:[%s11828_s1 + $0x660] sm:$0xff]  ;;  %v5248_v51 = vld [vmem:[%s11828_s1 + $0x5d0] sm:$0xff] }
 0x356   : > { %3333 = vmatmul.f32.gmra.mxu0 %v4203_v13  ;;  %3391 = vmatmul.f32.gmra.mxu2 %v4205_v46  ;;  %v5246_v60 = vld [vmem:[%s11828_s1 + $0x4d8] sm:$0xff]  ;;  %v5247_v46 = vld [vmem:[%s11828_s1 + $0x560] sm:$0xff] }
 0x357   : > { %3492 = vmatpush.msrb.mxu2 %v5244_v19  ;;  %3520 = vmatpush.msrb.mxu3 %v5245_v41  ;;  %v10502_v13 = vpop.f32.mrf.mxu2  ;;  %v5249_v41 = vld [vmem:[%s11828_s1 + $0x658] sm:$0xff] }
 0x358   : > { %3434 = vmatpush.msrb.mxu0 %v5246_v60  ;;  %3462 = vmatpush.msrb.mxu1 %v5247_v46  ;;  %12065 = vst [vmem:[#allocation235_spill] sm:$0xff] %v10502_v13  ;;  %v5250_v60 = vld [vmem:[%s11828_s1 + $0x4d0] sm:$0xff]  ;;  %v5252_v46 = vld [vmem:[%s11828_s1 + $0x5c8] sm:$0xff] }
 0x359   : > { %3362 = vmatmul.f32.gmra.mxu1 %v4204_v20  ;;  %3420 = vmatmul.f32.gmra.mxu3 %v4206_v32  ;;  %v5251_v32 = vld [vmem:[%s11828_s1 + $0x558] sm:$0xff]  ;;  %v4231_v13 = vld [vmem:[%s5712_s7 + $0xb30] sm:$0xff] }
 0x35a   : > { %3493 = vmatpush.msrb.mxu2 %v5248_v51  ;;  %3521 = vmatpush.msrb.mxu3 %v5249_v41  ;;  %v10510_v19 = vpop.f32.mrf.mxu3  ;;  %v5253_v51 = vld [vmem:[%s11828_s1 + $0x650] sm:$0xff]  ;;  %v5254_v41 = vld [vmem:[%s11828_s1 + $0x4c8] sm:$0xff] }
 0x35b   : > { %12066 = vst [vmem:[#allocation236_spill] sm:$0xff] %v10510_v19  ;;  %3435 = vmatpush.msrb.mxu0 %v5250_v60  ;;  %3463 = vmatpush.msrb.mxu1 %v5251_v32  ;;  %v10518_v20 = vpop.f32.mrf.mxu0  ;;  %v5255_v60 = vld [vmem:[%s11828_s1 + $0x550] sm:$0xff]  ;;  %v4228_v32 = vld [vmem:[%s5712_s7 + $0xb18] sm:$0xff]  ;;  %v4230_v19 = vld [vmem:[%s5712_s7 + $0xb28] sm:$0xff] }
 0x35c   : > { %12067 = vst [vmem:[#allocation237_spill] sm:$0xff] %v10518_v20  ;;  %3494 = vmatpush.msrb.mxu2 %v5252_v46  ;;  %3522 = vmatpush.msrb.mxu3 %v5253_v51  ;;  %v5256_v46 = vld [vmem:[%s11828_s1 + $0x5c0] sm:$0xff]  ;;  %v5257_v51 = vld [vmem:[%s11828_s1 + $0x648] sm:$0xff] }
 0x35d   : > { %3436 = vmatpush.msrb.mxu0 %v5254_v41  ;;  %3464 = vmatpush.msrb.mxu1 %v5255_v60  ;;  %v5258_v20 = vld [vmem:[%s11828_s1 + $0x4c0] sm:$0xff]  ;;  %v5259_v60 = vld [vmem:[%s11828_s1 + $0x548] sm:$0xff] }
 0x35e   : > { %3495 = vmatpush.msrb.mxu2 %v5256_v46  ;;  %3523 = vmatpush.msrb.mxu3 %v5257_v51  ;;  %v10540_v41 = vpop.f32.mrf.mxu1  ;;  %v4229_v46 = vld [vmem:[%s5712_s7 + $0xb20] sm:$0xff]  ;;  %v5260_v51 = vld [vmem:[%s11828_s1 + $0x5b8] sm:$0xff] }
 0x35f   : > { %12068 = vst [vmem:[#allocation238_spill] sm:$0xff] %v10540_v41  ;;  %3437 = vmatpush.msrb.mxu0 %v5258_v20  ;;  %3465 = vmatpush.msrb.mxu1 %v5259_v60  ;;  %v5261_v41 = vld [vmem:[%s11828_s1 + $0x640] sm:$0xff]  ;;  %v5262_v20 = vld [vmem:[%s11828_s1 + $0x4b8] sm:$0xff]  ;;  %v5264_v60 = vld [vmem:[%s11828_s1 + $0x5b0] sm:$0xff] }
 0x360   : > { %3336 = vmatmul.f32.gmra.mxu0 %v4228_v32  ;;  %3394 = vmatmul.f32.gmra.mxu2 %v4230_v19  ;;  %v5263_v19 = vld [vmem:[%s11828_s1 + $0x540] sm:$0xff] }
 0x361   : > { %3496 = vmatpush.msrb.mxu2 %v5260_v51  ;;  %3524 = vmatpush.msrb.mxu3 %v5261_v41  ;;  %v10562_v32 = vpop.f32.mrf.mxu2  ;;  %v5265_v41 = vld [vmem:[%s11828_s1 + $0x638] sm:$0xff] }
 0x362   : > { %3438 = vmatpush.msrb.mxu0 %v5262_v20  ;;  %3466 = vmatpush.msrb.mxu1 %v5263_v19  ;;  %12069 = vst [vmem:[#allocation239_spill] sm:$0xff] %v10562_v32  ;;  %v5266_v20 = vld [vmem:[%s11828_s1 + $0x4b0] sm:$0xff]  ;;  %v5268_v19 = vld [vmem:[%s11828_s1 + $0x5a8] sm:$0xff]  ;;  %v4256_v32 = vld [vmem:[%s5712_s7 + $0xbf8] sm:$0x1] }
 0x363   : > { %3365 = vmatmul.f32.gmra.mxu1 %v4229_v46  ;;  %3423 = vmatmul.f32.gmra.mxu3 %v4231_v13  ;;  %v5267_v13 = vld [vmem:[%s11828_s1 + $0x538] sm:$0xff] }
 0x364   : > { %3497 = vmatpush.msrb.mxu2 %v5264_v60  ;;  %3525 = vmatpush.msrb.mxu3 %v5265_v41  ;;  %v10570_v51 = vpop.f32.mrf.mxu3  ;;  %v5269_v60 = vld [vmem:[%s11828_s1 + $0x630] sm:$0xff]  ;;  %v5270_v41 = vld [vmem:[%s11828_s1 + $0x4a8] sm:$0xff] }
 0x365   : > { %12070 = vst [vmem:[#allocation240_spill] sm:$0xff] %v10570_v51  ;;  %3439 = vmatpush.msrb.mxu0 %v5266_v20  ;;  %3467 = vmatpush.msrb.mxu1 %v5267_v13  ;;  %v10578_v46 = vpop.f32.mrf.mxu0  ;;  %v5271_v20 = vld [vmem:[%s11828_s1 + $0x530] sm:$0xff]  ;;  %v4253_v13 = vld [vmem:[%s5712_s7 + $0xbe0] sm:$0x1] }
 0x366   : > { %12071 = vst [vmem:[#allocation241_spill] sm:$0xff] %v10578_v46  ;;  %3498 = vmatpush.msrb.mxu2 %v5268_v19  ;;  %3526 = vmatpush.msrb.mxu3 %v5269_v60  ;;  %v4255_v51 = vld [vmem:[%s5712_s7 + $0xbf0] sm:$0x1]  ;;  %v5272_v19 = vld [vmem:[%s11828_s1 + $0x5a0] sm:$0xff]  ;;  %v5273_v60 = vld [vmem:[%s11828_s1 + $0x628] sm:$0xff] }
 0x367   : > { %3440 = vmatpush.msrb.mxu0 %v5270_v41  ;;  %3468 = vmatpush.msrb.mxu1 %v5271_v20  ;;  %v5274_v46 = vld [vmem:[%s11828_s1 + $0x4a0] sm:$0xff]  ;;  %v5275_v20 = vld [vmem:[%s11828_s1 + $0x528] sm:$0xff] }
 0x368   : > { %3499 = vmatpush.msrb.mxu2 %v5272_v19  ;;  %3527 = vmatpush.msrb.mxu3 %v5273_v60  ;;  %v10600_v41 = vpop.f32.mrf.mxu1  ;;  %v4254_v19 = vld [vmem:[%s5712_s7 + $0xbe8] sm:$0x1]  ;;  %v5276_v60 = vld [vmem:[%s11828_s1 + $0x598] sm:$0xff] }
 0x369   : > { %12072 = vst [vmem:[#allocation242_spill] sm:$0xff] %v10600_v41  ;;  %3441 = vmatpush.msrb.mxu0 %v5274_v46  ;;  %3469 = vmatpush.msrb.mxu1 %v5275_v20  ;;  %v5277_v41 = vld [vmem:[%s11828_s1 + $0x620] sm:$0xff]  ;;  %v5278_v46 = vld [vmem:[%s11828_s1 + $0x498] sm:$0xff]  ;;  %v5280_v20 = vld [vmem:[%s11828_s1 + $0x590] sm:$0xff] }
 0x36a   : > { %3339 = vmatmul.f32.gmra.mxu0 %v4253_v13  ;;  %3397 = vmatmul.f32.gmra.mxu2 %v4255_v51  ;;  %v5279_v51 = vld [vmem:[%s11828_s1 + $0x520] sm:$0xff] }
 0x36b   : > { %3500 = vmatpush.msrb.mxu2 %v5276_v60  ;;  %3528 = vmatpush.msrb.mxu3 %v5277_v41  ;;  %v10622_v13 = vpop.f32.mrf.mxu2  ;;  %v5281_v41 = vld [vmem:[%s11828_s1 + $0x618] sm:$0xff] }
 0x36c   : > { %3442 = vmatpush.msrb.mxu0 %v5278_v46  ;;  %3470 = vmatpush.msrb.mxu1 %v5279_v51  ;;  %12073 = vst [vmem:[#allocation243_spill] sm:$0xff] %v10622_v13  ;;  %v5282_v46 = vld [vmem:[%s11828_s1 + $0x490] sm:$0xff]  ;;  %v5284_v51 = vld [vmem:[%s11828_s1 + $0x588] sm:$0xff]  ;;  %v4185_v13 = vld [vmem:[%s5712_s7 + $0x9c0] sm:$0xff] }
 0x36d   : > { %3368 = vmatmul.f32.gmra.mxu1 %v4254_v19  ;;  %3426 = vmatmul.f32.gmra.mxu3 %v4256_v32  ;;  %v5283_v32 = vld [vmem:[%s11828_s1 + $0x518] sm:$0xff] }
 0x36e   : > { %3501 = vmatpush.msrb.mxu2 %v5280_v20  ;;  %3529 = vmatpush.msrb.mxu3 %v5281_v41  ;;  %v10630_v60 = vpop.f32.mrf.mxu3  ;;  %v5285_v20 = vld [vmem:[%s11828_s1 + $0x610] sm:$0xff]  ;;  %v5286_v41 = vld [vmem:[%s11828_s1 + $0x488] sm:$0xff] }
 0x36f   : > { %12074 = vst [vmem:[#allocation244_spill] sm:$0xff] %v10630_v60  ;;  %3443 = vmatpush.msrb.mxu0 %v5282_v46  ;;  %3471 = vmatpush.msrb.mxu1 %v5283_v32  ;;  %v10638_v19 = vpop.f32.mrf.mxu0  ;;  %v5287_v46 = vld [vmem:[%s11828_s1 + $0x510] sm:$0xff]  ;;  %v4182_v32 = vld [vmem:[%s5712_s7 + $0x9a8] sm:$0xff]  ;;  %v4184_v60 = vld [vmem:[%s5712_s7 + $0x9b8] sm:$0xff] }
 0x370   : > { %12075 = vst [vmem:[#allocation245_spill] sm:$0xff] %v10638_v19  ;;  %3502 = vmatpush.msrb.mxu2 %v5284_v51  ;;  %3530 = vmatpush.msrb.mxu3 %v5285_v20  ;;  %v5288_v51 = vld [vmem:[%s11828_s1 + $0x580] sm:$0xff]  ;;  %v5289_v20 = vld [vmem:[%s11828_s1 + $0x608] sm:$0xff] }
 0x371   : > { %3444 = vmatpush.msrb.mxu0 %v5286_v41  ;;  %3472 = vmatpush.msrb.mxu1 %v5287_v46  ;;  %v5290_v19 = vld [vmem:[%s11828_s1 + $0x480] sm:$0xff]  ;;  %v5291_v46 = vld [vmem:[%s11828_s1 + $0x508] sm:$0xff] }
 0x372   : > { %3503 = vmatpush.msrb.mxu2 %v5288_v51  ;;  %3531 = vmatpush.msrb.mxu3 %v5289_v20  ;;  %v10660_v41 = vpop.f32.mrf.mxu1  ;;  %v4183_v51 = vld [vmem:[%s5712_s7 + $0x9b0] sm:$0xff]  ;;  %v5292_v20 = vld [vmem:[%s11828_s1 + $0x600] sm:$0xff] }
 0x373   : > { %12076 = vst [vmem:[#allocation246_spill] sm:$0xff] %v10660_v41  ;;  %3445 = vmatpush.msrb.mxu0 %v5290_v19  ;;  %3473 = vmatpush.msrb.mxu1 %v5291_v46  ;;  %v5293_v41 = vld [vmem:[%s11828_s1 + $0x7f8] sm:$0xff]  ;;  %v5294_v19 = vld [vmem:[%s11828_s1 + $0x500] sm:$0xff]  ;;  %v5296_v46 = vld [vmem:[%s11828_s1 + $0x7f0] sm:$0xff] }
 0x374   : > { %3446 = vmatmul.f32.vlgmr.msrb.gmra.mxu0 %v4182_v32  ;;  %3504 = vmatmul.f32.vlgmr.msrb.gmra.mxu2 %v4184_v60  ;;  %v5295_v60 = vld [vmem:[%s11828_s1 + $0x6f8] sm:$0xff] }
 0x375   : > { %3532 = vmatpush.msrb.mxu3 %v5292_v20  ;;  %3604 = vmatpush.msra.mxu2 %v5293_v41  ;;  %v10682_v32 = vpop.f32.mrf.mxu2  ;;  %v5297_v41 = vld [vmem:[%s11828_s1 + $0x878] sm:$0xff] }
 0x376   : > { %3474 = vmatpush.msrb.mxu1 %v5294_v19  ;;  %3546 = vmatpush.msra.mxu0 %v5295_v60  ;;  %12077 = vst [vmem:[#allocation247_spill] sm:$0xff] %v10682_v32  ;;  %v5298_v19 = vld [vmem:[%s11828_s1 + $0x6f0] sm:$0xff]  ;;  %v5300_v60 = vld [vmem:[%s11828_s1 + $0x7e8] sm:$0xff]  ;;  %v5306_v32 = vld [vmem:[%s11828_s1 + $0x6e0] sm:$0xff] }
 0x377   : > { %3475 = vmatmul.f32.vlgmr.msrb.gmra.mxu1 %v4183_v51  ;;  %3533 = vmatmul.f32.vlgmr.msrb.gmra.mxu3 %v4185_v13  ;;  %v5299_v13 = vld [vmem:[%s11828_s1 + $0x778] sm:$0xff] }
 0x378   : > { %3605 = vmatpush.msra.mxu2 %v5296_v46  ;;  %3633 = vmatpush.msra.mxu3 %v5297_v41  ;;  %v10690_v20 = vpop.f32.mrf.mxu3  ;;  %v5301_v46 = vld [vmem:[%s11828_s1 + $0x870] sm:$0xff]  ;;  %v5302_v41 = vld [vmem:[%s11828_s1 + $0x6e8] sm:$0xff] }
 0x379   : > { %12078 = vst [vmem:[#allocation248_spill] sm:$0xff] %v10690_v20  ;;  %3547 = vmatpush.msra.mxu0 %v5298_v19  ;;  %3575 = vmatpush.msra.mxu1 %v5299_v13  ;;  %v10698_v51 = vpop.f32.mrf.mxu0  ;;  %v5303_v19 = vld [vmem:[%s11828_s1 + $0x770] sm:$0xff]  ;;  %v4209_v20 = vld [vmem:[%s5712_s7 + $0xa80] sm:$0xff] }
 0x37a   : > { %12079 = vst [vmem:[#allocation249_spill] sm:$0xff] %v10698_v51  ;;  %3606 = vmatpush.msra.mxu2 %v5300_v60  ;;  %3634 = vmatpush.msra.mxu3 %v5301_v46  ;;  %v4207_v13 = vld [vmem:[%s5712_s7 + $0xa70] sm:$0xff]  ;;  %v5304_v60 = vld [vmem:[%s11828_s1 + $0x7e0] sm:$0xff]  ;;  %v5305_v46 = vld [vmem:[%s11828_s1 + $0x868] sm:$0xff] }
 0x37b   : > { %3548 = vmatpush.msra.mxu0 %v5302_v41  ;;  %3576 = vmatpush.msra.mxu1 %v5303_v19  ;;  %v5307_v19 = vld [vmem:[%s11828_s1 + $0x768] sm:$0xff] }
 0x37c   : > { %3607 = vmatpush.msra.mxu2 %v5304_v60  ;;  %3635 = vmatpush.msra.mxu3 %v5305_v46  ;;  %v10720_v41 = vpop.f32.mrf.mxu1  ;;  %v4208_v60 = vld [vmem:[%s5712_s7 + $0xa78] sm:$0xff]  ;;  %v4210_v51 = vld [vmem:[%s5712_s7 + $0xa88] sm:$0xff] }
 0x37d   : > { %12080 = vst [vmem:[#allocation250_spill] sm:$0xff] %v10720_v41  ;;  %3549 = vmatpush.msra.mxu0 %v5306_v32  ;;  %3577 = vmatpush.msra.mxu1 %v5307_v19  ;;  %v5308_v46 = vld [vmem:[%s11828_s1 + $0x7d8] sm:$0xff]  ;;  %v5309_v41 = vld [vmem:[%s11828_s1 + $0x860] sm:$0xff]  ;;  %v5312_v19 = vld [vmem:[%s11828_s1 + $0x7d0] sm:$0xff] }
 0x37e   : > { %3449 = vmatmul.f32.gmra.mxu0 %v4207_v13  ;;  %3507 = vmatmul.f32.gmra.mxu2 %v4209_v20  ;;  %v5310_v32 = vld [vmem:[%s11828_s1 + $0x6d8] sm:$0xff]  ;;  %v5311_v20 = vld [vmem:[%s11828_s1 + $0x760] sm:$0xff] }
 0x37f   : > { %3608 = vmatpush.msra.mxu2 %v5308_v46  ;;  %3636 = vmatpush.msra.mxu3 %v5309_v41  ;;  %v10742_v13 = vpop.f32.mrf.mxu2  ;;  %v5313_v41 = vld [vmem:[%s11828_s1 + $0x858] sm:$0xff] }
 0x380   : > { %3550 = vmatpush.msra.mxu0 %v5310_v32  ;;  %3578 = vmatpush.msra.mxu1 %v5311_v20  ;;  %12081 = vst [vmem:[#allocation251_spill] sm:$0xff] %v10742_v13  ;;  %v5314_v32 = vld [vmem:[%s11828_s1 + $0x6d0] sm:$0xff]  ;;  %v5316_v20 = vld [vmem:[%s11828_s1 + $0x7c8] sm:$0xff]  ;;  %v5322_v13 = vld [vmem:[%s11828_s1 + $0x6c0] sm:$0xff] }
 0x381   : > { %3478 = vmatmul.f32.gmra.mxu1 %v4208_v60  ;;  %3536 = vmatmul.f32.gmra.mxu3 %v4210_v51  ;;  %v5315_v51 = vld [vmem:[%s11828_s1 + $0x758] sm:$0xff] }
 0x382   : > { %3609 = vmatpush.msra.mxu2 %v5312_v19  ;;  %3637 = vmatpush.msra.mxu3 %v5313_v41  ;;  %v10750_v46 = vpop.f32.mrf.mxu3  ;;  %v5317_v19 = vld [vmem:[%s11828_s1 + $0x850] sm:$0xff]  ;;  %v5318_v41 = vld [vmem:[%s11828_s1 + $0x6c8] sm:$0xff] }
 0x383   : > { %3551 = vmatpush.msra.mxu0 %v5314_v32  ;;  %3579 = vmatpush.msra.mxu1 %v5315_v51  ;;  %v10758_v60 = vpop.f32.mrf.mxu0  ;;  %v5319_v32 = vld [vmem:[%s11828_s1 + $0x750] sm:$0xff]  ;;  %v4232_v51 = vld [vmem:[%s5712_s7 + $0xb38] sm:$0xff] }
 0x384   : > { %12082 = vst [vmem:[#allocation252_spill] sm:$0xff] %v10758_v60  ;;  %3610 = vmatpush.msra.mxu2 %v5316_v20  ;;  %3638 = vmatpush.msra.mxu3 %v5317_v19  ;;  %v4234_v60 = vld [vmem:[%s5712_s7 + $0xb48] sm:$0xff]  ;;  %v5320_v20 = vld [vmem:[%s11828_s1 + $0x7c0] sm:$0xff] }
 0x385   : > { %3552 = vmatpush.msra.mxu0 %v5318_v41  ;;  %3580 = vmatpush.msra.mxu1 %v5319_v32  ;;  %v5321_v19 = vld [vmem:[%s11828_s1 + $0x848] sm:$0xff] }
 0x386   : > { %3611 = vmatpush.msra.mxu2 %v5320_v20  ;;  %3639 = vmatpush.msra.mxu3 %v5321_v19  ;;  %v10780_v41 = vpop.f32.mrf.mxu1  ;;  %v5323_v32 = vld [vmem:[%s11828_s1 + $0x748] sm:$0xff]  ;;  %v4233_v20 = vld [vmem:[%s5712_s7 + $0xb40] sm:$0xff]  ;;  %v5324_v19 = vld [vmem:[%s11828_s1 + $0x7b8] sm:$0xff] }
 0x387   : > { %12083 = vst [vmem:[#allocation253_spill] sm:$0xff] %v10780_v41  ;;  %3553 = vmatpush.msra.mxu0 %v5322_v13  ;;  %3581 = vmatpush.msra.mxu1 %v5323_v32  ;;  %v5325_v41 = vld [vmem:[%s11828_s1 + $0x840] sm:$0xff]  ;;  %v5326_v13 = vld [vmem:[%s11828_s1 + $0x6b8] sm:$0xff]  ;;  %v5328_v32 = vld [vmem:[%s11828_s1 + $0x7b0] sm:$0xff] }
 0x388   : > { %3452 = vmatmul.f32.gmra.mxu0 %v4232_v51  ;;  %3510 = vmatmul.f32.gmra.mxu2 %v4234_v60  ;;  %v5327_v60 = vld [vmem:[%s11828_s1 + $0x740] sm:$0xff] }
 0x389   : > { %3612 = vmatpush.msra.mxu2 %v5324_v19  ;;  %3640 = vmatpush.msra.mxu3 %v5325_v41  ;;  %v10802_v51 = vpop.f32.mrf.mxu2  ;;  %v5329_v41 = vld [vmem:[%s11828_s1 + $0x838] sm:$0xff] }
 0x38a   : > { %3554 = vmatpush.msra.mxu0 %v5326_v13  ;;  %3582 = vmatpush.msra.mxu1 %v5327_v60  ;;  %12084 = vst [vmem:[#allocation254_spill] sm:$0xff] %v10802_v51  ;;  %v5330_v13 = vld [vmem:[%s11828_s1 + $0x6b0] sm:$0xff]  ;;  %v5332_v60 = vld [vmem:[%s11828_s1 + $0x7a8] sm:$0xff]  ;;  %v5338_v51 = vld [vmem:[%s11828_s1 + $0x6a0] sm:$0xff] }
 0x38b   : > { %3481 = vmatmul.f32.gmra.mxu1 %v4233_v20  ;;  %3539 = vmatmul.f32.gmra.mxu3 %v4235_v2  ;;  %v5331_v2 = vld [vmem:[%s11828_s1 + $0x738] sm:$0xff] }
 0x38c   : > { %3613 = vmatpush.msra.mxu2 %v5328_v32  ;;  %3641 = vmatpush.msra.mxu3 %v5329_v41  ;;  %v10810_v19 = vpop.f32.mrf.mxu3  ;;  %v5333_v32 = vld [vmem:[%s11828_s1 + $0x830] sm:$0xff]  ;;  %v5334_v41 = vld [vmem:[%s11828_s1 + $0x6a8] sm:$0xff] }
 0x38d   : > { %3555 = vmatpush.msra.mxu0 %v5330_v13  ;;  %3583 = vmatpush.msra.mxu1 %v5331_v2  ;;  %v10818_v20 = vpop.f32.mrf.mxu0  ;;  %v5335_v13 = vld [vmem:[%s11828_s1 + $0x730] sm:$0xff]  ;;  %v4257_v2 = vld [vmem:[%s5712_s7 + $0xc00] sm:$0x1] }
 0x38e   : > { %12085 = vst [vmem:[#allocation255_spill] sm:$0xff] %v10818_v20  ;;  %3614 = vmatpush.msra.mxu2 %v5332_v60  ;;  %3642 = vmatpush.msra.mxu3 %v5333_v32  ;;  %v4259_v20 = vld [vmem:[%s5712_s7 + $0xc10] sm:$0x1]  ;;  %v5336_v60 = vld [vmem:[%s11828_s1 + $0x7a0] sm:$0xff]  ;;  %v5337_v32 = vld [vmem:[%s11828_s1 + $0x828] sm:$0xff] }
 0x38f   : > { %3556 = vmatpush.msra.mxu0 %v5334_v41  ;;  %3584 = vmatpush.msra.mxu1 %v5335_v13  ;;  %v5339_v13 = vld [vmem:[%s11828_s1 + $0x728] sm:$0xff] }
 0x390   : > { %3615 = vmatpush.msra.mxu2 %v5336_v60  ;;  %3643 = vmatpush.msra.mxu3 %v5337_v32  ;;  %v10840_v41 = vpop.f32.mrf.mxu1  ;;  %v4258_v60 = vld [vmem:[%s5712_s7 + $0xc08] sm:$0x1]  ;;  %v5340_v32 = vld [vmem:[%s11828_s1 + $0x798] sm:$0xff] }
 0x391   : > { %12086 = vst [vmem:[#allocation256_spill] sm:$0xff] %v10840_v41  ;;  %3557 = vmatpush.msra.mxu0 %v5338_v51  ;;  %3585 = vmatpush.msra.mxu1 %v5339_v13  ;;  %v5341_v41 = vld [vmem:[%s11828_s1 + $0x820] sm:$0xff]  ;;  %v5342_v51 = vld [vmem:[%s11828_s1 + $0x698] sm:$0xff]  ;;  %v5344_v13 = vld [vmem:[%s11828_s1 + $0x790] sm:$0xff] }
 0x392   : > { %3455 = vmatmul.f32.gmra.mxu0 %v4257_v2  ;;  %3513 = vmatmul.f32.gmra.mxu2 %v4259_v20  ;;  %v5343_v20 = vld [vmem:[%s11828_s1 + $0x720] sm:$0xff] }
 0x393   : > { %3616 = vmatpush.msra.mxu2 %v5340_v32  ;;  %3644 = vmatpush.msra.mxu3 %v5341_v41  ;;  %v10862_v2 = vpop.f32.mrf.mxu2  ;;  %v5345_v41 = vld [vmem:[%s11828_s1 + $0x818] sm:$0xff] }
 0x394   : > { %3558 = vmatpush.msra.mxu0 %v5342_v51  ;;  %3586 = vmatpush.msra.mxu1 %v5343_v20  ;;  %12087 = vst [vmem:[#allocation257_spill] sm:$0xff] %v10862_v2  ;;  %v5346_v51 = vld [vmem:[%s11828_s1 + $0x690] sm:$0xff]  ;;  %v5348_v20 = vld [vmem:[%s11828_s1 + $0x788] sm:$0xff]  ;;  %v5354_v2 = vld [vmem:[%s11828_s1 + $0x680] sm:$0xff] }
 0x395   : > { %3484 = vmatmul.f32.gmra.mxu1 %v4258_v60  ;;  %3542 = vmatmul.f32.gmra.mxu3 %v4260_v23  ;;  %v5347_v23 = vld [vmem:[%s11828_s1 + $0x718] sm:$0xff] }
 0x396   : > { %3617 = vmatpush.msra.mxu2 %v5344_v13  ;;  %3645 = vmatpush.msra.mxu3 %v5345_v41  ;;  %v10870_v32 = vpop.f32.mrf.mxu3  ;;  %v5349_v13 = vld [vmem:[%s11828_s1 + $0x810] sm:$0xff]  ;;  %v5350_v41 = vld [vmem:[%s11828_s1 + $0x688] sm:$0xff] }
 0x397   : > { %3559 = vmatpush.msra.mxu0 %v5346_v51  ;;  %3587 = vmatpush.msra.mxu1 %v5347_v23  ;;  %v10878_v60 = vpop.f32.mrf.mxu0  ;;  %v5351_v51 = vld [vmem:[%s11828_s1 + $0x710] sm:$0xff]  ;;  %v4186_v23 = vld [vmem:[%s5712_s7 + $0x9c8] sm:$0xff] }
 0x398   : > { %12088 = vst [vmem:[#allocation258_spill] sm:$0xff] %v10878_v60  ;;  %3618 = vmatpush.msra.mxu2 %v5348_v20  ;;  %3646 = vmatpush.msra.mxu3 %v5349_v13  ;;  %v4188_v60 = vld [vmem:[%s5712_s7 + $0x9d8] sm:$0xff]  ;;  %v5352_v20 = vld [vmem:[%s11828_s1 + $0x780] sm:$0xff]  ;;  %v5353_v13 = vld [vmem:[%s11828_s1 + $0x808] sm:$0xff] }
 0x399   : > { %3560 = vmatpush.msra.mxu0 %v5350_v41  ;;  %3588 = vmatpush.msra.mxu1 %v5351_v51  ;;  %v5355_v51 = vld [vmem:[%s11828_s1 + $0x708] sm:$0xff] }
 0x39a   : > { %3619 = vmatpush.msra.mxu2 %v5352_v20  ;;  %3647 = vmatpush.msra.mxu3 %v5353_v13  ;;  %v10900_v41 = vpop.f32.mrf.mxu1  ;;  %v4187_v20 = vld [vmem:[%s5712_s7 + $0x9d0] sm:$0xff]  ;;  %v5356_v13 = vld [vmem:[%s11828_s1 + $0x800] sm:$0xff] }
 0x39b   : > { %12089 = vst [vmem:[#allocation259_spill] sm:$0xff] %v10900_v41  ;;  %3561 = vmatpush.msra.mxu0 %v5354_v2  ;;  %3589 = vmatpush.msra.mxu1 %v5355_v51  ;;  %v5357_v41 = vld [vmem:[%s11828_s1 + $0x9f8] sm:$0xff]  ;;  %v10919_v2 = vld [vmem:[%s11829_s2] ss:$0 sm:$0xff] }
 0x39c   : > { %3562 = vmatmul.f32.vlgmr.msra.gmra.mxu0 %v4186_v23  ;;  %3620 = vmatmul.f32.vlgmr.msra.gmra.mxu2 %v4188_v60  ;;  %v5358_v60 = vld [vmem:[%s11828_s1 + $0x700] sm:$0xff]  ;;  %v5359_v23 = vld [vmem:[%s11828_s1 + $0x8f8] sm:$0xff] }
 0x39d   : > { %3648 = vmatpush.msra.mxu3 %v5356_v13  ;;  %3720 = vmatpush.msrb.mxu2 %v5357_v41  ;;  %v10927_v51 = vpop.f32.mrf.mxu2  ;;  %v5360_v41 = vld [vmem:[%s11828_s1 + $0x9f0] sm:$0xff]  ;;  %v5361_v13 = vld [vmem:[%s11828_s1 + $0xa78] sm:$0xff] }
 0x39e   : > { %3590 = vmatpush.msra.mxu1 %v5358_v60  ;;  %3662 = vmatpush.msrb.mxu0 %v5359_v23  ;;  %12090 = vst [vmem:[#allocation260_spill] sm:$0xff] %v10927_v51  ;;  %v3187_v60 = vadd.f32 %v10919_v2, %v10750_v46  ;;  %v5365_v46 = vld [vmem:[%s11828_s1 + $0xa70] sm:$0xff] }
 0x39f   : > { %3591 = vmatmul.f32.vlgmr.msra.gmra.mxu1 %v4187_v20  ;;  %3649 = vmatmul.f32.vlgmr.msra.gmra.mxu3 %v4189_v15  ;;  %v5362_v15 = vld [vmem:[%s11828_s1 + $0x8f0] sm:$0xff]  ;;  %v5363_v20 = vld [vmem:[%s11828_s1 + $0x978] sm:$0xff] }
 0x3a0   : > { %3721 = vmatpush.msrb.mxu2 %v5360_v41  ;;  %3749 = vmatpush.msrb.mxu3 %v5361_v13  ;;  %v10937_v42 = vpop.f32.mrf.mxu3  ;;  %v5364_v41 = vld [vmem:[%s11828_s1 + $0x9e8] sm:$0xff]  ;;  %v4211_v51 = vld [vmem:[%s5712_s7 + $0xa90] sm:$0xff] }
 0x3a1   : > { %3663 = vmatpush.msrb.mxu0 %v5362_v15  ;;  %3691 = vmatpush.msrb.mxu1 %v5363_v20  ;;  %v3215_v23 = vpop.f32.mrf.mxu0  ;;  %v5366_v15 = vld [vmem:[%s11828_s1 + $0x8e8] sm:$0xff]  ;;  %v5367_v20 = vld [vmem:[%s11828_s1 + $0x970] sm:$0xff] }
 0x3a2   : > { %3722 = vmatpush.msrb.mxu2 %v5364_v41  ;;  %3750 = vmatpush.msrb.mxu3 %v5365_v46  ;;  %v3216_v13 = vadd.f32 %v3215_v23, %v3187_v60  ;;  %v4213_v41 = vld [vmem:[%s5712_s7 + $0xaa0] sm:$0xff]  ;;  %v5369_v60 = vld [vmem:[%s11828_s1 + $0xa68] sm:$0xff] }
 0x3a3   : > { %3664 = vmatpush.msrb.mxu0 %v5366_v15  ;;  %3692 = vmatpush.msrb.mxu1 %v5367_v20  ;;  %v5370_v46 = vld [vmem:[%s11828_s1 + $0x8e0] sm:$0xff]  ;;  %v5371_v15 = vld [vmem:[%s11828_s1 + $0x968] sm:$0xff] }
 0x3a4   : > { %3723 = vmatpush.msrb.mxu2 %v5368_v43  ;;  %3751 = vmatpush.msrb.mxu3 %v5369_v60  ;;  %v3244_v23 = vpop.f32.mrf.mxu1  ;;  %v4212_v43 = vld [vmem:[%s5712_s7 + $0xa98] sm:$0xff] }
 0x3a5   : > { %3665 = vmatpush.msrb.mxu0 %v5370_v46  ;;  %3693 = vmatpush.msrb.mxu1 %v5371_v15  ;;  %v3245_v20 = vadd.f32 %v3244_v23, %v3216_v13  ;;  %v5372_v60 = vld [vmem:[%s11828_s1 + $0x9d8] sm:$0xff]  ;;  %v5376_v23 = vld [vmem:[%s11828_s1 + $0x9d0] sm:$0xff]  ;;  %v3190_v15 = vadd.f32 %v10919_v2, %v10810_v19  ;;  %v5380_v19 = vld [vmem:[%s11828_s1 + $0x9c8] sm:$0xff] }
 0x3a6   : > { %3565 = vmatmul.f32.gmra.mxu0 %v4211_v51  ;;  %3623 = vmatmul.f32.gmra.mxu2 %v4213_v41  ;;  %v5374_v46 = vld [vmem:[%s11828_s1 + $0x8d8] sm:$0xff]  ;;  %v5375_v51 = vld [vmem:[%s11828_s1 + $0x960] sm:$0xff] }
 0x3a7   : > { %3724 = vmatpush.msrb.mxu2 %v5372_v60  ;;  %3752 = vmatpush.msrb.mxu3 %v5373_v37  ;;  %v3273_v13 = vpop.f32.mrf.mxu2  ;;  %v5377_v37 = vld [vmem:[%s11828_s1 + $0xa58] sm:$0xff] }
 0x3a8   : > { %3666 = vmatpush.msrb.mxu0 %v5374_v46  ;;  %3694 = vmatpush.msrb.mxu1 %v5375_v51  ;;  %v3274_v41 = vadd.f32 %v3273_v13, %v3245_v20  ;;  %v5379_v20 = vld [vmem:[%s11828_s1 + $0x958] sm:$0xff]  ;;  %v5381_v51 = vld [vmem:[%s11828_s1 + $0xa50] sm:$0xff] }
 0x3a9   : > { %3594 = vmatmul.f32.gmra.mxu1 %v4212_v43  ;;  %3652 = vmatmul.f32.gmra.mxu3 %v4214_v3  ;;  %v5378_v3 = vld [vmem:[%s11828_s1 + $0x8d0] sm:$0xff] }
 0x3aa   : > { %3725 = vmatpush.msrb.mxu2 %v5376_v23  ;;  %3753 = vmatpush.msrb.mxu3 %v5377_v37  ;;  %v3302_v60 = vpop.f32.mrf.mxu3  ;;  %v5382_v23 = vld [vmem:[%s11828_s1 + $0x8c8] sm:$0xff]  ;;  %v4236_v37 = vld [vmem:[%s5712_s7 + $0xb58] sm:$0xff] }
 0x3ab   : > { %3667 = vmatpush.msrb.mxu0 %v5378_v3  ;;  %3695 = vmatpush.msrb.mxu1 %v5379_v20  ;;  %v3218_v43 = vpop.f32.mrf.mxu0  ;;  %v10999_v46 = vadd.f32 %v3302_v60, %v3274_v41  ;;  %v5383_v41 = vld [vmem:[%s11828_s1 + $0x950] sm:$0xff]  ;;  %v4238_v60 = vld [vmem:[%s5712_s7 + $0xb68] sm:$0xff]  ;;  %v5384_v3 = vld [vmem:[%s11828_s1 + $0x9c0] sm:$0xff] }
 0x3ac   : > { %3726 = vmatpush.msrb.mxu2 %v5380_v19  ;;  %3754 = vmatpush.msrb.mxu3 %v5381_v51  ;;  %v3219_v13 = vadd.f32 %v3218_v43, %v3190_v15  ;;  %v5385_v15 = vld [vmem:[%s11828_s1 + $0xa48] sm:$0xff]  ;;  %v5386_v43 = vld [vmem:[%s11828_s1 + $0x8c0] sm:$0xff] }
 0x3ad   : > { %3668 = vmatpush.msrb.mxu0 %v5382_v23  ;;  %3696 = vmatpush.msrb.mxu1 %v5383_v41  ;;  %v5387_v19 = vld [vmem:[%s11828_s1 + $0x948] sm:$0xff]  ;;  %v4237_v23 = vld [vmem:[%s5712_s7 + $0xb60] sm:$0xff]  ;;  %v4239_v41 = vld [vmem:[%s5712_s7 + $0xb70] sm:$0xff] }
 0x3ae   : > { %3727 = vmatpush.msrb.mxu2 %v5384_v3  ;;  %3755 = vmatpush.msrb.mxu3 %v5385_v15  ;;  %v3247_v20 = vpop.f32.mrf.mxu1  ;;  %v5388_v3 = vld [vmem:[%s11828_s1 + $0x9b8] sm:$0xff]  ;;  %v5389_v15 = vld [vmem:[%s11828_s1 + $0xa40] sm:$0xff] }
 0x3af   : > { %3669 = vmatpush.msrb.mxu0 %v5386_v43  ;;  %3697 = vmatpush.msrb.mxu1 %v5387_v19  ;;  %v3248_v51 = vadd.f32 %v3247_v20, %v3219_v13  ;;  %v5390_v43 = vld [vmem:[%s11828_s1 + $0x8b8] sm:$0xff]  ;;  %v5391_v13 = vld [vmem:[%s11828_s1 + $0x940] sm:$0xff]  ;;  %v5392_v20 = vld [vmem:[%s11828_s1 + $0x9b0] sm:$0xff] }
 0x3b0   : > { %3568 = vmatmul.f32.gmra.mxu0 %v4236_v37  ;;  %3626 = vmatmul.f32.gmra.mxu2 %v4238_v60  ;;  %v5393_v19 = vld [vmem:[%s11828_s1 + $0xa38] sm:$0xff] }
 0x3b1   : > { %3728 = vmatpush.msrb.mxu2 %v5388_v3  ;;  %3756 = vmatpush.msrb.mxu3 %v5389_v15  ;;  %v3276_v37 = vpop.f32.mrf.mxu2  ;;  %v3193_v3 = vadd.f32 %v10919_v2, %v10870_v32  ;;  %v5396_v32 = vld [vmem:[%s11828_s1 + $0x9a8] sm:$0xff] }
 0x3b2   : > { %3670 = vmatpush.msrb.mxu0 %v5390_v43  ;;  %3698 = vmatpush.msrb.mxu1 %v5391_v13  ;;  %v3277_v60 = vadd.f32 %v3276_v37, %v3248_v51  ;;  %v5395_v51 = vld [vmem:[%s11828_s1 + $0x938] sm:$0xff]  ;;  %v5397_v13 = vld [vmem:[%s11828_s1 + $0xa30] sm:$0xff] }
 0x3b3   : > { %3597 = vmatmul.f32.gmra.mxu1 %v4237_v23  ;;  %3655 = vmatmul.f32.gmra.mxu3 %v4239_v41  ;;  %v5394_v23 = vld [vmem:[%s11828_s1 + $0x8b0] sm:$0xff] }
 0x3b4   : > { %3729 = vmatpush.msrb.mxu2 %v5392_v20  ;;  %3757 = vmatpush.msrb.mxu3 %v5393_v19  ;;  %v3305_v15 = vpop.f32.mrf.mxu3  ;;  %v5398_v20 = vld [vmem:[%s11828_s1 + $0x8a8] sm:$0xff]  ;;  %v4261_v19 = vld [vmem:[%s5712_s7 + $0xc20] sm:$0x1] }
 0x3b5   : > { %3671 = vmatpush.msrb.mxu0 %v5394_v23  ;;  %3699 = vmatpush.msrb.mxu1 %v5395_v51  ;;  %v3221_v41 = vpop.f32.mrf.mxu0  ;;  %v11055_v43 = vadd.f32 %v3305_v15, %v3277_v60  ;;  %v5399_v60 = vld [vmem:[%s11828_s1 + $0x930] sm:$0xff]  ;;  %v5400_v23 = vld [vmem:[%s11828_s1 + $0x9a0] sm:$0xff] }
 0x3b6   : > { %3730 = vmatpush.msrb.mxu2 %v5396_v32  ;;  %3758 = vmatpush.msrb.mxu3 %v5397_v13  ;;  %v3222_v37 = vadd.f32 %v3221_v41, %v3193_v3  ;;  %v4263_v15 = vld [vmem:[%s5712_s7 + $0xc30] sm:$0x1]  ;;  %v5401_v3 = vld [vmem:[%s11828_s1 + $0xa28] sm:$0xff]  ;;  %v5402_v41 = vld [vmem:[%s11828_s1 + $0x8a0] sm:$0xff] }
 0x3b7   : > { %3672 = vmatpush.msrb.mxu0 %v5398_v20  ;;  %3700 = vmatpush.msrb.mxu1 %v5399_v60  ;;  %v5403_v32 = vld [vmem:[%s11828_s1 + $0x928] sm:$0xff]  ;;  %v4264_v60 = vld [vmem:[%s5712_s7 + $0xc38] sm:$0x1] }
 0x3b8   : > { %3731 = vmatpush.msrb.mxu2 %v5400_v23  ;;  %3759 = vmatpush.msrb.mxu3 %v5401_v3  ;;  %v3250_v51 = vpop.f32.mrf.mxu1  ;;  %v4262_v20 = vld [vmem:[%s5712_s7 + $0xc28] sm:$0x1]  ;;  %v5404_v23 = vld [vmem:[%s11828_s1 + $0x998] sm:$0xff]  ;;  %v5405_v3 = vld [vmem:[%s11828_s1 + $0xa20] sm:$0xff] }
 0x3b9   : > { %3673 = vmatpush.msrb.mxu0 %v5402_v41  ;;  %3701 = vmatpush.msrb.mxu1 %v5403_v32  ;;  %v3251_v13 = vadd.f32 %v3250_v51, %v3222_v37  ;;  %v5406_v41 = vld [vmem:[%s11828_s1 + $0x898] sm:$0xff]  ;;  %v5407_v37 = vld [vmem:[%s11828_s1 + $0x920] sm:$0xff]  ;;  %v5408_v51 = vld [vmem:[%s11828_s1 + $0x990] sm:$0xff] }
 0x3ba   : > { %3571 = vmatmul.f32.gmra.mxu0 %v4261_v19  ;;  %3629 = vmatmul.f32.gmra.mxu2 %v4263_v15  ;;  %v5409_v32 = vld [vmem:[%s11828_s1 + $0xa18] sm:$0xff] }
 0x3bb   : > { %3732 = vmatpush.msrb.mxu2 %v5404_v23  ;;  %3760 = vmatpush.msrb.mxu3 %v5405_v3  ;;  %v3279_v19 = vpop.f32.mrf.mxu2  ;;  %v3196_v23 = vadd.f32 %v10919_v2, %v10937_v42  ;;  %v5412_v42 = vld [vmem:[%s11828_s1 + $0x988] sm:$0xff] }
 0x3bc   : > { %3674 = vmatpush.msrb.mxu0 %v5406_v41  ;;  %3702 = vmatpush.msrb.mxu1 %v5407_v37  ;;  %v3280_v15 = vadd.f32 %v3279_v19, %v3251_v13  ;;  %v5411_v13 = vld [vmem:[%s11828_s1 + $0x918] sm:$0xff]  ;;  %v5413_v37 = vld [vmem:[%s11828_s1 + $0xa10] sm:$0xff] }
 0x3bd   : > { %3600 = vmatmul.f32.gmra.mxu1 %v4262_v20  ;;  %3658 = vmatmul.f32.gmra.mxu3 %v4264_v60  ;;  %v5410_v20 = vld [vmem:[%s11828_s1 + $0x890] sm:$0xff] }
 0x3be   : > { %3733 = vmatpush.msrb.mxu2 %v5408_v51  ;;  %3761 = vmatpush.msrb.mxu3 %v5409_v32  ;;  %v3308_v3 = vpop.f32.mrf.mxu3  ;;  %v5414_v51 = vld [vmem:[%s11828_s1 + $0x888] sm:$0xff] }
 0x3bf   : > { %3675 = vmatpush.msrb.mxu0 %v5410_v20  ;;  %3703 = vmatpush.msrb.mxu1 %v5411_v13  ;;  %v3224_v60 = vpop.f32.mrf.mxu0  ;;  %v11111_v41 = vadd.f32 %v3308_v3, %v3280_v15  ;;  %v5415_v15 = vld [vmem:[%s11828_s1 + $0x910] sm:$0xff]  ;;  %v4190_v32 = vld [vmem:[%s5712_s7 + $0x9e8] sm:$0xff]  ;;  %v4192_v3 = vld [vmem:[%s5712_s7 + $0x9f8] sm:$0xff] }
 0x3c0   : > { %3734 = vmatpush.msrb.mxu2 %v5412_v42  ;;  %3762 = vmatpush.msrb.mxu3 %v5413_v37  ;;  %v3225_v19 = vadd.f32 %v3224_v60, %v3196_v23  ;;  %v5416_v20 = vld [vmem:[%s11828_s1 + $0x980] sm:$0xff]  ;;  %v5417_v23 = vld [vmem:[%s11828_s1 + $0xa08] sm:$0xff] }
 0x3c1   : > { %3676 = vmatpush.msrb.mxu0 %v5414_v51  ;;  %3704 = vmatpush.msrb.mxu1 %v5415_v15  ;;  %v5418_v60 = vld [vmem:[%s11828_s1 + $0x880] sm:$0xff]  ;;  %v5419_v42 = vld [vmem:[%s11828_s1 + $0x908] sm:$0xff]  ;;  %v4191_v51 = vld [vmem:[%s5712_s7 + $0x9f0] sm:$0xff] }
 0x3c2   : > { %3735 = vmatpush.msrb.mxu2 %v5416_v20  ;;  %3763 = vmatpush.msrb.mxu3 %v5417_v23  ;;  %v3253_v13 = vpop.f32.mrf.mxu1  ;;  %v4193_v15 = vld [vmem:[%s5712_s7 + $0xa00] sm:$0xff]  ;;  %v5421_v23 = vld [vmem:[%s11828_s1 + $0xbf8] sm:$0xff] }
 0x3c3   : > { %3677 = vmatpush.msrb.mxu0 %v5418_v60  ;;  %3705 = vmatpush.msrb.mxu1 %v5419_v42  ;;  %v3254_v37 = vadd.f32 %v3253_v13, %v3225_v19  ;;  %v5420_v20 = vld [vmem:[%s11828_s1 + $0xa00] sm:$0xff]  ;;  %v5423_v19 = vld [vmem:[%s11828_s1 + $0xaf8] sm:$0xff]  ;;  %v5424_v13 = vld [vmem:[%s11828_s1 + $0xbf0] sm:$0xff] }
 0x3c4   : > { %3678 = vmatmul.f32.vlgmr.msrb.gmra.mxu0 %v4190_v32  ;;  %3736 = vmatmul.f32.vlgmr.msrb.gmra.mxu2 %v4192_v3  ;;  %v5422_v60 = vld [vmem:[%s11828_s1 + $0x900] sm:$0xff]  ;;  %v5425_v42 = vld [vmem:[%s11828_s1 + $0xc78] sm:$0xff] }
 0x3c5   : > { %3764 = vmatpush.msrb.mxu3 %v5420_v20  ;;  %3836 = vmatpush.msra.mxu2 %v5421_v23  ;;  %v3282_v32 = vpop.f32.mrf.mxu2  ;;  %v5426_v23 = vld [vmem:[%s11828_s1 + $0xaf0] sm:$0xff] }
 0x3c6   : > { %3706 = vmatpush.msrb.mxu1 %v5422_v60  ;;  %3778 = vmatpush.msra.mxu0 %v5423_v19  ;;  %v3283_v3 = vadd.f32 %v3282_v32, %v3254_v37  ;;  %v5427_v37 = vld [vmem:[%s11828_s1 + $0xb78] sm:$0xff]  ;;  %v5428_v60 = vld [vmem:[%s11828_s1 + $0xbe8] sm:$0xff]  ;;  %v5429_v19 = vld [vmem:[%s11828_s1 + $0xc70] sm:$0xff] }
 0x3c7   : > { %3707 = vmatmul.f32.vlgmr.msrb.gmra.mxu1 %v4191_v51  ;;  %3765 = vmatmul.f32.vlgmr.msrb.gmra.mxu3 %v4193_v15 }
 0x3c8   : > { %3837 = vmatpush.msra.mxu2 %v5424_v13  ;;  %3865 = vmatpush.msra.mxu3 %v5425_v42  ;;  %v3311_v20 = vpop.f32.mrf.mxu3  ;;  %v5430_v13 = vld [vmem:[%s11828_s1 + $0xae8] sm:$0xff]  ;;  %v4215_v42 = vld [vmem:[%s5712_s7 + $0xab0] sm:$0xff] }
 0x3c9   : > { %3779 = vmatpush.msra.mxu0 %v5426_v23  ;;  %3807 = vmatpush.msra.mxu1 %v5427_v37  ;;  %v11165_v51 = vadd.f32 %v3311_v20, %v3283_v3  ;;  %v3331_v15 = vpop.f32.mrf.mxu0  ;;  %v5431_v3 = vld [vmem:[%s11828_s1 + $0xb70] sm:$0xff]  ;;  %v4217_v20 = vld [vmem:[%s5712_s7 + $0xac0] sm:$0xff] }
 0x3ca   : > { %3838 = vmatpush.msra.mxu2 %v5428_v60  ;;  %3866 = vmatpush.msra.mxu3 %v5429_v19  ;;  %v3332_v32 = vadd.f32 %v3331_v15, %v10999_v46  ;;  %v5432_v23 = vld [vmem:[%s11828_s1 + $0xbe0] sm:$0xff]  ;;  %v5433_v46 = vld [vmem:[%s11828_s1 + $0xc68] sm:$0xff] }
 0x3cb   : > { %3780 = vmatpush.msra.mxu0 %v5430_v13  ;;  %3808 = vmatpush.msra.mxu1 %v5431_v3  ;;  %v5434_v15 = vld [vmem:[%s11828_s1 + $0xae0] sm:$0xff]  ;;  %v5435_v60 = vld [vmem:[%s11828_s1 + $0xb68] sm:$0xff]  ;;  %v4216_v13 = vld [vmem:[%s5712_s7 + $0xab8] sm:$0xff] }
 0x3cc   : > { %3839 = vmatpush.msra.mxu2 %v5432_v23  ;;  %3867 = vmatpush.msra.mxu3 %v5433_v46  ;;  %v3360_v37 = vpop.f32.mrf.mxu1  ;;  %v4218_v3 = vld [vmem:[%s5712_s7 + $0xac8] sm:$0xff]  ;;  %v5436_v23 = vld [vmem:[%s11828_s1 + $0xbd8] sm:$0xff]  ;;  %v5437_v46 = vld [vmem:[%s11828_s1 + $0xc60] sm:$0xff] }
 0x3cd   : > { %3781 = vmatpush.msra.mxu0 %v5434_v15  ;;  %3809 = vmatpush.msra.mxu1 %v5435_v60  ;;  %v3361_v19 = vadd.f32 %v3360_v37, %v3332_v32  ;;  %v5438_v60 = vld [vmem:[%s11828_s1 + $0xad8] sm:$0xff]  ;;  %v5439_v32 = vld [vmem:[%s11828_s1 + $0xb60] sm:$0xff] }
 0x3ce   : > { %3681 = vmatmul.f32.gmra.mxu0 %v4215_v42  ;;  %3739 = vmatmul.f32.gmra.mxu2 %v4217_v20  ;;  %v5440_v20 = vld [vmem:[%s11828_s1 + $0xbd0] sm:$0xff]  ;;  %v5441_v37 = vld [vmem:[%s11828_s1 + $0xc58] sm:$0xff] }
 0x3cf   : > { %3840 = vmatpush.msra.mxu2 %v5436_v23  ;;  %3868 = vmatpush.msra.mxu3 %v5437_v46  ;;  %v3389_v15 = vpop.f32.mrf.mxu2  ;;  %v5442_v46 = vld [vmem:[%s11828_s1 + $0xad0] sm:$0xff] }
 0x3d0   : > { %3782 = vmatpush.msra.mxu0 %v5438_v60  ;;  %3810 = vmatpush.msra.mxu1 %v5439_v32  ;;  %v3390_v42 = vadd.f32 %v3389_v15, %v3361_v19  ;;  %v5443_v19 = vld [vmem:[%s11828_s1 + $0xb58] sm:$0xff]  ;;  %v5444_v15 = vld [vmem:[%s11828_s1 + $0xbc8] sm:$0xff]  ;;  %v5445_v60 = vld [vmem:[%s11828_s1 + $0xc50] sm:$0xff] }
 0x3d1   : > { %3710 = vmatmul.f32.gmra.mxu1 %v4216_v13  ;;  %3768 = vmatmul.f32.gmra.mxu3 %v4218_v3 }
 0x3d2   : > { %3841 = vmatpush.msra.mxu2 %v5440_v20  ;;  %3869 = vmatpush.msra.mxu3 %v5441_v37  ;;  %v3418_v23 = vpop.f32.mrf.mxu3  ;;  %v5446_v20 = vld [vmem:[%s11828_s1 + $0xac8] sm:$0xff]  ;;  %v4240_v37 = vld [vmem:[%s5712_s7 + $0xb78] sm:$0xff] }
 0x3d3   : > { %3783 = vmatpush.msra.mxu0 %v5442_v46  ;;  %3811 = vmatpush.msra.mxu1 %v5443_v19  ;;  %v3334_v13 = vpop.f32.mrf.mxu0  ;;  %v11220_v3 = vadd.f32 %v3418_v23, %v3390_v42  ;;  %v5447_v42 = vld [vmem:[%s11828_s1 + $0xb50] sm:$0xff]  ;;  %v4242_v23 = vld [vmem:[%s5712_s7 + $0xb88] sm:$0xff]  ;;  %v5448_v46 = vld [vmem:[%s11828_s1 + $0xbc0] sm:$0xff] }
 0x3d4   : > { %3842 = vmatpush.msra.mxu2 %v5444_v15  ;;  %3870 = vmatpush.msra.mxu3 %v5445_v60  ;;  %v3335_v32 = vadd.f32 %v3334_v13, %v11055_v43  ;;  %v5449_v43 = vld [vmem:[%s11828_s1 + $0xc48] sm:$0xff]  ;;  %v5450_v13 = vld [vmem:[%s11828_s1 + $0xac0] sm:$0xff] }
 0x3d5   : > { %3784 = vmatpush.msra.mxu0 %v5446_v20  ;;  %3812 = vmatpush.msra.mxu1 %v5447_v42  ;;  %v5451_v15 = vld [vmem:[%s11828_s1 + $0xb48] sm:$0xff]  ;;  %v4241_v20 = vld [vmem:[%s5712_s7 + $0xb80] sm:$0xff]  ;;  %v4243_v42 = vld [vmem:[%s5712_s7 + $0xb90] sm:$0xff] }
 0x3d6   : > { %3843 = vmatpush.msra.mxu2 %v5448_v46  ;;  %3871 = vmatpush.msra.mxu3 %v5449_v43  ;;  %v3363_v19 = vpop.f32.mrf.mxu1  ;;  %v5452_v46 = vld [vmem:[%s11828_s1 + $0xbb8] sm:$0xff]  ;;  %v5453_v43 = vld [vmem:[%s11828_s1 + $0xc40] sm:$0xff] }
 0x3d7   : > { %3785 = vmatpush.msra.mxu0 %v5450_v13  ;;  %3813 = vmatpush.msra.mxu1 %v5451_v15  ;;  %v3364_v60 = vadd.f32 %v3363_v19, %v3335_v32  ;;  %v5454_v15 = vld [vmem:[%s11828_s1 + $0xab8] sm:$0xff]  ;;  %v5455_v32 = vld [vmem:[%s11828_s1 + $0xb40] sm:$0xff] }
 0x3d8   : > { %3684 = vmatmul.f32.gmra.mxu0 %v4240_v37  ;;  %3742 = vmatmul.f32.gmra.mxu2 %v4242_v23  ;;  %v5456_v23 = vld [vmem:[%s11828_s1 + $0xbb0] sm:$0xff]  ;;  %v5457_v19 = vld [vmem:[%s11828_s1 + $0xc38] sm:$0xff] }
 0x3d9   : > { %3844 = vmatpush.msra.mxu2 %v5452_v46  ;;  %3872 = vmatpush.msra.mxu3 %v5453_v43  ;;  %v3392_v13 = vpop.f32.mrf.mxu2  ;;  %v5458_v43 = vld [vmem:[%s11828_s1 + $0xab0] sm:$0xff] }
 0x3da   : > { %3786 = vmatpush.msra.mxu0 %v5454_v15  ;;  %3814 = vmatpush.msra.mxu1 %v5455_v32  ;;  %v3393_v37 = vadd.f32 %v3392_v13, %v3364_v60  ;;  %v5459_v60 = vld [vmem:[%s11828_s1 + $0xb38] sm:$0xff]  ;;  %v5460_v13 = vld [vmem:[%s11828_s1 + $0xba8] sm:$0xff]  ;;  %v5461_v15 = vld [vmem:[%s11828_s1 + $0xc30] sm:$0xff] }
 0x3db   : > { %3713 = vmatmul.f32.gmra.mxu1 %v4241_v20  ;;  %3771 = vmatmul.f32.gmra.mxu3 %v4243_v42 }
 0x3dc   : > { %3845 = vmatpush.msra.mxu2 %v5456_v23  ;;  %3873 = vmatpush.msra.mxu3 %v5457_v19  ;;  %v3421_v46 = vpop.f32.mrf.mxu3  ;;  %v5462_v23 = vld [vmem:[%s11828_s1 + $0xaa8] sm:$0xff]  ;;  %v4265_v19 = vld [vmem:[%s5712_s7 + $0xc40] sm:$0x1] }
 0x3dd   : > { %3787 = vmatpush.msra.mxu0 %v5458_v43  ;;  %3815 = vmatpush.msra.mxu1 %v5459_v60  ;;  %v3337_v20 = vpop.f32.mrf.mxu0  ;;  %v11275_v42 = vadd.f32 %v3421_v46, %v3393_v37  ;;  %v5463_v37 = vld [vmem:[%s11828_s1 + $0xb30] sm:$0xff]  ;;  %v5464_v43 = vld [vmem:[%s11828_s1 + $0xba0] sm:$0xff] }
 0x3de   : > { %3846 = vmatpush.msra.mxu2 %v5460_v13  ;;  %3874 = vmatpush.msra.mxu3 %v5461_v15  ;;  %v3338_v32 = vadd.f32 %v3337_v20, %v11111_v41  ;;  %v4267_v46 = vld [vmem:[%s5712_s7 + $0xc50] sm:$0x1]  ;;  %v5465_v41 = vld [vmem:[%s11828_s1 + $0xc28] sm:$0xff]  ;;  %v5466_v20 = vld [vmem:[%s11828_s1 + $0xaa0] sm:$0xff] }
 0x3df   : > { %3788 = vmatpush.msra.mxu0 %v5462_v23  ;;  %3816 = vmatpush.msra.mxu1 %v5463_v37  ;;  %v5467_v13 = vld [vmem:[%s11828_s1 + $0xb28] sm:$0xff]  ;;  %v4268_v37 = vld [vmem:[%s5712_s7 + $0xc58] sm:$0x1] }
 0x3e0   : > { %3847 = vmatpush.msra.mxu2 %v5464_v43  ;;  %3875 = vmatpush.msra.mxu3 %v5465_v41  ;;  %v3366_v60 = vpop.f32.mrf.mxu1  ;;  %v4266_v23 = vld [vmem:[%s5712_s7 + $0xc48] sm:$0x1]  ;;  %v5468_v43 = vld [vmem:[%s11828_s1 + $0xb98] sm:$0xff]  ;;  %v5469_v41 = vld [vmem:[%s11828_s1 + $0xc20] sm:$0xff] }
 0x3e1   : > { %3789 = vmatpush.msra.mxu0 %v5466_v20  ;;  %3817 = vmatpush.msra.mxu1 %v5467_v13  ;;  %v3367_v15 = vadd.f32 %v3366_v60, %v3338_v32  ;;  %v5470_v13 = vld [vmem:[%s11828_s1 + $0xa98] sm:$0xff]  ;;  %v5471_v32 = vld [vmem:[%s11828_s1 + $0xb20] sm:$0xff] }
 0x3e2   : > { %3687 = vmatmul.f32.gmra.mxu0 %v4265_v19  ;;  %3745 = vmatmul.f32.gmra.mxu2 %v4267_v46  ;;  %v5472_v46 = vld [vmem:[%s11828_s1 + $0xb90] sm:$0xff]  ;;  %v5473_v60 = vld [vmem:[%s11828_s1 + $0xc18] sm:$0xff] }
 0x3e3   : > { %3848 = vmatpush.msra.mxu2 %v5468_v43  ;;  %3876 = vmatpush.msra.mxu3 %v5469_v41  ;;  %v3395_v20 = vpop.f32.mrf.mxu2  ;;  %v5474_v41 = vld [vmem:[%s11828_s1 + $0xa90] sm:$0xff] }
 0x3e4   : > { %3790 = vmatpush.msra.mxu0 %v5470_v13  ;;  %3818 = vmatpush.msra.mxu1 %v5471_v32  ;;  %v3396_v19 = vadd.f32 %v3395_v20, %v3367_v15  ;;  %v5475_v15 = vld [vmem:[%s11828_s1 + $0xb18] sm:$0xff]  ;;  %v5476_v20 = vld [vmem:[%s11828_s1 + $0xb88] sm:$0xff]  ;;  %v5477_v13 = vld [vmem:[%s11828_s1 + $0xc10] sm:$0xff] }
 0x3e5   : > { %3716 = vmatmul.f32.gmra.mxu1 %v4266_v23  ;;  %3774 = vmatmul.f32.gmra.mxu3 %v4268_v37 }
 0x3e6   : > { %3849 = vmatpush.msra.mxu2 %v5472_v46  ;;  %3877 = vmatpush.msra.mxu3 %v5473_v60  ;;  %v3424_v43 = vpop.f32.mrf.mxu3  ;;  %v5478_v46 = vld [vmem:[%s11828_s1 + $0xa88] sm:$0xff] }
 0x3e7   : > { %3791 = vmatpush.msra.mxu0 %v5474_v41  ;;  %3819 = vmatpush.msra.mxu1 %v5475_v15  ;;  %v3340_v23 = vpop.f32.mrf.mxu0  ;;  %v11330_v37 = vadd.f32 %v3424_v43, %v3396_v19  ;;  %v5479_v19 = vld [vmem:[%s11828_s1 + $0xb10] sm:$0xff]  ;;  %v4194_v60 = vld [vmem:[%s5712_s7 + $0xa08] sm:$0xff]  ;;  %v4196_v43 = vld [vmem:[%s5712_s7 + $0xa18] sm:$0xff] }
 0x3e8   : > { %3850 = vmatpush.msra.mxu2 %v5476_v20  ;;  %3878 = vmatpush.msra.mxu3 %v5477_v13  ;;  %v3341_v32 = vadd.f32 %v3340_v23, %v11165_v51  ;;  %v5480_v41 = vld [vmem:[%s11828_s1 + $0xb80] sm:$0xff]  ;;  %v5481_v51 = vld [vmem:[%s11828_s1 + $0xc08] sm:$0xff]  ;;  %v4195_v13 = vld [vmem:[%s5712_s7 + $0xa10] sm:$0xff] }
 0x3e9   : > { %3792 = vmatpush.msra.mxu0 %v5478_v46  ;;  %3820 = vmatpush.msra.mxu1 %v5479_v19  ;;  %v5482_v23 = vld [vmem:[%s11828_s1 + $0xa80] sm:$0xff]  ;;  %v5483_v20 = vld [vmem:[%s11828_s1 + $0xb08] sm:$0xff] }
 0x3ea   : > { %3851 = vmatpush.msra.mxu2 %v5480_v41  ;;  %3879 = vmatpush.msra.mxu3 %v5481_v51  ;;  %v3369_v15 = vpop.f32.mrf.mxu1  ;;  %v4197_v46 = vld [vmem:[%s5712_s7 + $0xa20] sm:$0xff] }
 0x3eb   : > { %3793 = vmatpush.msra.mxu0 %v5482_v23  ;;  %3821 = vmatpush.msra.mxu1 %v5483_v20  ;;  %v3370_v19 = vadd.f32 %v3369_v15, %v3341_v32  ;;  %v5484_v41 = vld [vmem:[%s11828_s1 + $0xc00] sm:$0xff]  ;;  %v4219_v32 = vld [vmem:[%s5712_s7 + $0xad0] sm:$0xff] }
 0x3ec   : > { %3794 = vmatmul.f32.vlgmr.msra.gmra.mxu0 %v4194_v60  ;;  %3852 = vmatmul.f32.vlgmr.msra.gmra.mxu2 %v4196_v43  ;;  %v5485_v51 = vld [vmem:[%s11828_s1 + $0xb00] sm:$0xff] }
 0x3ed   : > { %3880 = vmatpush.msra.mxu3 %v5484_v41  ;;  %3822 = vmatpush.msra.mxu1 %v5485_v51  ;;  %v3398_v23 = vpop.f32.mrf.mxu2  ;;  %v4221_v60 = vld [vmem:[%s5712_s7 + $0xae0] sm:$0xff] }
 0x3ee   : > { %3823 = vmatmul.f32.vlgmr.msra.gmra.mxu1 %v4195_v13  ;;  %3881 = vmatmul.f32.vlgmr.msra.gmra.mxu3 %v4197_v46  ;;  %v3399_v20 = vadd.f32 %v3398_v23, %v3370_v19  ;;  %v4244_v19 = vld [vmem:[%s5712_s7 + $0xb98] sm:$0xff]  ;;  %v4246_v23 = vld [vmem:[%s5712_s7 + $0xba8] sm:$0xff] }
 0x3f0   : > { %v3427_v53 = vpop.f32.mrf.mxu3 }
 0x3f1   : > { %v3428_v43 = vadd.f32 %v3427_v53, %v3399_v20  ;;  %v3447_v15 = vpop.f32.mrf.mxu0  ;;  %v4245_v20 = vld [vmem:[%s5712_s7 + $0xba0] sm:$0xff] }
 0x3f2   : > { %v3448_v41 = vadd.f32 %v3447_v15, %v11220_v3 }
 0x3f4   : > { %3797 = vmatmul.f32.gmra.mxu0 %v4219_v32  ;;  %3855 = vmatmul.f32.gmra.mxu2 %v4221_v60  ;;  %v3476_v51 = vpop.f32.mrf.mxu1  ;;  %v4271_v60 = vld [vmem:[%s5712_s7 + $0xc70] sm:$0x1] }
 0x3f5   : > { %v3477_v49 = vadd.f32 %v3476_v51, %v3448_v41 }
 0x3f6   : > { %3826 = vmatmul.f32.gmra.mxu1 %v4220_v56  ;;  %3884 = vmatmul.f32.gmra.mxu3 %v4222_v17 }
 0x3f7   : > { %v3505_v13 = vpop.f32.mrf.mxu2 }
 0x3f8   : > { %v3506_v46 = vadd.f32 %v3505_v13, %v3477_v49  ;;  %v4269_v49 = vld [vmem:[%s5712_s7 + $0xc60] sm:$0x1]  ;;  %v4270_v13 = vld [vmem:[%s5712_s7 + $0xc68] sm:$0x1]  ;;  %s4275_s7 = sshll.u32 %s12351_s13, 5 }
 0x3f9   : > { %s11789_s25 = scalar_lea.vmem %s11830_s3, %s4275_s7 }
 0x3fa   : > { %v3534_v53 = vpop.f32.mrf.mxu3 }
 0x3fb   : > { %v3450_v3 = vpop.f32.mrf.mxu0  ;;  %v11376_v15 = vadd.f32 %v3534_v53, %v3506_v46 }
 0x3fc   : > { %3800 = vmatmul.f32.gmra.mxu0 %v4244_v19  ;;  %3858 = vmatmul.f32.gmra.mxu2 %v4246_v23  ;;  %v3451_v32 = vadd.f32 %v3450_v3, %v11275_v42 }
 0x3fe   : > { %3829 = vmatmul.f32.gmra.mxu1 %v4245_v20  ;;  %3887 = vmatmul.f32.gmra.mxu3 %v4247_v59  ;;  %v3479_v17 = vpop.f32.mrf.mxu1 }
 0x3ff   : > { %v3480_v56 = vadd.f32 %v3479_v17, %v3451_v32 }
 0x401   : > { %v3508_v41 = vpop.f32.mrf.mxu2 }
 0x402   : > { %v3509_v51 = vadd.f32 %v3508_v41, %v3480_v56 }
 0x404   : > { %3803 = vmatmul.f32.gmra.mxu0 %v4269_v49  ;;  %3861 = vmatmul.f32.gmra.mxu2 %v4271_v60  ;;  %v3537_v33 = vpop.f32.mrf.mxu3  ;;  %v693_v60 = vadd.f32 %v10919_v2, %v6396_v0 }
 0x405   : > { %v3453_v8 = vpop.f32.mrf.mxu0  ;;  %v11383_v46 = vadd.f32 %v3537_v33, %v3509_v51  ;;  %v696_v33 = vadd.f32 %v10919_v2, %v6456_v24  ;;  %v699_v51 = vadd.f32 %v10919_v2, %v6516_v48 }
 0x406   : > { %3832 = vmatmul.f32.gmra.mxu1 %v4270_v13  ;;  %3890 = vmatmul.f32.gmra.mxu3 %v4272_v9  ;;  %v3454_v42 = vadd.f32 %v3453_v8, %v11330_v37  ;;  %v722_v8 = vadd.f32 %v6412_v7, %v693_v60 }
 0x407   : > { %v725_v37 = vadd.f32 %v6472_v31, %v696_v33  ;;  %v728_v24 = vadd.f32 %v6532_v55, %v699_v51 }
 0x408   : > { %v3482_v19 = vpop.f32.mrf.mxu1 }
 0x409   : > { %v3483_v59 = vadd.f32 %v3482_v19, %v3454_v42  ;;  %v751_v19 = vadd.f32 %v6434_v16, %v722_v8  ;;  %v754_v0 = vadd.f32 %v6494_v40, %v725_v37  ;;  %v12093_v37 = vld [vmem:[#allocation78_spill] sm:$0xff] }
 0x40b   : > { %v3511_v23 = vpop.f32.mrf.mxu2  ;;  %v780_v48 = vadd.f32 %v6448_v21, %v751_v19 }
 0x40c   : > { %v3512_v53 = vadd.f32 %v3511_v23, %v3483_v59  ;;  %v702_v59 = vadd.f32 %v10919_v2, %v6576_v10  ;;  %v783_v23 = vadd.f32 %v6508_v45, %v754_v0  ;;  %v1523_v10 = vadd.f32 %v10919_v2, %v7840_v52 }
 0x40d   : > { %v809_v16 = vadd.f32 %v6636_v38, %v780_v48  ;;  %v12099_v48 = vld [vmem:[#allocation71_spill] sm:$0xff] }
 0x40e   : > { %v3540_v20 = vpop.f32.mrf.mxu3  ;;  %v812_v40 = vadd.f32 %v6696_v4, %v783_v23  ;;  %v1552_v4 = vadd.f32 %v7862_v54, %v1523_v10  ;;  %v1526_v54 = vadd.f32 %v10919_v2, %v7900_v36  ;;  %v12100_v23 = vld [vmem:[#allocation79_spill] sm:$0xff]  ;;  %v12102_v10 = vld [vmem:[#allocation4_spill] sm:$0xff] }
 0x40f   : > { %v3456_v3 = vpop.f32.mrf.mxu0  ;;  %v11386_v32 = vadd.f32 %v3540_v20, %v3512_v53  ;;  %v757_v53 = vadd.f32 %v6554_v1, %v728_v24  ;;  %v731_v20 = vadd.f32 %v6592_v18, %v702_v59  ;;  %v838_v45 = vadd.f32 %v6652_v47, %v809_v16 }
 0x410   : > { %v3457_v17 = vadd.f32 %v3456_v3, %v3428_v43  ;;  %v841_v1 = vadd.f32 %v6712_v14, %v812_v40 }
 0x411   : > { %v760_v21 = vadd.f32 %v6614_v29, %v731_v20  ;;  %v867_v52 = vadd.f32 %v6674_v58, %v838_v45  ;;  %v12101_v20 = vld [vmem:[#allocation161_spill] sm:$0xff] }
 0x412   : > { %v3485_v56 = vpop.f32.mrf.mxu1 }
 0x413   : > { %v3486_v49 = vadd.f32 %v3485_v56, %v3457_v17  ;;  %v786_v17 = vadd.f32 %v6568_v6, %v757_v53  ;;  %v789_v56 = vadd.f32 %v6628_v35, %v760_v21  ;;  %v2357_v6 = vadd.f32 %v10919_v2, %v9302_v11  ;;  %v12103_v21 = vld [vmem:[#allocation6_spill] sm:$0xff] }
 0x414   : > { %v896_v35 = vadd.f32 %v6688_v63, %v867_v52  ;;  %v12106_v52 = vld [vmem:[#allocation81_spill] sm:$0xff] }
 0x415   : > { %v3514_v9 = vpop.f32.mrf.mxu2  ;;  %v815_v18 = vadd.f32 %v6756_v39, %v786_v17  ;;  %v818_v14 = vadd.f32 %v6816_v12, %v789_v56  ;;  %v1581_v39 = vadd.f32 %v7870_v62, %v1552_v4  ;;  %v2386_v60 = vadd.f32 %v9310_v57, %v2357_v6  ;;  %v12091_v57 = vld [vmem:[#allocation2_spill] sm:$0xff]  ;;  %v12105_v4 = vld [vmem:[#allocation9_spill] sm:$0xff] }
 0x416   : > { %v3515_v41 = vadd.f32 %v3514_v9, %v3486_v49  ;;  %v870_v49 = vadd.f32 %v6734_v27, %v841_v1  ;;  %v925_v62 = vadd.f32 %v6861_v44, %v896_v35  ;;  %v12095_v44 = vld [vmem:[#allocation8_spill] sm:$0xff]  ;;  %v12104_v1 = vld [vmem:[#allocation171_spill] sm:$0xff]  ;;  %v12107_v6 = vld [vmem:[#allocation173_spill] sm:$0xff] }
 0x417   : > { %v844_v47 = vadd.f32 %v6772_v50, %v815_v18  ;;  %v1610_v33 = vadd.f32 %v8058_v28, %v1581_v39  ;;  %v847_v12 = vadd.f32 %v6829_v22, %v818_v14  ;;  %v2415_v63 = vadd.f32 %v9498_v30, %v2386_v60  ;;  %v12094_v22 = vld [vmem:[#allocation5_spill] sm:$0xff]  ;;  %v12097_v30 = vld [vmem:[#allocation170_spill] sm:$0xff]  ;;  %v12108_v14 = vld [vmem:[#allocation12_spill] sm:$0xff] }
 0x418   : > { %v3543_v13 = vpop.f32.mrf.mxu3  ;;  %v899_v58 = vadd.f32 %v6748_v34, %v870_v49  ;;  %v1555_v34 = vadd.f32 %v7922_v25, %v1526_v54  ;;  %v12098_v25 = vld [vmem:[#allocation69_spill] sm:$0xff]  ;;  %v12109_v54 = vld [vmem:[#allocation15_spill] sm:$0xff] }
 0x419   : > { %v11396_v42 = vadd.f32 %v3543_v13, %v3515_v41  ;;  %v11398_v43 = vpop.f32.mrf.mxu0  ;;  %v873_v27 = vadd.f32 %v6794_v61, %v844_v47  ;;  %v2360_v61 = vadd.f32 %v10919_v2, %v9362_v5  ;;  %v12092_v41 = vld [vmem:[#allocation3_spill] sm:$0xff]  ;;  %v1639_v51 = vadd.f32 %v12093_v37, %v1610_v33  ;;  %v12111_v33 = vld [vmem:[#allocation80_spill] sm:$0xff]  ;;  %v12116_v37 = vld [vmem:[#allocation10_spill] sm:$0xff] }
 0x41a   : > { %v928_v36 = vadd.f32 %v6921_v26, %v899_v58  ;;  %v876_v8 = vadd.f32 %v12092_v41, %v847_v12  ;;  %v954_v13 = vadd.f32 %v12094_v22, %v925_v62  ;;  %v12096_v26 = vld [vmem:[#allocation11_spill] sm:$0xff]  ;;  %v2444_v24 = vadd.f32 %v12097_v30, %v2415_v63  ;;  %v12112_v62 = vld [vmem:[#allocation164_spill] sm:$0xff]  ;;  %v12117_v22 = vld [vmem:[#allocation82_spill] sm:$0xff] }
 0x41b   : > { %v902_v9 = vadd.f32 %v12091_v57, %v873_v27  ;;  %v1584_v59 = vadd.f32 %v12098_v25, %v1555_v34  ;;  %v1529_v5 = vadd.f32 %v10919_v2, %v12099_v48  ;;  %v1668_v53 = vadd.f32 %v12100_v23, %v1639_v51  ;;  %v12110_v27 = vld [vmem:[#allocation72_spill] sm:$0xff]  ;;  %v12113_v34 = vld [vmem:[#allocation7_spill] sm:$0xff]  ;;  %v12114_v57 = vld [vmem:[#allocation13_spill] sm:$0xff] }
 0x41c   : > { %v11405_v7 = vpop.f32.mrf.mxu1  ;;  %v957_v19 = vadd.f32 %v12095_v44, %v928_v36  ;;  %v2389_v16 = vadd.f32 %v12101_v20, %v2360_v61  ;;  %v905_v17 = vadd.f32 %v12102_v10, %v876_v8  ;;  %v983_v45 = vadd.f32 %v12103_v21, %v954_v13  ;;  %v12115_v41 = vld [vmem:[#allocation172_spill] sm:$0xff]  ;;  %v12118_v44 = vld [vmem:[#allocation93_spill] sm:$0xff]  ;;  %v12121_v25 = vld [vmem:[#allocation19_spill] sm:$0xff] }
 0x41d   : > { %v931_v0 = vadd.f32 %v12096_v26, %v902_v9  ;;  %v2473_v18 = vadd.f32 %v12104_v1, %v2444_v24  ;;  %v1613_v49 = vadd.f32 %v12106_v52, %v1584_v59  ;;  %v1558_v60 = vadd.f32 %v12110_v27, %v1529_v5  ;;  %v12119_v26 = vld [vmem:[#allocation174_spill] sm:$0xff]  ;;  %v12120_v30 = vld [vmem:[#allocation16_spill] sm:$0xff]  ;;  %v12122_v48 = vld [vmem:[#allocation75_spill] sm:$0xff] }
 0x41e   : > { %v986_v56 = vadd.f32 %v12105_v4, %v957_v19  ;;  %v2418_v47 = vadd.f32 %v12107_v6, %v2389_v16  ;;  %v934_v35 = vadd.f32 %v12109_v54, %v905_v17  ;;  %v1697_v12 = vadd.f32 %v12111_v33, %v1668_v53  ;;  %v12123_v23 = vld [vmem:[#allocation185_spill] sm:$0xff]  ;;  %v12125_v17 = vld [vmem:[#allocation83_spill] sm:$0xff] }
 0x41f   : > { %v11407_v31 = vpop.f32.mrf.mxu2  ;;  %v960_v39 = vadd.f32 %v12108_v14, %v931_v0  ;;  %v2363_v36 = vadd.f32 %v10919_v2, %v12112_v62  ;;  %v1012_v61 = vadd.f32 %v12113_v34, %v983_v45  ;;  %v2502_v8 = vadd.f32 %v12115_v41, %v2473_v18  ;;  %v12124_v16 = vld [vmem:[#allocation73_spill] sm:$0xff]  ;;  %v12127_v18 = vld [vmem:[#allocation175_spill] sm:$0xff] }
 0x420   : > { %v1015_v51 = vadd.f32 %v12116_v37, %v986_v56  ;;  %v1642_v13 = vadd.f32 %v12117_v22, %v1613_v49  ;;  %v1726_v19 = vadd.f32 %v12118_v44, %v1697_v12  ;;  %v2447_v0 = vadd.f32 %v12119_v26, %v2418_v47  ;;  %v12126_v45 = vld [vmem:[#allocation165_spill] sm:$0xff]  ;;  %v12128_v56 = vld [vmem:[#allocation14_spill] sm:$0xff]  ;;  %v12130_v47 = vld [vmem:[#allocation23_spill] sm:$0xff] }
 0x421   : > { %v989_v9 = vadd.f32 %v12114_v57, %v960_v39  ;;  %v963_v24 = vadd.f32 %v12120_v30, %v934_v35  ;;  %v1041_v59 = vadd.f32 %v12121_v25, %v1012_v61  ;;  %v1532_v5 = vadd.f32 %v10919_v2, %v12122_v48  ;;  %v12129_v49 = vld [vmem:[#allocation17_spill] sm:$0xff]  ;;  %v12132_v35 = vld [vmem:[#allocation94_spill] sm:$0xff]  ;;  %v12135_v61 = vld [vmem:[#allocation27_spill] sm:$0xff] }
 0x422   : > { %v11415_v55 = vpop.f32.mrf.mxu3  ;;  %v2531_v53 = vadd.f32 %v12123_v23, %v2502_v8  ;;  %v1587_v10 = vadd.f32 %v12124_v16, %v1558_v60  ;;  %v1671_v21 = vadd.f32 %v12125_v17, %v1642_v13  ;;  %v2392_v1 = vadd.f32 %v12126_v45, %v2363_v36  ;;  %v12131_v39 = vld [vmem:[#allocation85_spill] sm:$0xff]  ;;  %v12134_v60 = vld [vmem:[#allocation20_spill] sm:$0xff]  ;;  %v12137_v8 = vld [vmem:[#allocation186_spill] sm:$0xff] }
 0x423   : > { %v11419_v3 = vpop.f32.mrf.mxu0  ;;  %v2476_v4 = vadd.f32 %v12127_v18, %v2447_v0  ;;  %v1018_v52 = vadd.f32 %v12128_v56, %v989_v9  ;;  %v992_v6 = vadd.f32 %v12129_v49, %v963_v24  ;;  %v1044_v14 = vadd.f32 %v12130_v47, %v1015_v51  ;;  %v12133_v33 = vld [vmem:[#allocation177_spill] sm:$0xff]  ;;  %v12136_v57 = vld [vmem:[#allocation76_spill] sm:$0xff]  ;;  %v12139_v13 = vld [vmem:[#allocation95_spill] sm:$0xff] }
 0x424   : > { %v1616_v54 = vadd.f32 %v12131_v39, %v1587_v10  ;;  %v1755_v27 = vadd.f32 %v12132_v35, %v1726_v19  ;;  %v2421_v12 = vadd.f32 %v12133_v33, %v2392_v1  ;;  %v1070_v34 = vadd.f32 %v12134_v60, %v1041_v59  ;;  %v12138_v37 = vld [vmem:[#allocation84_spill] sm:$0xff]  ;;  %v12142_v30 = vld [vmem:[#allocation18_spill] sm:$0xff]  ;;  %v12143_v25 = vld [vmem:[#allocation21_spill] sm:$0xff] }
 0x425   : > { %v1047_v36 = vadd.f32 %v12135_v61, %v1018_v52  ;;  %v1561_v41 = vadd.f32 %v12136_v57, %v1532_v5  ;;  %v2560_v9 = vadd.f32 %v12137_v8, %v2531_v53  ;;  %v1700_v22 = vadd.f32 %v12138_v37, %v1671_v21  ;;  %v12140_v44 = vld [vmem:[#allocation168_spill] sm:$0xff]  ;;  %v12145_v16 = vld [vmem:[#allocation187_spill] sm:$0xff]  ;;  %v12146_v53 = vld [vmem:[#allocation86_spill] sm:$0xff] }
 0x426   : > { %v11426_v38 = vpop.f32.mrf.mxu1  ;;  %v1784_v51 = vadd.f32 %v12139_v13, %v1755_v27  ;;  %v2366_v26 = vadd.f32 %v10919_v2, %v12140_v44  ;;  %v12141_v19 = vld [vmem:[#allocation176_spill] sm:$0xff]  ;;  %v1021_v24 = vadd.f32 %v12142_v30, %v992_v6  ;;  %v1099_v48 = vadd.f32 %v12143_v25, %v1070_v34  ;;  %v12147_v21 = vld [vmem:[#allocation97_spill] sm:$0xff]  ;;  %v12148_v1 = vld [vmem:[#allocation178_spill] sm:$0xff] }
 0x427   : > { %v2505_v0 = vadd.f32 %v12141_v19, %v2476_v4  ;;  %v12144_v59 = vld [vmem:[#allocation24_spill] sm:$0xff]  ;;  %v2589_v10 = vadd.f32 %v12145_v16, %v2560_v9  ;;  %v1645_v17 = vadd.f32 %v12146_v53, %v1616_v54  ;;  %v1729_v45 = vadd.f32 %v12147_v21, %v1700_v22  ;;  %v12149_v56 = vld [vmem:[#allocation189_spill] sm:$0xff]  ;;  %v12152_v39 = vld [vmem:[#allocation31_spill] sm:$0xff] }
 0x428   : > { %v1073_v23 = vadd.f32 %v12144_v59, %v1044_v14  ;;  %v2450_v18 = vadd.f32 %v12148_v1, %v2421_v12  ;;  %v12150_v4 = vld [vmem:[#allocation25_spill] sm:$0xff]  ;;  %v12151_v6 = vld [vmem:[#allocation28_spill] sm:$0xff]  ;;  %v1050_v14 = vadd.f32 %v12152_v39, %v1021_v24  ;;  %v12154_v33 = vld [vmem:[#allocation87_spill] sm:$0xff] }
 0x429   : > { %v11434_v29 = vpop.f32.mrf.mxu2  ;;  %v2534_v2 = vadd.f32 %v12149_v56, %v2505_v0  ;;  %v1076_v47 = vadd.f32 %v12151_v6, %v1047_v36  ;;  %v12153_v35 = vld [vmem:[#allocation77_spill] sm:$0xff]  ;;  %v1674_v60 = vadd.f32 %v12154_v33, %v1645_v17  ;;  %v12155_v34 = vld [vmem:[#allocation96_spill] sm:$0xff]  ;;  %v12157_v8 = vld [vmem:[#allocation179_spill] sm:$0xff] }
 0x42a   : > { %v1102_v49 = vadd.f32 %v12150_v4, %v1073_v23  ;;  %v1590_v27 = vadd.f32 %v12153_v35, %v1561_v41  ;;  %v1813_v54 = vadd.f32 %v12155_v34, %v1784_v51  ;;  %v12156_v61 = vld [vmem:[#allocation169_spill] sm:$0xff]  ;;  %v2479_v12 = vadd.f32 %v12157_v8, %v2450_v18  ;;  %v12158_v9 = vld [vmem:[#allocation22_spill] sm:$0xff]  ;;  %v12161_v0 = vld [vmem:[#allocation188_spill] sm:$0xff] }
 0x42b   : > { %v2395_v57 = vadd.f32 %v12156_v61, %v2366_v26  ;;  %v1128_v37 = vadd.f32 %v12158_v9, %v1099_v48  ;;  %v12159_v22 = vld [vmem:[#allocation29_spill] sm:$0xff]  ;;  %v2618_v36 = vadd.f32 %v12161_v0, %v2589_v10  ;;  %v12162_v24 = vld [vmem:[#allocation98_spill] sm:$0xff]  ;;  %v12167_v21 = vld [vmem:[#allocation32_spill] sm:$0xff] }
 0x42c   : > { %v11445_v11 = vpop.f32.mrf.mxu3  ;;  %v1105_v13 = vadd.f32 %v12159_v22, %v1076_v47  ;;  %v12160_v44 = vld [vmem:[#allocation89_spill] sm:$0xff]  ;;  %v1758_v41 = vadd.f32 %v12162_v24, %v1729_v45  ;;  %v12165_v16 = vld [vmem:[#allocation190_spill] sm:$0xff]  ;;  %v1079_v48 = vadd.f32 %v12167_v21, %v1050_v14  ;;  %v12168_v1 = vld [vmem:[#allocation35_spill] sm:$0xff] }
 0x42d   : > { %v11448_v50 = vpop.f32.mrf.mxu0  ;;  %v1619_v19 = vadd.f32 %v12160_v44, %v1590_v27  ;;  %v12163_v25 = vld [vmem:[#allocation109_spill] sm:$0xff]  ;;  %v2563_v26 = vadd.f32 %v12165_v16, %v2534_v2  ;;  %v12166_v53 = vld [vmem:[#allocation26_spill] sm:$0xff]  ;;  %v1157_v18 = vadd.f32 %v12168_v1, %v1128_v37  ;;  %v12170_v6 = vld [vmem:[#allocation88_spill] sm:$0xff] }
 0x42e   : > { %v1842_v59 = vadd.f32 %v12163_v25, %v1813_v54  ;;  %v12164_v23 = vld [vmem:[#allocation181_spill] sm:$0xff]  ;;  %v1131_v17 = vadd.f32 %v12166_v53, %v1102_v49  ;;  %v1703_v10 = vadd.f32 %v12170_v6, %v1674_v60  ;;  %v12171_v47 = vld [vmem:[#allocation99_spill] sm:$0xff]  ;;  %v12172_v35 = vld [vmem:[#allocation180_spill] sm:$0xff] }
 0x42f   : > { %v2424_v51 = vadd.f32 %v12164_v23, %v2395_v57  ;;  %v12169_v56 = vld [vmem:[#allocation201_spill] sm:$0xff]  ;;  %v1787_v39 = vadd.f32 %v12171_v47, %v1758_v41  ;;  %v2508_v45 = vadd.f32 %v12172_v35, %v2479_v12  ;;  %v12173_v27 = vld [vmem:[#allocation191_spill] sm:$0xff]  ;;  %v12174_v54 = vld [vmem:[#allocation30_spill] sm:$0xff] }
 0x430   : > { %v11459_v28 = vpop.f32.mrf.mxu1  ;;  %v2647_v4 = vadd.f32 %v12169_v56, %v2618_v36  ;;  %v2592_v33 = vadd.f32 %v12173_v27, %v2563_v26  ;;  %v1134_v2 = vadd.f32 %v12174_v54, %v1105_v13  ;;  %v12175_v61 = vld [vmem:[#allocation33_spill] sm:$0xff]  ;;  %v12176_v57 = vld [vmem:[#allocation39_spill] sm:$0xff]  ;;  %v12177_v8 = vld [vmem:[#allocation90_spill] sm:$0xff] }
 0x431   : > { %v1108_v49 = vadd.f32 %v12175_v61, %v1079_v48  ;;  %v1160_v14 = vadd.f32 %v12176_v57, %v1131_v17  ;;  %v1648_v9 = vadd.f32 %v12177_v8, %v1619_v19  ;;  %v12178_v37 = vld [vmem:[#allocation101_spill] sm:$0xff]  ;;  %v12179_v44 = vld [vmem:[#allocation110_spill] sm:$0xff]  ;;  %v12182_v41 = vld [vmem:[#allocation36_spill] sm:$0xff] }
 0x432   : > { %v1732_v22 = vadd.f32 %v12178_v37, %v1703_v10  ;;  %v1871_v60 = vadd.f32 %v12179_v44, %v1842_v59  ;;  %v12180_v0 = vld [vmem:[#allocation182_spill] sm:$0xff]  ;;  %v12181_v24 = vld [vmem:[#allocation193_spill] sm:$0xff]  ;;  %v1186_v25 = vadd.f32 %v12182_v41, %v1157_v18  ;;  %v12183_v23 = vld [vmem:[#allocation43_spill] sm:$0xff] }
 0x433   : > { %v11471_v40 = vpop.f32.mrf.mxu2  ;;  %v2453_v36 = vadd.f32 %v12180_v0, %v2424_v51  ;;  %v2537_v12 = vadd.f32 %v12181_v24, %v2508_v45  ;;  %v1163_v16 = vadd.f32 %v12183_v23, %v1134_v2  ;;  %v12184_v26 = vld [vmem:[#allocation91_spill] sm:$0xff]  ;;  %v12185_v53 = vld [vmem:[#allocation202_spill] sm:$0xff]  ;;  %v12186_v17 = vld [vmem:[#allocation100_spill] sm:$0xff] }
 0x434   : > { %v1677_v13 = vadd.f32 %v12184_v26, %v1648_v9  ;;  %v2676_v21 = vadd.f32 %v12185_v53, %v2647_v4  ;;  %v1816_v19 = vadd.f32 %v12186_v17, %v1787_v39  ;;  %v12187_v1 = vld [vmem:[#allocation111_spill] sm:$0xff]  ;;  %v12189_v10 = vld [vmem:[#allocation192_spill] sm:$0xff]  ;;  %v12190_v35 = vld [vmem:[#allocation34_spill] sm:$0xff] }
 0x435   : > { %v1900_v56 = vadd.f32 %v12187_v1, %v1871_v60  ;;  %v12188_v6 = vld [vmem:[#allocation183_spill] sm:$0xff]  ;;  %v2621_v51 = vadd.f32 %v12189_v10, %v2592_v33  ;;  %v1137_v18 = vadd.f32 %v12190_v35, %v1108_v49  ;;  %v12191_v45 = vld [vmem:[#allocation37_spill] sm:$0xff]  ;;  %v12192_v54 = vld [vmem:[#allocation40_spill] sm:$0xff] }
 0x436   : > { %v11481_v58 = vpop.f32.mrf.mxu3  ;;  %v2482_v59 = vadd.f32 %v12188_v6, %v2453_v36  ;;  %v1215_v27 = vadd.f32 %v12191_v45, %v1186_v25  ;;  %v1189_v2 = vadd.f32 %v12192_v54, %v1160_v14  ;;  %v12193_v61 = vld [vmem:[#allocation203_spill] sm:$0xff]  ;;  %v12194_v57 = vld [vmem:[#allocation102_spill] sm:$0xff]  ;;  %v12195_v9 = vld [vmem:[#allocation113_spill] sm:$0xff] }
 0x437   : > { %v11487_v63 = vpop.f32.mrf.mxu0  ;;  %v2705_v4 = vadd.f32 %v12193_v61, %v2676_v21  ;;  %v1761_v8 = vadd.f32 %v12194_v57, %v1732_v22  ;;  %v1845_v39 = vadd.f32 %v12195_v9, %v1816_v19  ;;  %v12196_v37 = vld [vmem:[#allocation194_spill] sm:$0xff]  ;;  %v12197_v60 = vld [vmem:[#allocation205_spill] sm:$0xff]  ;;  %v12199_v24 = vld [vmem:[#allocation44_spill] sm:$0xff] }
 0x438   : > { %v2566_v44 = vadd.f32 %v12196_v37, %v2537_v12  ;;  %v2650_v0 = vadd.f32 %v12197_v60, %v2621_v51  ;;  %v12198_v36 = vld [vmem:[#allocation41_spill] sm:$0xff]  ;;  %v1192_v41 = vadd.f32 %v12199_v24, %v1163_v16  ;;  %v12200_v23 = vld [vmem:[#allocation47_spill] sm:$0xff]  ;;  %v12201_v26 = vld [vmem:[#allocation92_spill] sm:$0xff] }
 0x439   : > { %v1218_v33 = vadd.f32 %v12198_v36, %v1189_v2  ;;  %v1166_v49 = vadd.f32 %v12200_v23, %v1137_v18  ;;  %v1706_v25 = vadd.f32 %v12201_v26, %v1677_v13  ;;  %v12202_v14 = vld [vmem:[#allocation103_spill] sm:$0xff]  ;;  %v12203_v17 = vld [vmem:[#allocation112_spill] sm:$0xff]  ;;  %v12206_v10 = vld [vmem:[#allocation38_spill] sm:$0xff]  ;;  %v3564_v26 = vadd.f32 %v11398_v43, %v11376_v15 }
 0x43a   : > { %v11501_v20 = vpop.f32.mrf.mxu1  ;;  %v1790_v21 = vadd.f32 %v12202_v14, %v1761_v8  ;;  %v1929_v22 = vadd.f32 %v12203_v17, %v1900_v56  ;;  %v12204_v1 = vld [vmem:[#allocation184_spill] sm:$0xff]  ;;  %v12205_v6 = vld [vmem:[#allocation195_spill] sm:$0xff]  ;;  %v1244_v51 = vadd.f32 %v12206_v10, %v1215_v27  ;;  %v12207_v35 = vld [vmem:[#allocation45_spill] sm:$0xff] }
 0x43b   : > { %v2511_v19 = vadd.f32 %v12204_v1, %v2482_v59  ;;  %v2595_v12 = vadd.f32 %v12205_v6, %v2566_v44  ;;  %v1221_v45 = vadd.f32 %v12207_v35, %v1192_v41  ;;  %v12208_v54 = vld [vmem:[#allocation105_spill] sm:$0xff]  ;;  %v12209_v2 = vld [vmem:[#allocation204_spill] sm:$0xff]  ;;  %v12210_v61 = vld [vmem:[#allocation114_spill] sm:$0xff] }
 0x43c   : > { %v1735_v16 = vadd.f32 %v12208_v54, %v1706_v25  ;;  %v2734_v18 = vadd.f32 %v12209_v2, %v2705_v4  ;;  %v1874_v13 = vadd.f32 %v12210_v61, %v1845_v39  ;;  %v12211_v57 = vld [vmem:[#allocation125_spill] sm:$0xff]  ;;  %v12213_v60 = vld [vmem:[#allocation206_spill] sm:$0xff]  ;;  %v12215_v24 = vld [vmem:[#allocation48_spill] sm:$0xff] }
 0x43d   : > { %v11513_v62 = vpop.f32.mrf.mxu2  ;;  %v1958_v9 = vadd.f32 %v12211_v57, %v1929_v22  ;;  %v12212_v37 = vld [vmem:[#allocation197_spill] sm:$0xff]  ;;  %v2679_v56 = vadd.f32 %v12213_v60, %v2650_v0  ;;  %v12214_v59 = vld [vmem:[#allocation42_spill] sm:$0xff]  ;;  %v1195_v27 = vadd.f32 %v12215_v24, %v1166_v49  ;;  %v12217_v4 = vld [vmem:[#allocation104_spill] sm:$0xff] }
 0x43e   : > { %v2540_v8 = vadd.f32 %v12212_v37, %v2511_v19  ;;  %v1247_v44 = vadd.f32 %v12214_v59, %v1218_v33  ;;  %v12216_v23 = vld [vmem:[#allocation217_spill] sm:$0xff]  ;;  %v1819_v25 = vadd.f32 %v12217_v4, %v1790_v21  ;;  %v12218_v39 = vld [vmem:[#allocation115_spill] sm:$0xff]  ;;  %v12219_v17 = vld [vmem:[#allocation196_spill] sm:$0xff] }
 0x43f   : > { %v2763_v41 = vadd.f32 %v12216_v23, %v2734_v18  ;;  %v1903_v14 = vadd.f32 %v12218_v39, %v1874_v13  ;;  %v2624_v22 = vadd.f32 %v12219_v17, %v2595_v12  ;;  %v12220_v1 = vld [vmem:[#allocation207_spill] sm:$0xff]  ;;  %v12221_v0 = vld [vmem:[#allocation46_spill] sm:$0xff]  ;;  %v12222_v10 = vld [vmem:[#allocation49_spill] sm:$0xff] }
 0x440   : > { %v11528_v5 = vpop.f32.mrf.mxu3  ;;  %v2708_v19 = vadd.f32 %v12220_v1, %v2679_v56  ;;  %v1250_v6 = vadd.f32 %v12221_v0, %v1221_v45  ;;  %v1224_v35 = vadd.f32 %v12222_v10, %v1195_v27  ;;  %v12223_v33 = vld [vmem:[#allocation51_spill] sm:$0xff]  ;;  %v12224_v49 = vld [vmem:[#allocation106_spill] sm:$0xff]  ;;  %v12225_v61 = vld [vmem:[#allocation117_spill] sm:$0xff] }
 0x441   : > { %v11534_v52 = vpop.f32.mrf.mxu0  ;;  %v1273_v54 = vadd.f32 %v12223_v33, %v1244_v51  ;;  %v1764_v2 = vadd.f32 %v12224_v49, %v1735_v16  ;;  %v1848_v15 = vadd.f32 %v12225_v61, %v1819_v25  ;;  %v12226_v43 = vld [vmem:[#allocation126_spill] sm:$0xff]  ;;  %v12228_v37 = vld [vmem:[#allocation209_spill] sm:$0xff]  ;;  %v12229_v56 = vld [vmem:[#allocation55_spill] sm:$0xff]  ;;  %v3593_v16 = vadd.f32 %v11405_v7, %v3564_v26 }
 0x442   : > { %v1987_v21 = vadd.f32 %v12226_v43, %v1958_v9  ;;  %v12227_v57 = vld [vmem:[#allocation198_spill] sm:$0xff]  ;;  %v2653_v12 = vadd.f32 %v12228_v37, %v2624_v22  ;;  %v1276_v45 = vadd.f32 %v12229_v56, %v1247_v44  ;;  %v12230_v59 = vld [vmem:[#allocation107_spill] sm:$0xff]  ;;  %v12232_v23 = vld [vmem:[#allocation116_spill] sm:$0xff] }
 0x443   : > { %v2569_v13 = vadd.f32 %v12227_v57, %v2540_v8  ;;  %v1793_v24 = vadd.f32 %v12230_v59, %v1764_v2  ;;  %v12231_v27 = vld [vmem:[#allocation218_spill] sm:$0xff]  ;;  %v1932_v4 = vadd.f32 %v12232_v23, %v1903_v14  ;;  %v12233_v39 = vld [vmem:[#allocation127_spill] sm:$0xff]  ;;  %v12235_v1 = vld [vmem:[#allocation208_spill] sm:$0xff]  ;;  %v3622_v2 = vadd.f32 %v11407_v31, %v3593_v16 }
 0x444   : > { %v11548_v30 = vpop.f32.mrf.mxu1  ;;  %v2792_v51 = vadd.f32 %v12231_v27, %v2763_v41  ;;  %v2016_v25 = vadd.f32 %v12233_v39, %v1987_v21  ;;  %v12234_v17 = vld [vmem:[#allocation199_spill] sm:$0xff]  ;;  %v2737_v8 = vadd.f32 %v12235_v1, %v2708_v19  ;;  %v12236_v0 = vld [vmem:[#allocation50_spill] sm:$0xff]  ;;  %v12237_v10 = vld [vmem:[#allocation52_spill] sm:$0xff]  ;;  %v3567_v27 = vadd.f32 %v11419_v3, %v11383_v46 }
 0x445   : > { %v2598_v9 = vadd.f32 %v12234_v17, %v2569_v13  ;;  %v11642_v22 = vadd.f32 %v12236_v0, %v1224_v35  ;;  %v1302_v33 = vadd.f32 %v12237_v10, %v1273_v54  ;;  %v12238_v44 = vld [vmem:[#allocation219_spill] sm:$0xff]  ;;  %v12239_v7 = vld [vmem:[#allocation118_spill] sm:$0xff]  ;;  %v12240_v14 = vld [vmem:[#allocation129_spill] sm:$0xff] }
 0x446   : > { %v2821_v49 = vadd.f32 %v12238_v44, %v2792_v51  ;;  %v1877_v26 = vadd.f32 %v12239_v7, %v1848_v15  ;;  %v1961_v61 = vadd.f32 %v12240_v14, %v1932_v4  ;;  %v12241_v43 = vld [vmem:[#allocation210_spill] sm:$0xff]  ;;  %v12242_v57 = vld [vmem:[#allocation221_spill] sm:$0xff]  ;;  %v12244_v35 = vld [vmem:[#allocation56_spill] sm:$0xff] }
 0x447   : > { %v11562_v34 = vpop.f32.mrf.mxu2  ;;  %v2682_v21 = vadd.f32 %v12241_v43, %v2653_v12  ;;  %v2766_v13 = vadd.f32 %v12242_v57, %v2737_v8  ;;  %v12243_v19 = vld [vmem:[#allocation53_spill] sm:$0xff]  ;;  %v1305_v56 = vadd.f32 %v12244_v35, %v1276_v45  ;;  %v12245_v59 = vld [vmem:[#allocation108_spill] sm:$0xff]  ;;  %v12246_v31 = vld [vmem:[#allocation119_spill] sm:$0xff]  ;;  %v3596_v35 = vadd.f32 %v11426_v38, %v3567_v27 }
 0x448   : > { %v1331_v37 = vadd.f32 %v12243_v19, %v1302_v33  ;;  %v1822_v54 = vadd.f32 %v12245_v59, %v1793_v24  ;;  %v1906_v51 = vadd.f32 %v12246_v31, %v1877_v26  ;;  %v12247_v16 = vld [vmem:[#allocation128_spill] sm:$0xff]  ;;  %v12249_v4 = vld [vmem:[#allocation211_spill] sm:$0xff]  ;;  %v12250_v1 = vld [vmem:[#allocation57_spill] sm:$0xff]  ;;  %v3651_v24 = vadd.f32 %v11415_v55, %v3622_v2 }
 0x449   : > { %v2045_v23 = vadd.f32 %v12247_v16, %v2016_v25  ;;  %v12248_v15 = vld [vmem:[#allocation200_spill] sm:$0xff]  ;;  %v2711_v17 = vadd.f32 %v12249_v4, %v2682_v21  ;;  %v1334_v8 = vadd.f32 %v12250_v1, %v1305_v56  ;;  %v12251_v0 = vld [vmem:[#allocation121_spill] sm:$0xff]  ;;  %v12253_v44 = vld [vmem:[#allocation130_spill] sm:$0xff] }
 0x44a   : > { %v11576_v48 = vpop.f32.mrf.mxu3  ;;  %v2627_v39 = vadd.f32 %v12248_v15, %v2598_v9  ;;  %v1851_v10 = vadd.f32 %v12251_v0, %v1822_v54  ;;  %v12252_v45 = vld [vmem:[#allocation220_spill] sm:$0xff]  ;;  %v1990_v46 = vadd.f32 %v12253_v44, %v1961_v61  ;;  %v12254_v3 = vld [vmem:[#allocation141_spill] sm:$0xff]  ;;  %v12256_v14 = vld [vmem:[#allocation222_spill] sm:$0xff]  ;;  %v3680_v56 = vadd.f32 %v11534_v52, %v3651_v24 }
 0x44b   : > { %v11582_v47 = vpop.f32.mrf.mxu0  ;;  %v2850_v33 = vadd.f32 %v12252_v45, %v2821_v49  ;;  %v2074_v7 = vadd.f32 %v12254_v3, %v2045_v23  ;;  %v12255_v26 = vld [vmem:[#allocation213_spill] sm:$0xff]  ;;  %v2795_v9 = vadd.f32 %v12256_v14, %v2766_v13  ;;  %v12257_v43 = vld [vmem:[#allocation54_spill] sm:$0xff]  ;;  %v12259_v49 = vld [vmem:[#allocation120_spill] sm:$0xff]  ;;  %v3625_v52 = vadd.f32 %v11434_v29, %v3596_v35 }
 0x44c   : > { %v2656_v25 = vadd.f32 %v12255_v26, %v2627_v39  ;;  %v1360_v21 = vadd.f32 %v12257_v43, %v1331_v37  ;;  %v12258_v57 = vld [vmem:[#allocation233_spill] sm:$0xff]  ;;  %v1935_v55 = vadd.f32 %v12259_v49, %v1906_v51  ;;  %v12260_v2 = vld [vmem:[#allocation131_spill] sm:$0xff]  ;;  %v12261_v54 = vld [vmem:[#allocation212_spill] sm:$0xff] }
 0x44d   : > { %v2879_v19 = vadd.f32 %v12258_v57, %v2850_v33  ;;  %v2019_v61 = vadd.f32 %v12260_v2, %v1990_v46  ;;  %v2740_v31 = vadd.f32 %v12261_v54, %v2711_v17  ;;  %v12262_v16 = vld [vmem:[#allocation223_spill] sm:$0xff]  ;;  %v12264_v39 = vld [vmem:[#allocation58_spill] sm:$0xff]  ;;  %v12266_v1 = vld [vmem:[#allocation133_spill] sm:$0xff] }
 0x44e   : > { %v11596_v53 = vpop.f32.mrf.mxu1  ;;  %v2824_v23 = vadd.f32 %v12262_v16, %v2795_v9  ;;  %v12263_v13 = vld [vmem:[#allocation59_spill] sm:$0xff]  ;;  %v11686_v4 = vadd.f32 %v12264_v39, %v1334_v8  ;;  %v12265_v38 = vld [vmem:[#allocation122_spill] sm:$0xff]  ;;  %v1964_v0 = vadd.f32 %v12266_v1, %v1935_v55  ;;  %v12269_v17 = vld [vmem:[#allocation225_spill] sm:$0xff]  ;;  %v3709_v8 = vadd.f32 %v11548_v30, %v3680_v56 }
 0x44f   : > { %v1279_v37 = vadd.f32 %v12263_v13, %v1250_v6  ;;  %v1880_v27 = vadd.f32 %v12265_v38, %v1851_v10  ;;  %v12267_v51 = vld [vmem:[#allocation142_spill] sm:$0xff]  ;;  %v2769_v44 = vadd.f32 %v12269_v17, %v2740_v31  ;;  %v12270_v46 = vld [vmem:[#allocation123_spill] sm:$0xff]  ;;  %v3570_v6 = vadd.f32 %v11448_v50, %v11386_v32  ;;  %v12272_v29 = vld [vmem:[#allocation132_spill] sm:$0xff] }
 0x450   : > { %v2103_v45 = vadd.f32 %v12267_v51, %v2074_v7  ;;  %v12268_v33 = vld [vmem:[#allocation214_spill] sm:$0xff]  ;;  %v2048_v9 = vadd.f32 %v12272_v29, %v2019_v61  ;;  %v12273_v43 = vld [vmem:[#allocation143_spill] sm:$0xff]  ;;  %v12276_v55 = vld [vmem:[#allocation60_spill] sm:$0xff]  ;;  %v3654_v31 = vadd.f32 %v11445_v11, %v3625_v52  ;;  %v3738_v32 = vadd.f32 %v11562_v34, %v3709_v8 }
 0x451   : > { %v11610_v36 = vpop.f32.mrf.mxu2  ;;  %v2685_v24 = vadd.f32 %v12268_v33, %v2656_v25  ;;  %v1909_v3 = vadd.f32 %v12270_v46, %v1880_v27  ;;  %v12271_v26 = vld [vmem:[#allocation234_spill] sm:$0xff]  ;;  %v12274_v7 = vld [vmem:[#allocation215_spill] sm:$0xff]  ;;  %v12275_v25 = vld [vmem:[#allocation224_spill] sm:$0xff]  ;;  %v11706_v2 = vadd.f32 %v12276_v55, %v1279_v37 }
 0x452   : > { %v2908_v14 = vadd.f32 %v12271_v26, %v2879_v19  ;;  %v2132_v57 = vadd.f32 %v12273_v43, %v2103_v45  ;;  %v2853_v49 = vadd.f32 %v12275_v25, %v2824_v23  ;;  %v12277_v54 = vld [vmem:[#allocation235_spill] sm:$0xff]  ;;  %v12278_v50 = vld [vmem:[#allocation134_spill] sm:$0xff]  ;;  %v12279_v56 = vld [vmem:[#allocation145_spill] sm:$0xff]  ;;  %v3599_v45 = vadd.f32 %v11459_v28, %v3570_v6 }
 0x453   : > { %v2714_v35 = vadd.f32 %v12274_v7, %v2685_v24  ;;  %v1993_v30 = vadd.f32 %v12278_v50, %v1964_v0  ;;  %v2077_v16 = vadd.f32 %v12279_v56, %v2048_v9  ;;  %v12280_v61 = vld [vmem:[#allocation226_spill] sm:$0xff]  ;;  %v12281_v39 = vld [vmem:[#allocation237_spill] sm:$0xff]  ;;  %v12282_v23 = vld [vmem:[#allocation67_spill] sm:$0xff]  ;;  %v3683_v11 = vadd.f32 %v11582_v47, %v3654_v31 }
 0x454   : > { %v11625_v18 = vpop.f32.mrf.mxu3  ;;  %v2937_v19 = vadd.f32 %v12277_v54, %v2908_v14  ;;  %v2798_v13 = vadd.f32 %v12280_v61, %v2769_v44  ;;  %v2882_v38 = vadd.f32 %v12281_v39, %v2853_v49  ;;  %v11718_v1 = vadd.f32 %v12282_v23, %v1360_v21  ;;  %v12283_v37 = vld [vmem:[#allocation124_spill] sm:$0xff]  ;;  %v12284_v34 = vld [vmem:[#allocation135_spill] sm:$0xff]  ;;  %v12288_v26 = vld [vmem:[#allocation137_spill] sm:$0xff] }
 0x455   : > { %v11631_v60 = vpop.f32.mrf.mxu0  ;;  %v1938_v51 = vadd.f32 %v12283_v37, %v1909_v3  ;;  %v2022_v52 = vadd.f32 %v12284_v34, %v1993_v30  ;;  %v12285_v0 = vld [vmem:[#allocation144_spill] sm:$0xff]  ;;  %v12287_v44 = vld [vmem:[#allocation227_spill] sm:$0xff]  ;;  %v3628_v21 = vadd.f32 %v11471_v40, %v3599_v45  ;;  %v3767_v3 = vadd.f32 %v11576_v48, %v3738_v32  ;;  %v12290_v28 = vld [vmem:[#allocation146_spill] sm:$0xff] }
 0x456   : > { %v2161_v33 = vadd.f32 %v12285_v0, %v2132_v57  ;;  %v12286_v24 = vld [vmem:[#allocation216_spill] sm:$0xff]  ;;  %v2827_v46 = vadd.f32 %v12287_v44, %v2798_v13  ;;  %v2106_v47 = vadd.f32 %v12290_v28, %v2077_v16  ;;  %v12291_v6 = vld [vmem:[#allocation157_spill] sm:$0xff]  ;;  %v12293_v25 = vld [vmem:[#allocation238_spill] sm:$0xff]  ;;  %v3712_v40 = vadd.f32 %v11596_v53, %v3683_v11 }
 0x457   : > { %v2743_v17 = vadd.f32 %v12286_v24, %v2714_v35  ;;  %v1967_v14 = vadd.f32 %v12288_v26, %v1938_v51  ;;  %v12289_v8 = vld [vmem:[#allocation236_spill] sm:$0xff]  ;;  %v12292_v7 = vld [vmem:[#allocation229_spill] sm:$0xff]  ;;  %v2911_v35 = vadd.f32 %v12293_v25, %v2882_v38  ;;  %v12296_v50 = vld [vmem:[#allocation147_spill] sm:$0xff]  ;;  %v1400_v38 = vmax.f32 %v11718_v1, 0.0 }
 0x458   : > { %v11647_v41 = vpop.f32.mrf.mxu1  ;;  %v2966_v29 = vadd.f32 %v12289_v8, %v2937_v19  ;;  %v2190_v43 = vadd.f32 %v12291_v6, %v2161_v33  ;;  %v12294_v55 = vld [vmem:[#allocation249_spill] sm:$0xff]  ;;  %v3573_v19 = vadd.f32 %v11487_v63, %v11396_v42  ;;  %v12295_v48 = vld [vmem:[#allocation136_spill] sm:$0xff]  ;;  %v2135_v30 = vadd.f32 %v12296_v50, %v2106_v47  ;;  %v12298_v61 = vld [vmem:[#allocation239_spill] sm:$0xff] }
 0x459   : > { %v2772_v57 = vadd.f32 %v12292_v7, %v2743_v17  ;;  %v2051_v32 = vadd.f32 %v12295_v48, %v2022_v52  ;;  %v12297_v56 = vld [vmem:[#allocation228_spill] sm:$0xff]  ;;  %v2940_v13 = vadd.f32 %v12298_v61, %v2911_v35  ;;  %v12299_v23 = vld [vmem:[#allocation138_spill] sm:$0xff]  ;;  %v3657_v51 = vadd.f32 %v11481_v58, %v3628_v21  ;;  %v12300_v63 = vld [vmem:[#allocation149_spill] sm:$0xff] }
 0x45a   : > { %v2995_v54 = vadd.f32 %v12294_v55, %v2966_v29  ;;  %v2856_v16 = vadd.f32 %v12297_v56, %v2827_v46  ;;  %v1996_v37 = vadd.f32 %v12299_v23, %v1967_v14  ;;  %v3741_v42 = vadd.f32 %v11610_v36, %v3712_v40  ;;  %v12301_v45 = vld [vmem:[#allocation158_spill] sm:$0xff]  ;;  %v12303_v0 = vld [vmem:[#allocation241_spill] sm:$0xff]  ;;  %v12305_v26 = vld [vmem:[#allocation139_spill] sm:$0xff] }
 0x45b   : > { %v11662_v12 = vpop.f32.mrf.mxu2  ;;  %v2080_v53 = vadd.f32 %v12300_v63, %v2051_v32  ;;  %v2219_v11 = vadd.f32 %v12301_v45, %v2190_v43  ;;  %v12302_v34 = vld [vmem:[#allocation230_spill] sm:$0xff]  ;;  %v3602_v44 = vadd.f32 %v11501_v20, %v3573_v19  ;;  %v3686_v1 = vadd.f32 %v11631_v60, %v3657_v51  ;;  %v12306_v58 = vld [vmem:[#allocation148_spill] sm:$0xff]  ;;  %v12307_v36 = vld [vmem:[#allocation231_spill] sm:$0xff] }
 0x45c   : > { %v2801_v52 = vadd.f32 %v12302_v34, %v2772_v57  ;;  %v2885_v33 = vadd.f32 %v12303_v0, %v2856_v16  ;;  %v12304_v24 = vld [vmem:[#allocation250_spill] sm:$0xff]  ;;  %v2025_v14 = vadd.f32 %v12305_v26, %v1996_v37  ;;  %v2164_v8 = vadd.f32 %v12306_v58, %v2135_v30  ;;  %v12308_v21 = vld [vmem:[#allocation240_spill] sm:$0xff]  ;;  %v12309_v47 = vld [vmem:[#allocation251_spill] sm:$0xff] }
 0x45d   : > { %v3024_v17 = vadd.f32 %v12304_v24, %v2995_v54  ;;  %v3631_v43 = vadd.f32 %v11513_v62, %v3602_v44  ;;  %v3770_v7 = vadd.f32 %v11625_v18, %v3741_v42  ;;  %v12310_v20 = vld [vmem:[#allocation150_spill] sm:$0xff]  ;;  %v2230_v60 = vmax.f32 %v2219_v11, 0.0  ;;  %v12311_v35 = vld [vmem:[#allocation159_spill] sm:$0xff]  ;;  %v12314_v62 = vld [vmem:[#allocation140_spill] sm:$0xff] }
 0x45e   : > { %v11676_v59 = vpop.f32.mrf.mxu3  ;;  %v2830_v29 = vadd.f32 %v12307_v36, %v2801_v52  ;;  %v2109_v25 = vadd.f32 %v12310_v20, %v2080_v53  ;;  %v12312_v55 = vld [vmem:[#allocation242_spill] sm:$0xff]  ;;  %v3715_v32 = vadd.f32 %v11647_v41, %v3686_v1  ;;  %v2054_v56 = vadd.f32 %v12314_v62, %v2025_v14  ;;  %v12315_v18 = vld [vmem:[#allocation151_spill] sm:$0xff]  ;;  %v12316_v61 = vld [vmem:[#allocation232_spill] sm:$0xff] }
 0x45f   : > { %v11682_v15 = vpop.f32.mrf.mxu0  ;;  %v3053_v6 = vadd.f32 %v12309_v47, %v3024_v17  ;;  %v2914_v54 = vadd.f32 %v12312_v55, %v2885_v33  ;;  %v3660_v42 = vadd.f32 %v11528_v5, %v3631_v43  ;;  %v12318_v45 = vld [vmem:[#allocation153_spill] sm:$0xff]  ;;  %v2234_v11 = vmax.f32 %v1400_v38, %v2230_v60  ;;  %v12319_v34 = vld [vmem:[#allocation160_spill] sm:$0xff]  ;;  %v12327_v47 = vld [vmem:[#allocation154_spill] sm:$0xff] }
 0x460   : > { %v2138_v16 = vadd.f32 %v12315_v18, %v2109_v25  ;;  %v3744_v63 = vadd.f32 %v11662_v12, %v3715_v32  ;;  %v2083_v41 = vadd.f32 %v12318_v45, %v2054_v56  ;;  %v12320_v0 = vld [vmem:[#allocation245_spill] sm:$0xff]  ;;  %v12323_v12 = vld [vmem:[#allocation68_spill] sm:$0xff]  ;;  %v12328_v43 = vld [vmem:[#allocation162_spill] sm:$0xff] }
 0x461   : > { %v3064_v51 = vmax.f32 %v3053_v6, 0.0  ;;  %v12321_v24 = vld [vmem:[#allocation253_spill] sm:$0xff]  ;;  %v3689_v44 = vadd.f32 %v11682_v15, %v3660_v42  ;;  %v1392_v14 = vadd.f32 %v12323_v12, %v11686_v4  ;;  %v12324_v58 = vld [vmem:[#allocation152_spill] sm:$0xff]  ;;  %v12326_v15 = vld [vmem:[#allocation254_spill] sm:$0xff] }
 0x462   : > { %v11699_v10 = vpop.f32.mrf.mxu1  ;;  %v12322_v26 = vld [vmem:[#allocation61_spill] sm:$0xff]  ;;  %v12325_v36 = vld [vmem:[#allocation244_spill] sm:$0xff]  ;;  %v2112_v6 = vadd.f32 %v12327_v47, %v2083_v41  ;;  %v12333_v32 = vld [vmem:[#allocation247_spill] sm:$0xff] }
 0x463   : > { %v1337_v5 = vadd.f32 %v12322_v26, %v11706_v2  ;;  %v3718_v55 = vadd.f32 %v11699_v10, %v3689_v44  ;;  %v1401_v62 = vmax.f32 %v1392_v14, 0.0  ;;  %v12338_v45 = vld [vmem:[#allocation70_spill] sm:$0xff] }
 0x465   : > { %v11715_v27 = vpop.f32.mrf.mxu2 }
 0x466   : > { %v3747_v18 = vadd.f32 %v11715_v27, %v3718_v55  ;;  %v12349_v55 = vld [vmem:[#allocation260_spill] sm:$0xff] }
 0x468   : > { %v11731_v9 = vpop.f32.mrf.mxu3 }
 0x469   : > { %v3795_v49 = vpop.f32.mrf.mxu0 }
 0x46a   : > { %v3796_v31 = vadd.f32 %v3795_v49, %v3767_v3  ;;  %v2969_v3 = vadd.f32 %v12308_v21, %v2940_v13  ;;  %v2193_v49 = vadd.f32 %v12311_v35, %v2164_v8  ;;  %v2859_v13 = vadd.f32 %v12316_v61, %v2830_v29  ;;  %v12330_v35 = vld [vmem:[#allocation255_spill] sm:$0xff]  ;;  %v12334_v61 = vld [vmem:[#allocation62_spill] sm:$0xff] }
 0x46b   : > { %v3824_v39 = vpop.f32.mrf.mxu1  ;;  %v2167_v8 = vadd.f32 %v12324_v58, %v2138_v16  ;;  %v12343_v58 = vld [vmem:[#allocation166_spill] sm:$0xff] }
 0x46c   : > { %v3825_v46 = vadd.f32 %v3824_v39, %v3796_v31  ;;  %v12313_v31 = vld [vmem:[#allocation252_spill] sm:$0xff]  ;;  %v12317_v39 = vld [vmem:[#allocation243_spill] sm:$0xff]  ;;  %v2222_v52 = vadd.f32 %v12319_v34, %v2193_v49  ;;  %v2888_v33 = vadd.f32 %v12320_v0, %v2859_v13  ;;  %v1366_v13 = vadd.f32 %v12334_v61, %v1337_v5 }
 0x46d   : > { %v2998_v48 = vadd.f32 %v12313_v31, %v2969_v3  ;;  %v2943_v23 = vadd.f32 %v12317_v39, %v2914_v54  ;;  %v3773_v3 = vadd.f32 %v11676_v59, %v3744_v63  ;;  %v12331_v59 = vld [vmem:[#allocation63_spill] sm:$0xff] }
 0x46e   : > { %v2231_v4 = vmax.f32 %v2222_v52, 0.0  ;;  %v12332_v31 = vld [vmem:[#allocation155_spill] sm:$0xff]  ;;  %v1395_v41 = vadd.f32 %v12338_v45, %v1366_v13  ;;  %v12340_v52 = vld [vmem:[#allocation248_spill] sm:$0xff] }
 0x46f   : > { %v3853_v28 = vpop.f32.mrf.mxu2  ;;  %v3027_v17 = vadd.f32 %v12321_v24, %v2998_v48  ;;  %v2972_v38 = vadd.f32 %v12325_v36, %v2943_v23  ;;  %v2141_v48 = vadd.f32 %v12332_v31, %v2112_v6  ;;  %v12335_v39 = vld [vmem:[#allocation163_spill] sm:$0xff]  ;;  %v12344_v36 = vld [vmem:[#allocation258_spill] sm:$0xff] }
 0x470   : > { %v3854_v57 = vadd.f32 %v3853_v28, %v3825_v46  ;;  %v2235_v23 = vmax.f32 %v1401_v62, %v2231_v4  ;;  %v12346_v4 = vld [vmem:[#allocation167_spill] sm:$0xff] }
 0x471   : > { %v3798_v19 = vpop.f32.mrf.mxu0  ;;  %v3882_v40 = vpop.f32.mrf.mxu3  ;;  %v3056_v21 = vadd.f32 %v12326_v15, %v3027_v17  ;;  %v3001_v49 = vadd.f32 %v12330_v35, %v2972_v38  ;;  %v3776_v17 = vadd.f32 %v11731_v9, %v3747_v18  ;;  %v12345_v9 = vld [vmem:[#allocation66_spill] sm:$0xff] }
 0x472   : > { %v3799_v50 = vadd.f32 %v3798_v19, %v3770_v7  ;;  %v3883_v30 = vadd.f32 %v3882_v40, %v3854_v57  ;;  %v2196_v7 = vadd.f32 %v12328_v43, %v2167_v8  ;;  %v12329_v57 = vld [vmem:[#allocation246_spill] sm:$0xff]  ;;  %v1282_v40 = vadd.f32 %v12331_v59, %v11642_v22  ;;  %v12337_v22 = vld [vmem:[#allocation64_spill] sm:$0xff] }
 0x473   : > { %v3827_v37 = vpop.f32.mrf.mxu1  ;;  %v2917_v20 = vadd.f32 %v12329_v57, %v2888_v33  ;;  %v3065_v56 = vmax.f32 %v3056_v21, 0.0  ;;  %v12341_v33 = vld [vmem:[#allocation257_spill] sm:$0xff]  ;;  %v1402_v21 = vmax.f32 %v1395_v41, 0.0  ;;  %v12348_v35 = vld [vmem:[#allocation74_spill] sm:$0xff] }
 0x474   : > { %v3894_v53 = vmax.f32 %v3883_v30, 0.0  ;;  %v3828_v46 = vadd.f32 %v3827_v37, %v3799_v50  ;;  %v2225_v10 = vadd.f32 %v12335_v39, %v2196_v7  ;;  %v12336_v37 = vld [vmem:[#allocation256_spill] sm:$0xff]  ;;  %v12347_v7 = vld [vmem:[#allocation259_spill] sm:$0xff] }
 0x475   : > { %v2946_v50 = vadd.f32 %v12333_v32, %v2917_v20 }
 0x476   : > { %v3898_v1 = vmax.f32 %v3064_v51, %v3894_v53  ;;  %v3030_v51 = vadd.f32 %v12336_v37, %v3001_v49  ;;  %v1311_v53 = vadd.f32 %v12337_v22, %v1282_v40  ;;  %v2232_v5 = vmax.f32 %v2225_v10, 0.0 }
 0x477   : > { %v3856_v29 = vpop.f32.mrf.mxu2  ;;  %v2975_v0 = vadd.f32 %v12340_v52, %v2946_v50 }
 0x478   : > { %v3902_v28 = vmax.f32 %v2234_v11, %v3898_v1  ;;  %v3857_v2 = vadd.f32 %v3856_v29, %v3828_v46  ;;  %v12339_v11 = vld [vmem:[#allocation156_spill] sm:$0xff]  ;;  %v3059_v24 = vadd.f32 %v12341_v33, %v3030_v51  ;;  %v12342_v46 = vld [vmem:[#allocation65_spill] sm:$0xff]  ;;  %v2236_v6 = vmax.f32 %v1402_v21, %v2232_v5 }
 0x479   : > { %v3801_v25 = vpop.f32.mrf.mxu0  ;;  %v3885_v60 = vpop.f32.mrf.mxu3  ;;  %v2170_v34 = vadd.f32 %v12339_v11, %v2141_v48  ;;  %v1340_v26 = vadd.f32 %v12342_v46, %v1311_v53  ;;  %v3004_v38 = vadd.f32 %v12344_v36, %v2975_v0 }
 0x47a   : > { %3906 = vst [vmem:[%s11789_s25] sm:$0xff] %v3902_v28  ;;  %v3802_v54 = vadd.f32 %v3801_v25, %v3773_v3  ;;  %v3886_v19 = vadd.f32 %v3885_v60, %v3857_v2  ;;  %v3066_v28 = vmax.f32 %v3059_v24, 0.0 }
 0x47b   : > { %v3830_v30 = vpop.f32.mrf.mxu1  ;;  %v2199_v8 = vadd.f32 %v12343_v58, %v2170_v34  ;;  %v1369_v47 = vadd.f32 %v12345_v9, %v1340_v26  ;;  %v3033_v57 = vadd.f32 %v12347_v7, %v3004_v38 }
 0x47c   : > { %v3895_v16 = vmax.f32 %v3886_v19, 0.0  ;;  %v3831_v63 = vadd.f32 %v3830_v30, %v3802_v54 }
 0x47d   : > { %v2228_v43 = vadd.f32 %v12346_v4, %v2199_v8  ;;  %v1398_v49 = vadd.f32 %v12348_v35, %v1369_v47  ;;  %v3062_v54 = vadd.f32 %v12349_v55, %v3033_v57 }
 0x47e   : > { %v3899_v42 = vmax.f32 %v3065_v56, %v3895_v16 }
 0x47f   : > { %v3859_v27 = vpop.f32.mrf.mxu2  ;;  %v2233_v31 = vmax.f32 %v2228_v43, 0.0  ;;  %v1403_v32 = vmax.f32 %v1398_v49, 0.0  ;;  %v3067_v50 = vmax.f32 %v3062_v54, 0.0 }
 0x480   : > { %v3903_v44 = vmax.f32 %v2235_v23, %v3899_v42  ;;  %v3860_v1 = vadd.f32 %v3859_v27, %v3831_v63 }
 0x481   : > { %v3804_v12 = vpop.f32.mrf.mxu0  ;;  %v3888_v14 = vpop.f32.mrf.mxu3  ;;  %v2237_v62 = vmax.f32 %v1403_v32, %v2233_v31 }
 0x482   : > { %3907 = vst [vmem:[%s11789_s25 + $0x8] sm:$0xff] %v3903_v44  ;;  %v3805_v29 = vadd.f32 %v3804_v12, %v3776_v17  ;;  %v3889_v15 = vadd.f32 %v3888_v14, %v3860_v1 }
 0x483   : > { %v3833_v3 = vpop.f32.mrf.mxu1 }
 0x484   : > { %v3896_v2 = vmax.f32 %v3889_v15, 0.0  ;;  %v3834_v25 = vadd.f32 %v3833_v3, %v3805_v29 }
 0x486   : > { %v3900_v20 = vmax.f32 %v3066_v28, %v3896_v2 }
 0x487   : > { %v3862_v60 = vpop.f32.mrf.mxu2 }
 0x488   : > { %v3904_v19 = vmax.f32 %v2236_v6, %v3900_v20  ;;  %v3863_v59 = vadd.f32 %v3862_v60, %v3834_v25 }
 0x489   : > { %v3891_v40 = vpop.f32.mrf.mxu3 }
 0x48a   : > { %3908 = vst [vmem:[%s11789_s25 + $0x10] sm:$0xff] %v3904_v19  ;;  %v3892_v48 = vadd.f32 %v3891_v40, %v3863_v59 }
 0x48c   : > { %v3897_v30 = vmax.f32 %v3892_v48, 0.0 }
 0x48e   : > { %v3901_v56 = vmax.f32 %v3067_v50, %v3897_v30 }
 0x490   : > { %v3905_v18 = vmax.f32 %v2237_v62, %v3901_v56 }
 0x492   : > { %3909 = vst [vmem:[%s11789_s25 + $0x18] sm:$0x1] %v3905_v18 }
 0x493 PF: > { %s13_s12 = sadd.s32 1, %s5492_s12  }
 0x494   : > { %p10_p4 = scmp.ge.s32.totalorder %s13_s12, 4  }
 0x496   :  { %12 = sbr.rel (!%p10_p4) target bundleno = 1 (0x1), region = 65 }

</bundles_post_ra>
